<compile_context>
chip_gen: v7x
topology: tpu7x:2x2x1
jax: 0.10.0
libtpu: 0.0.40
codegen_flags: <defaults>
</compile_context>

<pallas_src>
import jax
import jax.numpy as jnp
from jax import lax
from jax.experimental import pallas as pl
from jax.experimental.pallas import tpu as pltpu

# ----------------------------- configuration --------------------------------
B = 2              # batch size
W = 4              # window size (w)
C_IN = 6           # input_channels (embedding dims of the path)
N_UNIT = 8         # unit size (n) = path length per window (power of two)
OUT_CH = 4         # output_channels after Conv1d augmentation (U)
SIG_DEPTH = 2      # signature truncation depth (this implementation fixes 2)
SIG_TERMS = OUT_CH + OUT_CH * OUT_CH      # signatory.signature_channels(4, 2) = 20
NUM_HEADS = 4
HEAD_DIM = SIG_TERMS // NUM_HEADS         # 5 (true head dim used for scaling)
HEAD_DIM_P = 8                            # zero-padded head dim (8-lane aligned)
E_PAD = NUM_HEADS * HEAD_DIM_P            # 32
NUM_LAYERS = 2
HIDDEN_LSTM = 16
NUM_FEATURES = 3
EMB_DIM = 12
FEAT_DIM = EMB_DIM + NUM_FEATURES         # 15
HIDDEN_FFN = 32
OUTPUT_DIM = 5

N_TOT = B * W                             # 8 windows processed at once
SIG_F = 128                               # lane width of one folded-projection
                                          # block (= max(3*E_PAD, 8*HIDDEN_LSTM))

# --- packed-slab row offsets -------------------------------------------------
# sig_slab [SIGW_ROWS, 5*SIG_F]: folded signature-projection matrices.
SIGW_LAYER_STRIDE = 8
SIGW_LSTM = 8 * NUM_LAYERS                # 16
SIGW_ROWS = SIGW_LSTM + 8                 # 24

# w_slab [W_SLAB_ROWS, 128]: everything else, 8-row-aligned sections.
ATTN_BLOCK = 72
ATTN_INB = 0                              # [1, 96]  MHA in-proj bias (padded heads)
ATTN_OUTW = 8                             # [32, 20] MHA out-proj weight (padded rows)
ATTN_OUTB = 40                            # [1, 20]
ATTN_LINW = 48                            # [20, 4]  per-layer tanh Linear
ATTN_LINB = 68                            # [1, 4]
LSTM_WHH = NUM_LAYERS * ATTN_BLOCK        # 144: [16, 128]  (fwd 0:64 | bwd 64:128)
LSTM_B = LSTM_WHH + HIDDEN_LSTM           # 160: [1, 128]
CONV_W = 168                              # [6, 12]
CONV_B = 176                              # [1, 4]
FFN_W1H = 184                             # [16, 32]
FFN_W1F = FFN_W1H + HIDDEN_LSTM           # 200: [15, 32]
FFN_B1 = 216                              # [1, 32]
FFN_W2 = 224                              # [32, 5]
FFN_B2 = FFN_W2 + HIDDEN_FFN              # 256: [1, 5]
W_SLAB_ROWS = 264


# --------------------------- in-kernel helpers -------------------------------
def _sigmoid(x):
    # Numerically stable sigmoid routed through the EUP tanh unit.
    return 0.5 * jnp.tanh(0.5 * x) + 0.5


def _cumsum_rows(x):
    """Inclusive prefix-sum along axis 1 (length must be a power of two).
    Hillis-Steele built from XLU sublane rotates + VPU selects; no per-step
    Python state and no sublane concatenations."""
    P = x.shape[1]
    k = 1
    while k < P:
        rows = lax.broadcasted_iota(jnp.int32, x.shape, 1)
        shifted = pltpu.roll(x, k, axis=1)          # shifted[t] = x[t - k]
        x = x + jnp.where(rows >= k, shifted, 0.0)
        k *= 2
    return x


def _sig_project(p, valid_inc, w_fold, *, cumulative):
    """Depth-2 signature of `p` projected by a signature-term weight matrix,
    WITHOUT materialising the level-2 (U*U) terms or any lane concatenation.

    p          : [N, P, U] path; rows beyond the valid range duplicate the
                 last valid row.
    valid_inc  : number of valid increments (static Python int).
    w_fold     : [U, (U+1)*F] folded weights (see `_fold_sig_weight`):
                 block 0 = level-1 rows; block i+1 = level-2 rows (i, :).
    cumulative : True  -> streamed signature projection  [N, P, F]
                 False -> full-path signature projection [N, F]

    Increment t contributes  d_t  to level 1 and  a_t[i] * d_t[j]  to level-2
    term (i, j) with a_t = s1_t - 0.5*d_t, so
        (sig @ W)_t = cumsum_t( d_t @ W1 + sum_i a_t[i] * (d_t @ W2_i) ).
    One consolidated MXU matmul per call; everything is batched over all
    (window, time) positions at once.
    """
    N, P, U = p.shape
    F = w_fold.shape[-1] // (U + 1)
    rows = lax.broadcasted_iota(jnp.int32, p.shape, 1)
    # increments, zeroed outside the valid range (incl. the wrap-around row)
    d = jnp.where(rows < valid_inc, pltpu.roll(p, P - 1, axis=1) - p, 0.0)
    s1 = _cumsum_rows(d)                             # level-1 stream
    a = (s1 - 0.5 * d).reshape(N * P, U)
    d2 = d.reshape(N * P, U)
    prod = jnp.dot(d2, w_fold, preferred_element_type=jnp.float32)  # [N*P, 5F]
    step = prod[:, 0:F]
    for i in range(U):
        step = step + a[:, i:i + 1] * prod[:, (i + 1) * F:(i + 2) * F]
    step = step.reshape(N, P, F)
    if cumulative:
        return _cumsum_rows(step)
    return jnp.sum(step, axis=1)


def _mha(qkv, out_w, out_b, valid_len):
    """Multi-head self-attention on a padded-head-layout QKV tensor.

    qkv : [N, P, SIG_F] with q at lanes [0, E_PAD), k at [E_PAD, 2*E_PAD),
          v at [2*E_PAD, 3*E_PAD); inside each, head h occupies an 8-lane
          aligned block whose last (HEAD_DIM_P - HEAD_DIM) lanes are exactly
          zero (zero weight/bias columns), so scores are unchanged.
    valid_len : number of valid key positions (static); the rest get -1e30.
    Head outputs are folded into split output-projection matmuls, so heads are
    never lane-concatenated.  Returns [N*P, SIG_TERMS].
    """
    N, P, _ = qkv.shape
    scale = 1.0 / float(HEAD_DIM) ** 0.5
    cols = lax.broadcasted_iota(jnp.int32, (N, P, P), 2)
    key_bias = jnp.where(cols < valid_len, 0.0, -1e30)
    out = out_b                                       # [1, E] broadcasts over rows
    for h in range(NUM_HEADS):
        o0 = h * HEAD_DIM_P
        q = qkv[:, :, o0:o0 + HEAD_DIM_P] * scale
        k = qkv[:, :, E_PAD + o0:E_PAD + o0 + HEAD_DIM_P]
        v = qkv[:, :, 2 * E_PAD + o0:2 * E_PAD + o0 + HEAD_DIM_P]
        s = jnp.einsum("bld,bmd->blm", q, k,
                       preferred_element_type=jnp.float32) + key_bias
        s = s - jnp.max(s, axis=-1, keepdims=True)
        e = jnp.exp(s)
        # EUP approx reciprocal: ~1e-4 relative error vs exact softmax divide.
        w = e * pl.reciprocal(jnp.sum(e, axis=-1, keepdims=True), approx=True)
        ctx = jnp.einsum("blm,bmd->bld", w, v, preferred_element_type=jnp.float32)
        out = out + jnp.dot(ctx.reshape(N * P, HEAD_DIM_P),
                            out_w[o0:o0 + HEAD_DIM_P, :],
                            preferred_element_type=jnp.float32)
    return out


# ------------------------------ fused Pallas kernel ---------------------------
def seqsignet_kernel(x_ref, misc_ref, sig_ref, w_ref, o_ref):
    """Whole SeqSigNetAttentionBiLSTM forward in one kernel; every intermediate
    (signature streams, attention activations, BiLSTM state) stays in VMEM and
    all parameters arrive in two packed slabs."""
    U, E, H, P, N = OUT_CH, SIG_TERMS, HIDDEN_LSTM, N_UNIT, N_TOT

    # ---- Conv1d(kernel=3, stride=1, padding=1, padding_mode='replicate') ----
    x = x_ref[...]                                               # [N, P, C_IN]
    y = jnp.dot(x.reshape(N * P, C_IN), w_ref[CONV_W:CONV_W + C_IN, 0:3 * U],
                preferred_element_type=jnp.float32).reshape(N, P, 3 * U)
    y0, y1, y2 = y[..., 0:U], y[..., U:2 * U], y[..., 2 * U:3 * U]
    rows = lax.broadcasted_iota(jnp.int32, (N, P, U), 1)
    p = y1 + w_ref[CONV_B:CONV_B + 1, 0:U].reshape(1, 1, U)
    # taps on x[t-1] / x[t+1]: sublane rotates + edge-replicate selects
    p = p + jnp.where(rows == 0, y0, pltpu.roll(y0, 1, axis=1))
    p = p + jnp.where(rows == P - 1, y2, pltpu.roll(y2, P - 1, axis=1))

    # ---- SWMHA layers: streamed signature -> MHA -> Linear + tanh -----------
    # Sequence length shrinks by one per layer; everything stays padded to P
    # sublanes.  Padded rows are exact duplicates of the last valid row and
    # padded key positions are masked inside the attention.
    valid_path = P
    for layer in range(NUM_LAYERS):
        base = layer * ATTN_BLOCK
        valid_inc = valid_path - 1
        qkv = _sig_project(
            p, valid_inc,
            sig_ref[SIGW_LAYER_STRIDE * layer:SIGW_LAYER_STRIDE * layer + U, :],
            cumulative=True)                                     # [N, P, 128]
        qkv = qkv + w_ref[base + ATTN_INB:base + ATTN_INB + 1, :].reshape(1, 1, SIG_F)
        att = _mha(qkv,
                   w_ref[base + ATTN_OUTW:base + ATTN_OUTW + E_PAD, 0:E],
                   w_ref[base + ATTN_OUTB:base + ATTN_OUTB + 1, 0:E],
                   valid_inc)                                    # [N*P, E]
        p = jnp.tanh(
            jnp.dot(att, w_ref[base + ATTN_LINW:base + ATTN_LINW + E, 0:U],
                    preferred_element_type=jnp.float32)
            + w_ref[base + ATTN_LINB:base + ATTN_LINB + 1, 0:U]
        ).reshape(N, P, U)
        valid_path = valid_inc

    # ---- "signature" pooling folded straight into the BiLSTM input proj -----
    proj = _sig_project(p, valid_path - 1, sig_ref[SIGW_LSTM:SIGW_LSTM + U, :],
                        cumulative=False)                        # [B*W, 8H]
    proj = proj.reshape(B, W, 8 * H)

    # ---- length-masked BiLSTM over the window axis ---------------------------
    whh = w_ref[LSTM_WHH:LSTM_WHH + H, :]                        # [H, 8H]
    whh_f, whh_b = whh[:, 0:4 * H], whh[:, 4 * H:8 * H]
    lstm_b = w_ref[LSTM_B:LSTM_B + 1, :]
    proj_f = proj[..., 0:4 * H] + lstm_b[:, 0:4 * H]             # hoisted biases
    proj_b = proj[..., 4 * H:8 * H] + lstm_b[:, 4 * H:8 * H]
    step_mask = misc_ref[:, FEAT_DIM:FEAT_DIM + W]               # [B, W] in {0,1}

    def cell(gates, h, c, m):
        i = _sigmoid(gates[:, 0:H])
        f = _sigmoid(gates[:, H:2 * H])
        g = jnp.tanh(gates[:, 2 * H:3 * H])
        o = _sigmoid(gates[:, 3 * H:4 * H])
        c_new = f * c + i * g
        h_new = o * jnp.tanh(c_new)
        return m * h_new + (1.0 - m) * h, m * c_new + (1.0 - m) * c

    h_f = jnp.zeros((B, H), jnp.float32)
    c_f = jnp.zeros((B, H), jnp.float32)
    h_b = jnp.zeros((B, H), jnp.float32)
    c_b = jnp.zeros((B, H), jnp.float32)
    for t in range(W):                      # both directions in one unrolled loop
        tb = W - 1 - t
        g_f = proj_f[:, t, :] + jnp.dot(h_f, whh_f, preferred_element_type=jnp.float32)
        g_b = proj_b[:, tb, :] + jnp.dot(h_b, whh_b, preferred_element_type=jnp.float32)
        h_f, c_f = cell(g_f, h_f, c_f, step_mask[:, t:t + 1])
        h_b, c_b = cell(g_b, h_b, c_b, step_mask[:, tb:tb + 1])
    h = h_f + h_b                           # == h_n[-1] + h_n[-2]

    # ---- FeatureConcatenation ("concatenation") + FFN (Linear->ReLU->Linear) -
    # concat([h, features]) @ W1 folded into two matmuls (no lane concat).
    hid = (jnp.dot(h, w_ref[FFN_W1H:FFN_W1H + H, 0:HIDDEN_FFN],
                   preferred_element_type=jnp.float32)
           + jnp.dot(misc_ref[:, 0:FEAT_DIM],
                     w_ref[FFN_W1F:FFN_W1F + FEAT_DIM, 0:HIDDEN_FFN],
                     preferred_element_type=jnp.float32)
           + w_ref[FFN_B1:FFN_B1 + 1, 0:HIDDEN_FFN])
    hid = jnp.maximum(hid, 0.0)
    o_ref[...] = (jnp.dot(hid, w_ref[FFN_W2:FFN_W2 + HIDDEN_FFN, 0:OUTPUT_DIM],
                          preferred_element_type=jnp.float32)
                  + w_ref[FFN_B2:FFN_B2 + 1, 0:OUTPUT_DIM])


# ------------------------------- parameters ----------------------------------
def init_params(key):
    """Synthetic parameters in the 'PyTorch math layout' (pre-transposed for
    x @ W).  They are re-packed into two TPU-friendly slabs by pack_params."""
    E = SIG_TERMS
    ks = jax.random.split(key, 18)

    def nrm(k, shape, scale=0.1):
        return (scale * jax.random.normal(k, shape)).astype(jnp.float32)

    return {
        # Conv1d augmentation: taps stacked along columns [C_in, 3*out_ch].
        "convw": nrm(ks[0], (C_IN, 3 * OUT_CH)),
        "convb": nrm(ks[1], (1, OUT_CH)),
        # per-layer MHA + projection weights
        "inw": nrm(ks[2], (NUM_LAYERS, E, 3 * E)),
        "inb": nrm(ks[3], (NUM_LAYERS, 1, 3 * E)),
        "outw": nrm(ks[4], (NUM_LAYERS, E, E)),
        "outb": nrm(ks[5], (NUM_LAYERS, 1, E)),
        "linw": nrm(ks[6], (NUM_LAYERS, E, OUT_CH)),
        "linb": nrm(ks[7], (NUM_LAYERS, 1, OUT_CH)),
        # BiLSTM (PyTorch gate order i,f,g,o; bias = b_ih + b_hh combined).
        # Input weights of both directions fused: [:, :4H] fwd, [:, 4H:] bwd.
        "wih": nrm(ks[8], (E, 8 * HIDDEN_LSTM)),
        "whh_f": nrm(ks[9], (HIDDEN_LSTM, 4 * HIDDEN_LSTM)),
        "b_f": nrm(ks[10], (1, 4 * HIDDEN_LSTM)),
        "whh_b": nrm(ks[11], (HIDDEN_LSTM, 4 * HIDDEN_LSTM)),
        "b_b": nrm(ks[12], (1, 4 * HIDDEN_LSTM)),
        # FFN: first layer split into (hidden, features) row blocks.
        "w1h": nrm(ks[13], (HIDDEN_LSTM, HIDDEN_FFN)),
        "w1f": nrm(ks[14], (FEAT_DIM, HIDDEN_FFN)),
        "b1": nrm(ks[15], (1, HIDDEN_FFN)),
        "w2": nrm(ks[16], (HIDDEN_FFN, OUTPUT_DIM)),
        "b2": nrm(ks[17], (1, OUTPUT_DIM)),
    }


def _pad_head_cols(w):
    """Zero-pad each head's columns from HEAD_DIM to HEAD_DIM_P (8-aligned)."""
    lead = w.shape[:-1]
    w = w.reshape(lead + (NUM_HEADS, HEAD_DIM))
    w = jnp.pad(w, [(0, 0)] * len(lead) + [(0, 0), (0, HEAD_DIM_P - HEAD_DIM)])
    return w.reshape(lead + (NUM_HEADS * HEAD_DIM_P,))


def _fold_sig_weight(w, width):
    """Fold a [SIG_TERMS, F0] signature-term weight matrix (rows: level-1 (U),
    then level-2 row-major (U*U)) into the [U, (U+1)*width] layout used by
    `_sig_project`; columns are zero-padded to `width`."""
    U = OUT_CH
    w = jnp.pad(w, ((0, 0), (0, width - w.shape[1])))
    lvl2 = w[U:, :].reshape(U, U, width)
    return jnp.concatenate([w[0:U, :]] + [lvl2[i] for i in range(U)], axis=1)


def pack_params(params):
    """Pack all parameters into two slabs (2 input DMAs instead of ~20)."""
    U, E, H, Ep = OUT_CH, SIG_TERMS, HIDDEN_LSTM, E_PAD

    # --- wide slab: folded signature-projection matrices ----------------------
    sig_slab = jnp.zeros((SIGW_ROWS, (U + 1) * SIG_F), jnp.float32)
    for l in range(NUM_LAYERS):
        inw = params["inw"][l]
        inw_p = jnp.concatenate(
            [_pad_head_cols(inw[:, 0:E]),
             _pad_head_cols(inw[:, E:2 * E]),
             _pad_head_cols(inw[:, 2 * E:3 * E])], axis=1)       # [E, 96]
        sig_slab = sig_slab.at[SIGW_LAYER_STRIDE * l:
                               SIGW_LAYER_STRIDE * l + U, :].set(
            _fold_sig_weight(inw_p, SIG_F))
    sig_slab = sig_slab.at[SIGW_LSTM:SIGW_LSTM + U, :].set(
        _fold_sig_weight(params["wih"], SIG_F))

    # --- 128-wide slab: everything else ---------------------------------------
    slab = jnp.zeros((W_SLAB_ROWS, 128), jnp.float32)
    for l in range(NUM_LAYERS):
        base = l * ATTN_BLOCK
        inb = params["inb"][l]
        inb_p = jnp.concatenate(
            [_pad_head_cols(inb[:, 0:E]),
             _pad_head_cols(inb[:, E:2 * E]),
             _pad_head_cols(inb[:, 2 * E:3 * E])], axis=1)       # [1, 96]
        slab = slab.at[base + ATTN_INB, 0:3 * Ep].set(inb_p[0])
        outw_p = jnp.pad(params["outw"][l].reshape(NUM_HEADS, HEAD_DIM, E),
                         ((0, 0), (0, HEAD_DIM_P - HEAD_DIM), (0, 0))).reshape(Ep, E)
        slab = slab.at[base + ATTN_OUTW:base + ATTN_OUTW + Ep, 0:E].set(outw_p)
        slab = slab.at[base + ATTN_OUTB, 0:E].set(params["outb"][l][0])
        slab = slab.at[base + ATTN_LINW:base + ATTN_LINW + E, 0:U].set(params["linw"][l])
        slab = slab.at[base + ATTN_LINB, 0:U].set(params["linb"][l][0])
    slab = slab.at[LSTM_WHH:LSTM_WHH + H, 0:4 * H].set(params["whh_f"])
    slab = slab.at[LSTM_WHH:LSTM_WHH + H, 4 * H:8 * H].set(params["whh_b"])
    slab = slab.at[LSTM_B, 0:4 * H].set(params["b_f"][0])
    slab = slab.at[LSTM_B, 4 * H:8 * H].set(params["b_b"][0])
    slab = slab.at[CONV_W:CONV_W + C_IN, 0:3 * U].set(params["convw"])
    slab = slab.at[CONV_B, 0:U].set(params["convb"][0])
    slab = slab.at[FFN_W1H:FFN_W1H + H, 0:HIDDEN_FFN].set(params["w1h"])
    slab = slab.at[FFN_W1F:FFN_W1F + FEAT_DIM, 0:HIDDEN_FFN].set(params["w1f"])
    slab = slab.at[FFN_B1, 0:HIDDEN_FFN].set(params["b1"][0])
    slab = slab.at[FFN_W2:FFN_W2 + HIDDEN_FFN, 0:OUTPUT_DIM].set(params["w2"])
    slab = slab.at[FFN_B2, 0:OUTPUT_DIM].set(params["b2"][0])
    return sig_slab, slab


# --------------------------------- forward -----------------------------------
@jax.jit
def seqsignet_forward(path, features, sig_slab, w_slab):
    assert path.shape == (B, W, C_IN, N_UNIT)
    # SWMHAU input: path.flatten(0, 1) with channels moved to the lane axis.
    x = jnp.transpose(path.reshape(B * W, C_IN, N_UNIT), (0, 2, 1))
    # seq_lengths = number of windows whose path does not sum to zero,
    # turned into a {0,1} step mask for the masked BiLSTM recurrence.
    seq_lengths = jnp.sum(jnp.sum(path, axis=(2, 3)) != 0, axis=1)
    step_mask = (jnp.arange(W)[None, :] < seq_lengths[:, None]).astype(jnp.float32)
    misc = jnp.concatenate([features, step_mask], axis=1)        # [B, 15 + W]

    # TODO(synk): for large batch, add grid=(B,) with
    # dimension_semantics=("parallel",) so v7x's second TensorCore gets work;
    # at B=2 the fused single-call form is faster.
    return pl.pallas_call(
        seqsignet_kernel,
        out_shape=jax.ShapeDtypeStruct((B, OUTPUT_DIM), jnp.float32),
    )(x, misc, sig_slab, w_slab)


# ----------------------------------- main -------------------------------------
if __name__ == "__main__":
    key = jax.random.PRNGKey(0)
    k_param, k_path, k_feat = jax.random.split(key, 3)

    params = init_params(k_param)
    sig_slab, w_slab = pack_params(params)

    path = jax.random.normal(k_path, (B, W, C_IN, N_UNIT), dtype=jnp.float32)
    # zero-pad the last two windows of batch element 1 -> variable seq lengths
    path = path.at[1, 2:].set(0.0)
    features = jax.random.normal(k_feat, (B, FEAT_DIM), dtype=jnp.float32)

    out = jax.block_until_ready(seqsignet_forward(path, features, sig_slab, w_slab))
    assert out.shape == (B, OUTPUT_DIM)
    assert bool(jnp.all(jnp.isfinite(out)))
    print("KERNEL_OK")
</pallas_src>

<mosaic_0001>
module attributes {stable_mosaic.version = 11 : i64} {
  func.func @seqsignet_kernel(%arg0: memref<8x8x6xf32, #tpu.memory_space<vmem>>, %arg1: memref<2x19xf32, #tpu.memory_space<vmem>>, %arg2: memref<24x640xf32, #tpu.memory_space<vmem>>, %arg3: memref<264x128xf32, #tpu.memory_space<vmem>>, %arg4: memref<2x5xf32, #tpu.memory_space<vmem>>) attributes {dimension_semantics = [], scalar_prefetch = 0 : i64, scratch_operands = 0 : i64, tpu.core_type = #tpu.core_type<tc>} {
    %c0 = arith.constant 0 : index
    %c0_0 = arith.constant 0 : index
    %c0_1 = arith.constant 0 : index
    %0 = vector.load %arg0[%c0, %c0_0, %c0_1] : memref<8x8x6xf32, #tpu.memory_space<vmem>>, vector<8x8x6xf32>
    %1 = vector.shape_cast %0 : vector<8x8x6xf32> to vector<64x6xf32>
    %c168 = arith.constant 168 : index
    %c0_2 = arith.constant 0 : index
    %2 = vector.load %arg3[%c168, %c0_2] : memref<264x128xf32, #tpu.memory_space<vmem>>, vector<6x12xf32>
    %cst = arith.constant dense<0.000000e+00> : vector<64x12xf32>
    %3 = tpu.matmul %1, %2, %cst {dimension_numbers = #tpu.dot_dimension_numbers<[1], [0], [0], [1], [0, 0, 1, 1], [], []>} : vector<64x6xf32>, vector<6x12xf32>, vector<64x12xf32> -> vector<64x12xf32>
    %4 = vector.shape_cast %3 : vector<64x12xf32> to vector<8x8x12xf32>
    %5 = vector.extract_strided_slice %4 {offsets = [0, 0, 0], sizes = [8, 8, 4], strides = [1, 1, 1]} : vector<8x8x12xf32> to vector<8x8x4xf32>
    %6 = vector.extract_strided_slice %4 {offsets = [0, 0, 4], sizes = [8, 8, 4], strides = [1, 1, 1]} : vector<8x8x12xf32> to vector<8x8x4xf32>
    %7 = vector.extract_strided_slice %4 {offsets = [0, 0, 8], sizes = [8, 8, 4], strides = [1, 1, 1]} : vector<8x8x12xf32> to vector<8x8x4xf32>
    %8 = tpu.iota {dimensions = array<i32: 1>} : vector<8x8x4xi32>
    %c176 = arith.constant 176 : index
    %c0_3 = arith.constant 0 : index
    %9 = vector.load %arg3[%c176, %c0_3] : memref<264x128xf32, #tpu.memory_space<vmem>>, vector<1x4xf32>
    %10 = vector.shape_cast %9 : vector<1x4xf32> to vector<1x1x4xf32>
    %11 = vector.broadcast %10 : vector<1x1x4xf32> to vector<8x8x4xf32>
    %12 = arith.addf %6, %11 : vector<8x8x4xf32>
    %c0_i32 = arith.constant 0 : i32
    %13 = vector.broadcast %c0_i32 : i32 to vector<8x8x4xi32>
    %14 = arith.cmpi eq, %8, %13 : vector<8x8x4xi32>
    %c1_i32 = arith.constant 1 : i32
    %15 = tpu.dynamic_rotate %5 by %c1_i32 dim 1 : vector<8x8x4xf32>, i32 -> vector<8x8x4xf32>
    %16 = arith.select %14, %5, %15 : vector<8x8x4xi1>, vector<8x8x4xf32>
    %17 = arith.addf %12, %16 : vector<8x8x4xf32>
    %c7_i32 = arith.constant 7 : i32
    %18 = vector.broadcast %c7_i32 : i32 to vector<8x8x4xi32>
    %19 = arith.cmpi eq, %8, %18 : vector<8x8x4xi32>
    %c7_i32_4 = arith.constant 7 : i32
    %20 = tpu.dynamic_rotate %7 by %c7_i32_4 dim 1 : vector<8x8x4xf32>, i32 -> vector<8x8x4xf32>
    %21 = arith.select %19, %7, %20 : vector<8x8x4xi1>, vector<8x8x4xf32>
    %22 = arith.addf %17, %21 : vector<8x8x4xf32>
    %c0_5 = arith.constant 0 : index
    %c0_6 = arith.constant 0 : index
    %23 = vector.load %arg2[%c0_5, %c0_6] : memref<24x640xf32, #tpu.memory_space<vmem>>, vector<4x640xf32>
    %24 = tpu.iota {dimensions = array<i32: 1>} : vector<8x8x4xi32>
    %c7_i32_7 = arith.constant 7 : i32
    %25 = vector.broadcast %c7_i32_7 : i32 to vector<8x8x4xi32>
    %26 = arith.cmpi slt, %24, %25 : vector<8x8x4xi32>
    %c7_i32_8 = arith.constant 7 : i32
    %27 = tpu.dynamic_rotate %22 by %c7_i32_8 dim 1 : vector<8x8x4xf32>, i32 -> vector<8x8x4xf32>
    %28 = arith.subf %27, %22 : vector<8x8x4xf32>
    %cst_9 = arith.constant 0.000000e+00 : f32
    %29 = vector.broadcast %cst_9 : f32 to vector<8x8x4xf32>
    %30 = arith.select %26, %28, %29 : vector<8x8x4xi1>, vector<8x8x4xf32>
    %31 = tpu.iota {dimensions = array<i32: 1>} : vector<8x8x4xi32>
    %c1_i32_10 = arith.constant 1 : i32
    %32 = tpu.dynamic_rotate %30 by %c1_i32_10 dim 1 : vector<8x8x4xf32>, i32 -> vector<8x8x4xf32>
    %c1_i32_11 = arith.constant 1 : i32
    %33 = vector.broadcast %c1_i32_11 : i32 to vector<8x8x4xi32>
    %34 = arith.cmpi sge, %31, %33 : vector<8x8x4xi32>
    %cst_12 = arith.constant 0.000000e+00 : f32
    %35 = vector.broadcast %cst_12 : f32 to vector<8x8x4xf32>
    %36 = arith.select %34, %32, %35 : vector<8x8x4xi1>, vector<8x8x4xf32>
    %37 = arith.addf %30, %36 : vector<8x8x4xf32>
    %38 = tpu.iota {dimensions = array<i32: 1>} : vector<8x8x4xi32>
    %c2_i32 = arith.constant 2 : i32
    %39 = tpu.dynamic_rotate %37 by %c2_i32 dim 1 : vector<8x8x4xf32>, i32 -> vector<8x8x4xf32>
    %c2_i32_13 = arith.constant 2 : i32
    %40 = vector.broadcast %c2_i32_13 : i32 to vector<8x8x4xi32>
    %41 = arith.cmpi sge, %38, %40 : vector<8x8x4xi32>
    %cst_14 = arith.constant 0.000000e+00 : f32
    %42 = vector.broadcast %cst_14 : f32 to vector<8x8x4xf32>
    %43 = arith.select %41, %39, %42 : vector<8x8x4xi1>, vector<8x8x4xf32>
    %44 = arith.addf %37, %43 : vector<8x8x4xf32>
    %45 = tpu.iota {dimensions = array<i32: 1>} : vector<8x8x4xi32>
    %c4_i32 = arith.constant 4 : i32
    %46 = tpu.dynamic_rotate %44 by %c4_i32 dim 1 : vector<8x8x4xf32>, i32 -> vector<8x8x4xf32>
    %c4_i32_15 = arith.constant 4 : i32
    %47 = vector.broadcast %c4_i32_15 : i32 to vector<8x8x4xi32>
    %48 = arith.cmpi sge, %45, %47 : vector<8x8x4xi32>
    %cst_16 = arith.constant 0.000000e+00 : f32
    %49 = vector.broadcast %cst_16 : f32 to vector<8x8x4xf32>
    %50 = arith.select %48, %46, %49 : vector<8x8x4xi1>, vector<8x8x4xf32>
    %51 = arith.addf %44, %50 : vector<8x8x4xf32>
    %cst_17 = arith.constant 5.000000e-01 : f32
    %52 = vector.broadcast %cst_17 : f32 to vector<8x8x4xf32>
    %53 = arith.mulf %52, %30 : vector<8x8x4xf32>
    %54 = arith.subf %51, %53 : vector<8x8x4xf32>
    %55 = vector.shape_cast %54 : vector<8x8x4xf32> to vector<64x4xf32>
    %56 = vector.shape_cast %30 : vector<8x8x4xf32> to vector<64x4xf32>
    %cst_18 = arith.constant dense<0.000000e+00> : vector<64x640xf32>
    %57 = tpu.matmul %56, %23, %cst_18 {dimension_numbers = #tpu.dot_dimension_numbers<[1], [0], [0], [1], [0, 0, 1, 1], [], []>} : vector<64x4xf32>, vector<4x640xf32>, vector<64x640xf32> -> vector<64x640xf32>
    %58 = vector.extract_strided_slice %57 {offsets = [0, 0], sizes = [64, 128], strides = [1, 1]} : vector<64x640xf32> to vector<64x128xf32>
    %59 = vector.extract_strided_slice %55 {offsets = [0, 0], sizes = [64, 1], strides = [1, 1]} : vector<64x4xf32> to vector<64x1xf32>
    %60 = vector.extract_strided_slice %57 {offsets = [0, 128], sizes = [64, 128], strides = [1, 1]} : vector<64x640xf32> to vector<64x128xf32>
    %61 = vector.broadcast %59 : vector<64x1xf32> to vector<64x128xf32>
    %62 = arith.mulf %61, %60 : vector<64x128xf32>
    %63 = arith.addf %58, %62 : vector<64x128xf32>
    %64 = vector.extract_strided_slice %55 {offsets = [0, 1], sizes = [64, 1], strides = [1, 1]} : vector<64x4xf32> to vector<64x1xf32>
    %65 = vector.extract_strided_slice %57 {offsets = [0, 256], sizes = [64, 128], strides = [1, 1]} : vector<64x640xf32> to vector<64x128xf32>
    %66 = vector.broadcast %64 : vector<64x1xf32> to vector<64x128xf32>
    %67 = arith.mulf %66, %65 : vector<64x128xf32>
    %68 = arith.addf %63, %67 : vector<64x128xf32>
    %69 = vector.extract_strided_slice %55 {offsets = [0, 2], sizes = [64, 1], strides = [1, 1]} : vector<64x4xf32> to vector<64x1xf32>
    %70 = vector.extract_strided_slice %57 {offsets = [0, 384], sizes = [64, 128], strides = [1, 1]} : vector<64x640xf32> to vector<64x128xf32>
    %71 = vector.broadcast %69 : vector<64x1xf32> to vector<64x128xf32>
    %72 = arith.mulf %71, %70 : vector<64x128xf32>
    %73 = arith.addf %68, %72 : vector<64x128xf32>
    %74 = vector.extract_strided_slice %55 {offsets = [0, 3], sizes = [64, 1], strides = [1, 1]} : vector<64x4xf32> to vector<64x1xf32>
    %75 = vector.extract_strided_slice %57 {offsets = [0, 512], sizes = [64, 128], strides = [1, 1]} : vector<64x640xf32> to vector<64x128xf32>
    %76 = vector.broadcast %74 : vector<64x1xf32> to vector<64x128xf32>
    %77 = arith.mulf %76, %75 : vector<64x128xf32>
    %78 = arith.addf %73, %77 : vector<64x128xf32>
    %79 = vector.shape_cast %78 : vector<64x128xf32> to vector<8x8x128xf32>
    %80 = tpu.iota {dimensions = array<i32: 1>} : vector<8x8x128xi32>
    %c1_i32_19 = arith.constant 1 : i32
    %81 = tpu.dynamic_rotate %79 by %c1_i32_19 dim 1 : vector<8x8x128xf32>, i32 -> vector<8x8x128xf32>
    %c1_i32_20 = arith.constant 1 : i32
    %82 = vector.broadcast %c1_i32_20 : i32 to vector<8x8x128xi32>
    %83 = arith.cmpi sge, %80, %82 : vector<8x8x128xi32>
    %cst_21 = arith.constant 0.000000e+00 : f32
    %84 = vector.broadcast %cst_21 : f32 to vector<8x8x128xf32>
    %85 = arith.select %83, %81, %84 : vector<8x8x128xi1>, vector<8x8x128xf32>
    %86 = arith.addf %79, %85 : vector<8x8x128xf32>
    %87 = tpu.iota {dimensions = array<i32: 1>} : vector<8x8x128xi32>
    %c2_i32_22 = arith.constant 2 : i32
    %88 = tpu.dynamic_rotate %86 by %c2_i32_22 dim 1 : vector<8x8x128xf32>, i32 -> vector<8x8x128xf32>
    %c2_i32_23 = arith.constant 2 : i32
    %89 = vector.broadcast %c2_i32_23 : i32 to vector<8x8x128xi32>
    %90 = arith.cmpi sge, %87, %89 : vector<8x8x128xi32>
    %cst_24 = arith.constant 0.000000e+00 : f32
    %91 = vector.broadcast %cst_24 : f32 to vector<8x8x128xf32>
    %92 = arith.select %90, %88, %91 : vector<8x8x128xi1>, vector<8x8x128xf32>
    %93 = arith.addf %86, %92 : vector<8x8x128xf32>
    %94 = tpu.iota {dimensions = array<i32: 1>} : vector<8x8x128xi32>
    %c4_i32_25 = arith.constant 4 : i32
    %95 = tpu.dynamic_rotate %93 by %c4_i32_25 dim 1 : vector<8x8x128xf32>, i32 -> vector<8x8x128xf32>
    %c4_i32_26 = arith.constant 4 : i32
    %96 = vector.broadcast %c4_i32_26 : i32 to vector<8x8x128xi32>
    %97 = arith.cmpi sge, %94, %96 : vector<8x8x128xi32>
    %cst_27 = arith.constant 0.000000e+00 : f32
    %98 = vector.broadcast %cst_27 : f32 to vector<8x8x128xf32>
    %99 = arith.select %97, %95, %98 : vector<8x8x128xi1>, vector<8x8x128xf32>
    %100 = arith.addf %93, %99 : vector<8x8x128xf32>
    %c0_28 = arith.constant 0 : index
    %c0_29 = arith.constant 0 : index
    %101 = vector.load %arg3[%c0_28, %c0_29] : memref<264x128xf32, #tpu.memory_space<vmem>>, vector<1x128xf32>
    %102 = vector.shape_cast %101 : vector<1x128xf32> to vector<1x1x128xf32>
    %103 = vector.broadcast %102 : vector<1x1x128xf32> to vector<8x8x128xf32>
    %104 = arith.addf %100, %103 : vector<8x8x128xf32>
    %c8 = arith.constant 8 : index
    %c0_30 = arith.constant 0 : index
    %105 = vector.load %arg3[%c8, %c0_30] : memref<264x128xf32, #tpu.memory_space<vmem>>, vector<32x20xf32>
    %c40 = arith.constant 40 : index
    %c0_31 = arith.constant 0 : index
    %106 = vector.load %arg3[%c40, %c0_31] : memref<264x128xf32, #tpu.memory_space<vmem>>, vector<1x20xf32>
    %107 = tpu.iota {dimensions = array<i32: 2>} : vector<8x8x8xi32>
    %c7_i32_32 = arith.constant 7 : i32
    %108 = vector.broadcast %c7_i32_32 : i32 to vector<8x8x8xi32>
    %109 = arith.cmpi slt, %107, %108 : vector<8x8x8xi32>
    %cst_33 = arith.constant 0.000000e+00 : f32
    %cst_34 = arith.constant -1.000000e+30 : f32
    %110 = vector.broadcast %cst_33 : f32 to vector<8x8x8xf32>
    %111 = vector.broadcast %cst_34 : f32 to vector<8x8x8xf32>
    %112 = arith.select %109, %110, %111 : vector<8x8x8xi1>, vector<8x8x8xf32>
    %113 = vector.extract_strided_slice %104 {offsets = [0, 0, 0], sizes = [8, 8, 8], strides = [1, 1, 1]} : vector<8x8x128xf32> to vector<8x8x8xf32>
    %cst_35 = arith.constant 0.44721359 : f32
    %114 = vector.broadcast %cst_35 : f32 to vector<8x8x8xf32>
    %115 = arith.mulf %113, %114 : vector<8x8x8xf32>
    %116 = vector.extract_strided_slice %104 {offsets = [0, 0, 32], sizes = [8, 8, 8], strides = [1, 1, 1]} : vector<8x8x128xf32> to vector<8x8x8xf32>
    %117 = vector.extract_strided_slice %104 {offsets = [0, 0, 64], sizes = [8, 8, 8], strides = [1, 1, 1]} : vector<8x8x128xf32> to vector<8x8x8xf32>
    "tpu.trace_start"() <{level = 10 : i32, message = "bld,bmd->blm"}> : () -> ()
    %cst_36 = arith.constant dense<0.000000e+00> : vector<8x8x8xf32>
    %118 = tpu.matmul %115, %116, %cst_36 {dimension_numbers = #tpu.dot_dimension_numbers<[2], [2], [1], [1], [0, 0, 0, 1, 1, 1], [0], [0]>} : vector<8x8x8xf32>, vector<8x8x8xf32>, vector<8x8x8xf32> -> vector<8x8x8xf32>
    "tpu.trace_stop"() : () -> ()
    %119 = arith.addf %118, %112 : vector<8x8x8xf32>
    %cst_37 = arith.constant dense<0xFF800000> : vector<8x8xf32>
    %120 = vector.multi_reduction <maximumf>, %119, %cst_37 [2] : vector<8x8x8xf32> to vector<8x8xf32>
    %121 = vector.shape_cast %120 : vector<8x8xf32> to vector<8x8x1xf32>
    %122 = vector.broadcast %121 : vector<8x8x1xf32> to vector<8x8x8xf32>
    %123 = arith.subf %119, %122 : vector<8x8x8xf32>
    %124 = math.exp %123 : vector<8x8x8xf32>
    %cst_38 = arith.constant dense<0.000000e+00> : vector<8x8xf32>
    %125 = vector.multi_reduction <add>, %124, %cst_38 [2] : vector<8x8x8xf32> to vector<8x8xf32>
    %126 = vector.shape_cast %125 : vector<8x8xf32> to vector<8x8x1xf32>
    %127 = tpu.reciprocal %126 {approx = true} : vector<8x8x1xf32> -> vector<8x8x1xf32>
    %128 = vector.broadcast %127 : vector<8x8x1xf32> to vector<8x8x8xf32>
    %129 = arith.mulf %124, %128 : vector<8x8x8xf32>
    "tpu.trace_start"() <{level = 10 : i32, message = "blm,bmd->bld"}> : () -> ()
    %cst_39 = arith.constant dense<0.000000e+00> : vector<8x8x8xf32>
    %130 = tpu.matmul %129, %117, %cst_39 {dimension_numbers = #tpu.dot_dimension_numbers<[2], [1], [1], [2], [0, 0, 0, 1, 1, 2], [0], [0]>} : vector<8x8x8xf32>, vector<8x8x8xf32>, vector<8x8x8xf32> -> vector<8x8x8xf32>
    "tpu.trace_stop"() : () -> ()
    %131 = vector.shape_cast %130 : vector<8x8x8xf32> to vector<64x8xf32>
    %132 = vector.extract_strided_slice %105 {offsets = [0, 0], sizes = [8, 20], strides = [1, 1]} : vector<32x20xf32> to vector<8x20xf32>
    %cst_40 = arith.constant dense<0.000000e+00> : vector<64x20xf32>
    %133 = tpu.matmul %131, %132, %cst_40 {dimension_numbers = #tpu.dot_dimension_numbers<[1], [0], [0], [1], [0, 0, 1, 1], [], []>} : vector<64x8xf32>, vector<8x20xf32>, vector<64x20xf32> -> vector<64x20xf32>
    %134 = vector.broadcast %106 : vector<1x20xf32> to vector<64x20xf32>
    %135 = arith.addf %134, %133 : vector<64x20xf32>
    %136 = vector.extract_strided_slice %104 {offsets = [0, 0, 8], sizes = [8, 8, 8], strides = [1, 1, 1]} : vector<8x8x128xf32> to vector<8x8x8xf32>
    %cst_41 = arith.constant 0.44721359 : f32
    %137 = vector.broadcast %cst_41 : f32 to vector<8x8x8xf32>
    %138 = arith.mulf %136, %137 : vector<8x8x8xf32>
    %139 = vector.extract_strided_slice %104 {offsets = [0, 0, 40], sizes = [8, 8, 8], strides = [1, 1, 1]} : vector<8x8x128xf32> to vector<8x8x8xf32>
    %140 = vector.extract_strided_slice %104 {offsets = [0, 0, 72], sizes = [8, 8, 8], strides = [1, 1, 1]} : vector<8x8x128xf32> to vector<8x8x8xf32>
    "tpu.trace_start"() <{level = 10 : i32, message = "bld,bmd->blm"}> : () -> ()
    %cst_42 = arith.constant dense<0.000000e+00> : vector<8x8x8xf32>
    %141 = tpu.matmul %138, %139, %cst_42 {dimension_numbers = #tpu.dot_dimension_numbers<[2], [2], [1], [1], [0, 0, 0, 1, 1, 1], [0], [0]>} : vector<8x8x8xf32>, vector<8x8x8xf32>, vector<8x8x8xf32> -> vector<8x8x8xf32>
    "tpu.trace_stop"() : () -> ()
    %142 = arith.addf %141, %112 : vector<8x8x8xf32>
    %cst_43 = arith.constant dense<0xFF800000> : vector<8x8xf32>
    %143 = vector.multi_reduction <maximumf>, %142, %cst_43 [2] : vector<8x8x8xf32> to vector<8x8xf32>
    %144 = vector.shape_cast %143 : vector<8x8xf32> to vector<8x8x1xf32>
    %145 = vector.broadcast %144 : vector<8x8x1xf32> to vector<8x8x8xf32>
    %146 = arith.subf %142, %145 : vector<8x8x8xf32>
    %147 = math.exp %146 : vector<8x8x8xf32>
    %cst_44 = arith.constant dense<0.000000e+00> : vector<8x8xf32>
    %148 = vector.multi_reduction <add>, %147, %cst_44 [2] : vector<8x8x8xf32> to vector<8x8xf32>
    %149 = vector.shape_cast %148 : vector<8x8xf32> to vector<8x8x1xf32>
    %150 = tpu.reciprocal %149 {approx = true} : vector<8x8x1xf32> -> vector<8x8x1xf32>
    %151 = vector.broadcast %150 : vector<8x8x1xf32> to vector<8x8x8xf32>
    %152 = arith.mulf %147, %151 : vector<8x8x8xf32>
    "tpu.trace_start"() <{level = 10 : i32, message = "blm,bmd->bld"}> : () -> ()
    %cst_45 = arith.constant dense<0.000000e+00> : vector<8x8x8xf32>
    %153 = tpu.matmul %152, %140, %cst_45 {dimension_numbers = #tpu.dot_dimension_numbers<[2], [1], [1], [2], [0, 0, 0, 1, 1, 2], [0], [0]>} : vector<8x8x8xf32>, vector<8x8x8xf32>, vector<8x8x8xf32> -> vector<8x8x8xf32>
    "tpu.trace_stop"() : () -> ()
    %154 = vector.shape_cast %153 : vector<8x8x8xf32> to vector<64x8xf32>
    %155 = vector.extract_strided_slice %105 {offsets = [8, 0], sizes = [8, 20], strides = [1, 1]} : vector<32x20xf32> to vector<8x20xf32>
    %cst_46 = arith.constant dense<0.000000e+00> : vector<64x20xf32>
    %156 = tpu.matmul %154, %155, %cst_46 {dimension_numbers = #tpu.dot_dimension_numbers<[1], [0], [0], [1], [0, 0, 1, 1], [], []>} : vector<64x8xf32>, vector<8x20xf32>, vector<64x20xf32> -> vector<64x20xf32>
    %157 = arith.addf %135, %156 : vector<64x20xf32>
    %158 = vector.extract_strided_slice %104 {offsets = [0, 0, 16], sizes = [8, 8, 8], strides = [1, 1, 1]} : vector<8x8x128xf32> to vector<8x8x8xf32>
    %cst_47 = arith.constant 0.44721359 : f32
    %159 = vector.broadcast %cst_47 : f32 to vector<8x8x8xf32>
    %160 = arith.mulf %158, %159 : vector<8x8x8xf32>
    %161 = vector.extract_strided_slice %104 {offsets = [0, 0, 48], sizes = [8, 8, 8], strides = [1, 1, 1]} : vector<8x8x128xf32> to vector<8x8x8xf32>
    %162 = vector.extract_strided_slice %104 {offsets = [0, 0, 80], sizes = [8, 8, 8], strides = [1, 1, 1]} : vector<8x8x128xf32> to vector<8x8x8xf32>
    "tpu.trace_start"() <{level = 10 : i32, message = "bld,bmd->blm"}> : () -> ()
    %cst_48 = arith.constant dense<0.000000e+00> : vector<8x8x8xf32>
    %163 = tpu.matmul %160, %161, %cst_48 {dimension_numbers = #tpu.dot_dimension_numbers<[2], [2], [1], [1], [0, 0, 0, 1, 1, 1], [0], [0]>} : vector<8x8x8xf32>, vector<8x8x8xf32>, vector<8x8x8xf32> -> vector<8x8x8xf32>
    "tpu.trace_stop"() : () -> ()
    %164 = arith.addf %163, %112 : vector<8x8x8xf32>
    %cst_49 = arith.constant dense<0xFF800000> : vector<8x8xf32>
    %165 = vector.multi_reduction <maximumf>, %164, %cst_49 [2] : vector<8x8x8xf32> to vector<8x8xf32>
    %166 = vector.shape_cast %165 : vector<8x8xf32> to vector<8x8x1xf32>
    %167 = vector.broadcast %166 : vector<8x8x1xf32> to vector<8x8x8xf32>
    %168 = arith.subf %164, %167 : vector<8x8x8xf32>
    %169 = math.exp %168 : vector<8x8x8xf32>
    %cst_50 = arith.constant dense<0.000000e+00> : vector<8x8xf32>
    %170 = vector.multi_reduction <add>, %169, %cst_50 [2] : vector<8x8x8xf32> to vector<8x8xf32>
    %171 = vector.shape_cast %170 : vector<8x8xf32> to vector<8x8x1xf32>
    %172 = tpu.reciprocal %171 {approx = true} : vector<8x8x1xf32> -> vector<8x8x1xf32>
    %173 = vector.broadcast %172 : vector<8x8x1xf32> to vector<8x8x8xf32>
    %174 = arith.mulf %169, %173 : vector<8x8x8xf32>
    "tpu.trace_start"() <{level = 10 : i32, message = "blm,bmd->bld"}> : () -> ()
    %cst_51 = arith.constant dense<0.000000e+00> : vector<8x8x8xf32>
    %175 = tpu.matmul %174, %162, %cst_51 {dimension_numbers = #tpu.dot_dimension_numbers<[2], [1], [1], [2], [0, 0, 0, 1, 1, 2], [0], [0]>} : vector<8x8x8xf32>, vector<8x8x8xf32>, vector<8x8x8xf32> -> vector<8x8x8xf32>
    "tpu.trace_stop"() : () -> ()
    %176 = vector.shape_cast %175 : vector<8x8x8xf32> to vector<64x8xf32>
    %177 = vector.extract_strided_slice %105 {offsets = [16, 0], sizes = [8, 20], strides = [1, 1]} : vector<32x20xf32> to vector<8x20xf32>
    %cst_52 = arith.constant dense<0.000000e+00> : vector<64x20xf32>
    %178 = tpu.matmul %176, %177, %cst_52 {dimension_numbers = #tpu.dot_dimension_numbers<[1], [0], [0], [1], [0, 0, 1, 1], [], []>} : vector<64x8xf32>, vector<8x20xf32>, vector<64x20xf32> -> vector<64x20xf32>
    %179 = arith.addf %157, %178 : vector<64x20xf32>
    %180 = vector.extract_strided_slice %104 {offsets = [0, 0, 24], sizes = [8, 8, 8], strides = [1, 1, 1]} : vector<8x8x128xf32> to vector<8x8x8xf32>
    %cst_53 = arith.constant 0.44721359 : f32
    %181 = vector.broadcast %cst_53 : f32 to vector<8x8x8xf32>
    %182 = arith.mulf %180, %181 : vector<8x8x8xf32>
    %183 = vector.extract_strided_slice %104 {offsets = [0, 0, 56], sizes = [8, 8, 8], strides = [1, 1, 1]} : vector<8x8x128xf32> to vector<8x8x8xf32>
    %184 = vector.extract_strided_slice %104 {offsets = [0, 0, 88], sizes = [8, 8, 8], strides = [1, 1, 1]} : vector<8x8x128xf32> to vector<8x8x8xf32>
    "tpu.trace_start"() <{level = 10 : i32, message = "bld,bmd->blm"}> : () -> ()
    %cst_54 = arith.constant dense<0.000000e+00> : vector<8x8x8xf32>
    %185 = tpu.matmul %182, %183, %cst_54 {dimension_numbers = #tpu.dot_dimension_numbers<[2], [2], [1], [1], [0, 0, 0, 1, 1, 1], [0], [0]>} : vector<8x8x8xf32>, vector<8x8x8xf32>, vector<8x8x8xf32> -> vector<8x8x8xf32>
    "tpu.trace_stop"() : () -> ()
    %186 = arith.addf %185, %112 : vector<8x8x8xf32>
    %cst_55 = arith.constant dense<0xFF800000> : vector<8x8xf32>
    %187 = vector.multi_reduction <maximumf>, %186, %cst_55 [2] : vector<8x8x8xf32> to vector<8x8xf32>
    %188 = vector.shape_cast %187 : vector<8x8xf32> to vector<8x8x1xf32>
    %189 = vector.broadcast %188 : vector<8x8x1xf32> to vector<8x8x8xf32>
    %190 = arith.subf %186, %189 : vector<8x8x8xf32>
    %191 = math.exp %190 : vector<8x8x8xf32>
    %cst_56 = arith.constant dense<0.000000e+00> : vector<8x8xf32>
    %192 = vector.multi_reduction <add>, %191, %cst_56 [2] : vector<8x8x8xf32> to vector<8x8xf32>
    %193 = vector.shape_cast %192 : vector<8x8xf32> to vector<8x8x1xf32>
    %194 = tpu.reciprocal %193 {approx = true} : vector<8x8x1xf32> -> vector<8x8x1xf32>
    %195 = vector.broadcast %194 : vector<8x8x1xf32> to vector<8x8x8xf32>
    %196 = arith.mulf %191, %195 : vector<8x8x8xf32>
    "tpu.trace_start"() <{level = 10 : i32, message = "blm,bmd->bld"}> : () -> ()
    %cst_57 = arith.constant dense<0.000000e+00> : vector<8x8x8xf32>
    %197 = tpu.matmul %196, %184, %cst_57 {dimension_numbers = #tpu.dot_dimension_numbers<[2], [1], [1], [2], [0, 0, 0, 1, 1, 2], [0], [0]>} : vector<8x8x8xf32>, vector<8x8x8xf32>, vector<8x8x8xf32> -> vector<8x8x8xf32>
    "tpu.trace_stop"() : () -> ()
    %198 = vector.shape_cast %197 : vector<8x8x8xf32> to vector<64x8xf32>
    %199 = vector.extract_strided_slice %105 {offsets = [24, 0], sizes = [8, 20], strides = [1, 1]} : vector<32x20xf32> to vector<8x20xf32>
    %cst_58 = arith.constant dense<0.000000e+00> : vector<64x20xf32>
    %200 = tpu.matmul %198, %199, %cst_58 {dimension_numbers = #tpu.dot_dimension_numbers<[1], [0], [0], [1], [0, 0, 1, 1], [], []>} : vector<64x8xf32>, vector<8x20xf32>, vector<64x20xf32> -> vector<64x20xf32>
    %201 = arith.addf %179, %200 : vector<64x20xf32>
    %c48 = arith.constant 48 : index
    %c0_59 = arith.constant 0 : index
    %202 = vector.load %arg3[%c48, %c0_59] : memref<264x128xf32, #tpu.memory_space<vmem>>, vector<20x4xf32>
    %cst_60 = arith.constant dense<0.000000e+00> : vector<64x4xf32>
    %203 = tpu.matmul %201, %202, %cst_60 {dimension_numbers = #tpu.dot_dimension_numbers<[1], [0], [0], [1], [0, 0, 1, 1], [], []>} : vector<64x20xf32>, vector<20x4xf32>, vector<64x4xf32> -> vector<64x4xf32>
    %c68 = arith.constant 68 : index
    %c0_61 = arith.constant 0 : index
    %204 = vector.load %arg3[%c68, %c0_61] : memref<264x128xf32, #tpu.memory_space<vmem>>, vector<1x4xf32>
    %205 = vector.broadcast %204 : vector<1x4xf32> to vector<64x4xf32>
    %206 = arith.addf %203, %205 : vector<64x4xf32>
    %207 = math.tanh %206 : vector<64x4xf32>
    %208 = vector.shape_cast %207 : vector<64x4xf32> to vector<8x8x4xf32>
    %c8_62 = arith.constant 8 : index
    %c0_63 = arith.constant 0 : index
    %209 = vector.load %arg2[%c8_62, %c0_63] : memref<24x640xf32, #tpu.memory_space<vmem>>, vector<4x640xf32>
    %210 = tpu.iota {dimensions = array<i32: 1>} : vector<8x8x4xi32>
    %c6_i32 = arith.constant 6 : i32
    %211 = vector.broadcast %c6_i32 : i32 to vector<8x8x4xi32>
    %212 = arith.cmpi slt, %210, %211 : vector<8x8x4xi32>
    %c7_i32_64 = arith.constant 7 : i32
    %213 = tpu.dynamic_rotate %208 by %c7_i32_64 dim 1 : vector<8x8x4xf32>, i32 -> vector<8x8x4xf32>
    %214 = arith.subf %213, %208 : vector<8x8x4xf32>
    %cst_65 = arith.constant 0.000000e+00 : f32
    %215 = vector.broadcast %cst_65 : f32 to vector<8x8x4xf32>
    %216 = arith.select %212, %214, %215 : vector<8x8x4xi1>, vector<8x8x4xf32>
    %217 = tpu.iota {dimensions = array<i32: 1>} : vector<8x8x4xi32>
    %c1_i32_66 = arith.constant 1 : i32
    %218 = tpu.dynamic_rotate %216 by %c1_i32_66 dim 1 : vector<8x8x4xf32>, i32 -> vector<8x8x4xf32>
    %c1_i32_67 = arith.constant 1 : i32
    %219 = vector.broadcast %c1_i32_67 : i32 to vector<8x8x4xi32>
    %220 = arith.cmpi sge, %217, %219 : vector<8x8x4xi32>
    %cst_68 = arith.constant 0.000000e+00 : f32
    %221 = vector.broadcast %cst_68 : f32 to vector<8x8x4xf32>
    %222 = arith.select %220, %218, %221 : vector<8x8x4xi1>, vector<8x8x4xf32>
    %223 = arith.addf %216, %222 : vector<8x8x4xf32>
    %224 = tpu.iota {dimensions = array<i32: 1>} : vector<8x8x4xi32>
    %c2_i32_69 = arith.constant 2 : i32
    %225 = tpu.dynamic_rotate %223 by %c2_i32_69 dim 1 : vector<8x8x4xf32>, i32 -> vector<8x8x4xf32>
    %c2_i32_70 = arith.constant 2 : i32
    %226 = vector.broadcast %c2_i32_70 : i32 to vector<8x8x4xi32>
    %227 = arith.cmpi sge, %224, %226 : vector<8x8x4xi32>
    %cst_71 = arith.constant 0.000000e+00 : f32
    %228 = vector.broadcast %cst_71 : f32 to vector<8x8x4xf32>
    %229 = arith.select %227, %225, %228 : vector<8x8x4xi1>, vector<8x8x4xf32>
    %230 = arith.addf %223, %229 : vector<8x8x4xf32>
    %231 = tpu.iota {dimensions = array<i32: 1>} : vector<8x8x4xi32>
    %c4_i32_72 = arith.constant 4 : i32
    %232 = tpu.dynamic_rotate %230 by %c4_i32_72 dim 1 : vector<8x8x4xf32>, i32 -> vector<8x8x4xf32>
    %c4_i32_73 = arith.constant 4 : i32
    %233 = vector.broadcast %c4_i32_73 : i32 to vector<8x8x4xi32>
    %234 = arith.cmpi sge, %231, %233 : vector<8x8x4xi32>
    %cst_74 = arith.constant 0.000000e+00 : f32
    %235 = vector.broadcast %cst_74 : f32 to vector<8x8x4xf32>
    %236 = arith.select %234, %232, %235 : vector<8x8x4xi1>, vector<8x8x4xf32>
    %237 = arith.addf %230, %236 : vector<8x8x4xf32>
    %cst_75 = arith.constant 5.000000e-01 : f32
    %238 = vector.broadcast %cst_75 : f32 to vector<8x8x4xf32>
    %239 = arith.mulf %238, %216 : vector<8x8x4xf32>
    %240 = arith.subf %237, %239 : vector<8x8x4xf32>
    %241 = vector.shape_cast %240 : vector<8x8x4xf32> to vector<64x4xf32>
    %242 = vector.shape_cast %216 : vector<8x8x4xf32> to vector<64x4xf32>
    %cst_76 = arith.constant dense<0.000000e+00> : vector<64x640xf32>
    %243 = tpu.matmul %242, %209, %cst_76 {dimension_numbers = #tpu.dot_dimension_numbers<[1], [0], [0], [1], [0, 0, 1, 1], [], []>} : vector<64x4xf32>, vector<4x640xf32>, vector<64x640xf32> -> vector<64x640xf32>
    %244 = vector.extract_strided_slice %243 {offsets = [0, 0], sizes = [64, 128], strides = [1, 1]} : vector<64x640xf32> to vector<64x128xf32>
    %245 = vector.extract_strided_slice %241 {offsets = [0, 0], sizes = [64, 1], strides = [1, 1]} : vector<64x4xf32> to vector<64x1xf32>
    %246 = vector.extract_strided_slice %243 {offsets = [0, 128], sizes = [64, 128], strides = [1, 1]} : vector<64x640xf32> to vector<64x128xf32>
    %247 = vector.broadcast %245 : vector<64x1xf32> to vector<64x128xf32>
    %248 = arith.mulf %247, %246 : vector<64x128xf32>
    %249 = arith.addf %244, %248 : vector<64x128xf32>
    %250 = vector.extract_strided_slice %241 {offsets = [0, 1], sizes = [64, 1], strides = [1, 1]} : vector<64x4xf32> to vector<64x1xf32>
    %251 = vector.extract_strided_slice %243 {offsets = [0, 256], sizes = [64, 128], strides = [1, 1]} : vector<64x640xf32> to vector<64x128xf32>
    %252 = vector.broadcast %250 : vector<64x1xf32> to vector<64x128xf32>
    %253 = arith.mulf %252, %251 : vector<64x128xf32>
    %254 = arith.addf %249, %253 : vector<64x128xf32>
    %255 = vector.extract_strided_slice %241 {offsets = [0, 2], sizes = [64, 1], strides = [1, 1]} : vector<64x4xf32> to vector<64x1xf32>
    %256 = vector.extract_strided_slice %243 {offsets = [0, 384], sizes = [64, 128], strides = [1, 1]} : vector<64x640xf32> to vector<64x128xf32>
    %257 = vector.broadcast %255 : vector<64x1xf32> to vector<64x128xf32>
    %258 = arith.mulf %257, %256 : vector<64x128xf32>
    %259 = arith.addf %254, %258 : vector<64x128xf32>
    %260 = vector.extract_strided_slice %241 {offsets = [0, 3], sizes = [64, 1], strides = [1, 1]} : vector<64x4xf32> to vector<64x1xf32>
    %261 = vector.extract_strided_slice %243 {offsets = [0, 512], sizes = [64, 128], strides = [1, 1]} : vector<64x640xf32> to vector<64x128xf32>
    %262 = vector.broadcast %260 : vector<64x1xf32> to vector<64x128xf32>
    %263 = arith.mulf %262, %261 : vector<64x128xf32>
    %264 = arith.addf %259, %263 : vector<64x128xf32>
    %265 = vector.shape_cast %264 : vector<64x128xf32> to vector<8x8x128xf32>
    %266 = tpu.iota {dimensions = array<i32: 1>} : vector<8x8x128xi32>
    %c1_i32_77 = arith.constant 1 : i32
    %267 = tpu.dynamic_rotate %265 by %c1_i32_77 dim 1 : vector<8x8x128xf32>, i32 -> vector<8x8x128xf32>
    %c1_i32_78 = arith.constant 1 : i32
    %268 = vector.broadcast %c1_i32_78 : i32 to vector<8x8x128xi32>
    %269 = arith.cmpi sge, %266, %268 : vector<8x8x128xi32>
    %cst_79 = arith.constant 0.000000e+00 : f32
    %270 = vector.broadcast %cst_79 : f32 to vector<8x8x128xf32>
    %271 = arith.select %269, %267, %270 : vector<8x8x128xi1>, vector<8x8x128xf32>
    %272 = arith.addf %265, %271 : vector<8x8x128xf32>
    %273 = tpu.iota {dimensions = array<i32: 1>} : vector<8x8x128xi32>
    %c2_i32_80 = arith.constant 2 : i32
    %274 = tpu.dynamic_rotate %272 by %c2_i32_80 dim 1 : vector<8x8x128xf32>, i32 -> vector<8x8x128xf32>
    %c2_i32_81 = arith.constant 2 : i32
    %275 = vector.broadcast %c2_i32_81 : i32 to vector<8x8x128xi32>
    %276 = arith.cmpi sge, %273, %275 : vector<8x8x128xi32>
    %cst_82 = arith.constant 0.000000e+00 : f32
    %277 = vector.broadcast %cst_82 : f32 to vector<8x8x128xf32>
    %278 = arith.select %276, %274, %277 : vector<8x8x128xi1>, vector<8x8x128xf32>
    %279 = arith.addf %272, %278 : vector<8x8x128xf32>
    %280 = tpu.iota {dimensions = array<i32: 1>} : vector<8x8x128xi32>
    %c4_i32_83 = arith.constant 4 : i32
    %281 = tpu.dynamic_rotate %279 by %c4_i32_83 dim 1 : vector<8x8x128xf32>, i32 -> vector<8x8x128xf32>
    %c4_i32_84 = arith.constant 4 : i32
    %282 = vector.broadcast %c4_i32_84 : i32 to vector<8x8x128xi32>
    %283 = arith.cmpi sge, %280, %282 : vector<8x8x128xi32>
    %cst_85 = arith.constant 0.000000e+00 : f32
    %284 = vector.broadcast %cst_85 : f32 to vector<8x8x128xf32>
    %285 = arith.select %283, %281, %284 : vector<8x8x128xi1>, vector<8x8x128xf32>
    %286 = arith.addf %279, %285 : vector<8x8x128xf32>
    %c72 = arith.constant 72 : index
    %c0_86 = arith.constant 0 : index
    %287 = vector.load %arg3[%c72, %c0_86] : memref<264x128xf32, #tpu.memory_space<vmem>>, vector<1x128xf32>
    %288 = vector.shape_cast %287 : vector<1x128xf32> to vector<1x1x128xf32>
    %289 = vector.broadcast %288 : vector<1x1x128xf32> to vector<8x8x128xf32>
    %290 = arith.addf %286, %289 : vector<8x8x128xf32>
    %c80 = arith.constant 80 : index
    %c0_87 = arith.constant 0 : index
    %291 = vector.load %arg3[%c80, %c0_87] : memref<264x128xf32, #tpu.memory_space<vmem>>, vector<32x20xf32>
    %c112 = arith.constant 112 : index
    %c0_88 = arith.constant 0 : index
    %292 = vector.load %arg3[%c112, %c0_88] : memref<264x128xf32, #tpu.memory_space<vmem>>, vector<1x20xf32>
    %293 = tpu.iota {dimensions = array<i32: 2>} : vector<8x8x8xi32>
    %c6_i32_89 = arith.constant 6 : i32
    %294 = vector.broadcast %c6_i32_89 : i32 to vector<8x8x8xi32>
    %295 = arith.cmpi slt, %293, %294 : vector<8x8x8xi32>
    %cst_90 = arith.constant 0.000000e+00 : f32
    %cst_91 = arith.constant -1.000000e+30 : f32
    %296 = vector.broadcast %cst_90 : f32 to vector<8x8x8xf32>
    %297 = vector.broadcast %cst_91 : f32 to vector<8x8x8xf32>
    %298 = arith.select %295, %296, %297 : vector<8x8x8xi1>, vector<8x8x8xf32>
    %299 = vector.extract_strided_slice %290 {offsets = [0, 0, 0], sizes = [8, 8, 8], strides = [1, 1, 1]} : vector<8x8x128xf32> to vector<8x8x8xf32>
    %cst_92 = arith.constant 0.44721359 : f32
    %300 = vector.broadcast %cst_92 : f32 to vector<8x8x8xf32>
    %301 = arith.mulf %299, %300 : vector<8x8x8xf32>
    %302 = vector.extract_strided_slice %290 {offsets = [0, 0, 32], sizes = [8, 8, 8], strides = [1, 1, 1]} : vector<8x8x128xf32> to vector<8x8x8xf32>
    %303 = vector.extract_strided_slice %290 {offsets = [0, 0, 64], sizes = [8, 8, 8], strides = [1, 1, 1]} : vector<8x8x128xf32> to vector<8x8x8xf32>
    "tpu.trace_start"() <{level = 10 : i32, message = "bld,bmd->blm"}> : () -> ()
    %cst_93 = arith.constant dense<0.000000e+00> : vector<8x8x8xf32>
    %304 = tpu.matmul %301, %302, %cst_93 {dimension_numbers = #tpu.dot_dimension_numbers<[2], [2], [1], [1], [0, 0, 0, 1, 1, 1], [0], [0]>} : vector<8x8x8xf32>, vector<8x8x8xf32>, vector<8x8x8xf32> -> vector<8x8x8xf32>
    "tpu.trace_stop"() : () -> ()
    %305 = arith.addf %304, %298 : vector<8x8x8xf32>
    %cst_94 = arith.constant dense<0xFF800000> : vector<8x8xf32>
    %306 = vector.multi_reduction <maximumf>, %305, %cst_94 [2] : vector<8x8x8xf32> to vector<8x8xf32>
    %307 = vector.shape_cast %306 : vector<8x8xf32> to vector<8x8x1xf32>
    %308 = vector.broadcast %307 : vector<8x8x1xf32> to vector<8x8x8xf32>
    %309 = arith.subf %305, %308 : vector<8x8x8xf32>
    %310 = math.exp %309 : vector<8x8x8xf32>
    %cst_95 = arith.constant dense<0.000000e+00> : vector<8x8xf32>
    %311 = vector.multi_reduction <add>, %310, %cst_95 [2] : vector<8x8x8xf32> to vector<8x8xf32>
    %312 = vector.shape_cast %311 : vector<8x8xf32> to vector<8x8x1xf32>
    %313 = tpu.reciprocal %312 {approx = true} : vector<8x8x1xf32> -> vector<8x8x1xf32>
    %314 = vector.broadcast %313 : vector<8x8x1xf32> to vector<8x8x8xf32>
    %315 = arith.mulf %310, %314 : vector<8x8x8xf32>
    "tpu.trace_start"() <{level = 10 : i32, message = "blm,bmd->bld"}> : () -> ()
    %cst_96 = arith.constant dense<0.000000e+00> : vector<8x8x8xf32>
    %316 = tpu.matmul %315, %303, %cst_96 {dimension_numbers = #tpu.dot_dimension_numbers<[2], [1], [1], [2], [0, 0, 0, 1, 1, 2], [0], [0]>} : vector<8x8x8xf32>, vector<8x8x8xf32>, vector<8x8x8xf32> -> vector<8x8x8xf32>
    "tpu.trace_stop"() : () -> ()
    %317 = vector.shape_cast %316 : vector<8x8x8xf32> to vector<64x8xf32>
    %318 = vector.extract_strided_slice %291 {offsets = [0, 0], sizes = [8, 20], strides = [1, 1]} : vector<32x20xf32> to vector<8x20xf32>
    %cst_97 = arith.constant dense<0.000000e+00> : vector<64x20xf32>
    %319 = tpu.matmul %317, %318, %cst_97 {dimension_numbers = #tpu.dot_dimension_numbers<[1], [0], [0], [1], [0, 0, 1, 1], [], []>} : vector<64x8xf32>, vector<8x20xf32>, vector<64x20xf32> -> vector<64x20xf32>
    %320 = vector.broadcast %292 : vector<1x20xf32> to vector<64x20xf32>
    %321 = arith.addf %320, %319 : vector<64x20xf32>
    %322 = vector.extract_strided_slice %290 {offsets = [0, 0, 8], sizes = [8, 8, 8], strides = [1, 1, 1]} : vector<8x8x128xf32> to vector<8x8x8xf32>
    %cst_98 = arith.constant 0.44721359 : f32
    %323 = vector.broadcast %cst_98 : f32 to vector<8x8x8xf32>
    %324 = arith.mulf %322, %323 : vector<8x8x8xf32>
    %325 = vector.extract_strided_slice %290 {offsets = [0, 0, 40], sizes = [8, 8, 8], strides = [1, 1, 1]} : vector<8x8x128xf32> to vector<8x8x8xf32>
    %326 = vector.extract_strided_slice %290 {offsets = [0, 0, 72], sizes = [8, 8, 8], strides = [1, 1, 1]} : vector<8x8x128xf32> to vector<8x8x8xf32>
    "tpu.trace_start"() <{level = 10 : i32, message = "bld,bmd->blm"}> : () -> ()
    %cst_99 = arith.constant dense<0.000000e+00> : vector<8x8x8xf32>
    %327 = tpu.matmul %324, %325, %cst_99 {dimension_numbers = #tpu.dot_dimension_numbers<[2], [2], [1], [1], [0, 0, 0, 1, 1, 1], [0], [0]>} : vector<8x8x8xf32>, vector<8x8x8xf32>, vector<8x8x8xf32> -> vector<8x8x8xf32>
    "tpu.trace_stop"() : () -> ()
    %328 = arith.addf %327, %298 : vector<8x8x8xf32>
    %cst_100 = arith.constant dense<0xFF800000> : vector<8x8xf32>
    %329 = vector.multi_reduction <maximumf>, %328, %cst_100 [2] : vector<8x8x8xf32> to vector<8x8xf32>
    %330 = vector.shape_cast %329 : vector<8x8xf32> to vector<8x8x1xf32>
    %331 = vector.broadcast %330 : vector<8x8x1xf32> to vector<8x8x8xf32>
    %332 = arith.subf %328, %331 : vector<8x8x8xf32>
    %333 = math.exp %332 : vector<8x8x8xf32>
    %cst_101 = arith.constant dense<0.000000e+00> : vector<8x8xf32>
    %334 = vector.multi_reduction <add>, %333, %cst_101 [2] : vector<8x8x8xf32> to vector<8x8xf32>
    %335 = vector.shape_cast %334 : vector<8x8xf32> to vector<8x8x1xf32>
    %336 = tpu.reciprocal %335 {approx = true} : vector<8x8x1xf32> -> vector<8x8x1xf32>
    %337 = vector.broadcast %336 : vector<8x8x1xf32> to vector<8x8x8xf32>
    %338 = arith.mulf %333, %337 : vector<8x8x8xf32>
    "tpu.trace_start"() <{level = 10 : i32, message = "blm,bmd->bld"}> : () -> ()
    %cst_102 = arith.constant dense<0.000000e+00> : vector<8x8x8xf32>
    %339 = tpu.matmul %338, %326, %cst_102 {dimension_numbers = #tpu.dot_dimension_numbers<[2], [1], [1], [2], [0, 0, 0, 1, 1, 2], [0], [0]>} : vector<8x8x8xf32>, vector<8x8x8xf32>, vector<8x8x8xf32> -> vector<8x8x8xf32>
    "tpu.trace_stop"() : () -> ()
    %340 = vector.shape_cast %339 : vector<8x8x8xf32> to vector<64x8xf32>
    %341 = vector.extract_strided_slice %291 {offsets = [8, 0], sizes = [8, 20], strides = [1, 1]} : vector<32x20xf32> to vector<8x20xf32>
    %cst_103 = arith.constant dense<0.000000e+00> : vector<64x20xf32>
    %342 = tpu.matmul %340, %341, %cst_103 {dimension_numbers = #tpu.dot_dimension_numbers<[1], [0], [0], [1], [0, 0, 1, 1], [], []>} : vector<64x8xf32>, vector<8x20xf32>, vector<64x20xf32> -> vector<64x20xf32>
    %343 = arith.addf %321, %342 : vector<64x20xf32>
    %344 = vector.extract_strided_slice %290 {offsets = [0, 0, 16], sizes = [8, 8, 8], strides = [1, 1, 1]} : vector<8x8x128xf32> to vector<8x8x8xf32>
    %cst_104 = arith.constant 0.44721359 : f32
    %345 = vector.broadcast %cst_104 : f32 to vector<8x8x8xf32>
    %346 = arith.mulf %344, %345 : vector<8x8x8xf32>
    %347 = vector.extract_strided_slice %290 {offsets = [0, 0, 48], sizes = [8, 8, 8], strides = [1, 1, 1]} : vector<8x8x128xf32> to vector<8x8x8xf32>
    %348 = vector.extract_strided_slice %290 {offsets = [0, 0, 80], sizes = [8, 8, 8], strides = [1, 1, 1]} : vector<8x8x128xf32> to vector<8x8x8xf32>
    "tpu.trace_start"() <{level = 10 : i32, message = "bld,bmd->blm"}> : () -> ()
    %cst_105 = arith.constant dense<0.000000e+00> : vector<8x8x8xf32>
    %349 = tpu.matmul %346, %347, %cst_105 {dimension_numbers = #tpu.dot_dimension_numbers<[2], [2], [1], [1], [0, 0, 0, 1, 1, 1], [0], [0]>} : vector<8x8x8xf32>, vector<8x8x8xf32>, vector<8x8x8xf32> -> vector<8x8x8xf32>
    "tpu.trace_stop"() : () -> ()
    %350 = arith.addf %349, %298 : vector<8x8x8xf32>
    %cst_106 = arith.constant dense<0xFF800000> : vector<8x8xf32>
    %351 = vector.multi_reduction <maximumf>, %350, %cst_106 [2] : vector<8x8x8xf32> to vector<8x8xf32>
    %352 = vector.shape_cast %351 : vector<8x8xf32> to vector<8x8x1xf32>
    %353 = vector.broadcast %352 : vector<8x8x1xf32> to vector<8x8x8xf32>
    %354 = arith.subf %350, %353 : vector<8x8x8xf32>
    %355 = math.exp %354 : vector<8x8x8xf32>
    %cst_107 = arith.constant dense<0.000000e+00> : vector<8x8xf32>
    %356 = vector.multi_reduction <add>, %355, %cst_107 [2] : vector<8x8x8xf32> to vector<8x8xf32>
    %357 = vector.shape_cast %356 : vector<8x8xf32> to vector<8x8x1xf32>
    %358 = tpu.reciprocal %357 {approx = true} : vector<8x8x1xf32> -> vector<8x8x1xf32>
    %359 = vector.broadcast %358 : vector<8x8x1xf32> to vector<8x8x8xf32>
    %360 = arith.mulf %355, %359 : vector<8x8x8xf32>
    "tpu.trace_start"() <{level = 10 : i32, message = "blm,bmd->bld"}> : () -> ()
    %cst_108 = arith.constant dense<0.000000e+00> : vector<8x8x8xf32>
    %361 = tpu.matmul %360, %348, %cst_108 {dimension_numbers = #tpu.dot_dimension_numbers<[2], [1], [1], [2], [0, 0, 0, 1, 1, 2], [0], [0]>} : vector<8x8x8xf32>, vector<8x8x8xf32>, vector<8x8x8xf32> -> vector<8x8x8xf32>
    "tpu.trace_stop"() : () -> ()
    %362 = vector.shape_cast %361 : vector<8x8x8xf32> to vector<64x8xf32>
    %363 = vector.extract_strided_slice %291 {offsets = [16, 0], sizes = [8, 20], strides = [1, 1]} : vector<32x20xf32> to vector<8x20xf32>
    %cst_109 = arith.constant dense<0.000000e+00> : vector<64x20xf32>
    %364 = tpu.matmul %362, %363, %cst_109 {dimension_numbers = #tpu.dot_dimension_numbers<[1], [0], [0], [1], [0, 0, 1, 1], [], []>} : vector<64x8xf32>, vector<8x20xf32>, vector<64x20xf32> -> vector<64x20xf32>
    %365 = arith.addf %343, %364 : vector<64x20xf32>
    %366 = vector.extract_strided_slice %290 {offsets = [0, 0, 24], sizes = [8, 8, 8], strides = [1, 1, 1]} : vector<8x8x128xf32> to vector<8x8x8xf32>
    %cst_110 = arith.constant 0.44721359 : f32
    %367 = vector.broadcast %cst_110 : f32 to vector<8x8x8xf32>
    %368 = arith.mulf %366, %367 : vector<8x8x8xf32>
    %369 = vector.extract_strided_slice %290 {offsets = [0, 0, 56], sizes = [8, 8, 8], strides = [1, 1, 1]} : vector<8x8x128xf32> to vector<8x8x8xf32>
    %370 = vector.extract_strided_slice %290 {offsets = [0, 0, 88], sizes = [8, 8, 8], strides = [1, 1, 1]} : vector<8x8x128xf32> to vector<8x8x8xf32>
    "tpu.trace_start"() <{level = 10 : i32, message = "bld,bmd->blm"}> : () -> ()
    %cst_111 = arith.constant dense<0.000000e+00> : vector<8x8x8xf32>
    %371 = tpu.matmul %368, %369, %cst_111 {dimension_numbers = #tpu.dot_dimension_numbers<[2], [2], [1], [1], [0, 0, 0, 1, 1, 1], [0], [0]>} : vector<8x8x8xf32>, vector<8x8x8xf32>, vector<8x8x8xf32> -> vector<8x8x8xf32>
    "tpu.trace_stop"() : () -> ()
    %372 = arith.addf %371, %298 : vector<8x8x8xf32>
    %cst_112 = arith.constant dense<0xFF800000> : vector<8x8xf32>
    %373 = vector.multi_reduction <maximumf>, %372, %cst_112 [2] : vector<8x8x8xf32> to vector<8x8xf32>
    %374 = vector.shape_cast %373 : vector<8x8xf32> to vector<8x8x1xf32>
    %375 = vector.broadcast %374 : vector<8x8x1xf32> to vector<8x8x8xf32>
    %376 = arith.subf %372, %375 : vector<8x8x8xf32>
    %377 = math.exp %376 : vector<8x8x8xf32>
    %cst_113 = arith.constant dense<0.000000e+00> : vector<8x8xf32>
    %378 = vector.multi_reduction <add>, %377, %cst_113 [2] : vector<8x8x8xf32> to vector<8x8xf32>
    %379 = vector.shape_cast %378 : vector<8x8xf32> to vector<8x8x1xf32>
    %380 = tpu.reciprocal %379 {approx = true} : vector<8x8x1xf32> -> vector<8x8x1xf32>
    %381 = vector.broadcast %380 : vector<8x8x1xf32> to vector<8x8x8xf32>
    %382 = arith.mulf %377, %381 : vector<8x8x8xf32>
    "tpu.trace_start"() <{level = 10 : i32, message = "blm,bmd->bld"}> : () -> ()
    %cst_114 = arith.constant dense<0.000000e+00> : vector<8x8x8xf32>
    %383 = tpu.matmul %382, %370, %cst_114 {dimension_numbers = #tpu.dot_dimension_numbers<[2], [1], [1], [2], [0, 0, 0, 1, 1, 2], [0], [0]>} : vector<8x8x8xf32>, vector<8x8x8xf32>, vector<8x8x8xf32> -> vector<8x8x8xf32>
    "tpu.trace_stop"() : () -> ()
    %384 = vector.shape_cast %383 : vector<8x8x8xf32> to vector<64x8xf32>
    %385 = vector.extract_strided_slice %291 {offsets = [24, 0], sizes = [8, 20], strides = [1, 1]} : vector<32x20xf32> to vector<8x20xf32>
    %cst_115 = arith.constant dense<0.000000e+00> : vector<64x20xf32>
    %386 = tpu.matmul %384, %385, %cst_115 {dimension_numbers = #tpu.dot_dimension_numbers<[1], [0], [0], [1], [0, 0, 1, 1], [], []>} : vector<64x8xf32>, vector<8x20xf32>, vector<64x20xf32> -> vector<64x20xf32>
    %387 = arith.addf %365, %386 : vector<64x20xf32>
    %c120 = arith.constant 120 : index
    %c0_116 = arith.constant 0 : index
    %388 = vector.load %arg3[%c120, %c0_116] : memref<264x128xf32, #tpu.memory_space<vmem>>, vector<20x4xf32>
    %cst_117 = arith.constant dense<0.000000e+00> : vector<64x4xf32>
    %389 = tpu.matmul %387, %388, %cst_117 {dimension_numbers = #tpu.dot_dimension_numbers<[1], [0], [0], [1], [0, 0, 1, 1], [], []>} : vector<64x20xf32>, vector<20x4xf32>, vector<64x4xf32> -> vector<64x4xf32>
    %c140 = arith.constant 140 : index
    %c0_118 = arith.constant 0 : index
    %390 = vector.load %arg3[%c140, %c0_118] : memref<264x128xf32, #tpu.memory_space<vmem>>, vector<1x4xf32>
    %391 = vector.broadcast %390 : vector<1x4xf32> to vector<64x4xf32>
    %392 = arith.addf %389, %391 : vector<64x4xf32>
    %393 = math.tanh %392 : vector<64x4xf32>
    %394 = vector.shape_cast %393 : vector<64x4xf32> to vector<8x8x4xf32>
    %c16 = arith.constant 16 : index
    %c0_119 = arith.constant 0 : index
    %395 = vector.load %arg2[%c16, %c0_119] : memref<24x640xf32, #tpu.memory_space<vmem>>, vector<4x640xf32>
    %396 = tpu.iota {dimensions = array<i32: 1>} : vector<8x8x4xi32>
    %c5_i32 = arith.constant 5 : i32
    %397 = vector.broadcast %c5_i32 : i32 to vector<8x8x4xi32>
    %398 = arith.cmpi slt, %396, %397 : vector<8x8x4xi32>
    %c7_i32_120 = arith.constant 7 : i32
    %399 = tpu.dynamic_rotate %394 by %c7_i32_120 dim 1 : vector<8x8x4xf32>, i32 -> vector<8x8x4xf32>
    %400 = arith.subf %399, %394 : vector<8x8x4xf32>
    %cst_121 = arith.constant 0.000000e+00 : f32
    %401 = vector.broadcast %cst_121 : f32 to vector<8x8x4xf32>
    %402 = arith.select %398, %400, %401 : vector<8x8x4xi1>, vector<8x8x4xf32>
    %403 = tpu.iota {dimensions = array<i32: 1>} : vector<8x8x4xi32>
    %c1_i32_122 = arith.constant 1 : i32
    %404 = tpu.dynamic_rotate %402 by %c1_i32_122 dim 1 : vector<8x8x4xf32>, i32 -> vector<8x8x4xf32>
    %c1_i32_123 = arith.constant 1 : i32
    %405 = vector.broadcast %c1_i32_123 : i32 to vector<8x8x4xi32>
    %406 = arith.cmpi sge, %403, %405 : vector<8x8x4xi32>
    %cst_124 = arith.constant 0.000000e+00 : f32
    %407 = vector.broadcast %cst_124 : f32 to vector<8x8x4xf32>
    %408 = arith.select %406, %404, %407 : vector<8x8x4xi1>, vector<8x8x4xf32>
    %409 = arith.addf %402, %408 : vector<8x8x4xf32>
    %410 = tpu.iota {dimensions = array<i32: 1>} : vector<8x8x4xi32>
    %c2_i32_125 = arith.constant 2 : i32
    %411 = tpu.dynamic_rotate %409 by %c2_i32_125 dim 1 : vector<8x8x4xf32>, i32 -> vector<8x8x4xf32>
    %c2_i32_126 = arith.constant 2 : i32
    %412 = vector.broadcast %c2_i32_126 : i32 to vector<8x8x4xi32>
    %413 = arith.cmpi sge, %410, %412 : vector<8x8x4xi32>
    %cst_127 = arith.constant 0.000000e+00 : f32
    %414 = vector.broadcast %cst_127 : f32 to vector<8x8x4xf32>
    %415 = arith.select %413, %411, %414 : vector<8x8x4xi1>, vector<8x8x4xf32>
    %416 = arith.addf %409, %415 : vector<8x8x4xf32>
    %417 = tpu.iota {dimensions = array<i32: 1>} : vector<8x8x4xi32>
    %c4_i32_128 = arith.constant 4 : i32
    %418 = tpu.dynamic_rotate %416 by %c4_i32_128 dim 1 : vector<8x8x4xf32>, i32 -> vector<8x8x4xf32>
    %c4_i32_129 = arith.constant 4 : i32
    %419 = vector.broadcast %c4_i32_129 : i32 to vector<8x8x4xi32>
    %420 = arith.cmpi sge, %417, %419 : vector<8x8x4xi32>
    %cst_130 = arith.constant 0.000000e+00 : f32
    %421 = vector.broadcast %cst_130 : f32 to vector<8x8x4xf32>
    %422 = arith.select %420, %418, %421 : vector<8x8x4xi1>, vector<8x8x4xf32>
    %423 = arith.addf %416, %422 : vector<8x8x4xf32>
    %cst_131 = arith.constant 5.000000e-01 : f32
    %424 = vector.broadcast %cst_131 : f32 to vector<8x8x4xf32>
    %425 = arith.mulf %424, %402 : vector<8x8x4xf32>
    %426 = arith.subf %423, %425 : vector<8x8x4xf32>
    %427 = vector.shape_cast %426 : vector<8x8x4xf32> to vector<64x4xf32>
    %428 = vector.shape_cast %402 : vector<8x8x4xf32> to vector<64x4xf32>
    %cst_132 = arith.constant dense<0.000000e+00> : vector<64x640xf32>
    %429 = tpu.matmul %428, %395, %cst_132 {dimension_numbers = #tpu.dot_dimension_numbers<[1], [0], [0], [1], [0, 0, 1, 1], [], []>} : vector<64x4xf32>, vector<4x640xf32>, vector<64x640xf32> -> vector<64x640xf32>
    %430 = vector.extract_strided_slice %429 {offsets = [0, 0], sizes = [64, 128], strides = [1, 1]} : vector<64x640xf32> to vector<64x128xf32>
    %431 = vector.extract_strided_slice %427 {offsets = [0, 0], sizes = [64, 1], strides = [1, 1]} : vector<64x4xf32> to vector<64x1xf32>
    %432 = vector.extract_strided_slice %429 {offsets = [0, 128], sizes = [64, 128], strides = [1, 1]} : vector<64x640xf32> to vector<64x128xf32>
    %433 = vector.broadcast %431 : vector<64x1xf32> to vector<64x128xf32>
    %434 = arith.mulf %433, %432 : vector<64x128xf32>
    %435 = arith.addf %430, %434 : vector<64x128xf32>
    %436 = vector.extract_strided_slice %427 {offsets = [0, 1], sizes = [64, 1], strides = [1, 1]} : vector<64x4xf32> to vector<64x1xf32>
    %437 = vector.extract_strided_slice %429 {offsets = [0, 256], sizes = [64, 128], strides = [1, 1]} : vector<64x640xf32> to vector<64x128xf32>
    %438 = vector.broadcast %436 : vector<64x1xf32> to vector<64x128xf32>
    %439 = arith.mulf %438, %437 : vector<64x128xf32>
    %440 = arith.addf %435, %439 : vector<64x128xf32>
    %441 = vector.extract_strided_slice %427 {offsets = [0, 2], sizes = [64, 1], strides = [1, 1]} : vector<64x4xf32> to vector<64x1xf32>
    %442 = vector.extract_strided_slice %429 {offsets = [0, 384], sizes = [64, 128], strides = [1, 1]} : vector<64x640xf32> to vector<64x128xf32>
    %443 = vector.broadcast %441 : vector<64x1xf32> to vector<64x128xf32>
    %444 = arith.mulf %443, %442 : vector<64x128xf32>
    %445 = arith.addf %440, %444 : vector<64x128xf32>
    %446 = vector.extract_strided_slice %427 {offsets = [0, 3], sizes = [64, 1], strides = [1, 1]} : vector<64x4xf32> to vector<64x1xf32>
    %447 = vector.extract_strided_slice %429 {offsets = [0, 512], sizes = [64, 128], strides = [1, 1]} : vector<64x640xf32> to vector<64x128xf32>
    %448 = vector.broadcast %446 : vector<64x1xf32> to vector<64x128xf32>
    %449 = arith.mulf %448, %447 : vector<64x128xf32>
    %450 = arith.addf %445, %449 : vector<64x128xf32>
    %451 = vector.shape_cast %450 : vector<64x128xf32> to vector<8x8x128xf32>
    %cst_133 = arith.constant dense<0.000000e+00> : vector<8x128xf32>
    %452 = vector.multi_reduction <add>, %451, %cst_133 [1] : vector<8x8x128xf32> to vector<8x128xf32>
    %453 = vector.shape_cast %452 : vector<8x128xf32> to vector<2x4x128xf32>
    %c144 = arith.constant 144 : index
    %c0_134 = arith.constant 0 : index
    %454 = vector.load %arg3[%c144, %c0_134] : memref<264x128xf32, #tpu.memory_space<vmem>>, vector<16x128xf32>
    %455 = vector.extract_strided_slice %454 {offsets = [0, 0], sizes = [16, 64], strides = [1, 1]} : vector<16x128xf32> to vector<16x64xf32>
    %456 = vector.extract_strided_slice %454 {offsets = [0, 64], sizes = [16, 64], strides = [1, 1]} : vector<16x128xf32> to vector<16x64xf32>
    %c160 = arith.constant 160 : index
    %c0_135 = arith.constant 0 : index
    %457 = vector.load %arg3[%c160, %c0_135] : memref<264x128xf32, #tpu.memory_space<vmem>>, vector<1x128xf32>
    %458 = vector.extract_strided_slice %453 {offsets = [0, 0, 0], sizes = [2, 4, 64], strides = [1, 1, 1]} : vector<2x4x128xf32> to vector<2x4x64xf32>
    %459 = vector.extract_strided_slice %457 {offsets = [0, 0], sizes = [1, 64], strides = [1, 1]} : vector<1x128xf32> to vector<1x64xf32>
    %460 = vector.shape_cast %459 : vector<1x64xf32> to vector<1x1x64xf32>
    %461 = vector.broadcast %460 : vector<1x1x64xf32> to vector<2x4x64xf32>
    %462 = arith.addf %458, %461 : vector<2x4x64xf32>
    %463 = vector.extract_strided_slice %453 {offsets = [0, 0, 64], sizes = [2, 4, 64], strides = [1, 1, 1]} : vector<2x4x128xf32> to vector<2x4x64xf32>
    %464 = vector.extract_strided_slice %457 {offsets = [0, 64], sizes = [1, 64], strides = [1, 1]} : vector<1x128xf32> to vector<1x64xf32>
    %465 = vector.shape_cast %464 : vector<1x64xf32> to vector<1x1x64xf32>
    %466 = vector.broadcast %465 : vector<1x1x64xf32> to vector<2x4x64xf32>
    %467 = arith.addf %463, %466 : vector<2x4x64xf32>
    %c0_136 = arith.constant 0 : index
    %c15 = arith.constant 15 : index
    %468 = vector.load %arg1[%c0_136, %c15] : memref<2x19xf32, #tpu.memory_space<vmem>>, vector<2x4xf32>
    %cst_137 = arith.constant 0.000000e+00 : f32
    %469 = vector.broadcast %cst_137 : f32 to vector<2x16xf32>
    %cst_138 = arith.constant 0.000000e+00 : f32
    %470 = vector.broadcast %cst_138 : f32 to vector<2x16xf32>
    %cst_139 = arith.constant 0.000000e+00 : f32
    %471 = vector.broadcast %cst_139 : f32 to vector<2x16xf32>
    %cst_140 = arith.constant 0.000000e+00 : f32
    %472 = vector.broadcast %cst_140 : f32 to vector<2x16xf32>
    %473 = vector.extract_strided_slice %462 {offsets = [0, 0, 0], sizes = [2, 1, 64], strides = [1, 1, 1]} : vector<2x4x64xf32> to vector<2x1x64xf32>
    %474 = vector.shape_cast %473 : vector<2x1x64xf32> to vector<2x64xf32>
    %cst_141 = arith.constant dense<0.000000e+00> : vector<2x64xf32>
    %475 = tpu.matmul %469, %455, %cst_141 {dimension_numbers = #tpu.dot_dimension_numbers<[1], [0], [0], [1], [0, 0, 1, 1], [], []>} : vector<2x16xf32>, vector<16x64xf32>, vector<2x64xf32> -> vector<2x64xf32>
    %476 = arith.addf %474, %475 : vector<2x64xf32>
    %477 = vector.extract_strided_slice %467 {offsets = [0, 3, 0], sizes = [2, 1, 64], strides = [1, 1, 1]} : vector<2x4x64xf32> to vector<2x1x64xf32>
    %478 = vector.shape_cast %477 : vector<2x1x64xf32> to vector<2x64xf32>
    %cst_142 = arith.constant dense<0.000000e+00> : vector<2x64xf32>
    %479 = tpu.matmul %471, %456, %cst_142 {dimension_numbers = #tpu.dot_dimension_numbers<[1], [0], [0], [1], [0, 0, 1, 1], [], []>} : vector<2x16xf32>, vector<16x64xf32>, vector<2x64xf32> -> vector<2x64xf32>
    %480 = arith.addf %478, %479 : vector<2x64xf32>
    %481 = vector.extract_strided_slice %468 {offsets = [0, 0], sizes = [2, 1], strides = [1, 1]} : vector<2x4xf32> to vector<2x1xf32>
    %482 = vector.extract_strided_slice %476 {offsets = [0, 0], sizes = [2, 16], strides = [1, 1]} : vector<2x64xf32> to vector<2x16xf32>
    %cst_143 = arith.constant 5.000000e-01 : f32
    %483 = vector.broadcast %cst_143 : f32 to vector<2x16xf32>
    %484 = arith.mulf %483, %482 : vector<2x16xf32>
    %485 = math.tanh %484 : vector<2x16xf32>
    %cst_144 = arith.constant 5.000000e-01 : f32
    %486 = vector.broadcast %cst_144 : f32 to vector<2x16xf32>
    %487 = arith.mulf %486, %485 : vector<2x16xf32>
    %cst_145 = arith.constant 5.000000e-01 : f32
    %488 = vector.broadcast %cst_145 : f32 to vector<2x16xf32>
    %489 = arith.addf %487, %488 : vector<2x16xf32>
    %490 = vector.extract_strided_slice %476 {offsets = [0, 16], sizes = [2, 16], strides = [1, 1]} : vector<2x64xf32> to vector<2x16xf32>
    %cst_146 = arith.constant 5.000000e-01 : f32
    %491 = vector.broadcast %cst_146 : f32 to vector<2x16xf32>
    %492 = arith.mulf %491, %490 : vector<2x16xf32>
    %493 = math.tanh %492 : vector<2x16xf32>
    %cst_147 = arith.constant 5.000000e-01 : f32
    %494 = vector.broadcast %cst_147 : f32 to vector<2x16xf32>
    %495 = arith.mulf %494, %493 : vector<2x16xf32>
    %cst_148 = arith.constant 5.000000e-01 : f32
    %496 = vector.broadcast %cst_148 : f32 to vector<2x16xf32>
    %497 = arith.addf %495, %496 : vector<2x16xf32>
    %498 = vector.extract_strided_slice %476 {offsets = [0, 32], sizes = [2, 16], strides = [1, 1]} : vector<2x64xf32> to vector<2x16xf32>
    %499 = math.tanh %498 : vector<2x16xf32>
    %500 = vector.extract_strided_slice %476 {offsets = [0, 48], sizes = [2, 16], strides = [1, 1]} : vector<2x64xf32> to vector<2x16xf32>
    %cst_149 = arith.constant 5.000000e-01 : f32
    %501 = vector.broadcast %cst_149 : f32 to vector<2x16xf32>
    %502 = arith.mulf %501, %500 : vector<2x16xf32>
    %503 = math.tanh %502 : vector<2x16xf32>
    %cst_150 = arith.constant 5.000000e-01 : f32
    %504 = vector.broadcast %cst_150 : f32 to vector<2x16xf32>
    %505 = arith.mulf %504, %503 : vector<2x16xf32>
    %cst_151 = arith.constant 5.000000e-01 : f32
    %506 = vector.broadcast %cst_151 : f32 to vector<2x16xf32>
    %507 = arith.addf %505, %506 : vector<2x16xf32>
    %508 = arith.mulf %497, %470 : vector<2x16xf32>
    %509 = arith.mulf %489, %499 : vector<2x16xf32>
    %510 = arith.addf %508, %509 : vector<2x16xf32>
    %511 = math.tanh %510 : vector<2x16xf32>
    %512 = arith.mulf %507, %511 : vector<2x16xf32>
    %513 = vector.broadcast %481 : vector<2x1xf32> to vector<2x16xf32>
    %514 = arith.mulf %513, %512 : vector<2x16xf32>
    %cst_152 = arith.constant 1.000000e+00 : f32
    %515 = vector.broadcast %cst_152 : f32 to vector<2x1xf32>
    %516 = arith.subf %515, %481 : vector<2x1xf32>
    %517 = vector.broadcast %516 : vector<2x1xf32> to vector<2x16xf32>
    %518 = arith.mulf %517, %469 : vector<2x16xf32>
    %519 = arith.addf %514, %518 : vector<2x16xf32>
    %520 = vector.broadcast %481 : vector<2x1xf32> to vector<2x16xf32>
    %521 = arith.mulf %520, %510 : vector<2x16xf32>
    %cst_153 = arith.constant 1.000000e+00 : f32
    %522 = vector.broadcast %cst_153 : f32 to vector<2x1xf32>
    %523 = arith.subf %522, %481 : vector<2x1xf32>
    %524 = vector.broadcast %523 : vector<2x1xf32> to vector<2x16xf32>
    %525 = arith.mulf %524, %470 : vector<2x16xf32>
    %526 = arith.addf %521, %525 : vector<2x16xf32>
    %527 = vector.extract_strided_slice %468 {offsets = [0, 3], sizes = [2, 1], strides = [1, 1]} : vector<2x4xf32> to vector<2x1xf32>
    %528 = vector.extract_strided_slice %480 {offsets = [0, 0], sizes = [2, 16], strides = [1, 1]} : vector<2x64xf32> to vector<2x16xf32>
    %cst_154 = arith.constant 5.000000e-01 : f32
    %529 = vector.broadcast %cst_154 : f32 to vector<2x16xf32>
    %530 = arith.mulf %529, %528 : vector<2x16xf32>
    %531 = math.tanh %530 : vector<2x16xf32>
    %cst_155 = arith.constant 5.000000e-01 : f32
    %532 = vector.broadcast %cst_155 : f32 to vector<2x16xf32>
    %533 = arith.mulf %532, %531 : vector<2x16xf32>
    %cst_156 = arith.constant 5.000000e-01 : f32
    %534 = vector.broadcast %cst_156 : f32 to vector<2x16xf32>
    %535 = arith.addf %533, %534 : vector<2x16xf32>
    %536 = vector.extract_strided_slice %480 {offsets = [0, 16], sizes = [2, 16], strides = [1, 1]} : vector<2x64xf32> to vector<2x16xf32>
    %cst_157 = arith.constant 5.000000e-01 : f32
    %537 = vector.broadcast %cst_157 : f32 to vector<2x16xf32>
    %538 = arith.mulf %537, %536 : vector<2x16xf32>
    %539 = math.tanh %538 : vector<2x16xf32>
    %cst_158 = arith.constant 5.000000e-01 : f32
    %540 = vector.broadcast %cst_158 : f32 to vector<2x16xf32>
    %541 = arith.mulf %540, %539 : vector<2x16xf32>
    %cst_159 = arith.constant 5.000000e-01 : f32
    %542 = vector.broadcast %cst_159 : f32 to vector<2x16xf32>
    %543 = arith.addf %541, %542 : vector<2x16xf32>
    %544 = vector.extract_strided_slice %480 {offsets = [0, 32], sizes = [2, 16], strides = [1, 1]} : vector<2x64xf32> to vector<2x16xf32>
    %545 = math.tanh %544 : vector<2x16xf32>
    %546 = vector.extract_strided_slice %480 {offsets = [0, 48], sizes = [2, 16], strides = [1, 1]} : vector<2x64xf32> to vector<2x16xf32>
    %cst_160 = arith.constant 5.000000e-01 : f32
    %547 = vector.broadcast %cst_160 : f32 to vector<2x16xf32>
    %548 = arith.mulf %547, %546 : vector<2x16xf32>
    %549 = math.tanh %548 : vector<2x16xf32>
    %cst_161 = arith.constant 5.000000e-01 : f32
    %550 = vector.broadcast %cst_161 : f32 to vector<2x16xf32>
    %551 = arith.mulf %550, %549 : vector<2x16xf32>
    %cst_162 = arith.constant 5.000000e-01 : f32
    %552 = vector.broadcast %cst_162 : f32 to vector<2x16xf32>
    %553 = arith.addf %551, %552 : vector<2x16xf32>
    %554 = arith.mulf %543, %472 : vector<2x16xf32>
    %555 = arith.mulf %535, %545 : vector<2x16xf32>
    %556 = arith.addf %554, %555 : vector<2x16xf32>
    %557 = math.tanh %556 : vector<2x16xf32>
    %558 = arith.mulf %553, %557 : vector<2x16xf32>
    %559 = vector.broadcast %527 : vector<2x1xf32> to vector<2x16xf32>
    %560 = arith.mulf %559, %558 : vector<2x16xf32>
    %cst_163 = arith.constant 1.000000e+00 : f32
    %561 = vector.broadcast %cst_163 : f32 to vector<2x1xf32>
    %562 = arith.subf %561, %527 : vector<2x1xf32>
    %563 = vector.broadcast %562 : vector<2x1xf32> to vector<2x16xf32>
    %564 = arith.mulf %563, %471 : vector<2x16xf32>
    %565 = arith.addf %560, %564 : vector<2x16xf32>
    %566 = vector.broadcast %527 : vector<2x1xf32> to vector<2x16xf32>
    %567 = arith.mulf %566, %556 : vector<2x16xf32>
    %cst_164 = arith.constant 1.000000e+00 : f32
    %568 = vector.broadcast %cst_164 : f32 to vector<2x1xf32>
    %569 = arith.subf %568, %527 : vector<2x1xf32>
    %570 = vector.broadcast %569 : vector<2x1xf32> to vector<2x16xf32>
    %571 = arith.mulf %570, %472 : vector<2x16xf32>
    %572 = arith.addf %567, %571 : vector<2x16xf32>
    %573 = vector.extract_strided_slice %462 {offsets = [0, 1, 0], sizes = [2, 1, 64], strides = [1, 1, 1]} : vector<2x4x64xf32> to vector<2x1x64xf32>
    %574 = vector.shape_cast %573 : vector<2x1x64xf32> to vector<2x64xf32>
    %cst_165 = arith.constant dense<0.000000e+00> : vector<2x64xf32>
    %575 = tpu.matmul %519, %455, %cst_165 {dimension_numbers = #tpu.dot_dimension_numbers<[1], [0], [0], [1], [0, 0, 1, 1], [], []>} : vector<2x16xf32>, vector<16x64xf32>, vector<2x64xf32> -> vector<2x64xf32>
    %576 = arith.addf %574, %575 : vector<2x64xf32>
    %577 = vector.extract_strided_slice %467 {offsets = [0, 2, 0], sizes = [2, 1, 64], strides = [1, 1, 1]} : vector<2x4x64xf32> to vector<2x1x64xf32>
    %578 = vector.shape_cast %577 : vector<2x1x64xf32> to vector<2x64xf32>
    %cst_166 = arith.constant dense<0.000000e+00> : vector<2x64xf32>
    %579 = tpu.matmul %565, %456, %cst_166 {dimension_numbers = #tpu.dot_dimension_numbers<[1], [0], [0], [1], [0, 0, 1, 1], [], []>} : vector<2x16xf32>, vector<16x64xf32>, vector<2x64xf32> -> vector<2x64xf32>
    %580 = arith.addf %578, %579 : vector<2x64xf32>
    %581 = vector.extract_strided_slice %468 {offsets = [0, 1], sizes = [2, 1], strides = [1, 1]} : vector<2x4xf32> to vector<2x1xf32>
    %582 = vector.extract_strided_slice %576 {offsets = [0, 0], sizes = [2, 16], strides = [1, 1]} : vector<2x64xf32> to vector<2x16xf32>
    %cst_167 = arith.constant 5.000000e-01 : f32
    %583 = vector.broadcast %cst_167 : f32 to vector<2x16xf32>
    %584 = arith.mulf %583, %582 : vector<2x16xf32>
    %585 = math.tanh %584 : vector<2x16xf32>
    %cst_168 = arith.constant 5.000000e-01 : f32
    %586 = vector.broadcast %cst_168 : f32 to vector<2x16xf32>
    %587 = arith.mulf %586, %585 : vector<2x16xf32>
    %cst_169 = arith.constant 5.000000e-01 : f32
    %588 = vector.broadcast %cst_169 : f32 to vector<2x16xf32>
    %589 = arith.addf %587, %588 : vector<2x16xf32>
    %590 = vector.extract_strided_slice %576 {offsets = [0, 16], sizes = [2, 16], strides = [1, 1]} : vector<2x64xf32> to vector<2x16xf32>
    %cst_170 = arith.constant 5.000000e-01 : f32
    %591 = vector.broadcast %cst_170 : f32 to vector<2x16xf32>
    %592 = arith.mulf %591, %590 : vector<2x16xf32>
    %593 = math.tanh %592 : vector<2x16xf32>
    %cst_171 = arith.constant 5.000000e-01 : f32
    %594 = vector.broadcast %cst_171 : f32 to vector<2x16xf32>
    %595 = arith.mulf %594, %593 : vector<2x16xf32>
    %cst_172 = arith.constant 5.000000e-01 : f32
    %596 = vector.broadcast %cst_172 : f32 to vector<2x16xf32>
    %597 = arith.addf %595, %596 : vector<2x16xf32>
    %598 = vector.extract_strided_slice %576 {offsets = [0, 32], sizes = [2, 16], strides = [1, 1]} : vector<2x64xf32> to vector<2x16xf32>
    %599 = math.tanh %598 : vector<2x16xf32>
    %600 = vector.extract_strided_slice %576 {offsets = [0, 48], sizes = [2, 16], strides = [1, 1]} : vector<2x64xf32> to vector<2x16xf32>
    %cst_173 = arith.constant 5.000000e-01 : f32
    %601 = vector.broadcast %cst_173 : f32 to vector<2x16xf32>
    %602 = arith.mulf %601, %600 : vector<2x16xf32>
    %603 = math.tanh %602 : vector<2x16xf32>
    %cst_174 = arith.constant 5.000000e-01 : f32
    %604 = vector.broadcast %cst_174 : f32 to vector<2x16xf32>
    %605 = arith.mulf %604, %603 : vector<2x16xf32>
    %cst_175 = arith.constant 5.000000e-01 : f32
    %606 = vector.broadcast %cst_175 : f32 to vector<2x16xf32>
    %607 = arith.addf %605, %606 : vector<2x16xf32>
    %608 = arith.mulf %597, %526 : vector<2x16xf32>
    %609 = arith.mulf %589, %599 : vector<2x16xf32>
    %610 = arith.addf %608, %609 : vector<2x16xf32>
    %611 = math.tanh %610 : vector<2x16xf32>
    %612 = arith.mulf %607, %611 : vector<2x16xf32>
    %613 = vector.broadcast %581 : vector<2x1xf32> to vector<2x16xf32>
    %614 = arith.mulf %613, %612 : vector<2x16xf32>
    %cst_176 = arith.constant 1.000000e+00 : f32
    %615 = vector.broadcast %cst_176 : f32 to vector<2x1xf32>
    %616 = arith.subf %615, %581 : vector<2x1xf32>
    %617 = vector.broadcast %616 : vector<2x1xf32> to vector<2x16xf32>
    %618 = arith.mulf %617, %519 : vector<2x16xf32>
    %619 = arith.addf %614, %618 : vector<2x16xf32>
    %620 = vector.broadcast %581 : vector<2x1xf32> to vector<2x16xf32>
    %621 = arith.mulf %620, %610 : vector<2x16xf32>
    %cst_177 = arith.constant 1.000000e+00 : f32
    %622 = vector.broadcast %cst_177 : f32 to vector<2x1xf32>
    %623 = arith.subf %622, %581 : vector<2x1xf32>
    %624 = vector.broadcast %623 : vector<2x1xf32> to vector<2x16xf32>
    %625 = arith.mulf %624, %526 : vector<2x16xf32>
    %626 = arith.addf %621, %625 : vector<2x16xf32>
    %627 = vector.extract_strided_slice %468 {offsets = [0, 2], sizes = [2, 1], strides = [1, 1]} : vector<2x4xf32> to vector<2x1xf32>
    %628 = vector.extract_strided_slice %580 {offsets = [0, 0], sizes = [2, 16], strides = [1, 1]} : vector<2x64xf32> to vector<2x16xf32>
    %cst_178 = arith.constant 5.000000e-01 : f32
    %629 = vector.broadcast %cst_178 : f32 to vector<2x16xf32>
    %630 = arith.mulf %629, %628 : vector<2x16xf32>
    %631 = math.tanh %630 : vector<2x16xf32>
    %cst_179 = arith.constant 5.000000e-01 : f32
    %632 = vector.broadcast %cst_179 : f32 to vector<2x16xf32>
    %633 = arith.mulf %632, %631 : vector<2x16xf32>
    %cst_180 = arith.constant 5.000000e-01 : f32
    %634 = vector.broadcast %cst_180 : f32 to vector<2x16xf32>
    %635 = arith.addf %633, %634 : vector<2x16xf32>
    %636 = vector.extract_strided_slice %580 {offsets = [0, 16], sizes = [2, 16], strides = [1, 1]} : vector<2x64xf32> to vector<2x16xf32>
    %cst_181 = arith.constant 5.000000e-01 : f32
    %637 = vector.broadcast %cst_181 : f32 to vector<2x16xf32>
    %638 = arith.mulf %637, %636 : vector<2x16xf32>
    %639 = math.tanh %638 : vector<2x16xf32>
    %cst_182 = arith.constant 5.000000e-01 : f32
    %640 = vector.broadcast %cst_182 : f32 to vector<2x16xf32>
    %641 = arith.mulf %640, %639 : vector<2x16xf32>
    %cst_183 = arith.constant 5.000000e-01 : f32
    %642 = vector.broadcast %cst_183 : f32 to vector<2x16xf32>
    %643 = arith.addf %641, %642 : vector<2x16xf32>
    %644 = vector.extract_strided_slice %580 {offsets = [0, 32], sizes = [2, 16], strides = [1, 1]} : vector<2x64xf32> to vector<2x16xf32>
    %645 = math.tanh %644 : vector<2x16xf32>
    %646 = vector.extract_strided_slice %580 {offsets = [0, 48], sizes = [2, 16], strides = [1, 1]} : vector<2x64xf32> to vector<2x16xf32>
    %cst_184 = arith.constant 5.000000e-01 : f32
    %647 = vector.broadcast %cst_184 : f32 to vector<2x16xf32>
    %648 = arith.mulf %647, %646 : vector<2x16xf32>
    %649 = math.tanh %648 : vector<2x16xf32>
    %cst_185 = arith.constant 5.000000e-01 : f32
    %650 = vector.broadcast %cst_185 : f32 to vector<2x16xf32>
    %651 = arith.mulf %650, %649 : vector<2x16xf32>
    %cst_186 = arith.constant 5.000000e-01 : f32
    %652 = vector.broadcast %cst_186 : f32 to vector<2x16xf32>
    %653 = arith.addf %651, %652 : vector<2x16xf32>
    %654 = arith.mulf %643, %572 : vector<2x16xf32>
    %655 = arith.mulf %635, %645 : vector<2x16xf32>
    %656 = arith.addf %654, %655 : vector<2x16xf32>
    %657 = math.tanh %656 : vector<2x16xf32>
    %658 = arith.mulf %653, %657 : vector<2x16xf32>
    %659 = vector.broadcast %627 : vector<2x1xf32> to vector<2x16xf32>
    %660 = arith.mulf %659, %658 : vector<2x16xf32>
    %cst_187 = arith.constant 1.000000e+00 : f32
    %661 = vector.broadcast %cst_187 : f32 to vector<2x1xf32>
    %662 = arith.subf %661, %627 : vector<2x1xf32>
    %663 = vector.broadcast %662 : vector<2x1xf32> to vector<2x16xf32>
    %664 = arith.mulf %663, %565 : vector<2x16xf32>
    %665 = arith.addf %660, %664 : vector<2x16xf32>
    %666 = vector.broadcast %627 : vector<2x1xf32> to vector<2x16xf32>
    %667 = arith.mulf %666, %656 : vector<2x16xf32>
    %cst_188 = arith.constant 1.000000e+00 : f32
    %668 = vector.broadcast %cst_188 : f32 to vector<2x1xf32>
    %669 = arith.subf %668, %627 : vector<2x1xf32>
    %670 = vector.broadcast %669 : vector<2x1xf32> to vector<2x16xf32>
    %671 = arith.mulf %670, %572 : vector<2x16xf32>
    %672 = arith.addf %667, %671 : vector<2x16xf32>
    %673 = vector.extract_strided_slice %462 {offsets = [0, 2, 0], sizes = [2, 1, 64], strides = [1, 1, 1]} : vector<2x4x64xf32> to vector<2x1x64xf32>
    %674 = vector.shape_cast %673 : vector<2x1x64xf32> to vector<2x64xf32>
    %cst_189 = arith.constant dense<0.000000e+00> : vector<2x64xf32>
    %675 = tpu.matmul %619, %455, %cst_189 {dimension_numbers = #tpu.dot_dimension_numbers<[1], [0], [0], [1], [0, 0, 1, 1], [], []>} : vector<2x16xf32>, vector<16x64xf32>, vector<2x64xf32> -> vector<2x64xf32>
    %676 = arith.addf %674, %675 : vector<2x64xf32>
    %677 = vector.extract_strided_slice %467 {offsets = [0, 1, 0], sizes = [2, 1, 64], strides = [1, 1, 1]} : vector<2x4x64xf32> to vector<2x1x64xf32>
    %678 = vector.shape_cast %677 : vector<2x1x64xf32> to vector<2x64xf32>
    %cst_190 = arith.constant dense<0.000000e+00> : vector<2x64xf32>
    %679 = tpu.matmul %665, %456, %cst_190 {dimension_numbers = #tpu.dot_dimension_numbers<[1], [0], [0], [1], [0, 0, 1, 1], [], []>} : vector<2x16xf32>, vector<16x64xf32>, vector<2x64xf32> -> vector<2x64xf32>
    %680 = arith.addf %678, %679 : vector<2x64xf32>
    %681 = vector.extract_strided_slice %468 {offsets = [0, 2], sizes = [2, 1], strides = [1, 1]} : vector<2x4xf32> to vector<2x1xf32>
    %682 = vector.extract_strided_slice %676 {offsets = [0, 0], sizes = [2, 16], strides = [1, 1]} : vector<2x64xf32> to vector<2x16xf32>
    %cst_191 = arith.constant 5.000000e-01 : f32
    %683 = vector.broadcast %cst_191 : f32 to vector<2x16xf32>
    %684 = arith.mulf %683, %682 : vector<2x16xf32>
    %685 = math.tanh %684 : vector<2x16xf32>
    %cst_192 = arith.constant 5.000000e-01 : f32
    %686 = vector.broadcast %cst_192 : f32 to vector<2x16xf32>
    %687 = arith.mulf %686, %685 : vector<2x16xf32>
    %cst_193 = arith.constant 5.000000e-01 : f32
    %688 = vector.broadcast %cst_193 : f32 to vector<2x16xf32>
    %689 = arith.addf %687, %688 : vector<2x16xf32>
    %690 = vector.extract_strided_slice %676 {offsets = [0, 16], sizes = [2, 16], strides = [1, 1]} : vector<2x64xf32> to vector<2x16xf32>
    %cst_194 = arith.constant 5.000000e-01 : f32
    %691 = vector.broadcast %cst_194 : f32 to vector<2x16xf32>
    %692 = arith.mulf %691, %690 : vector<2x16xf32>
    %693 = math.tanh %692 : vector<2x16xf32>
    %cst_195 = arith.constant 5.000000e-01 : f32
    %694 = vector.broadcast %cst_195 : f32 to vector<2x16xf32>
    %695 = arith.mulf %694, %693 : vector<2x16xf32>
    %cst_196 = arith.constant 5.000000e-01 : f32
    %696 = vector.broadcast %cst_196 : f32 to vector<2x16xf32>
    %697 = arith.addf %695, %696 : vector<2x16xf32>
    %698 = vector.extract_strided_slice %676 {offsets = [0, 32], sizes = [2, 16], strides = [1, 1]} : vector<2x64xf32> to vector<2x16xf32>
    %699 = math.tanh %698 : vector<2x16xf32>
    %700 = vector.extract_strided_slice %676 {offsets = [0, 48], sizes = [2, 16], strides = [1, 1]} : vector<2x64xf32> to vector<2x16xf32>
    %cst_197 = arith.constant 5.000000e-01 : f32
    %701 = vector.broadcast %cst_197 : f32 to vector<2x16xf32>
    %702 = arith.mulf %701, %700 : vector<2x16xf32>
    %703 = math.tanh %702 : vector<2x16xf32>
    %cst_198 = arith.constant 5.000000e-01 : f32
    %704 = vector.broadcast %cst_198 : f32 to vector<2x16xf32>
    %705 = arith.mulf %704, %703 : vector<2x16xf32>
    %cst_199 = arith.constant 5.000000e-01 : f32
    %706 = vector.broadcast %cst_199 : f32 to vector<2x16xf32>
    %707 = arith.addf %705, %706 : vector<2x16xf32>
    %708 = arith.mulf %697, %626 : vector<2x16xf32>
    %709 = arith.mulf %689, %699 : vector<2x16xf32>
    %710 = arith.addf %708, %709 : vector<2x16xf32>
    %711 = math.tanh %710 : vector<2x16xf32>
    %712 = arith.mulf %707, %711 : vector<2x16xf32>
    %713 = vector.broadcast %681 : vector<2x1xf32> to vector<2x16xf32>
    %714 = arith.mulf %713, %712 : vector<2x16xf32>
    %cst_200 = arith.constant 1.000000e+00 : f32
    %715 = vector.broadcast %cst_200 : f32 to vector<2x1xf32>
    %716 = arith.subf %715, %681 : vector<2x1xf32>
    %717 = vector.broadcast %716 : vector<2x1xf32> to vector<2x16xf32>
    %718 = arith.mulf %717, %619 : vector<2x16xf32>
    %719 = arith.addf %714, %718 : vector<2x16xf32>
    %720 = vector.broadcast %681 : vector<2x1xf32> to vector<2x16xf32>
    %721 = arith.mulf %720, %710 : vector<2x16xf32>
    %cst_201 = arith.constant 1.000000e+00 : f32
    %722 = vector.broadcast %cst_201 : f32 to vector<2x1xf32>
    %723 = arith.subf %722, %681 : vector<2x1xf32>
    %724 = vector.broadcast %723 : vector<2x1xf32> to vector<2x16xf32>
    %725 = arith.mulf %724, %626 : vector<2x16xf32>
    %726 = arith.addf %721, %725 : vector<2x16xf32>
    %727 = vector.extract_strided_slice %468 {offsets = [0, 1], sizes = [2, 1], strides = [1, 1]} : vector<2x4xf32> to vector<2x1xf32>
    %728 = vector.extract_strided_slice %680 {offsets = [0, 0], sizes = [2, 16], strides = [1, 1]} : vector<2x64xf32> to vector<2x16xf32>
    %cst_202 = arith.constant 5.000000e-01 : f32
    %729 = vector.broadcast %cst_202 : f32 to vector<2x16xf32>
    %730 = arith.mulf %729, %728 : vector<2x16xf32>
    %731 = math.tanh %730 : vector<2x16xf32>
    %cst_203 = arith.constant 5.000000e-01 : f32
    %732 = vector.broadcast %cst_203 : f32 to vector<2x16xf32>
    %733 = arith.mulf %732, %731 : vector<2x16xf32>
    %cst_204 = arith.constant 5.000000e-01 : f32
    %734 = vector.broadcast %cst_204 : f32 to vector<2x16xf32>
    %735 = arith.addf %733, %734 : vector<2x16xf32>
    %736 = vector.extract_strided_slice %680 {offsets = [0, 16], sizes = [2, 16], strides = [1, 1]} : vector<2x64xf32> to vector<2x16xf32>
    %cst_205 = arith.constant 5.000000e-01 : f32
    %737 = vector.broadcast %cst_205 : f32 to vector<2x16xf32>
    %738 = arith.mulf %737, %736 : vector<2x16xf32>
    %739 = math.tanh %738 : vector<2x16xf32>
    %cst_206 = arith.constant 5.000000e-01 : f32
    %740 = vector.broadcast %cst_206 : f32 to vector<2x16xf32>
    %741 = arith.mulf %740, %739 : vector<2x16xf32>
    %cst_207 = arith.constant 5.000000e-01 : f32
    %742 = vector.broadcast %cst_207 : f32 to vector<2x16xf32>
    %743 = arith.addf %741, %742 : vector<2x16xf32>
    %744 = vector.extract_strided_slice %680 {offsets = [0, 32], sizes = [2, 16], strides = [1, 1]} : vector<2x64xf32> to vector<2x16xf32>
    %745 = math.tanh %744 : vector<2x16xf32>
    %746 = vector.extract_strided_slice %680 {offsets = [0, 48], sizes = [2, 16], strides = [1, 1]} : vector<2x64xf32> to vector<2x16xf32>
    %cst_208 = arith.constant 5.000000e-01 : f32
    %747 = vector.broadcast %cst_208 : f32 to vector<2x16xf32>
    %748 = arith.mulf %747, %746 : vector<2x16xf32>
    %749 = math.tanh %748 : vector<2x16xf32>
    %cst_209 = arith.constant 5.000000e-01 : f32
    %750 = vector.broadcast %cst_209 : f32 to vector<2x16xf32>
    %751 = arith.mulf %750, %749 : vector<2x16xf32>
    %cst_210 = arith.constant 5.000000e-01 : f32
    %752 = vector.broadcast %cst_210 : f32 to vector<2x16xf32>
    %753 = arith.addf %751, %752 : vector<2x16xf32>
    %754 = arith.mulf %743, %672 : vector<2x16xf32>
    %755 = arith.mulf %735, %745 : vector<2x16xf32>
    %756 = arith.addf %754, %755 : vector<2x16xf32>
    %757 = math.tanh %756 : vector<2x16xf32>
    %758 = arith.mulf %753, %757 : vector<2x16xf32>
    %759 = vector.broadcast %727 : vector<2x1xf32> to vector<2x16xf32>
    %760 = arith.mulf %759, %758 : vector<2x16xf32>
    %cst_211 = arith.constant 1.000000e+00 : f32
    %761 = vector.broadcast %cst_211 : f32 to vector<2x1xf32>
    %762 = arith.subf %761, %727 : vector<2x1xf32>
    %763 = vector.broadcast %762 : vector<2x1xf32> to vector<2x16xf32>
    %764 = arith.mulf %763, %665 : vector<2x16xf32>
    %765 = arith.addf %760, %764 : vector<2x16xf32>
    %766 = vector.broadcast %727 : vector<2x1xf32> to vector<2x16xf32>
    %767 = arith.mulf %766, %756 : vector<2x16xf32>
    %cst_212 = arith.constant 1.000000e+00 : f32
    %768 = vector.broadcast %cst_212 : f32 to vector<2x1xf32>
    %769 = arith.subf %768, %727 : vector<2x1xf32>
    %770 = vector.broadcast %769 : vector<2x1xf32> to vector<2x16xf32>
    %771 = arith.mulf %770, %672 : vector<2x16xf32>
    %772 = arith.addf %767, %771 : vector<2x16xf32>
    %773 = vector.extract_strided_slice %462 {offsets = [0, 3, 0], sizes = [2, 1, 64], strides = [1, 1, 1]} : vector<2x4x64xf32> to vector<2x1x64xf32>
    %774 = vector.shape_cast %773 : vector<2x1x64xf32> to vector<2x64xf32>
    %cst_213 = arith.constant dense<0.000000e+00> : vector<2x64xf32>
    %775 = tpu.matmul %719, %455, %cst_213 {dimension_numbers = #tpu.dot_dimension_numbers<[1], [0], [0], [1], [0, 0, 1, 1], [], []>} : vector<2x16xf32>, vector<16x64xf32>, vector<2x64xf32> -> vector<2x64xf32>
    %776 = arith.addf %774, %775 : vector<2x64xf32>
    %777 = vector.extract_strided_slice %467 {offsets = [0, 0, 0], sizes = [2, 1, 64], strides = [1, 1, 1]} : vector<2x4x64xf32> to vector<2x1x64xf32>
    %778 = vector.shape_cast %777 : vector<2x1x64xf32> to vector<2x64xf32>
    %cst_214 = arith.constant dense<0.000000e+00> : vector<2x64xf32>
    %779 = tpu.matmul %765, %456, %cst_214 {dimension_numbers = #tpu.dot_dimension_numbers<[1], [0], [0], [1], [0, 0, 1, 1], [], []>} : vector<2x16xf32>, vector<16x64xf32>, vector<2x64xf32> -> vector<2x64xf32>
    %780 = arith.addf %778, %779 : vector<2x64xf32>
    %781 = vector.extract_strided_slice %468 {offsets = [0, 3], sizes = [2, 1], strides = [1, 1]} : vector<2x4xf32> to vector<2x1xf32>
    %782 = vector.extract_strided_slice %776 {offsets = [0, 0], sizes = [2, 16], strides = [1, 1]} : vector<2x64xf32> to vector<2x16xf32>
    %cst_215 = arith.constant 5.000000e-01 : f32
    %783 = vector.broadcast %cst_215 : f32 to vector<2x16xf32>
    %784 = arith.mulf %783, %782 : vector<2x16xf32>
    %785 = math.tanh %784 : vector<2x16xf32>
    %cst_216 = arith.constant 5.000000e-01 : f32
    %786 = vector.broadcast %cst_216 : f32 to vector<2x16xf32>
    %787 = arith.mulf %786, %785 : vector<2x16xf32>
    %cst_217 = arith.constant 5.000000e-01 : f32
    %788 = vector.broadcast %cst_217 : f32 to vector<2x16xf32>
    %789 = arith.addf %787, %788 : vector<2x16xf32>
    %790 = vector.extract_strided_slice %776 {offsets = [0, 16], sizes = [2, 16], strides = [1, 1]} : vector<2x64xf32> to vector<2x16xf32>
    %cst_218 = arith.constant 5.000000e-01 : f32
    %791 = vector.broadcast %cst_218 : f32 to vector<2x16xf32>
    %792 = arith.mulf %791, %790 : vector<2x16xf32>
    %793 = math.tanh %792 : vector<2x16xf32>
    %cst_219 = arith.constant 5.000000e-01 : f32
    %794 = vector.broadcast %cst_219 : f32 to vector<2x16xf32>
    %795 = arith.mulf %794, %793 : vector<2x16xf32>
    %cst_220 = arith.constant 5.000000e-01 : f32
    %796 = vector.broadcast %cst_220 : f32 to vector<2x16xf32>
    %797 = arith.addf %795, %796 : vector<2x16xf32>
    %798 = vector.extract_strided_slice %776 {offsets = [0, 32], sizes = [2, 16], strides = [1, 1]} : vector<2x64xf32> to vector<2x16xf32>
    %799 = math.tanh %798 : vector<2x16xf32>
    %800 = vector.extract_strided_slice %776 {offsets = [0, 48], sizes = [2, 16], strides = [1, 1]} : vector<2x64xf32> to vector<2x16xf32>
    %cst_221 = arith.constant 5.000000e-01 : f32
    %801 = vector.broadcast %cst_221 : f32 to vector<2x16xf32>
    %802 = arith.mulf %801, %800 : vector<2x16xf32>
    %803 = math.tanh %802 : vector<2x16xf32>
    %cst_222 = arith.constant 5.000000e-01 : f32
    %804 = vector.broadcast %cst_222 : f32 to vector<2x16xf32>
    %805 = arith.mulf %804, %803 : vector<2x16xf32>
    %cst_223 = arith.constant 5.000000e-01 : f32
    %806 = vector.broadcast %cst_223 : f32 to vector<2x16xf32>
    %807 = arith.addf %805, %806 : vector<2x16xf32>
    %808 = arith.mulf %797, %726 : vector<2x16xf32>
    %809 = arith.mulf %789, %799 : vector<2x16xf32>
    %810 = arith.addf %808, %809 : vector<2x16xf32>
    %811 = math.tanh %810 : vector<2x16xf32>
    %812 = arith.mulf %807, %811 : vector<2x16xf32>
    %813 = vector.broadcast %781 : vector<2x1xf32> to vector<2x16xf32>
    %814 = arith.mulf %813, %812 : vector<2x16xf32>
    %cst_224 = arith.constant 1.000000e+00 : f32
    %815 = vector.broadcast %cst_224 : f32 to vector<2x1xf32>
    %816 = arith.subf %815, %781 : vector<2x1xf32>
    %817 = vector.broadcast %816 : vector<2x1xf32> to vector<2x16xf32>
    %818 = arith.mulf %817, %719 : vector<2x16xf32>
    %819 = arith.addf %814, %818 : vector<2x16xf32>
    %820 = vector.extract_strided_slice %468 {offsets = [0, 0], sizes = [2, 1], strides = [1, 1]} : vector<2x4xf32> to vector<2x1xf32>
    %821 = vector.extract_strided_slice %780 {offsets = [0, 0], sizes = [2, 16], strides = [1, 1]} : vector<2x64xf32> to vector<2x16xf32>
    %cst_225 = arith.constant 5.000000e-01 : f32
    %822 = vector.broadcast %cst_225 : f32 to vector<2x16xf32>
    %823 = arith.mulf %822, %821 : vector<2x16xf32>
    %824 = math.tanh %823 : vector<2x16xf32>
    %cst_226 = arith.constant 5.000000e-01 : f32
    %825 = vector.broadcast %cst_226 : f32 to vector<2x16xf32>
    %826 = arith.mulf %825, %824 : vector<2x16xf32>
    %cst_227 = arith.constant 5.000000e-01 : f32
    %827 = vector.broadcast %cst_227 : f32 to vector<2x16xf32>
    %828 = arith.addf %826, %827 : vector<2x16xf32>
    %829 = vector.extract_strided_slice %780 {offsets = [0, 16], sizes = [2, 16], strides = [1, 1]} : vector<2x64xf32> to vector<2x16xf32>
    %cst_228 = arith.constant 5.000000e-01 : f32
    %830 = vector.broadcast %cst_228 : f32 to vector<2x16xf32>
    %831 = arith.mulf %830, %829 : vector<2x16xf32>
    %832 = math.tanh %831 : vector<2x16xf32>
    %cst_229 = arith.constant 5.000000e-01 : f32
    %833 = vector.broadcast %cst_229 : f32 to vector<2x16xf32>
    %834 = arith.mulf %833, %832 : vector<2x16xf32>
    %cst_230 = arith.constant 5.000000e-01 : f32
    %835 = vector.broadcast %cst_230 : f32 to vector<2x16xf32>
    %836 = arith.addf %834, %835 : vector<2x16xf32>
    %837 = vector.extract_strided_slice %780 {offsets = [0, 32], sizes = [2, 16], strides = [1, 1]} : vector<2x64xf32> to vector<2x16xf32>
    %838 = math.tanh %837 : vector<2x16xf32>
    %839 = vector.extract_strided_slice %780 {offsets = [0, 48], sizes = [2, 16], strides = [1, 1]} : vector<2x64xf32> to vector<2x16xf32>
    %cst_231 = arith.constant 5.000000e-01 : f32
    %840 = vector.broadcast %cst_231 : f32 to vector<2x16xf32>
    %841 = arith.mulf %840, %839 : vector<2x16xf32>
    %842 = math.tanh %841 : vector<2x16xf32>
    %cst_232 = arith.constant 5.000000e-01 : f32
    %843 = vector.broadcast %cst_232 : f32 to vector<2x16xf32>
    %844 = arith.mulf %843, %842 : vector<2x16xf32>
    %cst_233 = arith.constant 5.000000e-01 : f32
    %845 = vector.broadcast %cst_233 : f32 to vector<2x16xf32>
    %846 = arith.addf %844, %845 : vector<2x16xf32>
    %847 = arith.mulf %836, %772 : vector<2x16xf32>
    %848 = arith.mulf %828, %838 : vector<2x16xf32>
    %849 = arith.addf %847, %848 : vector<2x16xf32>
    %850 = math.tanh %849 : vector<2x16xf32>
    %851 = arith.mulf %846, %850 : vector<2x16xf32>
    %852 = vector.broadcast %820 : vector<2x1xf32> to vector<2x16xf32>
    %853 = arith.mulf %852, %851 : vector<2x16xf32>
    %cst_234 = arith.constant 1.000000e+00 : f32
    %854 = vector.broadcast %cst_234 : f32 to vector<2x1xf32>
    %855 = arith.subf %854, %820 : vector<2x1xf32>
    %856 = vector.broadcast %855 : vector<2x1xf32> to vector<2x16xf32>
    %857 = arith.mulf %856, %765 : vector<2x16xf32>
    %858 = arith.addf %853, %857 : vector<2x16xf32>
    %859 = arith.addf %819, %858 : vector<2x16xf32>
    %c184 = arith.constant 184 : index
    %c0_235 = arith.constant 0 : index
    %860 = vector.load %arg3[%c184, %c0_235] : memref<264x128xf32, #tpu.memory_space<vmem>>, vector<16x32xf32>
    %cst_236 = arith.constant dense<0.000000e+00> : vector<2x32xf32>
    %861 = tpu.matmul %859, %860, %cst_236 {dimension_numbers = #tpu.dot_dimension_numbers<[1], [0], [0], [1], [0, 0, 1, 1], [], []>} : vector<2x16xf32>, vector<16x32xf32>, vector<2x32xf32> -> vector<2x32xf32>
    %c0_237 = arith.constant 0 : index
    %c0_238 = arith.constant 0 : index
    %862 = vector.load %arg1[%c0_237, %c0_238] : memref<2x19xf32, #tpu.memory_space<vmem>>, vector<2x15xf32>
    %c200 = arith.constant 200 : index
    %c0_239 = arith.constant 0 : index
    %863 = vector.load %arg3[%c200, %c0_239] : memref<264x128xf32, #tpu.memory_space<vmem>>, vector<15x32xf32>
    %cst_240 = arith.constant dense<0.000000e+00> : vector<2x32xf32>
    %864 = tpu.matmul %862, %863, %cst_240 {dimension_numbers = #tpu.dot_dimension_numbers<[1], [0], [0], [1], [0, 0, 1, 1], [], []>} : vector<2x15xf32>, vector<15x32xf32>, vector<2x32xf32> -> vector<2x32xf32>
    %865 = arith.addf %861, %864 : vector<2x32xf32>
    %c216 = arith.constant 216 : index
    %c0_241 = arith.constant 0 : index
    %866 = vector.load %arg3[%c216, %c0_241] : memref<264x128xf32, #tpu.memory_space<vmem>>, vector<1x32xf32>
    %867 = vector.broadcast %866 : vector<1x32xf32> to vector<2x32xf32>
    %868 = arith.addf %865, %867 : vector<2x32xf32>
    %cst_242 = arith.constant 0.000000e+00 : f32
    %869 = vector.broadcast %cst_242 : f32 to vector<2x32xf32>
    %870 = arith.maximumf %868, %869 : vector<2x32xf32>
    %c224 = arith.constant 224 : index
    %c0_243 = arith.constant 0 : index
    %871 = vector.load %arg3[%c224, %c0_243] : memref<264x128xf32, #tpu.memory_space<vmem>>, vector<32x5xf32>
    %cst_244 = arith.constant dense<0.000000e+00> : vector<2x5xf32>
    %872 = tpu.matmul %870, %871, %cst_244 {dimension_numbers = #tpu.dot_dimension_numbers<[1], [0], [0], [1], [0, 0, 1, 1], [], []>} : vector<2x32xf32>, vector<32x5xf32>, vector<2x5xf32> -> vector<2x5xf32>
    %c256 = arith.constant 256 : index
    %c0_245 = arith.constant 0 : index
    %873 = vector.load %arg3[%c256, %c0_245] : memref<264x128xf32, #tpu.memory_space<vmem>>, vector<1x5xf32>
    %874 = vector.broadcast %873 : vector<1x5xf32> to vector<2x5xf32>
    %875 = arith.addf %872, %874 : vector<2x5xf32>
    %c0_246 = arith.constant 0 : index
    %c0_247 = arith.constant 0 : index
    %876 = vector.load %arg4[%c0_246, %c0_247] : memref<2x5xf32, #tpu.memory_space<vmem>>, vector<2x5xf32>
    tpu.vector_store %arg4[%c0_246, %c0_247], %875 {strides = array<i32>} : memref<2x5xf32, #tpu.memory_space<vmem>>, vector<2x5xf32>,
    return
  }
}

</mosaic_0001>

<bundles_post_ra>
// kernel: seqsignet_forward.1
= control target key start
LH: loop header
LB: loop body
LE: loop exit
PB: predicated region body
PF: predicated region fallthrough
CT: control target
= control target key end

     0   :  { %9 = vsyncpa [#allocation3], 0  ;;  %s21678_s0 = inlined_call_operand.vmem [shape: f32[8,8,6], index: 0, kind: input, shape index: {}]   ;;  %s21679_s1 = inlined_call_operand.vmem [shape: f32[2,19], index: 1, kind: input, shape index: {}]   ;;  %s21680_s2 = inlined_call_operand.vmem [shape: f32[24,640], index: 2, kind: input, shape index: {}]   ;;  %s21681_s3 = inlined_call_operand.hbm [shape: f32[264,128], index: 3, kind: input, shape index: {}]   ;;  %s21682_s4 = inlined_call_operand.hbm [shape: f32[2,5], index: 4, kind: output, shape index: {}]  }
   0x1   :  { %10 = vsyncpa [#allocation4], 0  ;;  %s18605_s15 = smov [#allocation2]   ;;  %s18557_s19 = scalar_lea.hbm %s21681_s3, 4224 }
   0x2   :  { %s22_s16 = sshll.u32 %s18605_s15, 4  ;;  %p18558_p0 = scmp.ne.s32.totalorder %s21681_s3, %s18557_s19  ;;  %s23_s16 = int_to_ptr.vmem [resolvable:$true] %s22_s16 }
   0x3   :  { %p18561_p1 = scmp.lt.u32.totalorder %s18557_s19, %s21681_s3 }
   0x5   :  { %p18563_p2 = pnand %p18561_p1, %p18558_p0 }
   0x7   :  { %18566 = shalt.err (!%p18563_p2)
}
   0x8   :  { %s18567_s24 = scalar_lea.vmem %s23_s16, 4224  ;;  %p18572_p4 = scmp.lt.s32.totalorder %s23_s16, %s23_s16 }
   0x9   :  { %p18568_p3 = scmp.ne.s32.totalorder %s23_s16, %s18567_s24  ;;  %p18573_p5 = scmp.lt.s32.totalorder %s18567_s24, %s18567_s24 }
   0xb   :  { %p18574_p6 = por %p18573_p5, %p18572_p4 }
   0xd   :  { %p18575_p7 = pnand %p18574_p6, %p18568_p3 }
   0xf   :  { %18578 = shalt.err (!%p18575_p7)
}
  0x10   :  { %s18606_s25 = smov 128   ;;  %s18607_s26 = smov 8  }
  0x11   :  { %28 = dma.hbm_to_vmem [thread:$0]  %s21681_s3, 4224, %s23_s16, [#allocation3], %s18606_s25, %s18606_s25, %s18607_s26  }
  0x12   :  { %18601 = dma.done.wait [#allocation3], 4224  }
  0x13   :  { %18602 = vsyncadd [#allocation3], 4294963072  ;;  %vm66_vm0 = vcmask 1045504   ;;  %vm41_vm1 = vcmask 48128   ;;  %v40_v0 = vld [vmem:[#allocation2 + $0xa8] sm:$0x3f]  ;;  %v175_v13 = vlaneseq }
  0x14   :  { %v32_v1 = vld [vmem:[%s21678_s0] sm:$0xff]  ;;  %v33_v2 = vld [vmem:[%s21678_s0 + $0x8] sm:$0xff]  ;;  %17002 = vmatprep.subr.msk.mxu0 %vm66_vm0, %v40_v0  ;;  %v34_v3 = vld [vmem:[%s21678_s0 + $0x10] sm:$0xff]  ;;  %s18608_s18 = smov 120   ;;  %v18609_v17 = vmov -1e+30  }
  0x15   :  { %17004 = vmatprep.mubr.msk.f32.mxu0 %vm41_vm1, %v32_v1  ;;  %17003 = vmatpush3.msk.msra.mxu0 %vm66_vm0, %v40_v0  ;;  %v35_v4 = vld [vmem:[%s21678_s0 + $0x18] sm:$0xff]  ;;  %v36_v5 = vld [vmem:[%s21678_s0 + $0x20] sm:$0xff]  ;;  %v37_v6 = vld [vmem:[%s21678_s0 + $0x28] sm:$0xff]  ;;  %v18721_v14 = vand.u32 127, %v175_v13  ;;  %v18752_v35 = vshrl.u32 %v175_v13, 7  ;;  %s18611_s19 = smov 124  }
  0x16   :  { %17005 = vmatmul.mubr.msk.f32.vlgmr.msra.gmra.mrb[0].mxu0 %vm41_vm1, %v33_v2  ;;  %v38_v7 = vld [vmem:[%s21678_s0 + $0x30] sm:$0xff]  ;;  %v39_v8 = vld [vmem:[%s21678_s0 + $0x38] sm:$0xff]  ;;  %s18610_s0 = smov 4   ;;  %vm550_vm5 = vcmask 1043456   ;;  %vm525_vm7 = vcmask 31744   ;;  %vm18617_vm11 = vmmov 0  }
  0x17   :  { %17007 = vmatprep.mubr.msk.f32.mxu0 %vm41_vm1, %v34_v3  ;;  %vm7959_vm2 = vcmp.lt.s32.totalorder %v18721_v14, 6  ;;  %v16200_v37 = vld [vmem:[#allocation2 + $0xb0] ss:$0 sm:$0xff]  ;;  %vm194_vm3 = vcmp.eq.s32.totalorder %v18752_v35, 0  ;;  %vm251_vm4 = vcmp.eq.s32.totalorder %v18752_v35, 7  ;;  %vm377_vm6 = vcmp.lt.s32.totalorder %v18752_v35, 7 }
  0x18   :  { %v18733_v18 = vsel %vm7959_vm2, 0.0, %v18609_v17  ;;  %vm442_vm8 = vcmp.ge.s32.totalorder %v18752_v35, 1  ;;  %vm467_vm9 = vcmp.ge.s32.totalorder %v18752_v35, 2  ;;  %vm492_vm10 = vcmp.ge.s32.totalorder %v18752_v35, 4  ;;  %s18618_s30 = smov 96   ;;  %s18619_s5 = smov 64  }
  0x19   :  { %vm1202_vm12 = vcmask 64512   ;;  %vm1189_vm13 = vcmp.lt.s32.totalorder %v18721_v14, 7  ;;  %s18620_s6 = smov 88   ;;  %s18621_s7 = smov 56   ;;  %vm7040_vm14 = vcmask 162816   ;;  %vm7186_vm15 = vcmp.lt.s32.totalorder %v18752_v35, 6 }
  0x1a   :  { %17008 = vmatmul.mubr.msk.f32.gmra.mrb[2].mxu0 %vm41_vm1, %v35_v4  ;;  %s18622_s8 = smov 80   ;;  %s18623_s3 = smov 112   ;;  %vm13954_vm0 = vcmp.lt.s32.totalorder %v18752_v35, 5  ;;  %vm14701_vm2 = vcmask 130048  }
  0x1b   :  { %17010 = vmatprep.mubr.msk.f32.mxu0 %vm41_vm1, %v36_v5  ;;  %s18624_s9 = smov 48   ;;  %s18625_s10 = smov 72  }
  0x1c   :  { %s18626_s11 = smov 104   ;;  %s18627_s12 = smov 40  }
  0x1e   :  { %17011 = vmatmul.mubr.msk.f32.gmra.mrb[4].mxu0 %vm41_vm1, %v37_v6 }
  0x1f   :  { %17013 = vmatprep.mubr.msk.f32.mxu0 %vm41_vm1, %v38_v7 }
  0x22   :  { %17014 = vmatmul.mubr.msk.f32.gmra.mrb[6].mxu0 %vm41_vm1, %v39_v8  ;;  %vm14921_vm1 = vcmask 1041409  }
  0xe9   :  { %v18707_v9 = vpop.f32.mrb[0].mxu0 }
  0xea   :  { %v18709_v10 = vpop.f32.mrb[1].mxu0  ;;  %v196_v41 = vrot.slane %v18707_v9, 7 }
  0xeb   :  { %260 = vrot.lane.b32.xlu0 %v18709_v10, %s18608_s18  ;;  %v195_v39 = vrot.slane %v18709_v10, 7 }
  0xec   :  { %v204_v42 = vsel %vm194_vm3, %v18707_v9, %v196_v41 }
  0xed   :  { %v18713_v11 = vpop.f32.mrb[2].mxu0  ;;  %v203_v40 = vsel %vm194_vm3, %v18709_v10, %v195_v39 }
  0xee   :  { %v18715_v12 = vpop.f32.mrb[3].mxu0  ;;  %v198_v45 = vrot.slane %v18713_v11, 7 }
  0xef   :  { %262 = vrot.lane.b32.xlu0 %v18707_v9, %s18608_s18  ;;  %264 = vrot.lane.b32.xlu1 %v18715_v12, %s18608_s18  ;;  %v197_v43 = vrot.slane %v18715_v12, 7 }
  0xf0   :  { %v206_v46 = vsel %vm194_vm3, %v18713_v11, %v198_v45 }
  0xf1   :  { %v18723_v15 = vpop.f32.mrb[4].mxu0  ;;  %v205_v44 = vsel %vm194_vm3, %v18715_v12, %v197_v43 }
  0xf2   :  { %v18725_v16 = vpop.f32.mrb[5].mxu0  ;;  %v200_v49 = vrot.slane %v18723_v15, 7 }
  0xf3   :  { %266 = vrot.lane.b32.xlu1 %v18713_v11, %s18608_s18  ;;  %268 = vrot.lane.b32.xlu0 %v18725_v16, %s18608_s18  ;;  %v199_v47 = vrot.slane %v18725_v16, 7 }
  0xf4   :  { %v208_v50 = vsel %vm194_vm3, %v18723_v15, %v200_v49  ;;  %v18613_v49 = vmov 1  }
  0xf5   :  { %v18735_v19 = vpop.f32.mrb[6].mxu0  ;;  %v207_v48 = vsel %vm194_vm3, %v18725_v16, %v199_v47  ;;  %18069 = vset.pattern.permute.xlu1 %v18613_v49 }
  0xf6   :  { %v18737_v20 = vpop.f32.mrb[7].mxu0  ;;  %v202_v53 = vrot.slane %v18735_v19, 7 }
  0xf7   :  { %270 = vrot.lane.b32.xlu1 %v18723_v15, %s18608_s18  ;;  %272 = vrot.lane.b32.xlu0 %v18737_v20, %s18608_s18  ;;  %v201_v51 = vrot.slane %v18737_v20, 7 }
  0xf8   :  { %v210_v54 = vsel %vm194_vm3, %v18735_v19, %v202_v53 }
  0xf9   :  { %v209_v52 = vsel %vm194_vm3, %v18737_v20, %v201_v51  ;;  %vm15937_vm3 = vcmask 1046528  }
  0xfb   :  { %274 = vrot.lane.b32.xlu1 %v18735_v19, %s18608_s18 }
 0x15d   :  { %v261_v21 = vpop.permute.xlu0 %260 }
 0x15e   :  { %v284_v22 = vrot.slane %v261_v21, 1 }
 0x160   :  { %300 = vrot.lane.b32.xlu0 %v284_v22, %s18607_s26  ;;  %v373_v22 = vld [vmem:[%s21680_s2 + $0x8] sm:$0xf] }
 0x161   :  { %v263_v23 = vpop.permute.xlu0 %262  ;;  %v265_v24 = vpop.permute.xlu1 %264  ;;  %16201 = vmatprep.subr.msk.mxu1 %vm550_vm5, %v373_v22 }
 0x162   :  { %v285_v25 = vrot.slane %v263_v23, 1  ;;  %v286_v26 = vrot.slane %v265_v24, 1  ;;  %v375_v23 = vld [vmem:[%s21680_s2 + $0x18] sm:$0xf]  ;;  %v372_v24 = vld [vmem:[%s21680_s2] sm:$0xf] }
 0x163   :  { %16211 = vmatprep.subr.msk.mxu0 %vm550_vm5, %v375_v23  ;;  %16202 = vmatpush1.msk.msra.mxu1 %vm550_vm5, %v372_v24 }
 0x164   :  { %302 = vrot.lane.b32.xlu1 %v285_v25, %s18607_s26  ;;  %304 = vrot.lane.b32.xlu0 %v286_v26, %s18607_s26  ;;  %v374_v25 = vld [vmem:[%s21680_s2 + $0x10] sm:$0xf]  ;;  %v21687_v26 = vmov 0.0  }
 0x165   :  { %v267_v27 = vpop.permute.xlu1 %266  ;;  %v269_v28 = vpop.permute.xlu0 %268  ;;  %630 = vmatprep.mubr.f32.mxu1 %v21687_v26  ;;  %16212 = vmatpush1.msk.msra.mxu0 %vm550_vm5, %v374_v25 }
 0x166   :  { %v287_v29 = vrot.slane %v267_v27, 1  ;;  %v288_v30 = vrot.slane %v269_v28, 1  ;;  %743 = vmatprep.mubr.f32.mxu0 %v21687_v26  ;;  %17030 = vmatprep.subr.mxu0 %v21687_v26 }
 0x168   :  { %306 = vrot.lane.b32.xlu1 %v287_v29, %s18607_s26  ;;  %308 = vrot.lane.b32.xlu0 %v288_v30, %s18607_s26 }
 0x169   :  { %v271_v31 = vpop.permute.xlu1 %270  ;;  %v273_v32 = vpop.permute.xlu0 %272 }
 0x16a   :  { %v289_v33 = vrot.slane %v271_v31, 1  ;;  %v290_v34 = vrot.slane %v273_v32, 1 }
 0x16c   :  { %310 = vrot.lane.b32.xlu1 %v289_v33, %s18607_s26  ;;  %312 = vrot.lane.b32.xlu0 %v290_v34, %s18607_s26 }
 0x16d   :  { %v275_v36 = vpop.permute.xlu1 %274 }
 0x16e   :  { %v291_v38 = vrot.slane %v275_v36, 1 }
 0x170   :  { %314 = vrot.lane.b32.xlu1 %v291_v38, %s18607_s26  ;;  %183 = vrot.lane.b32.xlu0 %v16200_v37, %s18610_s0 }
 0x174   :  { %219 = vrot.lane.b32.xlu1 %v203_v40, %s18610_s0 }
 0x178   :  { %221 = vrot.lane.b32.xlu1 %v204_v42, %s18610_s0 }
 0x17c   :  { %223 = vrot.lane.b32.xlu1 %v205_v44, %s18610_s0 }
 0x180   :  { %225 = vrot.lane.b32.xlu1 %v206_v46, %s18610_s0 }
 0x184   :  { %227 = vrot.lane.b32.xlu1 %v207_v48, %s18610_s0 }
 0x188   :  { %229 = vrot.lane.b32.xlu1 %v208_v50, %s18610_s0 }
 0x18c   :  { %231 = vrot.lane.b32.xlu1 %v209_v52, %s18610_s0 }
 0x190   :  { %233 = vrot.lane.b32.xlu1 %v210_v54, %s18610_s0 }
 0x1d2   :  { %v301_v55 = vpop.permute.xlu0 %300 }
 0x1d3   :  { %v324_v56 = vsel %vm251_vm4, %v18709_v10, %v301_v55 }
 0x1d4   :  { %340 = vrot.lane.b32.xlu0 %v324_v56, %s18611_s19 }
 0x1d6   :  { %v303_v57 = vpop.permute.xlu1 %302  ;;  %v305_v59 = vpop.permute.xlu0 %304 }
 0x1d7   :  { %v325_v58 = vsel %vm251_vm4, %v18707_v9, %v303_v57  ;;  %v326_v60 = vsel %vm251_vm4, %v18715_v12, %v305_v59 }
 0x1d8   :  { %342 = vrot.lane.b32.xlu0 %v325_v58, %s18611_s19 }
 0x1da   :  { %v307_v61 = vpop.permute.xlu1 %306  ;;  %v309_v63 = vpop.permute.xlu0 %308 }
 0x1db   :  { %v327_v62 = vsel %vm251_vm4, %v18713_v11, %v307_v61  ;;  %v328_v0 = vsel %vm251_vm4, %v18725_v16, %v309_v63 }
 0x1dc   :  { %344 = vrot.lane.b32.xlu0 %v326_v60, %s18611_s19 }
 0x1de   :  { %v311_v1 = vpop.permute.xlu1 %310  ;;  %v313_v3 = vpop.permute.xlu0 %312 }
 0x1df   :  { %v329_v2 = vsel %vm251_vm4, %v18723_v15, %v311_v1  ;;  %v330_v4 = vsel %vm251_vm4, %v18737_v20, %v313_v3 }
 0x1e0   :  { %346 = vrot.lane.b32.xlu0 %v327_v62, %s18611_s19 }
 0x1e2   :  { %v315_v5 = vpop.permute.xlu1 %314  ;;  %v184_v13 = vpop.permute.xlu0 %183 }
 0x1e3   :  { %v331_v6 = vsel %vm251_vm4, %v18735_v19, %v315_v5  ;;  %v186_v27 = vadd.f32 %v184_v13, %v18709_v10  ;;  %v187_v31 = vadd.f32 %v18707_v9, %v184_v13  ;;  %v188_v36 = vadd.f32 %v184_v13, %v18715_v12 }
 0x1e4   :  { %348 = vrot.lane.b32.xlu0 %v328_v0, %s18611_s19  ;;  %v189_v40 = vadd.f32 %v18713_v11, %v184_v13  ;;  %v190_v44 = vadd.f32 %v184_v13, %v18725_v16  ;;  %v191_v47 = vadd.f32 %v18723_v15, %v184_v13  ;;  %v21683_v11 = vmov 0   ;;  %v376_v15 = vld [vmem:[%s21680_s2 + $0x20] sm:$0xf] }
 0x1e5   :  { %18068 = vset.pattern.permute.xlu0 %v21683_v11  ;;  %v192_v16 = vadd.f32 %v184_v13, %v18737_v20  ;;  %17016 = vmatprep.subr.msk.mxu1 %vm550_vm5, %v376_v15  ;;  %v193_v57 = vadd.f32 %v18735_v19, %v184_v13  ;;  %vm18635_vm4 = vmmov 1  }
 0x1e6   :  { %v220_v7 = vpop.permute.xlu1 %219 }
 0x1e7   :  { %v243_v28 = vadd.f32 %v220_v7, %v186_v27 }
 0x1e8   :  { %350 = vrot.lane.b32.xlu0 %v329_v2, %s18611_s19 }
 0x1ea   :  { %v222_v8 = vpop.permute.xlu1 %221 }
 0x1eb   :  { %v244_v33 = vadd.f32 %v222_v8, %v187_v31 }
 0x1ec   :  { %352 = vrot.lane.b32.xlu0 %v330_v4, %s18611_s19 }
 0x1ee   :  { %v224_v21 = vpop.permute.xlu1 %223 }
 0x1ef   :  { %v245_v38 = vadd.f32 %v224_v21, %v188_v36 }
 0x1f0   :  { %354 = vrot.lane.b32.xlu0 %v331_v6, %s18611_s19 }
 0x1f2   :  { %v226_v29 = vpop.permute.xlu1 %225 }
 0x1f3   :  { %v246_v42 = vadd.f32 %v226_v29, %v189_v40 }
 0x1f6   :  { %v228_v10 = vpop.permute.xlu1 %227 }
 0x1f7   :  { %v247_v46 = vadd.f32 %v228_v10, %v190_v44 }
 0x1fa   :  { %v230_v9 = vpop.permute.xlu1 %229 }
 0x1fb   :  { %v248_v51 = vadd.f32 %v230_v9, %v191_v47 }
 0x1fe   :  { %v232_v50 = vpop.permute.xlu1 %231 }
 0x1ff   :  { %v249_v54 = vadd.f32 %v232_v50, %v192_v16 }
 0x202   :  { %v234_v55 = vpop.permute.xlu1 %233 }
 0x203   :  { %v250_v59 = vadd.f32 %v234_v55, %v193_v57 }
 0x246   :  { %v341_v30 = vpop.permute.xlu0 %340 }
 0x247   :  { %v364_v32 = vadd.f32 %v341_v30, %v243_v28 }
 0x249   :  { %386 = vrot.lane.b32.xlu1 %v364_v32, %s18611_s19 }
 0x24a   :  { %v343_v34 = vpop.permute.xlu0 %342 }
 0x24b   :  { %v365_v37 = vadd.f32 %v343_v34, %v244_v33 }
 0x24d   :  { %388 = vrot.lane.b32.xlu0 %v365_v37, %s18611_s19 }
 0x24e   :  { %v345_v39 = vpop.permute.xlu0 %344 }
 0x24f   :  { %v366_v41 = vadd.f32 %v345_v39, %v245_v38 }
 0x251   :  { %390 = vrot.lane.b32.xlu1 %v366_v41, %s18611_s19 }
 0x252   :  { %v347_v43 = vpop.permute.xlu0 %346 }
 0x253   :  { %v367_v45 = vadd.f32 %v347_v43, %v246_v42 }
 0x255   :  { %392 = vrot.lane.b32.xlu0 %v367_v45, %s18611_s19 }
 0x256   :  { %v349_v12 = vpop.permute.xlu0 %348 }
 0x257   :  { %v368_v48 = vadd.f32 %v349_v12, %v247_v46 }
 0x259   :  { %394 = vrot.lane.b32.xlu1 %v368_v48, %s18611_s19 }
 0x25a   :  { %v351_v52 = vpop.permute.xlu0 %350 }
 0x25b   :  { %v369_v53 = vadd.f32 %v351_v52, %v248_v51 }
 0x25d   :  { %396 = vrot.lane.b32.xlu0 %v369_v53, %s18611_s19 }
 0x25e   :  { %v353_v56 = vpop.permute.xlu0 %352 }
 0x25f   :  { %v370_v58 = vadd.f32 %v353_v56, %v249_v54 }
 0x261   :  { %398 = vrot.lane.b32.xlu1 %v370_v58, %s18611_s19 }
 0x262   :  { %v355_v60 = vpop.permute.xlu0 %354 }
 0x263   :  { %v371_v20 = vadd.f32 %v355_v60, %v250_v59 }
 0x265   :  { %400 = vrot.lane.b32.xlu0 %v371_v20, %s18611_s19 }
 0x2bb   :  { %v387_v61 = vpop.permute.xlu1 %386 }
 0x2bc   :  { %v410_v62 = vrot.slane %v387_v61, 1 }
 0x2be   :  { %v418_v63 = vsub.f32 %v410_v62, %v387_v61 }
 0x2bf   :  { %v389_v0 = vpop.permute.xlu0 %388 }
 0x2c0   :  { %v18866_v19 = vsel %vm377_vm6, %v418_v63, 0.0  ;;  %v411_v1 = vrot.slane %v389_v0, 1 }
 0x2c1   :  { %v434_v2 = vrot.slane %v18866_v19, 7  ;;  %16203 = vmatmul.mubr.msk.f32.vlgmr.msra.gmra.mrb[0].mxu1 %vm525_vm7, %v18866_v19  ;;  %16213 = vmatmul.mubr.msk.f32.vlgmr.msra.gmra.mrb[8].mxu0 %vm525_vm7, %v18866_v19 }
 0x2c2   :  { %v419_v3 = vsub.f32 %v411_v1, %v389_v0  ;;  %636 = vmatprep.mubr.f32.mxu1 %v21687_v26  ;;  %749 = vmatprep.mubr.f32.mxu0 %v21687_v26 }
 0x2c3   :  { %v391_v4 = vpop.permute.xlu1 %390  ;;  %17017 = vmatpush3.msk.msra.mxu1 %vm550_vm5, %v376_v15  ;;  %v443_v5 = vsel %vm442_vm8, %v434_v2, 0.0 }
 0x2c4   :  { %v18880_v6 = vsel %vm377_vm6, %v419_v3, 0.0  ;;  %v412_v7 = vrot.slane %v391_v4, 1  ;;  %v451_v8 = vadd.f32 %v443_v5, %v18866_v19  ;;  %17035 = vmatprep.subr.mxu1 %v21687_v26 }
 0x2c5   :  { %v435_v13 = vrot.slane %v18880_v6, 7  ;;  %16204 = vmatmul.mubr.msk.f32.gmra.mrb[2].mxu1 %vm525_vm7, %v18880_v6  ;;  %16214 = vmatmul.mubr.msk.f32.gmra.mrb[10].mxu0 %vm525_vm7, %v18880_v6  ;;  %v510_v16 = vmul.f32 0.5, %v18880_v6 }
 0x2c6   :  { %v420_v21 = vsub.f32 %v412_v7, %v391_v4  ;;  %642 = vmatprep.mubr.f32.mxu1 %v21687_v26  ;;  %755 = vmatprep.mubr.f32.mxu0 %v21687_v26  ;;  %v459_v24 = vrot.slane %v451_v8, 6 }
 0x2c7   :  { %v393_v22 = vpop.permute.xlu0 %392  ;;  %v444_v23 = vsel %vm442_vm8, %v435_v13, 0.0  ;;  %v18615_v13 = vmov 2  }
 0x2c8   :  { %v18896_v25 = vsel %vm377_vm6, %v420_v21, 0.0  ;;  %v413_v27 = vrot.slane %v393_v22, 1  ;;  %v452_v28 = vadd.f32 %v444_v23, %v18880_v6  ;;  %v468_v33 = vsel %vm467_vm9, %v459_v24, 0.0 }
 0x2c9   :  { %v436_v29 = vrot.slane %v18896_v25, 7  ;;  %16205 = vmatmul.mubr.msk.f32.gmra.mrb[4].mxu1 %vm525_vm7, %v18896_v25  ;;  %16215 = vmatmul.mubr.msk.f32.gmra.mrb[12].mxu0 %vm525_vm7, %v18896_v25  ;;  %v476_v45 = vadd.f32 %v468_v33, %v451_v8  ;;  %v18616_v21 = vmov 3  }
 0x2ca   :  { %v421_v30 = vsub.f32 %v413_v27, %v393_v22  ;;  %648 = vmatprep.mubr.f32.mxu1 %v21687_v26  ;;  %761 = vmatprep.mubr.f32.mxu0 %v21687_v26  ;;  %v460_v31 = vrot.slane %v452_v28, 6 }
 0x2cb   :  { %v395_v32 = vpop.permute.xlu1 %394  ;;  %v445_v34 = vsel %vm442_vm8, %v436_v29, 0.0  ;;  %v484_v15 = vrot.slane %v476_v45, 4  ;;  %v509_v29 = vmul.f32 0.5, %v18866_v19 }
 0x2cc   :  { %v18912_v36 = vsel %vm377_vm6, %v421_v30, 0.0  ;;  %v414_v37 = vrot.slane %v395_v32, 1  ;;  %v469_v10 = vsel %vm467_vm9, %v460_v31, 0.0  ;;  %v453_v38 = vadd.f32 %v445_v34, %v18896_v25 }
 0x2cd   :  { %v437_v39 = vrot.slane %v18912_v36, 7  ;;  %16206 = vmatmul.mubr.msk.f32.gmra.mrb[6].mxu1 %vm525_vm7, %v18912_v36  ;;  %16216 = vmatmul.mubr.msk.f32.gmra.mrb[14].mxu0 %vm525_vm7, %v18912_v36  ;;  %v477_v40 = vadd.f32 %v469_v10, %v452_v28  ;;  %v493_v0 = vsel %vm492_vm10, %v484_v15, 0.0  ;;  %v512_v28 = vmul.f32 0.5, %v18912_v36 }
 0x2ce   :  { %v422_v41 = vsub.f32 %v414_v37, %v395_v32  ;;  %654 = vmatprep.mubr.f32.mxu1 %v21687_v26  ;;  %767 = vmatprep.mubr.f32.mxu0 %v21687_v26  ;;  %v461_v42 = vrot.slane %v453_v38, 6  ;;  %v501_v23 = vadd.f32 %v493_v0, %v476_v45 }
 0x2cf   :  { %v397_v9 = vpop.permute.xlu0 %396  ;;  %v485_v43 = vrot.slane %v477_v40, 4  ;;  %v446_v44 = vsel %vm442_vm8, %v437_v39, 0.0 }
 0x2d0   :  { %v18929_v46 = vsel %vm377_vm6, %v422_v41, 0.0  ;;  %v415_v12 = vrot.slane %v397_v9, 1  ;;  %v454_v47 = vadd.f32 %v446_v44, %v18912_v36  ;;  %v470_v50 = vsel %vm467_vm9, %v461_v42, 0.0 }
 0x2d1   :  { %16207 = vmatmul.mubr.msk.f32.gmra.mrb[8].mxu1 %vm525_vm7, %v18929_v46  ;;  %16217 = vmatmul.mubr.msk.f32.gmra.mrb[16].mxu0 %vm525_vm7, %v18929_v46  ;;  %v494_v48 = vsel %vm492_vm10, %v485_v43, 0.0  ;;  %v478_v55 = vadd.f32 %v470_v50, %v453_v38  ;;  %v517_v33 = vsub.f32 %v501_v23, %v509_v29  ;;  %v511_v38 = vmul.f32 0.5, %v18896_v25 }
 0x2d2   :  { %v423_v51 = vsub.f32 %v415_v12, %v397_v9  ;;  %660 = vmatprep.mubr.f32.mxu1 %v21687_v26  ;;  %773 = vmatprep.mubr.f32.mxu0 %v21687_v26  ;;  %v502_v52 = vadd.f32 %v494_v48, %v477_v40  ;;  %v462_v53 = vrot.slane %v454_v47, 6 }
 0x2d3   :  { %v399_v54 = vpop.permute.xlu1 %398  ;;  %v486_v1 = vrot.slane %v478_v55, 4 }
 0x2d4   :  { %v18945_v56 = vsel %vm377_vm6, %v423_v51, 0.0  ;;  %v416_v57 = vrot.slane %v399_v54, 1  ;;  %v518_v58 = vsub.f32 %v502_v52, %v510_v16  ;;  %v471_v59 = vsel %vm467_vm9, %v462_v53, 0.0 }
 0x2d5   :  { %v439_v60 = vrot.slane %v18945_v56, 7  ;;  %16208 = vmatmul.mubr.msk.f32.gmra.mrb[10].mxu1 %vm525_vm7, %v18945_v56  ;;  %16218 = vmatmul.mubr.msk.f32.gmra.mrb[18].mxu0 %vm525_vm7, %v18945_v56  ;;  %v479_v20 = vadd.f32 %v471_v59, %v454_v47  ;;  %v495_v24 = vsel %vm492_vm10, %v486_v1, 0.0  ;;  %v438_v47 = vrot.slane %v18929_v46, 7 }
 0x2d6   :  { %v424_v61 = vsub.f32 %v416_v57, %v399_v54  ;;  %958 = vperm.xlu1 %18069, %v518_v58   ;;  %904 = vperm.xlu0 %18068, %v518_v58   ;;  %v503_v34 = vadd.f32 %v495_v24, %v478_v55  ;;  %v514_v50 = vmul.f32 0.5, %v18945_v56 }
 0x2d7   :  { %v401_v62 = vpop.permute.xlu0 %400  ;;  %666 = vmatprep.mubr.f32.mxu1 %v21687_v26  ;;  %779 = vmatprep.mubr.f32.mxu0 %v21687_v26  ;;  %v487_v63 = vrot.slane %v479_v20, 4  ;;  %v448_v2 = vsel %vm442_vm8, %v439_v60, 0.0  ;;  %v447_v53 = vsel %vm442_vm8, %v438_v47, 0.0 }
 0x2d8   :  { %v18962_v3 = vsel %vm377_vm6, %v424_v61, 0.0  ;;  %v417_v4 = vrot.slane %v401_v62, 1  ;;  %v456_v5 = vadd.f32 %v448_v2, %v18945_v56  ;;  %v519_v39 = vsub.f32 %v503_v34, %v511_v38 }
 0x2d9   :  { %16209 = vmatmul.mubr.msk.f32.gmra.mrb[12].mxu1 %vm525_vm7, %v18962_v3  ;;  %16219 = vmatmul.mubr.msk.f32.gmra.mrb[20].mxu0 %vm525_vm7, %v18962_v3  ;;  %v496_v7 = vsel %vm492_vm10, %v487_v63, 0.0  ;;  %v440_v10 = vrot.slane %v18962_v3, 7  ;;  %v455_v55 = vadd.f32 %v447_v53, %v18929_v46 }
 0x2da   :  { %v425_v8 = vsub.f32 %v417_v4, %v401_v62  ;;  %18070 = vset.pattern.permute.xlu1 %v18615_v13  ;;  %18071 = vset.pattern.permute.xlu0 %v18616_v21  ;;  %v504_v22 = vadd.f32 %v496_v7, %v479_v20  ;;  %v464_v30 = vrot.slane %v456_v5, 6  ;;  %v515_v62 = vmul.f32 0.5, %v18962_v3 }
 0x2db   :  { %1006 = vperm.xlu1 %18070, %v518_v58   ;;  %1054 = vperm.xlu0 %18071, %v518_v58   ;;  %v449_v42 = vsel %vm442_vm8, %v440_v10, 0.0  ;;  %v463_v59 = vrot.slane %v455_v55, 6  ;;  %v513_v4 = vmul.f32 0.5, %v18929_v46 }
 0x2dc   :  { %v18977_v27 = vsel %vm377_vm6, %v425_v8, 0.0  ;;  %672 = vmatprep.mubr.f32.mxu1 %v21687_v26  ;;  %785 = vmatprep.mubr.f32.mxu0 %v21687_v26  ;;  %v18990_v32 = vsub.f32 %v504_v22, %v512_v28  ;;  %vm15934_vm6 = vcmask 121856  }
 0x2dd   :  { %v441_v31 = vrot.slane %v18977_v27, 7  ;;  %16210 = vmatmul.mubr.msk.f32.gmra.mrb[14].mxu1 %vm525_vm7, %v18977_v27  ;;  %16220 = vmatmul.mubr.msk.f32.gmra.mrb[22].mxu0 %vm525_vm7, %v18977_v27  ;;  %v516_v57 = vmul.f32 0.5, %v18977_v27  ;;  %v472_v61 = vsel %vm467_vm9, %v463_v59, 0.0 }
 0x2de   :  { %17018 = vmatprep.mubr.msk.f32.mxu1 %vm525_vm7, %v18866_v19  ;;  %v473_v19 = vsel %vm467_vm9, %v464_v30, 0.0  ;;  %v480_v0 = vadd.f32 %v472_v61, %v455_v55  ;;  %17032 = vmatprep.mubr.msk.f32.mxu0 %vm18617_vm11, %v21687_v26 }
 0x2df   :  { %18072 = vset.pattern.permute.xlu1 %v21683_v11  ;;  %18076 = vset.pattern.permute.xlu0 %v21683_v11  ;;  %v450_v37 = vsel %vm442_vm8, %v441_v31, 0.0  ;;  %v481_v41 = vadd.f32 %v473_v19, %v456_v5 }
 0x2e0   :  { %914 = vperm.xlu0 %18076, %v18990_v32   ;;  %899 = vperm.xlu1 %18072, %v517_v33   ;;  %v458_v40 = vadd.f32 %v450_v37, %v18977_v27  ;;  %v488_v1 = vrot.slane %v480_v0, 4 }
 0x2e1   :  { %17019 = vmatmul.mubr.msk.f32.vlgmr.msra.gmra.mrb[16].mxu1 %vm525_vm7, %v18880_v6  ;;  %v489_v9 = vrot.slane %v481_v41, 4 }
 0x2e2   :  { %17021 = vmatprep.mubr.msk.f32.mxu1 %vm525_vm7, %v18896_v25  ;;  %v466_v6 = vrot.slane %v458_v40, 6  ;;  %v457_v25 = vadd.f32 %v449_v42, %v18962_v3  ;;  %v497_v2 = vsel %vm492_vm10, %v488_v1, 0.0 }
 0x2e4   :  { %18073 = vset.pattern.permute.xlu1 %v18613_v49  ;;  %909 = vperm.xlu0 %18076, %v519_v39   ;;  %v475_v43 = vsel %vm467_vm9, %v466_v6, 0.0  ;;  %v465_v44 = vrot.slane %v457_v25, 6 }
 0x2e5   :  { %954 = vperm.xlu1 %18073, %v517_v33   ;;  %17022 = vmatmul.mubr.msk.f32.gmra.mrb[18].mxu1 %vm525_vm7, %v18912_v36  ;;  %v498_v36 = vsel %vm492_vm10, %v489_v9, 0.0  ;;  %v483_v45 = vadd.f32 %v475_v43, %v458_v40 }
 0x2e6   :  { %17024 = vmatprep.mubr.msk.f32.mxu1 %vm525_vm7, %v18929_v46  ;;  %v506_v12 = vadd.f32 %v498_v36, %v481_v41  ;;  %v474_v48 = vsel %vm467_vm9, %v465_v44, 0.0 }
 0x2e7   :  { %v491_v51 = vrot.slane %v483_v45, 4  ;;  %v482_v16 = vadd.f32 %v474_v48, %v457_v25 }
 0x2e8   :  { %18080 = vset.pattern.permute.xlu0 %v18613_v49  ;;  %v522_v52 = vsub.f32 %v506_v12, %v514_v50 }
 0x2e9   :  { %18074 = vset.pattern.permute.xlu1 %v18615_v13  ;;  %962 = vperm.xlu0 %18080, %v519_v39   ;;  %v500_v54 = vsel %vm492_vm10, %v491_v51, 0.0  ;;  %v490_v15 = vrot.slane %v482_v16, 4 }
 0x2ea   :  { %17025 = vmatmul.mubr.msk.f32.gmra.mrb[20].mxu1 %vm525_vm7, %v18945_v56  ;;  %1002 = vperm.xlu1 %18074, %v517_v33   ;;  %v508_v56 = vadd.f32 %v500_v54, %v483_v45 }
 0x2eb   :  { %17027 = vmatprep.mubr.msk.f32.mxu1 %vm525_vm7, %v18962_v3  ;;  %v499_v58 = vsel %vm492_vm10, %v490_v15, 0.0  ;;  %v505_v3 = vadd.f32 %v497_v2, %v480_v0 }
 0x2ec   :  { %v524_v60 = vsub.f32 %v508_v56, %v516_v57  ;;  %v507_v20 = vadd.f32 %v499_v58, %v482_v16 }
 0x2ed   :  { %18082 = vset.pattern.permute.xlu0 %v18616_v21  ;;  %v521_v5 = vsub.f32 %v505_v3, %v513_v4 }
 0x2ee   :  { %17028 = vmatmul.mubr.msk.f32.gmra.mrb[22].mxu1 %vm525_vm7, %v18977_v27  ;;  %18075 = vset.pattern.permute.xlu1 %v18616_v21  ;;  %v523_v63 = vsub.f32 %v507_v20, %v515_v62 }
 0x2ef   :  { %1058 = vperm.xlu0 %18082, %v519_v39   ;;  %1050 = vperm.xlu1 %18075, %v517_v33  }
 0x2f0   :  { %17037 = vmatprep.mubr.msk.f32.mxu1 %vm18617_vm11, %v21687_v26 }
 0x2f3   :  { %18083 = vset.pattern.permute.xlu0 %v21683_v11  ;;  %18077 = vset.pattern.permute.xlu1 %v18613_v49 }
 0x2f4   :  { %924 = vperm.xlu0 %18083, %v522_v52   ;;  %966 = vperm.xlu1 %18077, %v18990_v32  }
 0x2f8   :  { %18085 = vset.pattern.permute.xlu0 %v18615_v13  ;;  %18078 = vset.pattern.permute.xlu1 %v18615_v13 }
 0x2f9   :  { %1022 = vperm.xlu0 %18085, %v522_v52   ;;  %1014 = vperm.xlu1 %18078, %v18990_v32  }
 0x2fd   :  { %18092 = vset.pattern.permute.xlu0 %v18613_v49  ;;  %18079 = vset.pattern.permute.xlu1 %v18616_v21 }
 0x2fe   :  { %982 = vperm.xlu0 %18092, %v524_v60   ;;  %1062 = vperm.xlu1 %18079, %v18990_v32  }
 0x302   :  { %18093 = vset.pattern.permute.xlu0 %v21683_v11  ;;  %18081 = vset.pattern.permute.xlu1 %v18615_v13 }
 0x303   :  { %929 = vperm.xlu0 %18093, %v523_v63   ;;  %1010 = vperm.xlu1 %18081, %v519_v39  }
 0x307   :  { %18094 = vset.pattern.permute.xlu0 %v18615_v13  ;;  %18084 = vset.pattern.permute.xlu1 %v18613_v49 }
 0x308   :  { %1030 = vperm.xlu0 %18094, %v524_v60   ;;  %974 = vperm.xlu1 %18084, %v522_v52  }
 0x30c   :  { %18086 = vset.pattern.permute.xlu1 %v18616_v21  ;;  %18101 = vset.pattern.permute.xlu0 %v18616_v21 }
 0x30d   :  { %1070 = vperm.xlu1 %18086, %v522_v52  }
 0x311   :  { %18087 = vset.pattern.permute.xlu1 %v21683_v11 }
 0x312   :  { %919 = vperm.xlu1 %18087, %v521_v5  }
 0x316   :  { %18088 = vset.pattern.permute.xlu1 %v18613_v49 }
 0x317   :  { %970 = vperm.xlu1 %18088, %v521_v5  }
 0x31b   :  { %18089 = vset.pattern.permute.xlu1 %v18615_v13 }
 0x31c   :  { %1018 = vperm.xlu1 %18089, %v521_v5  }
 0x320   :  { %18090 = vset.pattern.permute.xlu1 %v18616_v21 }
 0x321   :  { %1066 = vperm.xlu1 %18090, %v521_v5  }
 0x325   :  { %18091 = vset.pattern.permute.xlu1 %v21683_v11 }
 0x326   :  { %934 = vperm.xlu1 %18091, %v524_v60  }
 0x32a   :  { %18095 = vset.pattern.permute.xlu1 %v18613_v49 }
 0x32b   :  { %978 = vperm.xlu1 %18095, %v523_v63  }
 0x32f   :  { %18096 = vset.pattern.permute.xlu1 %v18615_v13 }
 0x330   :  { %1026 = vperm.xlu1 %18096, %v523_v63  }
 0x334   :  { %18097 = vset.pattern.permute.xlu1 %v18616_v21 }
 0x335   :  { %1074 = vperm.xlu1 %18097, %v523_v63  }
 0x339   :  { %1078 = vperm.xlu1 %18097, %v524_v60  }
 0x33d   :  { %18098 = vset.pattern.permute.xlu1 %v21683_v11 }
 0x355   :  { %v959_v46 = vpop.permute.xlu1 %958  ;;  %v905_v27 = vpop.permute.xlu0 %904 }
 0x35a   :  { %v1007_v7 = vpop.permute.xlu1 %1006  ;;  %v19072_v29 = vpop.permute.xlu0 %1054 }
 0x35f   :  { %v900_v8 = vpop.permute.xlu1 %899  ;;  %v915_v31 = vpop.permute.xlu0 %914 }
 0x363   :  { %v910_v33 = vpop.permute.xlu0 %909 }
 0x364   :  { %v955_v22 = vpop.permute.xlu1 %954 }
 0x368   :  { %v963_v37 = vpop.permute.xlu0 %962 }
 0x369   :  { %v1003_v23 = vpop.permute.xlu1 %1002 }
 0x36e   :  { %v19070_v24 = vpop.permute.xlu1 %1050  ;;  %v19080_v19 = vpop.permute.xlu0 %1058 }
 0x373   :  { %v967_v28 = vpop.permute.xlu1 %966  ;;  %v925_v40 = vpop.permute.xlu0 %924 }
 0x378   :  { %v1015_v30 = vpop.permute.xlu1 %1014  ;;  %v1023_v16 = vpop.permute.xlu0 %1022 }
 0x37d   :  { %v19074_v32 = vpop.permute.xlu1 %1062 }
 0x382   :  { %v1011_v34 = vpop.permute.xlu1 %1010 }
 0x387   :  { %v19076_v10 = vpop.permute.xlu1 %974 }
 0x38c   :  { %v19078_v38 = vpop.permute.xlu1 %1070 }
 0x391   :  { %v920_v39 = vpop.permute.xlu1 %919 }
 0x394   :  { %v632_v41 = vpop.f32.mrb[0].mxu1  ;;  %v745_v42 = vpop.f32.mrb[8].mxu0 }
 0x395   :  { %v634_v6 = vpop.f32.mrb[1].mxu1  ;;  %v747_v9 = vpop.f32.mrb[9].mxu0  ;;  %v985_v36 = vmul.f32 %v955_v22, %v745_v42 }
 0x396   :  { %v937_v25 = vmul.f32 %v900_v8, %v634_v6  ;;  %v971_v43 = vpop.permute.xlu1 %970  ;;  %v1033_v51 = vmul.f32 %v1003_v23, %v747_v9  ;;  %v983_v23 = vpop.permute.xlu0 %982 }
 0x398   :  { %v945_v44 = vadd.f32 %v937_v25, %v632_v41  ;;  %v638_v45 = vpop.f32.mrb[2].mxu1  ;;  %v751_v12 = vpop.f32.mrb[10].mxu0 }
 0x399   :  { %v640_v47 = vpop.f32.mrb[3].mxu1  ;;  %v753_v48 = vpop.f32.mrb[11].mxu0  ;;  %v986_v15 = vmul.f32 %v959_v46, %v751_v12 }
 0x39a   :  { %v993_v50 = vadd.f32 %v985_v36, %v945_v44  ;;  %v938_v52 = vmul.f32 %v905_v27, %v640_v47  ;;  %v1034_v20 = vmul.f32 %v1007_v7, %v753_v48 }
 0x39b   :  { %v1019_v53 = vpop.permute.xlu1 %1018 }
 0x39c   :  { %v19082_v54 = vadd.f32 %v1033_v51, %v993_v50  ;;  %v946_v55 = vadd.f32 %v938_v52, %v638_v45  ;;  %v644_v56 = vpop.f32.mrb[4].mxu1  ;;  %v757_v57 = vpop.f32.mrb[12].mxu0 }
 0x39d   :  { %v646_v58 = vpop.f32.mrb[5].mxu1  ;;  %v759_v59 = vpop.f32.mrb[13].mxu0  ;;  %v987_v63 = vmul.f32 %v963_v37, %v757_v57 }
 0x39e   :  { %v994_v60 = vadd.f32 %v986_v15, %v946_v55  ;;  %v939_v61 = vmul.f32 %v910_v33, %v646_v58  ;;  %v1035_v8 = vmul.f32 %v1011_v34, %v759_v59  ;;  %v930_v55 = vpop.permute.xlu0 %929 }
 0x3a0   :  { %v19084_v62 = vadd.f32 %v1034_v20, %v994_v60  ;;  %v947_v0 = vadd.f32 %v939_v61, %v644_v56  ;;  %v650_v1 = vpop.f32.mrb[6].mxu1  ;;  %v763_v2 = vpop.f32.mrb[14].mxu0 }
 0x3a1   :  { %v19086_v3 = vpop.permute.xlu1 %1066  ;;  %v652_v4 = vpop.f32.mrb[7].mxu1  ;;  %v988_v41 = vmul.f32 %v967_v28, %v763_v2 }
 0x3a2   :  { %v995_v5 = vadd.f32 %v987_v63, %v947_v0  ;;  %v940_v46 = vmul.f32 %v915_v31, %v652_v4  ;;  %v765_v22 = vpop.f32.mrb[15].mxu0 }
 0x3a3   :  { %v1036_v25 = vmul.f32 %v1015_v30, %v765_v22 }
 0x3a4   :  { %v19088_v27 = vadd.f32 %v1035_v8, %v995_v5  ;;  %v948_v42 = vadd.f32 %v940_v46, %v650_v1  ;;  %v656_v7 = vpop.f32.mrb[8].mxu1  ;;  %v769_v33 = vpop.f32.mrb[16].mxu0 }
 0x3a5   :  { %v658_v6 = vpop.f32.mrb[9].mxu1  ;;  %v771_v9 = vpop.f32.mrb[17].mxu0  ;;  %v989_v12 = vmul.f32 %v971_v43, %v769_v33 }
 0x3a6   :  { %v996_v37 = vadd.f32 %v988_v41, %v948_v42  ;;  %v941_v36 = vmul.f32 %v920_v39, %v658_v6  ;;  %v935_v44 = vpop.permute.xlu1 %934  ;;  %v1037_v52 = vmul.f32 %v1019_v53, %v771_v9  ;;  %v1031_v33 = vpop.permute.xlu0 %1030 }
 0x3a8   :  { %v1044_v45 = vadd.f32 %v1036_v25, %v996_v37  ;;  %v949_v47 = vadd.f32 %v941_v36, %v656_v7  ;;  %v662_v48 = vpop.f32.mrb[10].mxu1  ;;  %v775_v34 = vpop.f32.mrb[18].mxu0 }
 0x3a9   :  { %v664_v31 = vpop.f32.mrb[11].mxu1  ;;  %v777_v50 = vpop.f32.mrb[19].mxu0  ;;  %v990_v57 = vmul.f32 %v19076_v10, %v775_v34 }
 0x3aa   :  { %v997_v51 = vadd.f32 %v989_v12, %v949_v47  ;;  %v942_v15 = vmul.f32 %v925_v40, %v664_v31  ;;  %v979_v28 = vpop.permute.xlu1 %978  ;;  %v1038_v20 = vmul.f32 %v1023_v16, %v777_v50 }
 0x3ac   :  { %v19090_v56 = vadd.f32 %v1037_v52, %v997_v51  ;;  %v950_v58 = vadd.f32 %v942_v15, %v662_v48  ;;  %v668_v30 = vpop.f32.mrb[12].mxu1  ;;  %v781_v39 = vpop.f32.mrb[20].mxu0 }
 0x3ad   :  { %v670_v59 = vpop.f32.mrb[13].mxu1  ;;  %v783_v60 = vpop.f32.mrb[21].mxu0  ;;  %v991_v1 = vmul.f32 %v979_v28, %v781_v39 }
 0x3ae   :  { %v998_v43 = vadd.f32 %v990_v57, %v950_v58  ;;  %v943_v61 = vmul.f32 %v930_v55, %v670_v59 }
 0x3af   :  { %v1027_v63 = vpop.permute.xlu1 %1026 }
 0x3b0   :  { %v1046_v0 = vadd.f32 %v1038_v20, %v998_v43  ;;  %v951_v2 = vadd.f32 %v943_v61, %v668_v30  ;;  %v674_v53 = vpop.f32.mrb[14].mxu1  ;;  %v787_v40 = vpop.f32.mrb[22].mxu0  ;;  %v1039_v46 = vmul.f32 %v1027_v63, %v783_v60 }
 0x3b1   :  { %v676_v4 = vpop.f32.mrb[15].mxu1  ;;  %v789_v5 = vpop.f32.mrb[23].mxu0  ;;  %v992_v41 = vmul.f32 %v983_v23, %v787_v40 }
 0x3b2   :  { %v999_v8 = vadd.f32 %v991_v1, %v951_v2  ;;  %v944_v22 = vmul.f32 %v935_v44, %v676_v4  ;;  %v1040_v37 = vmul.f32 %v1031_v33, %v789_v5 }
 0x3b4   :  { %v19093_v10 = vadd.f32 %v1039_v46, %v999_v8  ;;  %v952_v42 = vadd.f32 %v944_v22, %v674_v53  ;;  %v17020_v7 = vpop.f32.mrb[16].mxu1  ;;  %v1075_v51 = vpop.permute.xlu1 %1074 }
 0x3b5   :  { %v1082_v16 = vmul.f32 %v17020_v7, %v19072_v29  ;;  %v858_v6 = vpop.f32.mrb[17].mxu1 }
 0x3b6   :  { %v1000_v9 = vadd.f32 %v992_v41, %v952_v42  ;;  %v1081_v25 = vmul.f32 %v19070_v24, %v858_v6 }
 0x3b7   :  { %v1090_v36 = vadd.f32 %v1082_v16, %v19084_v62  ;;  %v16230_v16 = vld [vmem:[#allocation2] ss:$0 sm:$0xff] }
 0x3b8   :  { %v1048_v12 = vadd.f32 %v1040_v37, %v1000_v9  ;;  %v1089_v47 = vadd.f32 %v1081_v25, %v19082_v54  ;;  %v17023_v48 = vpop.f32.mrb[18].mxu1 }
 0x3b9   :  { %v1098_v44 = vrot.slane %v1090_v36, 7  ;;  %v1084_v34 = vmul.f32 %v17023_v48, %v19074_v32  ;;  %v868_v23 = vpop.f32.mrb[19].mxu1 }
 0x3ba   :  { %v1097_v31 = vrot.slane %v1089_v47, 7  ;;  %v1083_v50 = vmul.f32 %v19080_v19, %v868_v23 }
 0x3bb   :  { %v1106_v29 = vsel %vm442_vm8, %v1098_v44, 0.0  ;;  %v1092_v52 = vadd.f32 %v1084_v34, %v1044_v45 }
 0x3bc   :  { %v1114_v15 = vadd.f32 %v1106_v29, %v1090_v36  ;;  %v1105_v24 = vsel %vm442_vm8, %v1097_v31, 0.0  ;;  %v1091_v62 = vadd.f32 %v1083_v50, %v19088_v27 }
 0x3bd   :  { %v1113_v54 = vadd.f32 %v1105_v24, %v1089_v47  ;;  %v1100_v28 = vrot.slane %v1092_v52, 7  ;;  %v17026_v55 = vpop.f32.mrb[20].mxu1 }
 0x3be   :  { %v1122_v57 = vrot.slane %v1114_v15, 6  ;;  %v1099_v32 = vrot.slane %v1091_v62, 7  ;;  %v1086_v58 = vmul.f32 %v17026_v55, %v19078_v38  ;;  %v878_v30 = vpop.f32.mrb[21].mxu1 }
 0x3bf   :  { %v1121_v19 = vrot.slane %v1113_v54, 6  ;;  %v1108_v39 = vsel %vm442_vm8, %v1100_v28, 0.0  ;;  %v1085_v45 = vmul.f32 %v19086_v3, %v878_v30  ;;  %v1079_v3 = vpop.permute.xlu1 %1078 }
 0x3c0   :  { %v1130_v27 = vsel %vm467_vm9, %v1122_v57, 0.0  ;;  %v1116_v59 = vadd.f32 %v1108_v39, %v1092_v52  ;;  %v1107_v38 = vsel %vm442_vm8, %v1099_v32, 0.0  ;;  %v1094_v60 = vadd.f32 %v1086_v58, %v1046_v0 }
 0x3c1   :  { %v1138_v43 = vadd.f32 %v1130_v27, %v1114_v15  ;;  %v1129_v20 = vsel %vm467_vm9, %v1121_v19, 0.0  ;;  %v1115_v61 = vadd.f32 %v1107_v38, %v1091_v62  ;;  %v1093_v63 = vadd.f32 %v1085_v45, %v19090_v56  ;;  %v17029_v1 = vpop.f32.mrb[22].mxu1 }
 0x3c2   :  { %v1137_v2 = vadd.f32 %v1129_v20, %v1113_v54  ;;  %v1124_v53 = vrot.slane %v1116_v59, 6  ;;  %v1102_v40 = vrot.slane %v1094_v60, 7  ;;  %v1088_v4 = vmul.f32 %v17029_v1, %v1079_v3  ;;  %v888_v5 = vpop.f32.mrb[23].mxu1 }
 0x3c3   :  { %v1146_v8 = vrot.slane %v1138_v43, 4  ;;  %v1123_v46 = vrot.slane %v1115_v61, 6  ;;  %v1101_v22 = vrot.slane %v1093_v63, 7  ;;  %v1087_v41 = vmul.f32 %v1075_v51, %v888_v5 }
 0x3c4   :  { %v1145_v42 = vrot.slane %v1137_v2, 4  ;;  %v1132_v0 = vsel %vm467_vm9, %v1124_v53, 0.0  ;;  %v1110_v7 = vsel %vm442_vm8, %v1102_v40, 0.0  ;;  %v1096_v33 = vadd.f32 %v1088_v4, %v1048_v12 }
 0x3c5   :  { %v1154_v56 = vsel %vm492_vm10, %v1146_v8, 0.0  ;;  %v1140_v6 = vadd.f32 %v1132_v0, %v1116_v59  ;;  %v1131_v9 = vsel %vm467_vm9, %v1123_v46, 0.0  ;;  %v1118_v37 = vadd.f32 %v1110_v7, %v1094_v60 }
 0x3c6   :  { %v1162_v25 = vadd.f32 %v1154_v56, %v1138_v43  ;;  %v1153_v36 = vsel %vm492_vm10, %v1145_v42, 0.0  ;;  %v1139_v47 = vadd.f32 %v1131_v9, %v1115_v61  ;;  %v1109_v48 = vsel %vm442_vm8, %v1101_v22, 0.0 }
 0x3c7   :  { %v1161_v44 = vadd.f32 %v1153_v36, %v1137_v2  ;;  %v1148_v34 = vrot.slane %v1140_v6, 4  ;;  %v1126_v12 = vrot.slane %v1118_v37, 6  ;;  %v1117_v23 = vadd.f32 %v1109_v48, %v1093_v63 }
 0x3c8   :  { %v19133_v31 = vadd.f32 %v16230_v16, %v1162_v25  ;;  %v1147_v50 = vrot.slane %v1139_v47, 4  ;;  %v1104_v29 = vrot.slane %v1096_v33, 7  ;;  %v1095_v51 = vadd.f32 %v1087_v41, %v19093_v10 }
 0x3c9   :  { %v19136_v52 = vadd.f32 %v16230_v16, %v1161_v44  ;;  %v1156_v15 = vsel %vm492_vm10, %v1148_v34, 0.0  ;;  %v1134_v24 = vsel %vm467_vm9, %v1126_v12, 0.0  ;;  %v1125_v62 = vrot.slane %v1117_v23, 6 }
 0x3ca   :  { %v1164_v54 = vadd.f32 %v1156_v15, %v1140_v6  ;;  %v1155_v28 = vsel %vm492_vm10, %v1147_v50, 0.0  ;;  %v1142_v55 = vadd.f32 %v1134_v24, %v1118_v37  ;;  %v1112_v57 = vsel %vm442_vm8, %v1104_v29, 0.0  ;;  %1279 = vrot.lane.b32.xlu1 %v19133_v31, %s18618_s30 }
 0x3cb   :  { %v1163_v10 = vadd.f32 %v1155_v28, %v1139_v47  ;;  %v1133_v32 = vsel %vm467_vm9, %v1125_v62, 0.0  ;;  %v1120_v58 = vadd.f32 %v1112_v57, %v1096_v33  ;;  %v1103_v30 = vrot.slane %v1095_v51, 7  ;;  %1200 = vrot.lane.b32.xlu0 %v19136_v52, %s18618_s30 }
 0x3cc   :  { %v19152_v19 = vadd.f32 %v16230_v16, %v1164_v54  ;;  %v1150_v39 = vrot.slane %v1142_v55, 4  ;;  %v1141_v45 = vadd.f32 %v1133_v32, %v1117_v23  ;;  %v19193_v37 = vmul.f32 0.4472136, %v19133_v31 }
 0x3cd   :  { %v19154_v27 = vadd.f32 %v16230_v16, %v1163_v10  ;;  %v1128_v59 = vrot.slane %v1120_v58, 6  ;;  %v1111_v38 = vsel %vm442_vm8, %v1103_v30, 0.0  ;;  %v19197_v25 = vmul.f32 0.4472136, %v19136_v52 }
 0x3ce   :  { %v1158_v60 = vsel %vm492_vm10, %v1150_v39, 0.0  ;;  %v1149_v43 = vrot.slane %v1141_v45, 4  ;;  %v1119_v20 = vadd.f32 %v1111_v38, %v1095_v51  ;;  %1435 = vrot.lane.b32.xlu1 %v19152_v19, %s18618_s30  ;;  %v19209_v47 = vmul.f32 0.4472136, %v19152_v19 }
 0x3cf   :  { %v1166_v3 = vadd.f32 %v1158_v60, %v1142_v55  ;;  %v1136_v61 = vsel %vm467_vm9, %v1128_v59, 0.0  ;;  %1357 = vrot.lane.b32.xlu0 %v19154_v27, %s18618_s30  ;;  %v19215_v48 = vmul.f32 0.4472136, %v19154_v27  ;;  %v19264_v24 = vsel %vm1189_vm13, 0.0, %v18609_v17 }
 0x3d0   :  { %v1157_v63 = vsel %vm492_vm10, %v1149_v43, 0.0  ;;  %v1144_v1 = vadd.f32 %v1136_v61, %v1120_v58  ;;  %v1127_v2 = vrot.slane %v1119_v20, 6 }
 0x3d1   :  { %v19168_v53 = vadd.f32 %v16230_v16, %v1166_v3  ;;  %v1165_v40 = vadd.f32 %v1157_v63, %v1141_v45 }
 0x3d2   :  { %v1152_v4 = vrot.slane %v1144_v1, 4  ;;  %v1135_v5 = vsel %vm467_vm9, %v1127_v2, 0.0 }
 0x3d3   :  { %v19172_v8 = vadd.f32 %v16230_v16, %v1165_v40  ;;  %v1143_v46 = vadd.f32 %v1135_v5, %v1119_v20  ;;  %1591 = vrot.lane.b32.xlu1 %v19168_v53, %s18618_s30  ;;  %v19228_v12 = vmul.f32 0.4472136, %v19168_v53 }
 0x3d4   :  { %v1160_v22 = vsel %vm492_vm10, %v1152_v4, 0.0 }
 0x3d5   :  { %v1168_v41 = vadd.f32 %v1160_v22, %v1144_v1  ;;  %v1151_v42 = vrot.slane %v1143_v46, 4  ;;  %1513 = vrot.lane.b32.xlu0 %v19172_v8, %s18618_s30  ;;  %v19235_v23 = vmul.f32 0.4472136, %v19172_v8 }
 0x3d7   :  { %v19180_v0 = vadd.f32 %v16230_v16, %v1168_v41  ;;  %v1159_v7 = vsel %vm492_vm10, %v1151_v42, 0.0 }
 0x3d8   :  { %v1167_v33 = vadd.f32 %v1159_v7, %v1143_v46 }
 0x3d9   :  { %1747 = vrot.lane.b32.xlu1 %v19180_v0, %s18618_s30  ;;  %v19246_v29 = vmul.f32 0.4472136, %v19180_v0 }
 0x3da   :  { %v19186_v56 = vadd.f32 %v16230_v16, %v1167_v33 }
 0x3dc   :  { %1669 = vrot.lane.b32.xlu0 %v19186_v56, %s18618_s30  ;;  %v19253_v15 = vmul.f32 0.4472136, %v19186_v56 }
 0x43c   :  { %v1280_v6 = vpop.permute.xlu1 %1279 }
 0x43d   :  { %v1201_v9 = vpop.permute.xlu0 %1200  ;;  %17036 = vmatpush3.xpose.msk.msra.mxu1 %vm1202_vm12, %v1280_v6 }
 0x43e   :  { %17031 = vmatpush3.xpose.msk.msra.mxu0 %vm1202_vm12, %v1201_v9  ;;  %17045 = vmatprep.subr.mxu1 %v21687_v26 }
 0x43f   :  { %17040 = vmatprep.subr.mxu0 %v21687_v26 }
 0x440   :  { %17038 = vmatmul.mubr.msk.f32.vlgmr.msra.gmra.mrb[24].mxu1 %vm1202_vm12, %v19193_v37  ;;  %v1436_v16 = vpop.permute.xlu1 %1435 }
 0x441   :  { %17033 = vmatmul.mubr.msk.f32.vlgmr.msra.gmra.mrb[24].mxu0 %vm1202_vm12, %v19197_v25  ;;  %v1358_v36 = vpop.permute.xlu0 %1357  ;;  %17046 = vmatpush3.xpose.msk.msra.mxu1 %vm1202_vm12, %v1436_v16 }
 0x442   :  { %17041 = vmatpush3.xpose.msk.msra.mxu0 %vm1202_vm12, %v1358_v36  ;;  %17047 = vmatprep.mubr.msk.f32.mxu1 %vm18617_vm11, %v21687_v26 }
 0x443   :  { %17042 = vmatprep.mubr.msk.f32.mxu0 %vm18617_vm11, %v21687_v26  ;;  %17055 = vmatprep.subr.mxu1 %v21687_v26 }
 0x444   :  { %17048 = vmatmul.mubr.msk.f32.vlgmr.msra.gmra.mrb[26].mxu1 %vm1202_vm12, %v19209_v47  ;;  %17050 = vmatprep.subr.mxu0 %v21687_v26 }
 0x445   :  { %v1592_v44 = vpop.permute.xlu1 %1591  ;;  %17043 = vmatmul.mubr.msk.f32.vlgmr.msra.gmra.mrb[26].mxu0 %vm1202_vm12, %v19215_v48  ;;  %17057 = vmatprep.mubr.msk.f32.mxu1 %vm18617_vm11, %v21687_v26 }
 0x446   :  { %17056 = vmatpush3.xpose.msk.msra.mxu1 %vm1202_vm12, %v1592_v44  ;;  %17052 = vmatprep.mubr.msk.f32.mxu0 %vm18617_vm11, %v21687_v26 }
 0x447   :  { %v1514_v34 = vpop.permute.xlu0 %1513  ;;  %17065 = vmatprep.subr.mxu1 %v21687_v26 }
 0x448   :  { %17051 = vmatpush3.xpose.msk.msra.mxu0 %vm1202_vm12, %v1514_v34 }
 0x449   :  { %17058 = vmatmul.mubr.msk.f32.vlgmr.msra.gmra.mrb[28].mxu1 %vm1202_vm12, %v19228_v12  ;;  %17060 = vmatprep.subr.mxu0 %v21687_v26 }
 0x44a   :  { %17067 = vmatprep.mubr.msk.f32.mxu1 %vm18617_vm11, %v21687_v26 }
 0x44b   :  { %v1748_v50 = vpop.permute.xlu1 %1747  ;;  %17053 = vmatmul.mubr.msk.f32.vlgmr.msra.gmra.mrb[28].mxu0 %vm1202_vm12, %v19235_v23 }
 0x44c   :  { %17066 = vmatpush3.xpose.msk.msra.mxu1 %vm1202_vm12, %v1748_v50  ;;  %17062 = vmatprep.mubr.msk.f32.mxu0 %vm18617_vm11, %v21687_v26 }
 0x44d   :  { %17075 = vmatprep.subr.mxu1 %v21687_v26 }
 0x44e   :  { %v1670_v51 = vpop.permute.xlu0 %1669 }
 0x44f   :  { %17061 = vmatpush3.xpose.msk.msra.mxu0 %vm1202_vm12, %v1670_v51  ;;  %17068 = vmatmul.mubr.msk.f32.vlgmr.msra.gmra.mrb[30].mxu1 %vm1202_vm12, %v19246_v29 }
 0x450   :  { %17070 = vmatprep.subr.mxu0 %v21687_v26  ;;  %17077 = vmatprep.mubr.msk.f32.mxu1 %vm18617_vm11, %v21687_v26 }
 0x452   :  { %17063 = vmatmul.mubr.msk.f32.vlgmr.msra.gmra.mrb[30].mxu0 %vm1202_vm12, %v19253_v15 }
 0x453   :  { %17072 = vmatprep.mubr.msk.f32.mxu0 %vm18617_vm11, %v21687_v26 }
 0x513   :  { %v1352_v62 = vpop.f32.mrb[24].mxu1 }
 0x514   :  { %v1353_v54 = vadd.f32 %v1352_v62, %v19264_v24  ;;  %v1274_v28 = vpop.f32.mrb[24].mxu0  ;;  %v17039_v55 = vpop.f32.mrb[25].mxu1 }
 0x515   :  { %v1275_v57 = vadd.f32 %v1274_v28, %v19264_v24  ;;  %v17034_v10 = vpop.f32.mrb[25].mxu0 }
 0x516   :  { %v1827_v32 = vsel %vm1202_vm12, %v1353_v54, -inf }
 0x517   :  { %1828 = vmax.xlane.f32.xlu1 %v1827_v32  ;;  %v1508_v58 = vpop.f32.mrb[26].mxu1  ;;  %v1824_v30 = vsel %vm1202_vm12, %v1275_v57, -inf }
 0x518   :  { %v1430_v39 = vpop.f32.mrb[26].mxu0  ;;  %1825 = vmax.xlane.f32.xlu0 %v1824_v30  ;;  %v17049_v14 = vpop.f32.mrb[27].mxu1  ;;  %v1509_v59 = vadd.f32 %v1508_v58, %v19264_v24 }
 0x519   :  { %v1431_v17 = vadd.f32 %v1430_v39, %v19264_v24  ;;  %v17044_v45 = vpop.f32.mrb[27].mxu0 }
 0x51a   :  { %v1833_v1 = vsel %vm1202_vm12, %v1509_v59, -inf }
 0x51b   :  { %v1830_v38 = vsel %vm1202_vm12, %v1431_v17, -inf }
 0x51c   :  { %v1664_v60 = vpop.f32.mrb[28].mxu1  ;;  %1831 = vmax.xlane.f32.xlu0 %v1830_v38 }
 0x51d   :  { %v17059_v43 = vpop.f32.mrb[29].mxu1  ;;  %v1665_v3 = vadd.f32 %v1664_v60, %v19264_v24 }
 0x51e   :  { %v1586_v20 = vpop.f32.mrb[28].mxu0 }
 0x51f   :  { %v1587_v61 = vadd.f32 %v1586_v20, %v19264_v24  ;;  %v17054_v63 = vpop.f32.mrb[29].mxu0  ;;  %v1839_v46 = vsel %vm1202_vm12, %v1665_v3, -inf }
 0x520   :  { %1834 = vmax.xlane.f32.xlu0 %v1833_v1 }
 0x521   :  { %v1836_v2 = vsel %vm1202_vm12, %v1587_v61, -inf }
 0x522   :  { %v1820_v40 = vpop.f32.mrb[30].mxu1  ;;  %1837 = vmax.xlane.f32.xlu1 %v1836_v2 }
 0x523   :  { %v1821_v4 = vadd.f32 %v1820_v40, %v19264_v24  ;;  %v17069_v5 = vpop.f32.mrb[31].mxu1 }
 0x524   :  { %1840 = vmax.xlane.f32.xlu0 %v1839_v46 }
 0x525   :  { %v1742_v22 = vpop.f32.mrb[30].mxu0  ;;  %v1845_v7 = vsel %vm1202_vm12, %v1821_v4, -inf }
 0x526   :  { %v1743_v41 = vadd.f32 %v1742_v22, %v19264_v24  ;;  %v17064_v42 = vpop.f32.mrb[31].mxu0 }
 0x528   :  { %v1842_v33 = vsel %vm1202_vm12, %v1743_v41, -inf  ;;  %1846 = vmax.xlane.f32.xlu0 %v1845_v7 }
 0x529   :  { %1843 = vmax.xlane.f32.xlu1 %v1842_v33 }
 0x53a   :  { %1912 = vrot.lane.b32.xlu1 %v19136_v52, %s18619_s5 }
 0x53e   :  { %2064 = vrot.lane.b32.xlu1 %v19154_v27, %s18619_s5  ;;  %1988 = vrot.lane.b32.xlu0 %v19133_v31, %s18619_s5 }
 0x542   :  { %2140 = vrot.lane.b32.xlu1 %v19152_v19, %s18619_s5  ;;  %2216 = vrot.lane.b32.xlu0 %v19172_v8, %s18619_s5 }
 0x546   :  { %2292 = vrot.lane.b32.xlu1 %v19168_v53, %s18619_s5 }
 0x5a4   :  { %v1829_v6 = vpop.xlane.xlu1 %1828 }
 0x5a5   :  { %v1849_v9 = vsub.f32 %v1353_v54, %v1829_v6  ;;  %v1826_v16 = vpop.xlane.xlu0 %1825 }
 0x5a6   :  { %v1848_v36 = vsub.f32 %v1275_v57, %v1826_v16 }
 0x5a7   :  { %v1858_v44 = vmul.f32 1.442695, %v1849_v9 }
 0x5a8   :  { %v1856_v34 = vmul.f32 1.442695, %v1848_v36 }
 0x5a9   :  { %18172 = vpow2.f32 %v1858_v44  ;;  %v1832_v50 = vpop.xlane.xlu0 %1831 }
 0x5aa   :  { %18174 = vpow2.f32 %v1856_v34  ;;  %v1850_v51 = vsub.f32 %v1431_v17, %v1832_v50 }
 0x5ac   :  { %v1860_v62 = vmul.f32 1.442695, %v1850_v51 }
 0x5ad   :  { %v1835_v28 = vpop.xlane.xlu0 %1834 }
 0x5ae   :  { %18176 = vpow2.f32 %v1860_v62  ;;  %v1851_v55 = vsub.f32 %v1509_v59, %v1835_v28 }
 0x5af   :  { %v1838_v10 = vpop.xlane.xlu1 %1837 }
 0x5b0   :  { %v1862_v32 = vmul.f32 1.442695, %v1851_v55  ;;  %v1852_v58 = vsub.f32 %v1587_v61, %v1838_v10 }
 0x5b1   :  { %v1841_v30 = vpop.xlane.xlu0 %1840 }
 0x5b2   :  { %18178 = vpow2.f32 %v1862_v32  ;;  %v1864_v39 = vmul.f32 1.442695, %v1852_v58  ;;  %v1853_v14 = vsub.f32 %v1665_v3, %v1841_v30 }
 0x5b3   :  { %v19294_v54 = vpop.eup %18172 }
 0x5b4   :  { %v19296_v57 = vpop.eup %18174  ;;  %18180 = vpow2.f32 %v1864_v39  ;;  %v1866_v45 = vmul.f32 1.442695, %v1853_v14  ;;  %v1875_v17 = vsel %vm1202_vm12, %v19294_v54, 0.0 }
 0x5b5   :  { %v1847_v38 = vpop.xlane.xlu0 %1846  ;;  %1876 = vadd.xlane.f32.xlu0 %v1875_v17  ;;  %v1872_v59 = vsel %vm1202_vm12, %v19296_v57, 0.0 }
 0x5b6   :  { %18182 = vpow2.f32 %v1866_v45  ;;  %v1844_v60 = vpop.xlane.xlu1 %1843  ;;  %v1855_v43 = vsub.f32 %v1821_v4, %v1847_v38  ;;  %1873 = vadd.xlane.f32.xlu1 %v1872_v59 }
 0x5b7   :  { %v1854_v20 = vsub.f32 %v1743_v41, %v1844_v60 }
 0x5b8   :  { %v19302_v3 = vpop.eup %18176  ;;  %v1870_v61 = vmul.f32 1.442695, %v1855_v43 }
 0x5b9   :  { %v1868_v63 = vmul.f32 1.442695, %v1854_v20  ;;  %v1989_v1 = vpop.permute.xlu0 %1988  ;;  %v1878_v2 = vsel %vm1202_vm12, %v19302_v3, 0.0 }
 0x5ba   :  { %18184 = vpow2.f32 %v1870_v61  ;;  %v1913_v40 = vpop.permute.xlu1 %1912  ;;  %1879 = vadd.xlane.f32.xlu1 %v1878_v2  ;;  %17076 = vmatpush3.msra.mxu1 %v1989_v1  ;;  %v1182_v61 = vld [vmem:[#allocation2 + $0x8] sm:$0xff] }
 0x5bb   :  { %18186 = vpow2.f32 %v1868_v63  ;;  %17071 = vmatpush3.msra.mxu0 %v1913_v40  ;;  %17085 = vmatprep.subr.mxu1 %v21687_v26 }
 0x5bc   :  { %v19307_v5 = vpop.eup %18178  ;;  %17080 = vmatprep.subr.mxu0 %v21687_v26 }
 0x5bd   :  { %v1881_v4 = vsel %vm1202_vm12, %v19307_v5, 0.0  ;;  %v2217_v44 = vpop.permute.xlu0 %2216 }
 0x5be   :  { %v19312_v46 = vpop.eup %18180  ;;  %1882 = vadd.xlane.f32.xlu0 %v1881_v4  ;;  %v2065_v16 = vpop.permute.xlu1 %2064 }
 0x5bf   :  { %v1884_v22 = vsel %vm1202_vm12, %v19312_v46, 0.0 }
 0x5c0   :  { %v19316_v41 = vpop.eup %18182  ;;  %1885 = vadd.xlane.f32.xlu1 %v1884_v22 }
 0x5c1   :  { %v1887_v42 = vsel %vm1202_vm12, %v19316_v41, 0.0 }
 0x5c2   :  { %1888 = vadd.xlane.f32.xlu0 %v1887_v42  ;;  %v2141_v36 = vpop.permute.xlu1 %2140 }
 0x5c4   :  { %v19320_v7 = vpop.eup %18184 }
 0x5c5   :  { %v19322_v33 = vpop.eup %18186  ;;  %v1893_v6 = vsel %vm1202_vm12, %v19320_v7, 0.0 }
 0x5c6   :  { %v1890_v9 = vsel %vm1202_vm12, %v19322_v33, 0.0  ;;  %1894 = vadd.xlane.f32.xlu0 %v1893_v6  ;;  %v2293_v34 = vpop.permute.xlu1 %2292 }
 0x5c7   :  { %1891 = vadd.xlane.f32.xlu1 %v1890_v9 }
 0x5d8   :  { %2444 = vrot.lane.b32.xlu1 %v19180_v0, %s18619_s5 }
 0x5dc   :  { %2661 = vrot.lane.b32.xlu1 %v19197_v25, %s18608_s18  ;;  %2368 = vrot.lane.b32.xlu0 %v19186_v56, %s18619_s5 }
 0x5e0   :  { %2739 = vrot.lane.b32.xlu1 %v19193_v37, %s18608_s18  ;;  %2663 = vrot.lane.b32.xlu0 %v19136_v52, %s18620_s6 }
 0x5e4   :  { %2817 = vrot.lane.b32.xlu1 %v19215_v48, %s18608_s18  ;;  %2741 = vrot.lane.b32.xlu0 %v19133_v31, %s18620_s6 }
 0x5e8   :  { %2895 = vrot.lane.b32.xlu1 %v19209_v47, %s18608_s18  ;;  %2819 = vrot.lane.b32.xlu0 %v19154_v27, %s18620_s6 }
 0x5ec   :  { %3053 = vrot.lane.b32.xlu1 %v19168_v53, %s18620_s6  ;;  %2897 = vrot.lane.b32.xlu0 %v19152_v19, %s18620_s6 }
 0x5f0   :  { %3051 = vrot.lane.b32.xlu1 %v19228_v12, %s18608_s18  ;;  %2975 = vrot.lane.b32.xlu0 %v19172_v8, %s18620_s6 }
 0x5f4   :  { %3209 = vrot.lane.b32.xlu1 %v19180_v0, %s18620_s6  ;;  %2973 = vrot.lane.b32.xlu0 %v19235_v23, %s18608_s18 }
 0x5f8   :  { %3207 = vrot.lane.b32.xlu1 %v19246_v29, %s18608_s18  ;;  %3131 = vrot.lane.b32.xlu0 %v19186_v56, %s18620_s6 }
 0x5fc   :  { %3129 = vrot.lane.b32.xlu0 %v19253_v15, %s18608_s18 }
 0x642   :  { %v1877_v50 = vpop.xlane.xlu0 %1876 }
 0x643   :  { %18188 = vrcp.f32 %v1877_v50  ;;  %v1874_v51 = vpop.xlane.xlu1 %1873 }
 0x644   :  { %18190 = vrcp.f32 %v1874_v51 }
 0x647   :  { %v1880_v62 = vpop.xlane.xlu1 %1879 }
 0x648   :  { %18192 = vrcp.f32 %v1880_v62 }
 0x64b   :  { %v1883_v28 = vpop.xlane.xlu0 %1882 }
 0x64c   :  { %18194 = vrcp.f32 %v1883_v28 }
 0x64d   :  { %v18189_v55 = vpop.eup %18188  ;;  %v1886_v10 = vpop.xlane.xlu1 %1885 }
 0x64e   :  { %v18191_v32 = vpop.eup %18190  ;;  %18196 = vrcp.f32 %v1886_v10  ;;  %v1905_v58 = vmul.f32 %v18189_v55, %v19294_v54 }
 0x64f   :  { %v1889_v30 = vpop.xlane.xlu0 %1888  ;;  %v1904_v39 = vmul.f32 %v18191_v32, %v19296_v57 }
 0x650   :  { %18198 = vrcp.f32 %v1889_v30  ;;  %17078 = vmatmul.mubr.msk.f32.vlgmr.msra.gmra.mrb[32].mxu1 %vm1202_vm12, %v1905_v58 }
 0x651   :  { %17086 = vmatpush3.msra.mxu1 %v2141_v36  ;;  %17073 = vmatmul.mubr.msk.f32.vlgmr.msra.gmra.mrb[32].mxu0 %vm1202_vm12, %v1904_v39 }
 0x652   :  { %v18193_v14 = vpop.eup %18192  ;;  %17081 = vmatpush3.msra.mxu0 %v2065_v16  ;;  %17082 = vmatprep.mubr.msk.f32.mxu0 %vm18617_vm11, %v21687_v26 }
 0x653   :  { %v1895_v45 = vpop.xlane.xlu0 %1894  ;;  %17090 = vmatprep.subr.mxu0 %v21687_v26  ;;  %v1906_v17 = vmul.f32 %v18193_v14, %v19302_v3  ;;  %17087 = vmatprep.mubr.msk.f32.mxu1 %vm18617_vm11, %v21687_v26 }
 0x654   :  { %v1892_v54 = vpop.xlane.xlu1 %1891  ;;  %18200 = vrcp.f32 %v1895_v45  ;;  %17095 = vmatprep.subr.mxu1 %v21687_v26 }
 0x655   :  { %18202 = vrcp.f32 %v1892_v54  ;;  %17083 = vmatmul.mubr.msk.f32.vlgmr.msra.gmra.mrb[34].mxu0 %vm1202_vm12, %v1906_v17 }
 0x656   :  { %v18195_v57 = vpop.eup %18194  ;;  %17091 = vmatpush3.msra.mxu0 %v2217_v44  ;;  %17092 = vmatprep.mubr.msk.f32.mxu0 %vm18617_vm11, %v21687_v26 }
 0x657   :  { %17100 = vmatprep.subr.mxu0 %v21687_v26  ;;  %v1907_v38 = vmul.f32 %v18195_v57, %v19307_v5  ;;  %v2369_v43 = vpop.permute.xlu0 %2368 }
 0x658   :  { %v18197_v59 = vpop.eup %18196  ;;  %v2445_v60 = vpop.permute.xlu1 %2444 }
 0x659   :  { %17088 = vmatmul.mubr.msk.f32.vlgmr.msra.gmra.mrb[34].mxu1 %vm1202_vm12, %v1907_v38  ;;  %v1908_v20 = vmul.f32 %v18197_v59, %v19312_v46 }
 0x65a   :  { %v18199_v3 = vpop.eup %18198  ;;  %17096 = vmatpush3.msra.mxu1 %v2293_v34  ;;  %17097 = vmatprep.mubr.msk.f32.mxu1 %vm18617_vm11, %v21687_v26 }
 0x65b   :  { %17093 = vmatmul.mubr.msk.f32.vlgmr.msra.gmra.mrb[36].mxu0 %vm1202_vm12, %v1908_v20  ;;  %17105 = vmatprep.subr.mxu1 %v21687_v26  ;;  %v1909_v63 = vmul.f32 %v18199_v3, %v19316_v41  ;;  %v2664_v40 = vpop.permute.xlu0 %2663 }
 0x65c   :  { %v2662_v1 = vpop.permute.xlu1 %2661  ;;  %17101 = vmatpush3.msra.mxu0 %v2369_v43  ;;  %17102 = vmatprep.mubr.msk.f32.mxu0 %vm18617_vm11, %v21687_v26 }
 0x65d   :  { %17098 = vmatmul.mubr.msk.f32.vlgmr.msra.gmra.mrb[36].mxu1 %vm1202_vm12, %v1909_v63  ;;  %17110 = vmatprep.subr.mxu0 %v1182_v61 }
 0x65e   :  { %v18201_v2 = vpop.eup %18200  ;;  %17106 = vmatpush3.msra.mxu1 %v2445_v60  ;;  %17107 = vmatprep.mubr.msk.f32.mxu1 %vm18617_vm11, %v21687_v26 }
 0x65f   :  { %v18203_v5 = vpop.eup %18202  ;;  %v1911_v4 = vmul.f32 %v18201_v2, %v19320_v7  ;;  %17124 = vmatprep.subr.mxu1 %v21687_v26  ;;  %v2742_v41 = vpop.permute.xlu0 %2741 }
 0x660   :  { %v2740_v46 = vpop.permute.xlu1 %2739  ;;  %v1910_v22 = vmul.f32 %v18203_v5, %v19322_v33 }
 0x661   :  { %17108 = vmatmul.mubr.msk.f32.vlgmr.msra.gmra.mrb[38].mxu1 %vm1202_vm12, %v1911_v4 }
 0x662   :  { %17103 = vmatmul.mubr.msk.f32.vlgmr.msra.gmra.mrb[38].mxu0 %vm1202_vm12, %v1910_v22  ;;  %17126 = vmatprep.mubr.msk.f32.mxu1 %vm18617_vm11, %v21687_v26 }
 0x663   :  { %17111 = vmatpush3.msra.mxu0 %v1182_v61  ;;  %v2820_v33 = vpop.permute.xlu0 %2819 }
 0x664   :  { %v2818_v42 = vpop.permute.xlu1 %2817  ;;  %17144 = vmatprep.subr.mxu0 %v21687_v26 }
 0x665   :  { %17125 = vmatpush3.xpose.msk.msra.mxu1 %vm1202_vm12, %v2664_v40 }
 0x666   :  { %17129 = vmatprep.subr.mxu1 %v21687_v26 }
 0x667   :  { %v2898_v9 = vpop.permute.xlu0 %2897 }
 0x668   :  { %v2896_v7 = vpop.permute.xlu1 %2895  ;;  %17127 = vmatmul.mubr.msk.f32.vlgmr.msra.gmra.mrb[40].mxu1 %vm1202_vm12, %v2662_v1 }
 0x669   :  { %17130 = vmatpush3.xpose.msk.msra.mxu1 %vm1202_vm12, %v2742_v41  ;;  %17131 = vmatprep.mubr.msk.f32.mxu1 %vm18617_vm11, %v21687_v26 }
 0x66a   :  { %17134 = vmatprep.subr.mxu1 %v21687_v26 }
 0x66b   :  { %v2976_v28 = vpop.permute.xlu0 %2975 }
 0x66c   :  { %v3054_v6 = vpop.permute.xlu1 %3053  ;;  %17132 = vmatmul.mubr.msk.f32.vlgmr.msra.gmra.mrb[42].mxu1 %vm1202_vm12, %v2740_v46 }
 0x66d   :  { %17135 = vmatpush3.xpose.msk.msra.mxu1 %vm1202_vm12, %v2820_v33  ;;  %17136 = vmatprep.mubr.msk.f32.mxu1 %vm18617_vm11, %v21687_v26 }
 0x66e   :  { %17139 = vmatprep.subr.mxu1 %v21687_v26 }
 0x66f   :  { %v2974_v17 = vpop.permute.xlu0 %2973 }
 0x670   :  { %v3052_v16 = vpop.permute.xlu1 %3051  ;;  %17137 = vmatmul.mubr.msk.f32.vlgmr.msra.gmra.mrb[44].mxu1 %vm1202_vm12, %v2818_v42 }
 0x671   :  { %17140 = vmatpush3.xpose.msk.msra.mxu1 %vm1202_vm12, %v2898_v9  ;;  %17141 = vmatprep.mubr.msk.f32.mxu1 %vm18617_vm11, %v21687_v26 }
 0x672   :  { %17149 = vmatprep.subr.mxu1 %v21687_v26 }
 0x673   :  { %v3132_v60 = vpop.permute.xlu0 %3131 }
 0x674   :  { %17142 = vmatmul.mubr.msk.f32.vlgmr.msra.gmra.mrb[46].mxu1 %vm1202_vm12, %v2896_v7  ;;  %v3210_v36 = vpop.permute.xlu1 %3209 }
 0x675   :  { %17150 = vmatpush3.xpose.msk.msra.mxu1 %vm1202_vm12, %v3054_v6  ;;  %17151 = vmatprep.mubr.msk.f32.mxu1 %vm18617_vm11, %v21687_v26 }
 0x676   :  { %17159 = vmatprep.subr.mxu1 %v21687_v26 }
 0x677   :  { %v3130_v61 = vpop.permute.xlu0 %3129 }
 0x678   :  { %17152 = vmatmul.mubr.msk.f32.vlgmr.msra.gmra.mrb[48].mxu1 %vm1202_vm12, %v3052_v16  ;;  %v3208_v44 = vpop.permute.xlu1 %3207 }
 0x679   :  { %17160 = vmatpush3.xpose.msk.msra.mxu1 %vm1202_vm12, %v3210_v36  ;;  %17161 = vmatprep.mubr.msk.f32.mxu1 %vm18617_vm11, %v21687_v26 }
 0x67a   :  { %17169 = vmatprep.subr.mxu1 %v21687_v26 }
 0x67c   :  { %17162 = vmatmul.mubr.msk.f32.vlgmr.msra.gmra.mrb[50].mxu1 %vm1202_vm12, %v3208_v44 }
 0x67d   :  { %17171 = vmatprep.mubr.msk.f32.mxu1 %vm18617_vm11, %v21687_v26 }
 0x723   :  { %v2060_v34 = vpop.f32.mrb[32].mxu1 }
 0x724   :  { %v1984_v50 = vpop.f32.mrb[32].mxu0  ;;  %v17079_v51 = vpop.f32.mrb[33].mxu1 }
 0x725   :  { %v17074_v62 = vpop.f32.mrb[33].mxu0  ;;  %17112 = vmatprep.mubr.msk.f32.mxu0 %vm1202_vm12, %v1984_v50 }
 0x726   :  { %17113 = vmatmul.mubr.msk.f32.vlgmr.msra.gmra.mrb[40].mxu0 %vm1202_vm12, %v2060_v34 }
 0x727   :  { %17145 = vmatpush3.xpose.msk.msra.mxu0 %vm1202_vm12, %v2976_v28 }
 0x728   :  { %v2136_v55 = vpop.f32.mrb[34].mxu0  ;;  %17154 = vmatprep.subr.mxu0 %v21687_v26 }
 0x729   :  { %v17084_v10 = vpop.f32.mrb[35].mxu0  ;;  %17115 = vmatprep.mubr.msk.f32.mxu0 %vm1202_vm12, %v2136_v55 }
 0x72c   :  { %v2212_v32 = vpop.f32.mrb[34].mxu1 }
 0x72d   :  { %v17089_v58 = vpop.f32.mrb[35].mxu1  ;;  %17116 = vmatmul.mubr.msk.f32.gmra.mrb[42].mxu0 %vm1202_vm12, %v2212_v32 }
 0x72e   :  { %v2288_v30 = vpop.f32.mrb[36].mxu0 }
 0x72f   :  { %v17094_v39 = vpop.f32.mrb[37].mxu0  ;;  %17118 = vmatprep.mubr.msk.f32.mxu0 %vm1202_vm12, %v2288_v30 }
 0x730   :  { %v2364_v14 = vpop.f32.mrb[36].mxu1 }
 0x731   :  { %v17099_v45 = vpop.f32.mrb[37].mxu1  ;;  %17119 = vmatmul.mubr.msk.f32.gmra.mrb[44].mxu0 %vm1202_vm12, %v2364_v14 }
 0x734   :  { %v2516_v54 = vpop.f32.mrb[38].mxu1 }
 0x735   :  { %v2440_v57 = vpop.f32.mrb[38].mxu0  ;;  %v17109_v38 = vpop.f32.mrb[39].mxu1 }
 0x736   :  { %v17104_v59 = vpop.f32.mrb[39].mxu0  ;;  %17121 = vmatprep.mubr.msk.f32.mxu0 %vm1202_vm12, %v2440_v57 }
 0x737   :  { %17122 = vmatmul.mubr.msk.f32.gmra.mrb[46].mxu0 %vm1202_vm12, %v2516_v54 }
 0x738   :  { %17146 = vmatprep.mubr.msk.f32.mxu0 %vm18617_vm11, %v21687_v26 }
 0x73b   :  { %17147 = vmatmul.mubr.msk.f32.vlgmr.msra.gmra.mrb[48].mxu0 %vm1202_vm12, %v2974_v17  ;;  %v2735_v43 = vpop.f32.mrb[40].mxu1 }
 0x73c   :  { %17155 = vmatpush3.xpose.msk.msra.mxu0 %vm1202_vm12, %v3132_v60  ;;  %v19445_v20 = vadd.f32 %v2735_v43, %v19264_v24  ;;  %v17128_v3 = vpop.f32.mrb[41].mxu1  ;;  %17156 = vmatprep.mubr.msk.f32.mxu0 %vm18617_vm11, %v21687_v26 }
 0x73d   :  { %17164 = vmatprep.subr.mxu0 %v21687_v26 }
 0x73e   :  { %v3285_v63 = vsel %vm1202_vm12, %v19445_v20, -inf }
 0x73f   :  { %17157 = vmatmul.mubr.msk.f32.vlgmr.msra.gmra.mrb[50].mxu0 %vm1202_vm12, %v3130_v61  ;;  %3286 = vmax.xlane.f32.xlu0 %v3285_v63  ;;  %v2813_v1 = vpop.f32.mrb[42].mxu1 }
 0x740   :  { %v2814_v2 = vadd.f32 %v2813_v1, %v19264_v24  ;;  %v17133_v40 = vpop.f32.mrb[43].mxu1  ;;  %17166 = vmatprep.mubr.msk.f32.mxu0 %vm18617_vm11, %v21687_v26 }
 0x742   :  { %v3288_v5 = vsel %vm1202_vm12, %v2814_v2, -inf }
 0x743   :  { %3289 = vmax.xlane.f32.xlu1 %v3288_v5  ;;  %v2891_v4 = vpop.f32.mrb[44].mxu1 }
 0x744   :  { %v2892_v46 = vadd.f32 %v2891_v4, %v19264_v24  ;;  %v17138_v22 = vpop.f32.mrb[45].mxu1 }
 0x746   :  { %v3291_v41 = vsel %vm1202_vm12, %v2892_v46, -inf }
 0x747   :  { %3292 = vmax.xlane.f32.xlu0 %v3291_v41  ;;  %v2969_v42 = vpop.f32.mrb[46].mxu1 }
 0x748   :  { %v2970_v7 = vadd.f32 %v2969_v42, %v19264_v24  ;;  %v17143_v33 = vpop.f32.mrb[47].mxu1 }
 0x74a   :  { %v3294_v6 = vsel %vm1202_vm12, %v2970_v7, -inf }
 0x74b   :  { %3295 = vmax.xlane.f32.xlu0 %v3294_v6  ;;  %v3125_v9 = vpop.f32.mrb[48].mxu1 }
 0x74c   :  { %v3126_v16 = vadd.f32 %v3125_v9, %v19264_v24  ;;  %v17153_v36 = vpop.f32.mrb[49].mxu1 }
 0x74e   :  { %v3300_v44 = vsel %vm1202_vm12, %v3126_v16, -inf }
 0x74f   :  { %3301 = vmax.xlane.f32.xlu0 %v3300_v44  ;;  %v3281_v34 = vpop.f32.mrb[50].mxu1 }
 0x750   :  { %v3282_v50 = vadd.f32 %v3281_v34, %v19264_v24  ;;  %v17163_v51 = vpop.f32.mrb[51].mxu1 }
 0x752   :  { %v3306_v62 = vsel %vm1202_vm12, %v3282_v50, -inf }
 0x753   :  { %3307 = vmax.xlane.f32.xlu0 %v3306_v62 }
 0x7cc   :  { %v3287_v28 = vpop.xlane.xlu0 %3286 }
 0x7cd   :  { %v3309_v5 = vsub.f32 %v19445_v20, %v3287_v28 }
 0x7cf   :  { %v3317_v4 = vmul.f32 1.442695, %v3309_v5 }
 0x7d0   :  { %v3290_v55 = vpop.xlane.xlu1 %3289 }
 0x7d1   :  { %v3310_v10 = vsub.f32 %v2814_v2, %v3290_v55 }
 0x7d3   :  { %v3319_v32 = vmul.f32 1.442695, %v3310_v10 }
 0x7d4   :  { %v3293_v58 = vpop.xlane.xlu0 %3292 }
 0x7d5   :  { %18204 = vpow2.f32 %v3319_v32  ;;  %v3311_v22 = vsub.f32 %v2892_v46, %v3293_v58 }
 0x7d7   :  { %v3321_v41 = vmul.f32 1.442695, %v3311_v22 }
 0x7d8   :  { %v3296_v30 = vpop.xlane.xlu0 %3295 }
 0x7d9   :  { %v3312_v39 = vsub.f32 %v2970_v7, %v3296_v30 }
 0x7db   :  { %v3323_v14 = vmul.f32 1.442695, %v3312_v39 }
 0x7dc   :  { %v3302_v45 = vpop.xlane.xlu0 %3301 }
 0x7dd   :  { %18206 = vpow2.f32 %v3323_v14  ;;  %v3314_v17 = vsub.f32 %v3126_v16, %v3302_v45 }
 0x7df   :  { %v19465_v54 = vpop.eup %18204  ;;  %v3327_v57 = vmul.f32 1.442695, %v3314_v17 }
 0x7e0   :  { %v3308_v38 = vpop.xlane.xlu0 %3307  ;;  %v3336_v59 = vsel %vm1202_vm12, %v19465_v54, 0.0 }
 0x7e1   :  { %18208 = vpow2.f32 %v3327_v57  ;;  %v3316_v60 = vsub.f32 %v3282_v50, %v3308_v38  ;;  %3337 = vadd.xlane.f32.xlu0 %v3336_v59 }
 0x7e3   :  { %v3331_v43 = vmul.f32 1.442695, %v3316_v60 }
 0x7e5   :  { %18210 = vpow2.f32 %v3331_v43 }
 0x7e6   :  { %18212 = vpow2.f32 %v3317_v4 }
 0x7e7   :  { %v19469_v3 = vpop.eup %18206  ;;  %18214 = vpow2.f32 %v3321_v41 }
 0x7e8   :  { %v3342_v61 = vsel %vm1202_vm12, %v19469_v3, 0.0 }
 0x7e9   :  { %3343 = vadd.xlane.f32.xlu0 %v3342_v61 }
 0x7eb   :  { %v19473_v63 = vpop.eup %18208 }
 0x7ec   :  { %v3348_v1 = vsel %vm1202_vm12, %v19473_v63, 0.0 }
 0x7ed   :  { %3349 = vadd.xlane.f32.xlu0 %v3348_v1 }
 0x7ef   :  { %v19477_v2 = vpop.eup %18210 }
 0x7f0   :  { %v3354_v40 = vsel %vm1202_vm12, %v19477_v2, 0.0  ;;  %v18213_v36 = vpop.eup %18212 }
 0x7f1   :  { %3355 = vadd.xlane.f32.xlu0 %v3354_v40  ;;  %v3333_v44 = vsel %vm1202_vm12, %v18213_v36, 0.0  ;;  %v18215_v34 = vpop.eup %18214 }
 0x7f2   :  { %v3339_v50 = vsel %vm1202_vm12, %v18215_v34, 0.0 }
 0x807   :  { %3449 = vrot.lane.b32.xlu0 %v19133_v31, %s18621_s7 }
 0x80b   :  { %3677 = vrot.lane.b32.xlu0 %v19172_v8, %s18621_s7 }
 0x80e   :  { %v3047_v42 = vpop.f32.mrb[48].mxu0 }
 0x80f   :  { %v3048_v7 = vadd.f32 %v3047_v42, %v19264_v24  ;;  %v17148_v33 = vpop.f32.mrb[49].mxu0  ;;  %3829 = vrot.lane.b32.xlu0 %v19186_v56, %s18621_s7 }
 0x811   :  { %v3297_v20 = vsel %vm1202_vm12, %v3048_v7, -inf }
 0x812   :  { %v3203_v6 = vpop.f32.mrb[50].mxu0  ;;  %3298 = vmax.xlane.f32.xlu1 %v3297_v20 }
 0x813   :  { %v3204_v9 = vadd.f32 %v3203_v6, %v19264_v24  ;;  %v17158_v46 = vpop.f32.mrb[51].mxu0  ;;  %4120 = vrot.lane.b32.xlu0 %v19136_v52, %s18622_s8 }
 0x815   :  { %v3303_v16 = vsel %vm1202_vm12, %v3204_v9, -inf }
 0x816   :  { %3304 = vmax.xlane.f32.xlu1 %v3303_v16 }
 0x817   :  { %4198 = vrot.lane.b32.xlu0 %v19133_v31, %s18622_s8 }
 0x81a   :  { %3334 = vadd.xlane.f32.xlu1 %v3333_v44 }
 0x81b   :  { %4276 = vrot.lane.b32.xlu0 %v19154_v27, %s18622_s8 }
 0x81e   :  { %3340 = vadd.xlane.f32.xlu1 %v3339_v50 }
 0x81f   :  { %4354 = vrot.lane.b32.xlu0 %v19152_v19, %s18622_s8 }
 0x823   :  { %4432 = vrot.lane.b32.xlu0 %v19172_v8, %s18622_s8 }
 0x827   :  { %4430 = vrot.lane.b32.xlu0 %v19235_v23, %s18623_s3 }
 0x82b   :  { %4588 = vrot.lane.b32.xlu0 %v19186_v56, %s18622_s8 }
 0x82f   :  { %3373 = vrot.lane.b32.xlu1 %v19136_v52, %s18621_s7  ;;  %4586 = vrot.lane.b32.xlu0 %v19253_v15, %s18623_s3 }
 0x833   :  { %3525 = vrot.lane.b32.xlu1 %v19154_v27, %s18621_s7 }
 0x837   :  { %3601 = vrot.lane.b32.xlu1 %v19152_v19, %s18621_s7 }
 0x83b   :  { %3753 = vrot.lane.b32.xlu1 %v19168_v53, %s18621_s7 }
 0x86e   :  { %v3338_v51 = vpop.xlane.xlu0 %3337 }
 0x86f   :  { %18216 = vrcp.f32 %v3338_v51 }
 0x876   :  { %v3344_v62 = vpop.xlane.xlu0 %3343 }
 0x879   :  { %v18217_v10 = vpop.eup %18216 }
 0x87a   :  { %v3350_v28 = vpop.xlane.xlu0 %3349  ;;  %v3366_v58 = vmul.f32 %v18217_v10, %v19465_v54 }
 0x87e   :  { %v19518_v55 = vpop.xlane.xlu0 %3355 }
 0x882   :  { %v3450_v32 = vpop.permute.xlu0 %3449 }
 0x883   :  { %17170 = vmatpush3.msra.mxu1 %v3450_v32 }
 0x884   :  { %17172 = vmatmul.mubr.msk.f32.vlgmr.msra.gmra.mrb[52].mxu1 %vm1202_vm12, %v3366_v58  ;;  %17179 = vmatprep.subr.mxu1 %v21687_v26 }
 0x885   :  { %17181 = vmatprep.mubr.msk.f32.mxu1 %vm18617_vm11, %v21687_v26 }
 0x886   :  { %v3678_v6 = vpop.permute.xlu0 %3677 }
 0x89f   :  { %v3299_v30 = vpop.xlane.xlu1 %3298 }
 0x8a0   :  { %v3313_v39 = vsub.f32 %v3048_v7, %v3299_v30 }
 0x8a2   :  { %v3325_v14 = vmul.f32 1.442695, %v3313_v39 }
 0x8a3   :  { %v3305_v45 = vpop.xlane.xlu1 %3304 }
 0x8a4   :  { %18218 = vpow2.f32 %v3325_v14  ;;  %v3315_v17 = vsub.f32 %v3204_v9, %v3305_v45 }
 0x8a6   :  { %v3329_v57 = vmul.f32 1.442695, %v3315_v17 }
 0x8a7   :  { %v3335_v38 = vpop.xlane.xlu1 %3334 }
 0x8a8   :  { %18220 = vpow2.f32 %v3329_v57 }
 0x8a9   :  { %18222 = vrcp.f32 %v3335_v38 }
 0x8aa   :  { %18224 = vrcp.f32 %v3344_v62 }
 0x8ab   :  { %v3341_v54 = vpop.xlane.xlu1 %3340 }
 0x8ac   :  { %18226 = vrcp.f32 %v3341_v54 }
 0x8ad   :  { %18228 = vrcp.f32 %v3350_v28 }
 0x8ae   :  { %v19525_v59 = vpop.eup %18218  ;;  %18230 = vrcp.f32 %v19518_v55  ;;  %v1183_v55 = vld [vmem:[#allocation2 + $0x10] sm:$0xff] }
 0x8af   :  { %v3374_v60 = vpop.permute.xlu1 %3373  ;;  %v3345_v43 = vsel %vm1202_vm12, %v19525_v59, 0.0 }
 0x8b0   :  { %3346 = vadd.xlane.f32.xlu1 %v3345_v43  ;;  %17165 = vmatpush3.msra.mxu0 %v3374_v60 }
 0x8b1   :  { %17174 = vmatprep.subr.mxu0 %v21687_v26 }
 0x8b2   :  { %v19530_v61 = vpop.eup %18220 }
 0x8b3   :  { %v18223_v1 = vpop.eup %18222  ;;  %v3526_v40 = vpop.permute.xlu1 %3525  ;;  %v3351_v5 = vsel %vm1202_vm12, %v19530_v61, 0.0 }
 0x8b4   :  { %v18225_v4 = vpop.eup %18224  ;;  %3352 = vadd.xlane.f32.xlu1 %v3351_v5  ;;  %v3365_v22 = vmul.f32 %v18223_v1, %v18213_v36 }
 0x8b5   :  { %v3368_v33 = vmul.f32 %v18225_v4, %v19469_v3 }
 0x8b6   :  { %v18227_v41 = vpop.eup %18226  ;;  %17167 = vmatmul.mubr.msk.f32.vlgmr.msra.gmra.mrb[52].mxu0 %vm1202_vm12, %v3365_v22 }
 0x8b7   :  { %17175 = vmatpush3.msra.mxu0 %v3526_v40  ;;  %v3602_v42 = vpop.permute.xlu1 %3601  ;;  %17176 = vmatprep.mubr.msk.f32.mxu0 %vm18617_vm11, %v21687_v26  ;;  %v3367_v7 = vmul.f32 %v18227_v41, %v18215_v34  ;;  %v18229_v20 = vpop.eup %18228 }
 0x8b8   :  { %17180 = vmatpush3.msra.mxu1 %v3602_v42  ;;  %17184 = vmatprep.subr.mxu0 %v21687_v26  ;;  %v3370_v46 = vmul.f32 %v18229_v20, %v19473_v63  ;;  %v3830_v63 = vpop.permute.xlu0 %3829  ;;  %v18231_v36 = vpop.eup %18230 }
 0x8b9   :  { %17182 = vmatmul.mubr.msk.f32.vlgmr.msra.gmra.mrb[54].mxu1 %vm1202_vm12, %v3368_v33  ;;  %17189 = vmatprep.subr.mxu1 %v21687_v26  ;;  %v3372_v34 = vmul.f32 %v18231_v36, %v19477_v2 }
 0x8ba   :  { %17177 = vmatmul.mubr.msk.f32.vlgmr.msra.gmra.mrb[54].mxu0 %vm1202_vm12, %v3367_v7  ;;  %17191 = vmatprep.mubr.msk.f32.mxu1 %vm18617_vm11, %v21687_v26 }
 0x8bb   :  { %17185 = vmatpush3.msra.mxu0 %v3678_v6  ;;  %v3754_v9 = vpop.permute.xlu1 %3753  ;;  %17186 = vmatprep.mubr.msk.f32.mxu0 %vm18617_vm11, %v21687_v26 }
 0x8bc   :  { %17190 = vmatpush3.msra.mxu1 %v3754_v9  ;;  %17194 = vmatprep.subr.mxu0 %v21687_v26  ;;  %v4121_v50 = vpop.permute.xlu0 %4120 }
 0x8bd   :  { %17192 = vmatmul.mubr.msk.f32.vlgmr.msra.gmra.mrb[56].mxu1 %vm1202_vm12, %v3370_v46  ;;  %17199 = vmatprep.subr.mxu1 %v21687_v26 }
 0x8be   :  { %17201 = vmatprep.mubr.msk.f32.mxu1 %vm18617_vm11, %v21687_v26 }
 0x8c0   :  { %v4199_v32 = vpop.permute.xlu0 %4198 }
 0x8c4   :  { %v4277_v39 = vpop.permute.xlu0 %4276 }
 0x8c5   :  { %3905 = vrot.lane.b32.xlu1 %v19180_v0, %s18621_s7 }
 0x8c8   :  { %v4355_v17 = vpop.permute.xlu0 %4354 }
 0x8c9   :  { %4118 = vrot.lane.b32.xlu1 %v19197_v25, %s18623_s3 }
 0x8cc   :  { %v4433_v1 = vpop.permute.xlu0 %4432 }
 0x8cd   :  { %4196 = vrot.lane.b32.xlu1 %v19193_v37, %s18623_s3 }
 0x8d0   :  { %v4431_v6 = vpop.permute.xlu0 %4430 }
 0x8d1   :  { %4274 = vrot.lane.b32.xlu1 %v19215_v48, %s18623_s3 }
 0x8d5   :  { %4352 = vrot.lane.b32.xlu1 %v19209_v47, %s18623_s3 }
 0x8d9   :  { %4510 = vrot.lane.b32.xlu1 %v19168_v53, %s18622_s8 }
 0x8dd   :  { %4508 = vrot.lane.b32.xlu1 %v19228_v12, %s18623_s3 }
 0x8e1   :  { %4666 = vrot.lane.b32.xlu1 %v19180_v0, %s18622_s8 }
 0x8e5   :  { %4664 = vrot.lane.b32.xlu1 %v19246_v29, %s18623_s3 }
 0x93d   :  { %v3347_v3 = vpop.xlane.xlu1 %3346 }
 0x93e   :  { %18232 = vrcp.f32 %v3347_v3 }
 0x941   :  { %v3353_v16 = vpop.xlane.xlu1 %3352 }
 0x942   :  { %18234 = vrcp.f32 %v3353_v16 }
 0x945   :  { %v3906_v44 = vpop.permute.xlu1 %3905 }
 0x946   :  { %17200 = vmatpush3.msra.mxu1 %v3906_v44  ;;  %v4589_v44 = vpop.permute.xlu0 %4588 }
 0x947   :  { %17202 = vmatmul.mubr.msk.f32.vlgmr.msra.gmra.mrb[58].mxu1 %vm1202_vm12, %v3372_v34  ;;  %17218 = vmatprep.subr.mxu1 %v21687_v26 }
 0x948   :  { %v18233_v51 = vpop.eup %18232  ;;  %17220 = vmatprep.mubr.msk.f32.mxu1 %vm18617_vm11, %v21687_v26 }
 0x949   :  { %v4119_v62 = vpop.permute.xlu1 %4118  ;;  %v3369_v28 = vmul.f32 %v18233_v51, %v19525_v59 }
 0x94b   :  { %17187 = vmatmul.mubr.msk.f32.vlgmr.msra.gmra.mrb[56].mxu0 %vm1202_vm12, %v3369_v28 }
 0x94c   :  { %v18235_v10 = vpop.eup %18234  ;;  %17195 = vmatpush3.msra.mxu0 %v3830_v63  ;;  %17196 = vmatprep.mubr.msk.f32.mxu0 %vm18617_vm11, %v21687_v26 }
 0x94d   :  { %17219 = vmatpush3.xpose.msk.msra.mxu1 %vm1202_vm12, %v4121_v50  ;;  %v4197_v2 = vpop.permute.xlu1 %4196  ;;  %v3371_v58 = vmul.f32 %v18235_v10, %v19530_v61  ;;  %17204 = vmatprep.subr.mxu0 %v1183_v55 }
 0x94e   :  { %17223 = vmatprep.subr.mxu1 %v21687_v26 }
 0x94f   :  { %17197 = vmatmul.mubr.msk.f32.vlgmr.msra.gmra.mrb[58].mxu0 %vm1202_vm12, %v3371_v58 }
 0x950   :  { %17221 = vmatmul.mubr.msk.f32.vlgmr.msra.gmra.mrb[60].mxu1 %vm1202_vm12, %v4119_v62  ;;  %17205 = vmatpush3.msra.mxu0 %v1183_v55  ;;  %v4587_v55 = vpop.permute.xlu0 %4586 }
 0x951   :  { %17224 = vmatpush3.xpose.msk.msra.mxu1 %vm1202_vm12, %v4199_v32  ;;  %v4275_v30 = vpop.permute.xlu1 %4274  ;;  %17225 = vmatprep.mubr.msk.f32.mxu1 %vm18617_vm11, %v21687_v26 }
 0x952   :  { %17228 = vmatprep.subr.mxu1 %v21687_v26  ;;  %17238 = vmatprep.subr.mxu0 %v21687_v26 }
 0x954   :  { %17226 = vmatmul.mubr.msk.f32.vlgmr.msra.gmra.mrb[62].mxu1 %vm1202_vm12, %v4197_v2 }
 0x955   :  { %17229 = vmatpush3.xpose.msk.msra.mxu1 %vm1202_vm12, %v4277_v39  ;;  %v4353_v14 = vpop.permute.xlu1 %4352  ;;  %17230 = vmatprep.mubr.msk.f32.mxu1 %vm18617_vm11, %v21687_v26 }
 0x956   :  { %17233 = vmatprep.subr.mxu1 %v21687_v26 }
 0x957   :  { %v3521_v45 = vpop.f32.mrb[52].mxu1 }
 0x958   :  { %17231 = vmatmul.mubr.msk.f32.vlgmr.msra.gmra.mrb[64].mxu1 %vm1202_vm12, %v4275_v30  ;;  %v17173_v57 = vpop.f32.mrb[53].mxu1 }
 0x959   :  { %17234 = vmatpush3.xpose.msk.msra.mxu1 %vm1202_vm12, %v4355_v17  ;;  %v4511_v38 = vpop.permute.xlu1 %4510  ;;  %17235 = vmatprep.mubr.msk.f32.mxu1 %vm18617_vm11, %v21687_v26 }
 0x95a   :  { %17243 = vmatprep.subr.mxu1 %v21687_v26 }
 0x95c   :  { %17236 = vmatmul.mubr.msk.f32.vlgmr.msra.gmra.mrb[66].mxu1 %vm1202_vm12, %v4353_v14 }
 0x95d   :  { %17244 = vmatpush3.xpose.msk.msra.mxu1 %vm1202_vm12, %v4511_v38  ;;  %v4509_v54 = vpop.permute.xlu1 %4508  ;;  %17245 = vmatprep.mubr.msk.f32.mxu1 %vm18617_vm11, %v21687_v26 }
 0x95e   :  { %17253 = vmatprep.subr.mxu1 %v21687_v26 }
 0x960   :  { %17246 = vmatmul.mubr.msk.f32.vlgmr.msra.gmra.mrb[68].mxu1 %vm1202_vm12, %v4509_v54 }
 0x961   :  { %v4667_v59 = vpop.permute.xlu1 %4666  ;;  %17255 = vmatprep.mubr.msk.f32.mxu1 %vm18617_vm11, %v21687_v26 }
 0x962   :  { %17254 = vmatpush3.xpose.msk.msra.mxu1 %vm1202_vm12, %v4667_v59 }
 0x963   :  { %17263 = vmatprep.subr.mxu1 %v21687_v26 }
 0x965   :  { %v4665_v60 = vpop.permute.xlu1 %4664 }
 0x966   :  { %17256 = vmatmul.mubr.msk.f32.vlgmr.msra.gmra.mrb[70].mxu1 %vm1202_vm12, %v4665_v60 }
 0x967   :  { %17265 = vmatprep.mubr.msk.f32.mxu1 %vm18617_vm11, %v21687_v26 }
 0x989   :  { %v3445_v43 = vpop.f32.mrb[52].mxu0 }
 0x98a   :  { %v17168_v61 = vpop.f32.mrb[53].mxu0  ;;  %17206 = vmatprep.mubr.msk.f32.mxu0 %vm1202_vm12, %v3445_v43 }
 0x98b   :  { %17207 = vmatmul.mubr.msk.f32.vlgmr.msra.gmra.mrb[40].mxu0 %vm1202_vm12, %v3521_v45 }
 0x98c   :  { %17239 = vmatpush3.xpose.msk.msra.mxu0 %vm1202_vm12, %v4433_v1  ;;  %v3673_v40 = vpop.f32.mrb[54].mxu1 }
 0x98d   :  { %v3597_v5 = vpop.f32.mrb[54].mxu0  ;;  %v17183_v4 = vpop.f32.mrb[55].mxu1  ;;  %17248 = vmatprep.subr.mxu0 %v21687_v26 }
 0x98e   :  { %v17178_v22 = vpop.f32.mrb[55].mxu0  ;;  %17209 = vmatprep.mubr.msk.f32.mxu0 %vm1202_vm12, %v3597_v5 }
 0x98f   :  { %17210 = vmatmul.mubr.msk.f32.gmra.mrb[42].mxu0 %vm1202_vm12, %v3673_v40 }
 0x990   :  { %v3825_v41 = vpop.f32.mrb[56].mxu1 }
 0x991   :  { %v17193_v42 = vpop.f32.mrb[57].mxu1 }
 0xa1a   :  { %v3977_v7 = vpop.f32.mrb[58].mxu1 }
 0xa1b   :  { %v17203_v33 = vpop.f32.mrb[59].mxu1 }
 0xa1e   :  { %v3749_v20 = vpop.f32.mrb[56].mxu0 }
 0xa1f   :  { %v17188_v9 = vpop.f32.mrb[57].mxu0  ;;  %17212 = vmatprep.mubr.msk.f32.mxu0 %vm1202_vm12, %v3749_v20 }
 0xa20   :  { %17213 = vmatmul.mubr.msk.f32.gmra.mrb[44].mxu0 %vm1202_vm12, %v3825_v41 }
 0xa22   :  { %v3901_v46 = vpop.f32.mrb[58].mxu0 }
 0xa23   :  { %v17198_v3 = vpop.f32.mrb[59].mxu0  ;;  %17215 = vmatprep.mubr.msk.f32.mxu0 %vm1202_vm12, %v3901_v46  ;;  %v4192_v63 = vpop.f32.mrb[60].mxu1 }
 0xa24   :  { %v19623_v16 = vadd.f32 %v4192_v63, %v19264_v24  ;;  %17216 = vmatmul.mubr.msk.f32.gmra.mrb[46].mxu0 %vm1202_vm12, %v3977_v7  ;;  %v17222_v36 = vpop.f32.mrb[61].mxu1 }
 0xa25   :  { %17240 = vmatprep.mubr.msk.f32.mxu0 %vm18617_vm11, %v21687_v26 }
 0xa26   :  { %v4742_v34 = vsel %vm1202_vm12, %v19623_v16, -inf }
 0xa27   :  { %4743 = vmax.xlane.f32.xlu0 %v4742_v34  ;;  %v4270_v50 = vpop.f32.mrb[62].mxu1 }
 0xa28   :  { %v4271_v51 = vadd.f32 %v4270_v50, %v19264_v24  ;;  %v17227_v62 = vpop.f32.mrb[63].mxu1  ;;  %17241 = vmatmul.mubr.msk.f32.vlgmr.msra.gmra.mrb[60].mxu0 %vm1202_vm12, %v4431_v6 }
 0xa29   :  { %17249 = vmatpush3.xpose.msk.msra.mxu0 %vm1202_vm12, %v4589_v44  ;;  %17250 = vmatprep.mubr.msk.f32.mxu0 %vm18617_vm11, %v21687_v26 }
 0xa2a   :  { %v4745_v28 = vsel %vm1202_vm12, %v4271_v51, -inf  ;;  %17258 = vmatprep.subr.mxu0 %v21687_v26 }
 0xa2b   :  { %4746 = vmax.xlane.f32.xlu1 %v4745_v28  ;;  %v4348_v10 = vpop.f32.mrb[64].mxu1 }
 0xa2c   :  { %v4349_v32 = vadd.f32 %v4348_v10, %v19264_v24  ;;  %v17232_v2 = vpop.f32.mrb[65].mxu1  ;;  %17251 = vmatmul.mubr.msk.f32.vlgmr.msra.gmra.mrb[62].mxu0 %vm1202_vm12, %v4587_v55 }
 0xa2d   :  { %17260 = vmatprep.mubr.msk.f32.mxu0 %vm18617_vm11, %v21687_v26 }
 0xa2e   :  { %v4748_v58 = vsel %vm1202_vm12, %v4349_v32, -inf }
 0xa2f   :  { %4749 = vmax.xlane.f32.xlu0 %v4748_v58  ;;  %v4426_v30 = vpop.f32.mrb[66].mxu1 }
 0xa30   :  { %v4427_v39 = vadd.f32 %v4426_v30, %v19264_v24  ;;  %v17237_v14 = vpop.f32.mrb[67].mxu1 }
 0xa32   :  { %v4751_v45 = vsel %vm1202_vm12, %v4427_v39, -inf }
 0xa33   :  { %4752 = vmax.xlane.f32.xlu0 %v4751_v45  ;;  %v4582_v17 = vpop.f32.mrb[68].mxu1 }
 0xa34   :  { %v4583_v57 = vadd.f32 %v4582_v17, %v19264_v24  ;;  %v17247_v38 = vpop.f32.mrb[69].mxu1 }
 0xa36   :  { %v4757_v54 = vsel %vm1202_vm12, %v4583_v57, -inf }
 0xa37   :  { %4758 = vmax.xlane.f32.xlu0 %v4757_v54 }
 0xa39   :  { %v4738_v59 = vpop.f32.mrb[70].mxu1 }
 0xa3a   :  { %v4739_v60 = vadd.f32 %v4738_v59, %v19264_v24  ;;  %v17257_v43 = vpop.f32.mrb[71].mxu1 }
 0xa3c   :  { %v4763_v61 = vsel %vm1202_vm12, %v4739_v60, -inf }
 0xa3d   :  { %4764 = vmax.xlane.f32.xlu0 %v4763_v61 }
 0xab4   :  { %v4744_v1 = vpop.xlane.xlu0 %4743 }
 0xab5   :  { %v4766_v55 = vsub.f32 %v19623_v16, %v4744_v1 }
 0xab7   :  { %v4774_v10 = vmul.f32 1.442695, %v4766_v55 }
 0xab8   :  { %v4747_v40 = vpop.xlane.xlu1 %4746 }
 0xab9   :  { %v4767_v5 = vsub.f32 %v4271_v51, %v4747_v40 }
 0xabb   :  { %v4776_v4 = vmul.f32 1.442695, %v4767_v5 }
 0xabc   :  { %v4750_v22 = vpop.xlane.xlu0 %4749 }
 0xabd   :  { %18236 = vpow2.f32 %v4776_v4  ;;  %v4768_v2 = vsub.f32 %v4349_v32, %v4750_v22 }
 0xabf   :  { %v4778_v58 = vmul.f32 1.442695, %v4768_v2 }
 0xac0   :  { %v4753_v41 = vpop.xlane.xlu0 %4752 }
 0xac1   :  { %v4769_v42 = vsub.f32 %v4427_v39, %v4753_v41 }
 0xac3   :  { %v4780_v7 = vmul.f32 1.442695, %v4769_v42 }
 0xac4   :  { %v4759_v33 = vpop.xlane.xlu0 %4758 }
 0xac5   :  { %18238 = vpow2.f32 %v4780_v7  ;;  %v4771_v20 = vsub.f32 %v4583_v57, %v4759_v33 }
 0xac7   :  { %v19648_v6 = vpop.eup %18236  ;;  %v4784_v9 = vmul.f32 1.442695, %v4771_v20 }
 0xac8   :  { %v4793_v46 = vsel %vm1202_vm12, %v19648_v6, 0.0 }
 0xac9   :  { %18240 = vpow2.f32 %v4784_v9  ;;  %4794 = vadd.xlane.f32.xlu0 %v4793_v46 }
 0xaca   :  { %v4765_v3 = vpop.xlane.xlu0 %4764 }
 0xacb   :  { %v4773_v63 = vsub.f32 %v4739_v60, %v4765_v3 }
 0xacd   :  { %v4788_v36 = vmul.f32 1.442695, %v4773_v63 }
 0xacf   :  { %v19652_v44 = vpop.eup %18238  ;;  %18242 = vpow2.f32 %v4788_v36 }
 0xad0   :  { %v4799_v34 = vsel %vm1202_vm12, %v19652_v44, 0.0  ;;  %18244 = vpow2.f32 %v4774_v10 }
 0xad1   :  { %4800 = vadd.xlane.f32.xlu0 %v4799_v34  ;;  %18246 = vpow2.f32 %v4778_v58 }
 0xad3   :  { %v19656_v50 = vpop.eup %18240 }
 0xad4   :  { %v4805_v51 = vsel %vm1202_vm12, %v19656_v50, 0.0 }
 0xad5   :  { %4806 = vadd.xlane.f32.xlu0 %v4805_v51 }
 0xad9   :  { %v19660_v62 = vpop.eup %18242 }
 0xada   :  { %v4811_v28 = vsel %vm1202_vm12, %v19660_v62, 0.0  ;;  %v18245_v38 = vpop.eup %18244 }
 0xadb   :  { %4812 = vadd.xlane.f32.xlu0 %v4811_v28  ;;  %v4790_v54 = vsel %vm1202_vm12, %v18245_v38, 0.0  ;;  %v18247_v59 = vpop.eup %18246 }
 0xadc   :  { %v4796_v60 = vsel %vm1202_vm12, %v18247_v59, 0.0 }
 0xaf1   :  { %4906 = vrot.lane.b32.xlu0 %v19133_v31, %s18624_s9 }
 0xaf5   :  { %5134 = vrot.lane.b32.xlu0 %v19172_v8, %s18624_s9 }
 0xaf9   :  { %5286 = vrot.lane.b32.xlu0 %v19186_v56, %s18624_s9 }
 0xafb   :  { %v4504_v30 = vpop.f32.mrb[60].mxu0 }
 0xafc   :  { %v4505_v39 = vadd.f32 %v4504_v30, %v19264_v24  ;;  %v17242_v14 = vpop.f32.mrb[61].mxu0 }
 0xafd   :  { %5577 = vrot.lane.b32.xlu0 %v19136_v52, %s18625_s10 }
 0xafe   :  { %v4754_v16 = vsel %vm1202_vm12, %v4505_v39, -inf }
 0xaff   :  { %v4660_v32 = vpop.f32.mrb[62].mxu0  ;;  %4755 = vmax.xlane.f32.xlu1 %v4754_v16 }
 0xb00   :  { %v4661_v45 = vadd.f32 %v4660_v32, %v19264_v24  ;;  %v17252_v17 = vpop.f32.mrb[63].mxu0 }
 0xb01   :  { %5655 = vrot.lane.b32.xlu0 %v19133_v31, %s18625_s10 }
 0xb02   :  { %v4760_v57 = vsel %vm1202_vm12, %v4661_v45, -inf }
 0xb03   :  { %4761 = vmax.xlane.f32.xlu1 %v4760_v57  ;;  %v1184_v57 = vld [vmem:[#allocation2 + $0x18] sm:$0xff] }
 0xb05   :  { %5733 = vrot.lane.b32.xlu0 %v19154_v27, %s18625_s10 }
 0xb07   :  { %4791 = vadd.xlane.f32.xlu1 %v4790_v54 }
 0xb09   :  { %5811 = vrot.lane.b32.xlu0 %v19152_v19, %s18625_s10 }
 0xb0b   :  { %4797 = vadd.xlane.f32.xlu1 %v4796_v60 }
 0xb0d   :  { %5889 = vrot.lane.b32.xlu0 %v19172_v8, %s18625_s10 }
 0xb11   :  { %5887 = vrot.lane.b32.xlu0 %v19235_v23, %s18626_s11 }
 0xb15   :  { %6045 = vrot.lane.b32.xlu0 %v19186_v56, %s18625_s10 }
 0xb19   :  { %6043 = vrot.lane.b32.xlu0 %v19253_v15, %s18626_s11 }
 0xb1c   :  { %4830 = vrot.lane.b32.xlu1 %v19136_v52, %s18624_s9 }
 0xb20   :  { %4982 = vrot.lane.b32.xlu1 %v19154_v27, %s18624_s9 }
 0xb24   :  { %5058 = vrot.lane.b32.xlu1 %v19152_v19, %s18624_s9 }
 0xb28   :  { %5210 = vrot.lane.b32.xlu1 %v19168_v53, %s18624_s9 }
 0xb56   :  { %v4795_v43 = vpop.xlane.xlu0 %4794 }
 0xb57   :  { %18248 = vrcp.f32 %v4795_v43 }
 0xb5e   :  { %v4801_v23 = vpop.xlane.xlu0 %4800 }
 0xb61   :  { %v18249_v40 = vpop.eup %18248 }
 0xb62   :  { %v4807_v61 = vpop.xlane.xlu0 %4806  ;;  %v4823_v5 = vmul.f32 %v18249_v40, %v19648_v6 }
 0xb68   :  { %v19701_v1 = vpop.xlane.xlu0 %4812 }
 0xb6c   :  { %v4907_v15 = vpop.permute.xlu0 %4906 }
 0xb6d   :  { %17264 = vmatpush3.msra.mxu1 %v4907_v15 }
 0xb6e   :  { %17266 = vmatmul.mubr.msk.f32.vlgmr.msra.gmra.mrb[72].mxu1 %vm1202_vm12, %v4823_v5  ;;  %17273 = vmatprep.subr.mxu1 %v21687_v26 }
 0xb6f   :  { %17275 = vmatprep.mubr.msk.f32.mxu1 %vm18617_vm11, %v21687_v26 }
 0xb70   :  { %v5135_v14 = vpop.permute.xlu0 %5134 }
 0xb8c   :  { %v4756_v4 = vpop.xlane.xlu1 %4755 }
 0xb8d   :  { %v4770_v22 = vsub.f32 %v4505_v39, %v4756_v4 }
 0xb8f   :  { %v4782_v41 = vmul.f32 1.442695, %v4770_v22 }
 0xb90   :  { %v4762_v42 = vpop.xlane.xlu1 %4761 }
 0xb91   :  { %18250 = vpow2.f32 %v4782_v41  ;;  %v4772_v7 = vsub.f32 %v4661_v45, %v4762_v42 }
 0xb93   :  { %v4786_v33 = vmul.f32 1.442695, %v4772_v7 }
 0xb94   :  { %v4792_v20 = vpop.xlane.xlu1 %4791 }
 0xb95   :  { %18252 = vpow2.f32 %v4786_v33 }
 0xb96   :  { %18254 = vrcp.f32 %v4792_v20 }
 0xb97   :  { %18256 = vrcp.f32 %v4801_v23 }
 0xb98   :  { %v4798_v6 = vpop.xlane.xlu1 %4797 }
 0xb99   :  { %18258 = vrcp.f32 %v4798_v6 }
 0xb9a   :  { %18260 = vrcp.f32 %v4807_v61 }
 0xb9b   :  { %v19708_v9 = vpop.eup %18250  ;;  %18262 = vrcp.f32 %v19701_v1 }
 0xb9c   :  { %v4831_v46 = vpop.permute.xlu1 %4830  ;;  %v4802_v3 = vsel %vm1202_vm12, %v19708_v9, 0.0 }
 0xb9d   :  { %4803 = vadd.xlane.f32.xlu1 %v4802_v3  ;;  %17259 = vmatpush3.msra.mxu0 %v4831_v46 }
 0xb9e   :  { %17268 = vmatprep.subr.mxu0 %v21687_v26 }
 0xb9f   :  { %v19713_v63 = vpop.eup %18252 }
 0xba0   :  { %v18255_v36 = vpop.eup %18254  ;;  %v4983_v34 = vpop.permute.xlu1 %4982  ;;  %v4808_v51 = vsel %vm1202_vm12, %v19713_v63, 0.0 }
 0xba1   :  { %v18257_v28 = vpop.eup %18256  ;;  %4809 = vadd.xlane.f32.xlu1 %v4808_v51  ;;  %v4822_v55 = vmul.f32 %v18255_v36, %v18245_v38 }
 0xba2   :  { %v4825_v30 = vmul.f32 %v18257_v28, %v19652_v44 }
 0xba3   :  { %v18259_v10 = vpop.eup %18258  ;;  %17261 = vmatmul.mubr.msk.f32.vlgmr.msra.gmra.mrb[64].mxu0 %vm1202_vm12, %v4822_v55 }
 0xba4   :  { %17269 = vmatpush3.msra.mxu0 %v4983_v34  ;;  %v5059_v2 = vpop.permute.xlu1 %5058  ;;  %17270 = vmatprep.mubr.msk.f32.mxu0 %vm18617_vm11, %v21687_v26  ;;  %v4824_v58 = vmul.f32 %v18259_v10, %v18247_v59  ;;  %v18261_v39 = vpop.eup %18260 }
 0xba5   :  { %17274 = vmatpush3.msra.mxu1 %v5059_v2  ;;  %17278 = vmatprep.subr.mxu0 %v21687_v26  ;;  %v4827_v32 = vmul.f32 %v18261_v39, %v19656_v50  ;;  %v18263_v44 = vpop.eup %18262 }
 0xba6   :  { %17276 = vmatmul.mubr.msk.f32.vlgmr.msra.gmra.mrb[74].mxu1 %vm1202_vm12, %v4825_v30  ;;  %17283 = vmatprep.subr.mxu1 %v21687_v26  ;;  %v4829_v50 = vmul.f32 %v18263_v44, %v19660_v62 }
 0xba7   :  { %17271 = vmatmul.mubr.msk.f32.vlgmr.msra.gmra.mrb[66].mxu0 %vm1202_vm12, %v4824_v58  ;;  %17285 = vmatprep.mubr.msk.f32.mxu1 %vm18617_vm11, %v21687_v26 }
 0xba8   :  { %17279 = vmatpush3.msra.mxu0 %v5135_v14  ;;  %v5211_v16 = vpop.permute.xlu1 %5210  ;;  %17280 = vmatprep.mubr.msk.f32.mxu0 %vm18617_vm11, %v21687_v26 }
 0xba9   :  { %17284 = vmatpush3.msra.mxu1 %v5211_v16  ;;  %17288 = vmatprep.subr.mxu0 %v21687_v26 }
 0xbaa   :  { %17286 = vmatmul.mubr.msk.f32.vlgmr.msra.gmra.mrb[76].mxu1 %vm1202_vm12, %v4827_v32  ;;  %17293 = vmatprep.subr.mxu1 %v21687_v26 }
 0xbab   :  { %17295 = vmatprep.mubr.msk.f32.mxu1 %vm18617_vm11, %v21687_v26 }
 0xbb2   :  { %5362 = vrot.lane.b32.xlu1 %v19180_v0, %s18624_s9 }
 0xbb6   :  { %5575 = vrot.lane.b32.xlu1 %v19197_v25, %s18626_s11  ;;  %v5287_v25 = vpop.permute.xlu0 %5286 }
 0xbba   :  { %5653 = vrot.lane.b32.xlu1 %v19193_v37, %s18626_s11  ;;  %v5578_v45 = vpop.permute.xlu0 %5577 }
 0xbbe   :  { %5731 = vrot.lane.b32.xlu1 %v19215_v48, %s18626_s11  ;;  %v5656_v54 = vpop.permute.xlu0 %5655 }
 0xbc2   :  { %5809 = vrot.lane.b32.xlu1 %v19209_v47, %s18626_s11  ;;  %v5734_v43 = vpop.permute.xlu0 %5733 }
 0xbc6   :  { %5967 = vrot.lane.b32.xlu1 %v19168_v53, %s18625_s10  ;;  %v5812_v40 = vpop.permute.xlu0 %5811 }
 0xbca   :  { %5965 = vrot.lane.b32.xlu1 %v19228_v12, %s18626_s11  ;;  %v5890_v7 = vpop.permute.xlu0 %5889 }
 0xbce   :  { %6123 = vrot.lane.b32.xlu1 %v19180_v0, %s18625_s10  ;;  %v5888_v51 = vpop.permute.xlu0 %5887 }
 0xbd2   :  { %6121 = vrot.lane.b32.xlu1 %v19246_v29, %s18626_s11  ;;  %v6046_v39 = vpop.permute.xlu0 %6045 }
 0xc2a   :  { %v4804_v37 = vpop.xlane.xlu1 %4803 }
 0xc2b   :  { %18264 = vrcp.f32 %v4804_v37 }
 0xc2e   :  { %v4810_v48 = vpop.xlane.xlu1 %4809 }
 0xc2f   :  { %18266 = vrcp.f32 %v4810_v48  ;;  %v6044_v48 = vpop.permute.xlu0 %6043 }
 0xc32   :  { %v5363_v47 = vpop.permute.xlu1 %5362 }
 0xc33   :  { %17294 = vmatpush3.msra.mxu1 %v5363_v47 }
 0xc34   :  { %17296 = vmatmul.mubr.msk.f32.vlgmr.msra.gmra.mrb[78].mxu1 %vm1202_vm12, %v4829_v50  ;;  %17312 = vmatprep.subr.mxu1 %v21687_v26 }
 0xc35   :  { %v18265_v12 = vpop.eup %18264  ;;  %17314 = vmatprep.mubr.msk.f32.mxu1 %vm18617_vm11, %v21687_v26 }
 0xc36   :  { %v5576_v29 = vpop.permute.xlu1 %5575  ;;  %v4826_v17 = vmul.f32 %v18265_v12, %v19708_v9 }
 0xc38   :  { %17281 = vmatmul.mubr.msk.f32.vlgmr.msra.gmra.mrb[68].mxu0 %vm1202_vm12, %v4826_v17 }
 0xc39   :  { %v18267_v38 = vpop.eup %18266  ;;  %17289 = vmatpush3.msra.mxu0 %v5287_v25  ;;  %17290 = vmatprep.mubr.msk.f32.mxu0 %vm18617_vm11, %v21687_v26 }
 0xc3a   :  { %17313 = vmatpush3.xpose.msk.msra.mxu1 %vm1202_vm12, %v5578_v45  ;;  %v5654_v62 = vpop.permute.xlu1 %5653  ;;  %v4828_v59 = vmul.f32 %v18267_v38, %v19713_v63  ;;  %17298 = vmatprep.subr.mxu0 %v1184_v57 }
 0xc3b   :  { %17317 = vmatprep.subr.mxu1 %v21687_v26 }
 0xc3c   :  { %17291 = vmatmul.mubr.msk.f32.vlgmr.msra.gmra.mrb[70].mxu0 %vm1202_vm12, %v4828_v59 }
 0xc3d   :  { %17315 = vmatmul.mubr.msk.f32.vlgmr.msra.gmra.mrb[80].mxu1 %vm1202_vm12, %v5576_v29  ;;  %17299 = vmatpush3.msra.mxu0 %v1184_v57 }
 0xc3e   :  { %17318 = vmatpush3.xpose.msk.msra.mxu1 %vm1202_vm12, %v5656_v54  ;;  %v5732_v60 = vpop.permute.xlu1 %5731  ;;  %17319 = vmatprep.mubr.msk.f32.mxu1 %vm18617_vm11, %v21687_v26 }
 0xc3f   :  { %17322 = vmatprep.subr.mxu1 %v21687_v26  ;;  %17332 = vmatprep.subr.mxu0 %v21687_v26 }
 0xc41   :  { %v4978_v23 = vpop.f32.mrb[72].mxu1  ;;  %17320 = vmatmul.mubr.msk.f32.vlgmr.msra.gmra.mrb[82].mxu1 %vm1202_vm12, %v5654_v62 }
 0xc42   :  { %v17267_v61 = vpop.f32.mrb[73].mxu1  ;;  %17323 = vmatpush3.xpose.msk.msra.mxu1 %vm1202_vm12, %v5734_v43  ;;  %v5810_v1 = vpop.permute.xlu1 %5809  ;;  %17324 = vmatprep.mubr.msk.f32.mxu1 %vm18617_vm11, %v21687_v26 }
 0xc43   :  { %17327 = vmatprep.subr.mxu1 %v21687_v26 }
 0xc45   :  { %17325 = vmatmul.mubr.msk.f32.vlgmr.msra.gmra.mrb[84].mxu1 %vm1202_vm12, %v5732_v60 }
 0xc46   :  { %17328 = vmatpush3.xpose.msk.msra.mxu1 %vm1202_vm12, %v5812_v40  ;;  %v5968_v15 = vpop.permute.xlu1 %5967  ;;  %17329 = vmatprep.mubr.msk.f32.mxu1 %vm18617_vm11, %v21687_v26 }
 0xc47   :  { %17337 = vmatprep.subr.mxu1 %v21687_v26 }
 0xc49   :  { %17330 = vmatmul.mubr.msk.f32.vlgmr.msra.gmra.mrb[86].mxu1 %vm1202_vm12, %v5810_v1 }
 0xc4a   :  { %17338 = vmatpush3.xpose.msk.msra.mxu1 %vm1202_vm12, %v5968_v15  ;;  %v5966_v5 = vpop.permute.xlu1 %5965  ;;  %17339 = vmatprep.mubr.msk.f32.mxu1 %vm18617_vm11, %v21687_v26 }
 0xc4b   :  { %17347 = vmatprep.subr.mxu1 %v21687_v26 }
 0xc4d   :  { %17340 = vmatmul.mubr.msk.f32.vlgmr.msra.gmra.mrb[88].mxu1 %vm1202_vm12, %v5966_v5 }
 0xc4e   :  { %v6124_v4 = vpop.permute.xlu1 %6123  ;;  %17349 = vmatprep.mubr.msk.f32.mxu1 %vm18617_vm11, %v21687_v26 }
 0xc4f   :  { %17348 = vmatpush3.xpose.msk.msra.mxu1 %vm1202_vm12, %v6124_v4 }
 0xc50   :  { %17357 = vmatprep.subr.mxu1 %v21687_v26 }
 0xc52   :  { %v6122_v22 = vpop.permute.xlu1 %6121 }
 0xc53   :  { %17350 = vmatmul.mubr.msk.f32.vlgmr.msra.gmra.mrb[90].mxu1 %vm1202_vm12, %v6122_v22 }
 0xc54   :  { %17359 = vmatprep.mubr.msk.f32.mxu1 %vm18617_vm11, %v21687_v26 }
 0xc76   :  { %v4902_v41 = vpop.f32.mrb[64].mxu0 }
 0xc77   :  { %v17262_v42 = vpop.f32.mrb[65].mxu0  ;;  %17300 = vmatprep.mubr.msk.f32.mxu0 %vm1202_vm12, %v4902_v41 }
 0xc78   :  { %17301 = vmatmul.mubr.msk.f32.vlgmr.msra.gmra.mrb[40].mxu0 %vm1202_vm12, %v4978_v23 }
 0xc79   :  { %17333 = vmatpush3.xpose.msk.msra.mxu0 %vm1202_vm12, %v5890_v7  ;;  %v5130_v33 = vpop.f32.mrb[74].mxu1 }
 0xc7a   :  { %v5054_v20 = vpop.f32.mrb[66].mxu0  ;;  %v17277_v6 = vpop.f32.mrb[75].mxu1  ;;  %17342 = vmatprep.subr.mxu0 %v21687_v26 }
 0xc7b   :  { %v17272_v9 = vpop.f32.mrb[67].mxu0  ;;  %17303 = vmatprep.mubr.msk.f32.mxu0 %vm1202_vm12, %v5054_v20 }
 0xc7c   :  { %17304 = vmatmul.mubr.msk.f32.gmra.mrb[42].mxu0 %vm1202_vm12, %v5130_v33 }
 0xc7d   :  { %v5282_v46 = vpop.f32.mrb[76].mxu1 }
 0xc7e   :  { %v17287_v3 = vpop.f32.mrb[77].mxu1 }
 0xd07   :  { %v5434_v63 = vpop.f32.mrb[78].mxu1 }
 0xd08   :  { %v17297_v36 = vpop.f32.mrb[79].mxu1 }
 0xd0b   :  { %v5206_v34 = vpop.f32.mrb[68].mxu0 }
 0xd0c   :  { %v17282_v28 = vpop.f32.mrb[69].mxu0  ;;  %17306 = vmatprep.mubr.msk.f32.mxu0 %vm1202_vm12, %v5206_v34 }
 0xd0d   :  { %17307 = vmatmul.mubr.msk.f32.gmra.mrb[44].mxu0 %vm1202_vm12, %v5282_v46 }
 0xd0f   :  { %v5358_v55 = vpop.f32.mrb[70].mxu0 }
 0xd10   :  { %v17292_v10 = vpop.f32.mrb[71].mxu0  ;;  %17309 = vmatprep.mubr.msk.f32.mxu0 %vm1202_vm12, %v5358_v55  ;;  %v5649_v2 = vpop.f32.mrb[80].mxu1 }
 0xd11   :  { %v19806_v58 = vadd.f32 %v5649_v2, %v19264_v24  ;;  %17310 = vmatmul.mubr.msk.f32.gmra.mrb[46].mxu0 %vm1202_vm12, %v5434_v63  ;;  %v17316_v30 = vpop.f32.mrb[81].mxu1 }
 0xd12   :  { %17334 = vmatprep.mubr.msk.f32.mxu0 %vm18617_vm11, %v21687_v26 }
 0xd13   :  { %v6199_v14 = vsel %vm1202_vm12, %v19806_v58, -inf }
 0xd14   :  { %6200 = vmax.xlane.f32.xlu0 %v6199_v14  ;;  %v5727_v16 = vpop.f32.mrb[82].mxu1 }
 0xd15   :  { %v5728_v32 = vadd.f32 %v5727_v16, %v19264_v24  ;;  %v17321_v37 = vpop.f32.mrb[83].mxu1  ;;  %17335 = vmatmul.mubr.msk.f32.vlgmr.msra.gmra.mrb[72].mxu0 %vm1202_vm12, %v5888_v51 }
 0xd16   :  { %17343 = vmatpush3.xpose.msk.msra.mxu0 %vm1202_vm12, %v6046_v39  ;;  %17344 = vmatprep.mubr.msk.f32.mxu0 %vm18617_vm11, %v21687_v26 }
 0xd17   :  { %v6202_v25 = vsel %vm1202_vm12, %v5728_v32, -inf  ;;  %17352 = vmatprep.subr.mxu0 %v21687_v26 }
 0xd18   :  { %6203 = vmax.xlane.f32.xlu1 %v6202_v25  ;;  %v5805_v44 = vpop.f32.mrb[84].mxu1 }
 0xd19   :  { %v5806_v47 = vadd.f32 %v5805_v44, %v19264_v24  ;;  %v17326_v50 = vpop.f32.mrb[85].mxu1  ;;  %17345 = vmatmul.mubr.msk.f32.vlgmr.msra.gmra.mrb[74].mxu0 %vm1202_vm12, %v6044_v48 }
 0xd1a   :  { %17354 = vmatprep.mubr.msk.f32.mxu0 %vm18617_vm11, %v21687_v26 }
 0xd1b   :  { %v6205_v45 = vsel %vm1202_vm12, %v5806_v47, -inf }
 0xd1c   :  { %6206 = vmax.xlane.f32.xlu0 %v6205_v45  ;;  %v5883_v12 = vpop.f32.mrb[86].mxu1 }
 0xd1d   :  { %v5884_v29 = vadd.f32 %v5883_v12, %v19264_v24  ;;  %v17331_v17 = vpop.f32.mrb[87].mxu1 }
 0xd1f   :  { %v6208_v57 = vsel %vm1202_vm12, %v5884_v29, -inf }
 0xd20   :  { %6209 = vmax.xlane.f32.xlu0 %v6208_v57  ;;  %v6039_v38 = vpop.f32.mrb[88].mxu1 }
 0xd21   :  { %v6040_v54 = vadd.f32 %v6039_v38, %v19264_v24  ;;  %v17341_v62 = vpop.f32.mrb[89].mxu1 }
 0xd23   :  { %v6214_v59 = vsel %vm1202_vm12, %v6040_v54, -inf }
 0xd24   :  { %6215 = vmax.xlane.f32.xlu0 %v6214_v59 }
 0xd26   :  { %v6195_v60 = vpop.f32.mrb[90].mxu1 }
 0xd27   :  { %v6196_v43 = vadd.f32 %v6195_v60, %v19264_v24  ;;  %v17351_v23 = vpop.f32.mrb[91].mxu1 }
 0xd29   :  { %v6220_v61 = vsel %vm1202_vm12, %v6196_v43, -inf }
 0xd2a   :  { %6221 = vmax.xlane.f32.xlu0 %v6220_v61 }
 0xda1   :  { %v6201_v1 = vpop.xlane.xlu0 %6200 }
 0xda2   :  { %v6223_v2 = vsub.f32 %v19806_v58, %v6201_v1 }
 0xda4   :  { %v6231_v30 = vmul.f32 1.442695, %v6223_v2  ;;  %v1185_v2 = vld [vmem:[#allocation2 + $0x20] sm:$0xff] }
 0xda5   :  { %v6204_v40 = vpop.xlane.xlu1 %6203 }
 0xda6   :  { %v6224_v15 = vsub.f32 %v5728_v32, %v6204_v40 }
 0xda8   :  { %v6233_v5 = vmul.f32 1.442695, %v6224_v15 }
 0xda9   :  { %v6207_v4 = vpop.xlane.xlu0 %6206 }
 0xdaa   :  { %18268 = vpow2.f32 %v6233_v5  ;;  %v6225_v39 = vsub.f32 %v5806_v47, %v6207_v4 }
 0xdac   :  { %v6235_v14 = vmul.f32 1.442695, %v6225_v39 }
 0xdad   :  { %v6210_v22 = vpop.xlane.xlu0 %6209 }
 0xdae   :  { %v6226_v41 = vsub.f32 %v5884_v29, %v6210_v22 }
 0xdb0   :  { %v6237_v42 = vmul.f32 1.442695, %v6226_v41 }
 0xdb1   :  { %v6216_v7 = vpop.xlane.xlu0 %6215 }
 0xdb2   :  { %18270 = vpow2.f32 %v6237_v42  ;;  %v6228_v33 = vsub.f32 %v6040_v54, %v6216_v7 }
 0xdb4   :  { %v18269_v20 = vpop.eup %18268  ;;  %v6241_v6 = vmul.f32 1.442695, %v6228_v33 }
 0xdb5   :  { %v6250_v9 = vsel %vm1202_vm12, %v18269_v20, 0.0 }
 0xdb6   :  { %18272 = vpow2.f32 %v6241_v6  ;;  %6251 = vadd.xlane.f32.xlu0 %v6250_v9 }
 0xdb7   :  { %v6222_v46 = vpop.xlane.xlu0 %6221 }
 0xdb8   :  { %v6230_v3 = vsub.f32 %v6196_v43, %v6222_v46 }
 0xdba   :  { %v6245_v63 = vmul.f32 1.442695, %v6230_v3 }
 0xdbc   :  { %v19832_v36 = vpop.eup %18270  ;;  %18274 = vpow2.f32 %v6245_v63 }
 0xdbd   :  { %v6256_v34 = vsel %vm1202_vm12, %v19832_v36, 0.0  ;;  %18276 = vpow2.f32 %v6231_v30 }
 0xdbe   :  { %6257 = vadd.xlane.f32.xlu0 %v6256_v34  ;;  %18278 = vpow2.f32 %v6235_v14 }
 0xdc0   :  { %v19836_v51 = vpop.eup %18272 }
 0xdc1   :  { %v6262_v28 = vsel %vm1202_vm12, %v19836_v51, 0.0 }
 0xdc2   :  { %6263 = vadd.xlane.f32.xlu0 %v6262_v28 }
 0xdc6   :  { %v19840_v55 = vpop.eup %18274 }
 0xdc7   :  { %v6268_v10 = vsel %vm1202_vm12, %v19840_v55, 0.0 }
 0xdc8   :  { %6269 = vadd.xlane.f32.xlu0 %v6268_v10 }
 0xdde   :  { %6363 = vrot.lane.b32.xlu0 %v19133_v31, %s18627_s12 }
 0xde2   :  { %6591 = vrot.lane.b32.xlu0 %v19172_v8, %s18627_s12  ;;  %v18277_v8 = vpop.eup %18276 }
 0xde3   :  { %v6247_v47 = vsel %vm1202_vm12, %v18277_v8, 0.0  ;;  %v18279_v50 = vpop.eup %18278 }
 0xde6   :  { %6743 = vrot.lane.b32.xlu0 %v19186_v56, %s18627_s12  ;;  %v6253_v56 = vsel %vm1202_vm12, %v18279_v50, 0.0 }
 0xde8   :  { %v5961_v16 = vpop.f32.mrb[72].mxu0 }
 0xde9   :  { %v5962_v32 = vadd.f32 %v5961_v16, %v19264_v24  ;;  %v17336_v37 = vpop.f32.mrb[73].mxu0 }
 0xdeb   :  { %v6211_v58 = vsel %vm1202_vm12, %v5962_v32, -inf }
 0xdec   :  { %v6117_v25 = vpop.f32.mrb[74].mxu0  ;;  %6212 = vmax.xlane.f32.xlu1 %v6211_v58 }
 0xded   :  { %v6118_v31 = vadd.f32 %v6117_v25, %v19264_v24  ;;  %v17346_v48 = vpop.f32.mrb[75].mxu0 }
 0xdef   :  { %v6217_v44 = vsel %vm1202_vm12, %v6118_v31, -inf }
 0xdf0   :  { %6218 = vmax.xlane.f32.xlu1 %v6217_v44 }
 0xdf4   :  { %6248 = vadd.xlane.f32.xlu1 %v6247_v47  ;;  %v7033_v47 = vld [vmem:[#allocation2 + $0x38] sm:$0xff] }
 0xdf8   :  { %6254 = vadd.xlane.f32.xlu1 %v6253_v56  ;;  %v7034_v56 = vld [vmem:[#allocation2 + $0x40] sm:$0xf] }
 0xe09   :  { %6287 = vrot.lane.b32.xlu1 %v19136_v52, %s18627_s12 }
 0xe0d   :  { %6439 = vrot.lane.b32.xlu1 %v19154_v27, %s18627_s12 }
 0xe11   :  { %6515 = vrot.lane.b32.xlu1 %v19152_v19, %s18627_s12 }
 0xe15   :  { %6667 = vrot.lane.b32.xlu1 %v19168_v53, %s18627_s12 }
 0xe43   :  { %v6252_v24 = vpop.xlane.xlu0 %6251 }
 0xe44   :  { %18280 = vrcp.f32 %v6252_v24 }
 0xe4b   :  { %v6258_v45 = vpop.xlane.xlu0 %6257 }
 0xe4e   :  { %v18281_v17 = vpop.eup %18280 }
 0xe4f   :  { %v6264_v12 = vpop.xlane.xlu0 %6263  ;;  %v6280_v38 = vmul.f32 %v18281_v17, %v18269_v20 }
 0xe55   :  { %v6270_v29 = vpop.xlane.xlu0 %6269 }
 0xe59   :  { %v6364_v57 = vpop.permute.xlu0 %6363 }
 0xe5a   :  { %17358 = vmatpush3.msra.mxu1 %v6364_v57 }
 0xe5b   :  { %17360 = vmatmul.mubr.msk.f32.vlgmr.msra.gmra.mrb[92].mxu1 %vm1202_vm12, %v6280_v38  ;;  %17367 = vmatprep.subr.mxu1 %v21687_v26  ;;  %v16263_v38 = vld [vmem:[#allocation2 + $0x28] ss:$0 sm:$0xff] }
 0xe5c   :  { %17369 = vmatprep.mubr.msk.f32.mxu1 %vm18617_vm11, %v21687_v26 }
 0xe5d   :  { %v6592_v6 = vpop.permute.xlu0 %6591 }
 0xe61   :  { %v6744_v30 = vpop.permute.xlu0 %6743 }
 0xe79   :  { %v6213_v52 = vpop.xlane.xlu1 %6212 }
 0xe7a   :  { %v6227_v19 = vsub.f32 %v5962_v32, %v6213_v52 }
 0xe7c   :  { %v6239_v27 = vmul.f32 1.442695, %v6227_v19 }
 0xe7d   :  { %v6219_v53 = vpop.xlane.xlu1 %6218 }
 0xe7e   :  { %18282 = vpow2.f32 %v6239_v27  ;;  %v6229_v54 = vsub.f32 %v6118_v31, %v6219_v53 }
 0xe80   :  { %v6243_v62 = vmul.f32 1.442695, %v6229_v54 }
 0xe81   :  { %v6249_v59 = vpop.xlane.xlu1 %6248 }
 0xe82   :  { %18284 = vpow2.f32 %v6243_v62 }
 0xe83   :  { %18286 = vrcp.f32 %v6249_v59 }
 0xe84   :  { %18288 = vrcp.f32 %v6258_v45 }
 0xe85   :  { %v6255_v60 = vpop.xlane.xlu1 %6254 }
 0xe86   :  { %18290 = vrcp.f32 %v6255_v60 }
 0xe87   :  { %18292 = vrcp.f32 %v6264_v12 }
 0xe88   :  { %v18283_v43 = vpop.eup %18282  ;;  %18294 = vrcp.f32 %v6270_v29 }
 0xe89   :  { %v6288_v23 = vpop.permute.xlu1 %6287  ;;  %v6259_v61 = vsel %vm1202_vm12, %v18283_v43, 0.0 }
 0xe8a   :  { %6260 = vadd.xlane.f32.xlu1 %v6259_v61  ;;  %17353 = vmatpush3.msra.mxu0 %v6288_v23  ;;  %v7184_v23 = vld [vmem:[%s21680_s2 + $0x40] sm:$0xf]  ;;  %v7181_v61 = vld [vmem:[%s21680_s2 + $0x28] sm:$0xf] }
 0xe8b   :  { %17362 = vmatprep.subr.mxu0 %v21687_v26 }
 0xe8c   :  { %v18285_v1 = vpop.eup %18284 }
 0xe8d   :  { %v18287_v40 = vpop.eup %18286  ;;  %v6440_v15 = vpop.permute.xlu1 %6439  ;;  %v6265_v5 = vsel %vm1202_vm12, %v18285_v1, 0.0 }
 0xe8e   :  { %v18289_v4 = vpop.eup %18288  ;;  %6266 = vadd.xlane.f32.xlu1 %v6265_v5  ;;  %v6279_v22 = vmul.f32 %v18287_v40, %v18277_v8  ;;  %v7032_v8 = vld [vmem:[#allocation2 + $0x30] sm:$0xff] }
 0xe8f   :  { %v6282_v33 = vmul.f32 %v18289_v4, %v19832_v36 }
 0xe90   :  { %v18291_v41 = vpop.eup %18290  ;;  %17355 = vmatmul.mubr.msk.f32.vlgmr.msra.gmra.mrb[76].mxu0 %vm1202_vm12, %v6279_v22 }
 0xe91   :  { %17363 = vmatpush3.msra.mxu0 %v6440_v15  ;;  %v6516_v42 = vpop.permute.xlu1 %6515  ;;  %17364 = vmatprep.mubr.msk.f32.mxu0 %vm18617_vm11, %v21687_v26  ;;  %v6281_v7 = vmul.f32 %v18291_v41, %v18279_v50  ;;  %v18293_v20 = vpop.eup %18292  ;;  %v17927_v50 = vpack.c.bf16 %v7033_v47, %v7032_v8 }
 0xe92   :  { %17368 = vmatpush3.msra.mxu1 %v6516_v42  ;;  %17372 = vmatprep.subr.mxu0 %v21687_v26  ;;  %v6284_v46 = vmul.f32 %v18293_v20, %v19836_v51  ;;  %v18295_v36 = vpop.eup %18294 }
 0xe93   :  { %17370 = vmatmul.mubr.msk.f32.vlgmr.msra.gmra.mrb[94].mxu1 %vm1202_vm12, %v6282_v33  ;;  %17377 = vmatprep.subr.mxu1 %v21687_v26  ;;  %v6286_v51 = vmul.f32 %v18295_v36, %v19840_v55  ;;  %v19935_v33 = vld [vmem:[#allocation2 + $0x44] ss:$0 sm:$0xff] }
 0xe94   :  { %17365 = vmatmul.mubr.msk.f32.vlgmr.msra.gmra.mrb[78].mxu0 %vm1202_vm12, %v6281_v7  ;;  %17379 = vmatprep.mubr.msk.f32.mxu1 %vm18617_vm11, %v21687_v26 }
 0xe95   :  { %17373 = vmatpush3.msra.mxu0 %v6592_v6  ;;  %v6668_v9 = vpop.permute.xlu1 %6667  ;;  %17374 = vmatprep.mubr.msk.f32.mxu0 %vm18617_vm11, %v21687_v26 }
 0xe96   :  { %17378 = vmatpush3.msra.mxu1 %v6668_v9  ;;  %17382 = vmatprep.subr.mxu0 %v21687_v26 }
 0xe97   :  { %17380 = vmatmul.mubr.msk.f32.vlgmr.msra.gmra.mrb[96].mxu1 %vm1202_vm12, %v6284_v46  ;;  %17387 = vmatprep.subr.mxu1 %v21687_v26 }
 0xe98   :  { %17389 = vmatprep.mubr.msk.f32.mxu1 %vm18617_vm11, %v21687_v26 }
 0xe9f   :  { %6819 = vrot.lane.b32.xlu1 %v19180_v0, %s18627_s12 }
 0xf17   :  { %v6261_v3 = vpop.xlane.xlu1 %6260 }
 0xf18   :  { %18296 = vrcp.f32 %v6261_v3 }
 0xf1b   :  { %v6267_v63 = vpop.xlane.xlu1 %6266 }
 0xf1c   :  { %18298 = vrcp.f32 %v6267_v63 }
 0xf1f   :  { %v6820_v34 = vpop.permute.xlu1 %6819 }
 0xf20   :  { %17388 = vmatpush3.msra.mxu1 %v6820_v34 }
 0xf21   :  { %17390 = vmatmul.mubr.msk.f32.vlgmr.msra.gmra.mrb[98].mxu1 %vm1202_vm12, %v6286_v51  ;;  %17928 = vmatprep.subr.bf16.mxu1 %v17927_v50 }
 0xf22   :  { %v18297_v28 = vpop.eup %18296  ;;  %17930 = vmatpush3.bf16.msra.mxu1 %v17927_v50 }
 0xf23   :  { %v6283_v10 = vmul.f32 %v18297_v28, %v18283_v43  ;;  %17410 = vmatprep.subr.msk.mxu1 %vm550_vm5, %v7034_v56  ;;  %v7182_v43 = vld [vmem:[%s21680_s2 + $0x30] sm:$0xf] }
 0xf25   :  { %17375 = vmatmul.mubr.msk.f32.vlgmr.msra.gmra.mrb[80].mxu0 %vm1202_vm12, %v6283_v10 }
 0xf26   :  { %v18299_v39 = vpop.eup %18298  ;;  %17383 = vmatpush3.msra.mxu0 %v6744_v30  ;;  %17384 = vmatprep.mubr.msk.f32.mxu0 %vm18617_vm11, %v21687_v26 }
 0xf27   :  { %v6285_v0 = vmul.f32 %v18299_v39, %v18285_v1  ;;  %17392 = vmatprep.subr.mxu0 %v1185_v2  ;;  %17411 = vmatpush3.msk.msra.mxu1 %vm550_vm5, %v7034_v56  ;;  %v7183_v1 = vld [vmem:[%s21680_s2 + $0x38] sm:$0xf] }
 0xf28   :  { %16380 = vmatprep.subr.msk.mxu1 %vm550_vm5, %v7184_v23 }
 0xf29   :  { %17385 = vmatmul.mubr.msk.f32.vlgmr.msra.gmra.mrb[82].mxu0 %vm1202_vm12, %v6285_v0 }
 0xf2a   :  { %17393 = vmatpush3.msra.mxu0 %v1185_v2 }
 0xf2b   :  { %16370 = vmatprep.subr.msk.mxu0 %vm550_vm5, %v7182_v43 }
 0xf2e   :  { %v6435_v55 = vpop.f32.mrb[92].mxu1 }
 0xf2f   :  { %v17361_v14 = vpop.f32.mrb[93].mxu1 }
 0xf63   :  { %v6359_v16 = vpop.f32.mrb[76].mxu0 }
 0xf64   :  { %v17356_v32 = vpop.f32.mrb[77].mxu0  ;;  %17394 = vmatprep.mubr.msk.f32.mxu0 %vm1202_vm12, %v6359_v16 }
 0xf65   :  { %17395 = vmatmul.mubr.msk.f32.vlgmr.msra.gmra.mrb[40].mxu0 %vm1202_vm12, %v6435_v55 }
 0xf66   :  { %v6587_v37 = vpop.f32.mrb[94].mxu1  ;;  %16371 = vmatpush1.msk.msra.mxu0 %vm550_vm5, %v7181_v61 }
 0xf67   :  { %v6511_v58 = vpop.f32.mrb[78].mxu0  ;;  %v17371_v25 = vpop.f32.mrb[95].mxu1 }
 0xf68   :  { %v17366_v31 = vpop.f32.mrb[79].mxu0  ;;  %17397 = vmatprep.mubr.msk.f32.mxu0 %vm1202_vm12, %v6511_v58 }
 0xf69   :  { %17398 = vmatmul.mubr.msk.f32.gmra.mrb[42].mxu0 %vm1202_vm12, %v6587_v37 }
 0xf6a   :  { %v6739_v48 = vpop.f32.mrb[96].mxu1 }
 0xf6b   :  { %v17381_v44 = vpop.f32.mrb[97].mxu1 }
 0xff4   :  { %v6891_v24 = vpop.f32.mrb[98].mxu1 }
 0xff5   :  { %v17391_v45 = vpop.f32.mrb[99].mxu1 }
 0xff8   :  { %v6663_v12 = vpop.f32.mrb[80].mxu0 }
 0xff9   :  { %v17376_v29 = vpop.f32.mrb[81].mxu0  ;;  %17400 = vmatprep.mubr.msk.f32.mxu0 %vm1202_vm12, %v6663_v12 }
 0xffa   :  { %17401 = vmatmul.mubr.msk.f32.gmra.mrb[44].mxu0 %vm1202_vm12, %v6739_v48 }
 0xffc   :  { %v6815_v17 = vpop.f32.mrb[82].mxu0 }
 0xffd   :  { %v17386_v57 = vpop.f32.mrb[83].mxu0  ;;  %17403 = vmatprep.mubr.msk.f32.mxu0 %vm1202_vm12, %v6815_v17 }
 0xffe   :  { %17404 = vmatmul.mubr.msk.f32.gmra.mrb[46].mxu0 %vm1202_vm12, %v6891_v24 }
 0xfff   :  { %7402 = vmatprep.mubr.f32.mxu0 %v21687_v26 }
0x1038   :  { %v17396_v52 = vpop.f32.mrb[40].mxu0 }
0x1039   :  { %v6985_v19 = vpop.f32.mrb[41].mxu0  ;;  %v17972_v53 = vadd.f32 %v17396_v52, %v16263_v38 }
0x103a   :  { %v17973_v27 = vadd.f32 %v16263_v38, %v6985_v19 }
0x103c   :  { %v17399_v54 = vpop.f32.mrb[42].mxu0  ;;  %17412 = vmatprep.mubr.msk.f32.mxu1 %vm7040_vm14, %v17973_v27 }
0x103d   :  { %v6995_v62 = vpop.f32.mrb[43].mxu0  ;;  %17413 = vmatmul.mubr.msk.f32.vlgmr.msra.gmra.mrb[100].mxu1 %vm7040_vm14, %v17972_v53  ;;  %v17974_v60 = vadd.f32 %v17399_v54, %v16263_v38 }
0x103e   :  { %v17975_v59 = vadd.f32 %v16263_v38, %v6995_v62  ;;  %16381 = vmatpush1.msk.msra.mxu1 %vm550_vm5, %v7183_v1 }
0x103f   :  { %17438 = vmatprep.subr.mxu1 %v21687_v26 }
0x1040   :  { %17415 = vmatprep.mubr.msk.f32.mxu1 %vm7040_vm14, %v17975_v59 }
0x1041   :  { %17416 = vmatmul.mubr.msk.f32.gmra.mrb[102].mxu1 %vm7040_vm14, %v17974_v60 }
0x10cd   :  { %v17402_v40 = vpop.f32.mrb[44].mxu0 }
0x10ce   :  { %v7005_v15 = vpop.f32.mrb[45].mxu0  ;;  %v17976_v4 = vadd.f32 %v17402_v40, %v16263_v38 }
0x10cf   :  { %v17977_v5 = vadd.f32 %v16263_v38, %v7005_v15 }
0x10d1   :  { %v17405_v22 = vpop.f32.mrb[46].mxu0  ;;  %17418 = vmatprep.mubr.msk.f32.mxu1 %vm7040_vm14, %v17977_v5 }
0x10d2   :  { %v7015_v41 = vpop.f32.mrb[47].mxu0  ;;  %17419 = vmatmul.mubr.msk.f32.gmra.mrb[104].mxu1 %vm7040_vm14, %v17976_v4  ;;  %v17978_v7 = vadd.f32 %v17405_v22, %v16263_v38 }
0x10d3   :  { %v17979_v42 = vadd.f32 %v16263_v38, %v7015_v41 }
0x10d5   :  { %17421 = vmatprep.mubr.msk.f32.mxu1 %vm7040_vm14, %v17979_v42 }
0x10d6   :  { %17422 = vmatmul.mubr.msk.f32.gmra.mrb[106].mxu1 %vm7040_vm14, %v17978_v7 }
0x10d7   :  { %7515 = vmatprep.mubr.f32.mxu1 %v21687_v26 }
0x1110   :  { %v17414_v20 = vpop.f32.mrb[100].mxu1 }
0x1111   :  { %v7140_v6 = vadd.f32 %v17414_v20, %v19935_v33  ;;  %v7134_v9 = vpop.f32.mrb[101].mxu1 }
0x1112   :  { %v7135_v46 = vadd.f32 %v19935_v33, %v7134_v9 }
0x1113   :  { %18300 = vtanh.f32 %v7140_v6 }
0x1114   :  { %18302 = vtanh.f32 %v7135_v46  ;;  %v17417_v3 = vpop.f32.mrb[102].mxu1 }
0x1115   :  { %v7150_v63 = vadd.f32 %v17417_v3, %v19935_v33  ;;  %v7144_v36 = vpop.f32.mrb[103].mxu1 }
0x1116   :  { %v7145_v34 = vadd.f32 %v19935_v33, %v7144_v36 }
0x1117   :  { %18304 = vtanh.f32 %v7150_v63 }
0x1118   :  { %18306 = vtanh.f32 %v7145_v34 }
0x111d   :  { %v18301_v51 = vpop.eup %18300 }
0x111e   :  { %v18303_v28 = vpop.eup %18302  ;;  %v7188_v10 = vrot.slane %v18301_v51, 1 }
0x111f   :  { %v7187_v2 = vrot.slane %v18303_v28, 1 }
0x1120   :  { %v7196_v30 = vsub.f32 %v7188_v10, %v18301_v51 }
0x1121   :  { %v18305_v39 = vpop.eup %18304  ;;  %v7195_v0 = vsub.f32 %v7187_v2, %v18303_v28  ;;  %v7185_v2 = vld [vmem:[%s21680_s2 + $0x48] sm:$0xf] }
0x1122   :  { %v18307_v55 = vpop.eup %18306  ;;  %v7190_v14 = vrot.slane %v18305_v39, 1  ;;  %v19944_v16 = vsel %vm7186_vm15, %v7196_v30, 0.0  ;;  %17424 = vmatprep.subr.msk.mxu0 %vm550_vm5, %v7185_v2 }
0x1123   :  { %v7189_v32 = vrot.slane %v18307_v55, 1  ;;  %v19948_v37 = vsel %vm7186_vm15, %v7195_v0, 0.0  ;;  %v7212_v58 = vrot.slane %v19944_v16, 7  ;;  %v7284_v40 = vmul.f32 0.5, %v19944_v16 }
0x1124   :  { %16372 = vmatmul.mubr.msk.f32.vlgmr.msra.gmra.mrb[84].mxu0 %vm525_vm7, %v19948_v37  ;;  %16382 = vmatmul.mubr.msk.f32.vlgmr.msra.gmra.mrb[108].mxu1 %vm525_vm7, %v19948_v37  ;;  %v7198_v25 = vsub.f32 %v7190_v14, %v18305_v39  ;;  %v7211_v31 = vrot.slane %v19948_v37, 7  ;;  %v7283_v7 = vmul.f32 0.5, %v19948_v37 }
0x1125   :  { %7408 = vmatprep.mubr.f32.mxu0 %v21687_v26  ;;  %7521 = vmatprep.mubr.f32.mxu1 %v21687_v26  ;;  %v7197_v48 = vsub.f32 %v7189_v32, %v18307_v55  ;;  %v7220_v44 = vsel %vm442_vm8, %v7212_v58, 0.0 }
0x1126   :  { %v19962_v8 = vsel %vm7186_vm15, %v7198_v25, 0.0  ;;  %v7228_v47 = vadd.f32 %v7220_v44, %v19944_v16  ;;  %v7219_v50 = vsel %vm442_vm8, %v7211_v31, 0.0  ;;  %17425 = vmatpush3.msk.msra.mxu0 %vm550_vm5, %v7185_v2 }
0x1127   :  { %v19969_v56 = vsel %vm7186_vm15, %v7197_v48, 0.0  ;;  %v7227_v24 = vadd.f32 %v7219_v50, %v19948_v37  ;;  %v7214_v45 = vrot.slane %v19962_v8, 7  ;;  %v7286_v36 = vmul.f32 0.5, %v19962_v8  ;;  %17458 = vmatprep.subr.mxu0 %v21687_v26 }
0x1128   :  { %16373 = vmatmul.mubr.msk.f32.gmra.mrb[86].mxu0 %vm525_vm7, %v19944_v16  ;;  %16383 = vmatmul.mubr.msk.f32.gmra.mrb[110].mxu1 %vm525_vm7, %v19944_v16  ;;  %v7236_v12 = vrot.slane %v7228_v47, 6  ;;  %v7213_v29 = vrot.slane %v19969_v56, 7  ;;  %v7285_v10 = vmul.f32 0.5, %v19969_v56 }
0x1129   :  { %7414 = vmatprep.mubr.f32.mxu0 %v21687_v26  ;;  %7527 = vmatprep.mubr.f32.mxu1 %v21687_v26  ;;  %v7235_v17 = vrot.slane %v7227_v24, 6  ;;  %v7222_v57 = vsel %vm442_vm8, %v7214_v45, 0.0 }
0x112a   :  { %v7244_v38 = vsel %vm467_vm9, %v7236_v12, 0.0  ;;  %v7230_v52 = vadd.f32 %v7222_v57, %v19962_v8  ;;  %v7221_v19 = vsel %vm442_vm8, %v7213_v29, 0.0 }
0x112b   :  { %v7252_v27 = vadd.f32 %v7244_v38, %v7228_v47  ;;  %v7243_v53 = vsel %vm467_vm9, %v7235_v17, 0.0  ;;  %v7229_v59 = vadd.f32 %v7221_v19, %v19969_v56 }
0x112c   :  { %16374 = vmatmul.mubr.msk.f32.gmra.mrb[88].mxu0 %vm525_vm7, %v19969_v56  ;;  %16384 = vmatmul.mubr.msk.f32.gmra.mrb[112].mxu1 %vm525_vm7, %v19969_v56  ;;  %v7251_v54 = vadd.f32 %v7243_v53, %v7227_v24  ;;  %v7238_v62 = vrot.slane %v7230_v52, 6 }
0x112d   :  { %7420 = vmatprep.mubr.f32.mxu0 %v21687_v26  ;;  %7533 = vmatprep.mubr.f32.mxu1 %v21687_v26  ;;  %v7260_v60 = vrot.slane %v7252_v27, 4  ;;  %v7237_v5 = vrot.slane %v7229_v59, 6 }
0x112e   :  { %v7259_v43 = vrot.slane %v7251_v54, 4  ;;  %v7246_v61 = vsel %vm467_vm9, %v7238_v62, 0.0 }
0x112f   :  { %v7268_v23 = vsel %vm492_vm10, %v7260_v60, 0.0  ;;  %v7254_v22 = vadd.f32 %v7246_v61, %v7230_v52  ;;  %v7245_v42 = vsel %vm467_vm9, %v7237_v5, 0.0 }
0x1130   :  { %16375 = vmatmul.mubr.msk.f32.gmra.mrb[90].mxu0 %vm525_vm7, %v19962_v8  ;;  %16385 = vmatmul.mubr.msk.f32.gmra.mrb[114].mxu1 %vm525_vm7, %v19962_v8  ;;  %v7276_v1 = vadd.f32 %v7268_v23, %v7252_v27  ;;  %v7267_v15 = vsel %vm492_vm10, %v7259_v43, 0.0  ;;  %v7253_v9 = vadd.f32 %v7245_v42, %v7229_v59 }
0x1131   :  { %7426 = vmatprep.mubr.f32.mxu0 %v21687_v26  ;;  %7539 = vmatprep.mubr.f32.mxu1 %v21687_v26  ;;  %v7275_v41 = vadd.f32 %v7267_v15, %v7251_v54  ;;  %v7262_v20 = vrot.slane %v7254_v22, 4 }
0x1132   :  { %v7292_v4 = vsub.f32 %v7276_v1, %v7284_v40  ;;  %v7261_v3 = vrot.slane %v7253_v9, 4 }
0x1133   :  { %v7291_v6 = vsub.f32 %v7275_v41, %v7283_v7  ;;  %v7270_v46 = vsel %vm492_vm10, %v7262_v20, 0.0 }
0x1134   :  { %7826 = vperm.xlu0 %18101, %v7292_v4   ;;  %7676 = vperm.xlu1 %18098, %v7292_v4   ;;  %v7278_v63 = vadd.f32 %v7270_v46, %v7254_v22  ;;  %v7269_v34 = vsel %vm492_vm10, %v7261_v3, 0.0 }
0x1135   :  { %v7277_v28 = vadd.f32 %v7269_v34, %v7253_v9 }
0x1136   :  { %v7294_v51 = vsub.f32 %v7278_v63, %v7286_v36 }
0x1137   :  { %v7293_v30 = vsub.f32 %v7277_v28, %v7285_v10 }
0x1138   :  { %18102 = vset.pattern.permute.xlu0 %v21683_v11  ;;  %18099 = vset.pattern.permute.xlu1 %v18613_v49 }
0x1139   :  { %7730 = vperm.xlu1 %18099, %v7292_v4   ;;  %7671 = vperm.xlu0 %18102, %v7291_v6  }
0x113d   :  { %18100 = vset.pattern.permute.xlu1 %v18615_v13  ;;  %18104 = vset.pattern.permute.xlu0 %v18615_v13 }
0x113e   :  { %7778 = vperm.xlu1 %18100, %v7292_v4   ;;  %7774 = vperm.xlu0 %18104, %v7291_v6  }
0x1142   :  { %18103 = vset.pattern.permute.xlu1 %v18613_v49  ;;  %18107 = vset.pattern.permute.xlu0 %v18613_v49 }
0x1143   :  { %7726 = vperm.xlu1 %18103, %v7291_v6   ;;  %7738 = vperm.xlu0 %18107, %v7294_v51  }
0x1147   :  { %18105 = vset.pattern.permute.xlu1 %v18616_v21  ;;  %18110 = vset.pattern.permute.xlu0 %v21683_v11 }
0x1148   :  { %7822 = vperm.xlu1 %18105, %v7291_v6   ;;  %7681 = vperm.xlu0 %18110, %v7293_v30  }
0x114c   :  { %18106 = vset.pattern.permute.xlu1 %v21683_v11 }
0x114d   :  { %7686 = vperm.xlu1 %18106, %v7294_v51  }
0x1151   :  { %18108 = vset.pattern.permute.xlu1 %v18615_v13 }
0x1152   :  { %7786 = vperm.xlu1 %18108, %v7294_v51  }
0x1156   :  { %18109 = vset.pattern.permute.xlu1 %v18616_v21 }
0x1157   :  { %7834 = vperm.xlu1 %18109, %v7294_v51  }
0x115b   :  { %18111 = vset.pattern.permute.xlu1 %v18613_v49 }
0x115c   :  { %7734 = vperm.xlu1 %18111, %v7293_v30  }
0x1160   :  { %18112 = vset.pattern.permute.xlu1 %v18615_v13 }
0x1161   :  { %7782 = vperm.xlu1 %18112, %v7293_v30  }
0x1165   :  { %18113 = vset.pattern.permute.xlu1 %v18616_v21 }
0x1166   :  { %7830 = vperm.xlu1 %18113, %v7293_v30  }
0x116a   :  { %18115 = vset.pattern.permute.xlu1 %v18615_v13 }
0x11a5   :  { %v17420_v39 = vpop.f32.mrb[104].mxu1 }
0x11a6   :  { %v7160_v0 = vadd.f32 %v17420_v39, %v19935_v33  ;;  %v7154_v55 = vpop.f32.mrb[105].mxu1 }
0x11a7   :  { %v7155_v14 = vadd.f32 %v19935_v33, %v7154_v55 }
0x11a8   :  { %18308 = vtanh.f32 %v7160_v0 }
0x11a9   :  { %18310 = vtanh.f32 %v7155_v14  ;;  %v17423_v32 = vpop.f32.mrb[106].mxu1 }
0x11aa   :  { %v7170_v58 = vadd.f32 %v17423_v32, %v19935_v33  ;;  %v7164_v25 = vpop.f32.mrb[107].mxu1 }
0x11ab   :  { %v7165_v31 = vadd.f32 %v19935_v33, %v7164_v25 }
0x11ac   :  { %18312 = vtanh.f32 %v7170_v58 }
0x11ad   :  { %18314 = vtanh.f32 %v7165_v31 }
0x11b2   :  { %v18309_v48 = vpop.eup %18308 }
0x11b3   :  { %v18311_v44 = vpop.eup %18310  ;;  %v7192_v47 = vrot.slane %v18309_v48, 1  ;;  %v20112_v30 = vpop.permute.xlu1 %7676 }
0x11b4   :  { %v7191_v50 = vrot.slane %v18311_v44, 1 }
0x11b5   :  { %v7200_v24 = vsub.f32 %v7192_v47, %v18309_v48 }
0x11b6   :  { %v18313_v45 = vpop.eup %18312  ;;  %v7199_v12 = vsub.f32 %v7191_v50, %v18311_v44 }
0x11b7   :  { %v18315_v29 = vpop.eup %18314  ;;  %v7194_v17 = vrot.slane %v18313_v45, 1  ;;  %v20045_v57 = vsel %vm7186_vm15, %v7200_v24, 0.0 }
0x11b8   :  { %v7193_v38 = vrot.slane %v18315_v29, 1  ;;  %v20049_v52 = vsel %vm7186_vm15, %v7199_v12, 0.0  ;;  %v7216_v33 = vrot.slane %v20045_v57, 7  ;;  %v7288_v36 = vmul.f32 0.5, %v20045_v57 }
0x11b9   :  { %16376 = vmatmul.mubr.msk.f32.gmra.mrb[92].mxu0 %vm525_vm7, %v20049_v52  ;;  %16386 = vmatmul.mubr.msk.f32.gmra.mrb[116].mxu1 %vm525_vm7, %v20049_v52  ;;  %v7202_v19 = vsub.f32 %v7194_v17, %v18313_v45  ;;  %v7215_v27 = vrot.slane %v20049_v52, 7  ;;  %v7287_v0 = vmul.f32 0.5, %v20049_v52  ;;  %v20155_v17 = vpop.permute.xlu0 %7826 }
0x11ba   :  { %7432 = vmatprep.mubr.f32.mxu0 %v21687_v26  ;;  %7545 = vmatprep.mubr.f32.mxu1 %v21687_v26  ;;  %v7201_v53 = vsub.f32 %v7193_v38, %v18315_v29  ;;  %v7224_v54 = vsel %vm442_vm8, %v7216_v33, 0.0 }
0x11bb   :  { %v20063_v62 = vsel %vm7186_vm15, %v7202_v19, 0.0  ;;  %v7232_v59 = vadd.f32 %v7224_v54, %v20045_v57  ;;  %v7223_v60 = vsel %vm442_vm8, %v7215_v27, 0.0 }
0x11bc   :  { %v20070_v43 = vsel %vm7186_vm15, %v7201_v53, 0.0  ;;  %v7231_v23 = vadd.f32 %v7223_v60, %v20049_v52  ;;  %v7218_v61 = vrot.slane %v20063_v62, 7  ;;  %v7290_v47 = vmul.f32 0.5, %v20063_v62 }
0x11bd   :  { %16377 = vmatmul.mubr.msk.f32.gmra.mrb[94].mxu0 %vm525_vm7, %v20045_v57  ;;  %16387 = vmatmul.mubr.msk.f32.gmra.mrb[118].mxu1 %vm525_vm7, %v20045_v57  ;;  %v7240_v1 = vrot.slane %v7232_v59, 6  ;;  %v7217_v40 = vrot.slane %v20070_v43, 7  ;;  %v7289_v50 = vmul.f32 0.5, %v20070_v43  ;;  %v7672_v38 = vpop.permute.xlu0 %7671 }
0x11be   :  { %7438 = vmatprep.mubr.f32.mxu0 %v21687_v26  ;;  %7551 = vmatprep.mubr.f32.mxu1 %v21687_v26  ;;  %v7239_v15 = vrot.slane %v7231_v23, 6  ;;  %v7226_v4 = vsel %vm442_vm8, %v7218_v61, 0.0 }
0x11bf   :  { %v7248_v5 = vsel %vm467_vm9, %v7240_v1, 0.0  ;;  %v7225_v22 = vsel %vm442_vm8, %v7217_v40, 0.0  ;;  %v7234_v6 = vadd.f32 %v7226_v4, %v20063_v62 }
0x11c0   :  { %v7256_v41 = vadd.f32 %v7248_v5, %v7232_v59  ;;  %v7247_v42 = vsel %vm467_vm9, %v7239_v15, 0.0  ;;  %v7233_v9 = vadd.f32 %v7225_v22, %v20070_v43 }
0x11c1   :  { %16378 = vmatmul.mubr.msk.f32.gmra.mrb[96].mxu0 %vm525_vm7, %v20070_v43  ;;  %16388 = vmatmul.mubr.msk.f32.gmra.mrb[120].mxu1 %vm525_vm7, %v20070_v43  ;;  %v7255_v7 = vadd.f32 %v7247_v42, %v7231_v23  ;;  %v7242_v51 = vrot.slane %v7234_v6, 6  ;;  %v7775_v33 = vpop.permute.xlu0 %7774 }
0x11c2   :  { %7444 = vmatprep.mubr.f32.mxu0 %v21687_v26  ;;  %7557 = vmatprep.mubr.f32.mxu1 %v21687_v26  ;;  %v7264_v20 = vrot.slane %v7256_v41, 4  ;;  %v7241_v28 = vrot.slane %v7233_v9, 6 }
0x11c3   :  { %v7263_v46 = vrot.slane %v7255_v7, 4 }
0x11c4   :  { %v7272_v3 = vsel %vm492_vm10, %v7264_v20, 0.0  ;;  %v7249_v39 = vsel %vm467_vm9, %v7241_v28, 0.0 }
0x11c5   :  { %16379 = vmatmul.mubr.msk.f32.gmra.mrb[98].mxu0 %vm525_vm7, %v20063_v62  ;;  %16389 = vmatmul.mubr.msk.f32.gmra.mrb[122].mxu1 %vm525_vm7, %v20063_v62  ;;  %v7280_v63 = vadd.f32 %v7272_v3, %v7256_v41  ;;  %v7271_v34 = vsel %vm492_vm10, %v7263_v46, 0.0  ;;  %v7257_v14 = vadd.f32 %v7249_v39, %v7233_v9  ;;  %v7739_v27 = vpop.permute.xlu0 %7738 }
0x11c6   :  { %17426 = vmatprep.mubr.msk.f32.mxu0 %vm525_vm7, %v19948_v37  ;;  %17440 = vmatprep.mubr.msk.f32.mxu1 %vm18617_vm11, %v21687_v26  ;;  %v7279_v2 = vadd.f32 %v7271_v34, %v7255_v7  ;;  %v7250_v37 = vsel %vm467_vm9, %v7242_v51, 0.0 }
0x11c7   :  { %v7296_v10 = vsub.f32 %v7280_v63, %v7288_v36  ;;  %v7258_v55 = vadd.f32 %v7250_v37, %v7234_v6  ;;  %v7265_v58 = vrot.slane %v7257_v14, 4 }
0x11c9   :  { %17427 = vmatmul.mubr.msk.f32.vlgmr.msra.gmra.mrb[100].mxu0 %vm525_vm7, %v19944_v16  ;;  %7794 = vperm.xlu1 %18115, %v7296_v10   ;;  %v7295_v16 = vsub.f32 %v7279_v2, %v7287_v0  ;;  %v7266_v32 = vrot.slane %v7258_v55, 4  ;;  %v7273_v25 = vsel %vm492_vm10, %v7265_v58, 0.0  ;;  %v7682_v42 = vpop.permute.xlu0 %7681 }
0x11ca   :  { %7696 = vperm.xlu0 %18110, %v7296_v10   ;;  %17429 = vmatprep.mubr.msk.f32.mxu0 %vm525_vm7, %v19969_v56  ;;  %v20127_v56 = vpop.permute.xlu1 %7730  ;;  %v7281_v44 = vadd.f32 %v7273_v25, %v7257_v14 }
0x11cc   :  { %v7297_v12 = vsub.f32 %v7281_v44, %v7289_v50 }
0x11cd   :  { %17430 = vmatmul.mubr.msk.f32.gmra.mrb[102].mxu0 %vm525_vm7, %v19962_v8  ;;  %18117 = vset.pattern.permute.xlu1 %v21683_v11  ;;  %v7274_v8 = vsel %vm492_vm10, %v7266_v32, 0.0 }
0x11ce   :  { %18114 = vset.pattern.permute.xlu0 %v18613_v49  ;;  %17432 = vmatprep.mubr.msk.f32.mxu0 %vm525_vm7, %v20049_v52  ;;  %v20141_v31 = vpop.permute.xlu1 %7778  ;;  %v7282_v48 = vadd.f32 %v7274_v8, %v7258_v55 }
0x11cf   :  { %7691 = vperm.xlu1 %18117, %v7295_v16   ;;  %7746 = vperm.xlu0 %18114, %v7296_v10  }
0x11d0   :  { %v7298_v45 = vsub.f32 %v7282_v48, %v7290_v47 }
0x11d1   :  { %17433 = vmatmul.mubr.msk.f32.gmra.mrb[104].mxu0 %vm525_vm7, %v20045_v57 }
0x11d2   :  { %17435 = vmatprep.mubr.msk.f32.mxu0 %vm525_vm7, %v20070_v43  ;;  %v7727_v24 = vpop.permute.xlu1 %7726 }
0x11d3   :  { %18118 = vset.pattern.permute.xlu1 %v18613_v49  ;;  %18116 = vset.pattern.permute.xlu0 %v18616_v21 }
0x11d4   :  { %7742 = vperm.xlu1 %18118, %v7295_v16   ;;  %7842 = vperm.xlu0 %18116, %v7296_v10  }
0x11d5   :  { %17436 = vmatmul.mubr.msk.f32.gmra.mrb[106].mxu0 %vm525_vm7, %v20063_v62 }
0x11d6   :  { %17460 = vmatprep.mubr.msk.f32.mxu0 %vm18617_vm11, %v21687_v26  ;;  %v20151_v29 = vpop.permute.xlu1 %7822 }
0x11d8   :  { %18120 = vset.pattern.permute.xlu1 %v18616_v21  ;;  %18119 = vset.pattern.permute.xlu0 %v18615_v13 }
0x11d9   :  { %7838 = vperm.xlu1 %18120, %v7295_v16   ;;  %7790 = vperm.xlu0 %18119, %v7295_v16  }
0x11da   :  { %v7687_v57 = vpop.permute.xlu1 %7686 }
0x11dd   :  { %18121 = vset.pattern.permute.xlu1 %v21683_v11  ;;  %18125 = vset.pattern.permute.xlu0 %v18613_v49 }
0x11de   :  { %7706 = vperm.xlu1 %18121, %v7298_v45   ;;  %7750 = vperm.xlu0 %18125, %v7297_v12   ;;  %v7787_v52 = vpop.permute.xlu1 %7786 }
0x11e2   :  { %18122 = vset.pattern.permute.xlu1 %v18613_v49  ;;  %18127 = vset.pattern.permute.xlu0 %v18616_v21  ;;  %v20161_v19 = vpop.permute.xlu1 %7834 }
0x11e3   :  { %7754 = vperm.xlu1 %18122, %v7298_v45   ;;  %7846 = vperm.xlu0 %18127, %v7297_v12  }
0x11e6   :  { %v7735_v43 = vpop.permute.xlu1 %7734 }
0x11e7   :  { %18123 = vset.pattern.permute.xlu1 %v18615_v13  ;;  %18134 = vset.pattern.permute.xlu0 %v21683_v11 }
0x11e8   :  { %7802 = vperm.xlu1 %18123, %v7298_v45  }
0x11ea   :  { %v7783_v28 = vpop.permute.xlu1 %7782 }
0x11ec   :  { %18124 = vset.pattern.permute.xlu1 %v21683_v11 }
0x11ed   :  { %7701 = vperm.xlu1 %18124, %v7297_v12  }
0x11ee   :  { %v20176_v44 = vpop.permute.xlu1 %7830 }
0x11f1   :  { %18126 = vset.pattern.permute.xlu1 %v18615_v13 }
0x11f2   :  { %7798 = vperm.xlu1 %18126, %v7297_v12  }
0x11f6   :  { %18128 = vset.pattern.permute.xlu1 %v18616_v21 }
0x11f7   :  { %v7404_v53 = vpop.f32.mrb[84].mxu0  ;;  %v7517_v54 = vpop.f32.mrb[108].mxu1  ;;  %7850 = vperm.xlu1 %18128, %v7298_v45  }
0x11f8   :  { %v7406_v62 = vpop.f32.mrb[85].mxu0  ;;  %v7519_v59 = vpop.f32.mrb[109].mxu1  ;;  %v7757_v23 = vmul.f32 %v7727_v24, %v7517_v54 }
0x11f9   :  { %v7709_v60 = vmul.f32 %v7672_v38, %v7406_v62  ;;  %v7805_v22 = vmul.f32 %v7775_v33, %v7519_v59 }
0x11fb   :  { %v7717_v61 = vadd.f32 %v7709_v60, %v7404_v53  ;;  %v7410_v1 = vpop.f32.mrb[86].mxu0  ;;  %v7523_v40 = vpop.f32.mrb[110].mxu1  ;;  %18135 = vset.pattern.permute.xlu1 %v18613_v49 }
0x11fc   :  { %v7412_v15 = vpop.f32.mrb[87].mxu0  ;;  %v7525_v5 = vpop.f32.mrb[111].mxu1  ;;  %v7758_v20 = vmul.f32 %v20127_v56, %v7523_v40 }
0x11fd   :  { %v7765_v4 = vadd.f32 %v7757_v23, %v7717_v61  ;;  %v7710_v41 = vmul.f32 %v20112_v30, %v7412_v15  ;;  %v7806_v34 = vmul.f32 %v20141_v31, %v7525_v5 }
0x11ff   :  { %v20166_v7 = vadd.f32 %v7805_v22, %v7765_v4  ;;  %v7718_v6 = vadd.f32 %v7710_v41, %v7410_v1  ;;  %v7416_v9 = vpop.f32.mrb[88].mxu0  ;;  %v7529_v46 = vpop.f32.mrb[112].mxu1 }
0x1200   :  { %v7418_v3 = vpop.f32.mrb[89].mxu0  ;;  %v7531_v63 = vpop.f32.mrb[113].mxu1  ;;  %v7759_v2 = vmul.f32 %v7735_v43, %v7529_v46 }
0x1201   :  { %v7766_v36 = vadd.f32 %v7758_v20, %v7718_v6  ;;  %v7711_v51 = vmul.f32 %v7682_v42, %v7418_v3  ;;  %v7807_v14 = vmul.f32 %v7783_v28, %v7531_v63 }
0x1203   :  { %v20170_v10 = vadd.f32 %v7806_v34, %v7766_v36  ;;  %v7719_v37 = vadd.f32 %v7711_v51, %v7416_v9  ;;  %v7422_v30 = vpop.f32.mrb[90].mxu0  ;;  %v7535_v39 = vpop.f32.mrb[114].mxu1 }
0x1204   :  { %v7424_v0 = vpop.f32.mrb[91].mxu0  ;;  %v7537_v16 = vpop.f32.mrb[115].mxu1  ;;  %v7760_v58 = vmul.f32 %v7739_v27, %v7535_v39 }
0x1205   :  { %v7767_v55 = vadd.f32 %v7759_v2, %v7719_v37  ;;  %v7712_v56 = vmul.f32 %v7687_v57, %v7424_v0  ;;  %v7808_v48 = vmul.f32 %v7787_v52, %v7537_v16 }
0x1207   :  { %v20172_v32 = vadd.f32 %v7807_v14, %v7767_v55  ;;  %v7720_v8 = vadd.f32 %v7712_v56, %v7422_v30 }
0x1209   :  { %v7768_v25 = vadd.f32 %v7760_v58, %v7720_v8 }
0x120b   :  { %v20174_v31 = vadd.f32 %v7808_v48, %v7768_v25 }
0x1248   :  { %v7795_v47 = vpop.permute.xlu1 %7794 }
0x1249   :  { %v7697_v12 = vpop.permute.xlu0 %7696 }
0x124e   :  { %v7692_v50 = vpop.permute.xlu1 %7691  ;;  %v7747_v33 = vpop.permute.xlu0 %7746 }
0x1253   :  { %v7743_v24 = vpop.permute.xlu1 %7742  ;;  %v20180_v57 = vpop.permute.xlu0 %7842 }
0x1258   :  { %v20178_v45 = vpop.permute.xlu1 %7838  ;;  %v7791_v43 = vpop.permute.xlu0 %7790 }
0x125d   :  { %v7707_v38 = vpop.permute.xlu1 %7706  ;;  %v7751_v2 = vpop.permute.xlu0 %7750 }
0x1262   :  { %v7755_v53 = vpop.permute.xlu1 %7754 }
0x1267   :  { %v7803_v54 = vpop.permute.xlu1 %7802 }
0x126c   :  { %v7702_v23 = vpop.permute.xlu1 %7701 }
0x1271   :  { %v7799_v37 = vpop.permute.xlu1 %7798 }
0x128c   :  { %v7428_v27 = vpop.f32.mrb[92].mxu0  ;;  %v7541_v62 = vpop.f32.mrb[116].mxu1 }
0x128d   :  { %v7430_v59 = vpop.f32.mrb[93].mxu0  ;;  %v7543_v52 = vpop.f32.mrb[117].mxu1  ;;  %v7761_v61 = vmul.f32 %v7743_v24, %v7541_v62 }
0x128e   :  { %v7713_v60 = vmul.f32 %v7692_v50, %v7430_v59  ;;  %v7809_v41 = vmul.f32 %v7791_v43, %v7543_v52 }
0x1290   :  { %v7721_v1 = vadd.f32 %v7713_v60, %v7428_v27  ;;  %v7434_v40 = vpop.f32.mrb[94].mxu0  ;;  %v7547_v15 = vpop.f32.mrb[118].mxu1 }
0x1291   :  { %v7436_v5 = vpop.f32.mrb[95].mxu0  ;;  %v7549_v4 = vpop.f32.mrb[119].mxu1  ;;  %v7762_v6 = vmul.f32 %v7747_v33, %v7547_v15 }
0x1292   :  { %v7769_v22 = vadd.f32 %v7761_v61, %v7721_v1  ;;  %v7714_v42 = vmul.f32 %v7697_v12, %v7436_v5  ;;  %v7810_v51 = vmul.f32 %v7795_v47, %v7549_v4 }
0x1294   :  { %v7817_v20 = vadd.f32 %v7809_v41, %v7769_v22  ;;  %v7722_v9 = vadd.f32 %v7714_v42, %v7434_v40  ;;  %v7440_v46 = vpop.f32.mrb[96].mxu0  ;;  %v7553_v3 = vpop.f32.mrb[120].mxu1 }
0x1295   :  { %v7442_v63 = vpop.f32.mrb[97].mxu0  ;;  %v7555_v36 = vpop.f32.mrb[121].mxu1  ;;  %v7763_v39 = vmul.f32 %v7751_v2, %v7553_v3 }
0x1296   :  { %v7770_v34 = vadd.f32 %v7762_v6, %v7722_v9  ;;  %v7715_v28 = vmul.f32 %v7702_v23, %v7442_v63  ;;  %v7811_v8 = vmul.f32 %v7799_v37, %v7555_v36  ;;  %v7847_v37 = vpop.permute.xlu0 %7846 }
0x1298   :  { %v7818_v30 = vadd.f32 %v7810_v51, %v7770_v34  ;;  %v7723_v0 = vadd.f32 %v7715_v28, %v7440_v46  ;;  %v7446_v16 = vpop.f32.mrb[98].mxu0  ;;  %v7559_v55 = vpop.f32.mrb[122].mxu1 }
0x1299   :  { %v7448_v14 = vpop.f32.mrb[99].mxu0  ;;  %v7561_v56 = vpop.f32.mrb[123].mxu1  ;;  %v7764_v50 = vmul.f32 %v7755_v53, %v7559_v55 }
0x129a   :  { %v7771_v58 = vadd.f32 %v7763_v39, %v7723_v0  ;;  %v7716_v25 = vmul.f32 %v7707_v38, %v7448_v14  ;;  %v7812_v62 = vmul.f32 %v7803_v54, %v7561_v56 }
0x129c   :  { %v20182_v48 = vadd.f32 %v7811_v8, %v7771_v58  ;;  %v7724_v24 = vadd.f32 %v7716_v25, %v7446_v16  ;;  %v17428_v12 = vpop.f32.mrb[100].mxu0 }
0x129d   :  { %v7854_v47 = vmul.f32 %v17428_v12, %v20155_v17  ;;  %v7630_v33 = vpop.f32.mrb[101].mxu0  ;;  %v16399_v12 = vld [vmem:[#allocation2 + $0x48] ss:$0 sm:$0xff] }
0x129e   :  { %v7772_v27 = vadd.f32 %v7764_v50, %v7724_v24  ;;  %v7853_v59 = vmul.f32 %v20151_v29, %v7630_v33 }
0x129f   :  { %v7862_v52 = vadd.f32 %v7854_v47, %v20170_v10 }
0x12a0   :  { %v7820_v60 = vadd.f32 %v7812_v62, %v7772_v27  ;;  %v7861_v43 = vadd.f32 %v7853_v59, %v20166_v7  ;;  %v17431_v23 = vpop.f32.mrb[102].mxu0 }
0x12a1   :  { %v7870_v61 = vrot.slane %v7862_v52, 7  ;;  %v7856_v38 = vmul.f32 %v17431_v23, %v20161_v19  ;;  %v7640_v1 = vpop.f32.mrb[103].mxu0 }
0x12a2   :  { %v7869_v53 = vrot.slane %v7861_v43, 7  ;;  %v7855_v40 = vmul.f32 %v20176_v44, %v7640_v1 }
0x12a3   :  { %v7878_v17 = vsel %vm442_vm8, %v7870_v61, 0.0  ;;  %v7864_v54 = vadd.f32 %v7856_v38, %v20174_v31 }
0x12a4   :  { %v7886_v15 = vadd.f32 %v7878_v17, %v7862_v52  ;;  %v7877_v29 = vsel %vm442_vm8, %v7869_v53, 0.0  ;;  %v7863_v10 = vadd.f32 %v7855_v40, %v20172_v32  ;;  %v17434_v7 = vpop.f32.mrb[104].mxu0 }
0x12a5   :  { %v7885_v5 = vadd.f32 %v7877_v29, %v7861_v43  ;;  %v7872_v4 = vrot.slane %v7864_v54, 7  ;;  %v7858_v19 = vmul.f32 %v17434_v7, %v20180_v57  ;;  %v7650_v22 = vpop.f32.mrb[105].mxu0  ;;  %v7851_v57 = vpop.permute.xlu1 %7850 }
0x12a6   :  { %v7894_v41 = vrot.slane %v7886_v15, 6  ;;  %v7871_v42 = vrot.slane %v7863_v10, 7  ;;  %v7857_v44 = vmul.f32 %v20178_v45, %v7650_v22 }
0x12a7   :  { %v7893_v6 = vrot.slane %v7885_v5, 6  ;;  %v7880_v31 = vsel %vm442_vm8, %v7872_v4, 0.0  ;;  %v7866_v9 = vadd.f32 %v7858_v19, %v7818_v30 }
0x12a8   :  { %v7902_v46 = vsel %vm467_vm9, %v7894_v41, 0.0  ;;  %v7888_v3 = vadd.f32 %v7880_v31, %v7864_v54  ;;  %v7879_v32 = vsel %vm442_vm8, %v7871_v42, 0.0  ;;  %v7865_v63 = vadd.f32 %v7857_v44, %v7817_v20  ;;  %v17437_v36 = vpop.f32.mrb[106].mxu0 }
0x12a9   :  { %v7910_v34 = vadd.f32 %v7902_v46, %v7886_v15  ;;  %v7901_v51 = vsel %vm467_vm9, %v7893_v6, 0.0  ;;  %v7887_v45 = vadd.f32 %v7879_v32, %v7863_v10  ;;  %v7874_v28 = vrot.slane %v7866_v9, 7  ;;  %v7660_v2 = vpop.f32.mrb[107].mxu0 }
0x12aa   :  { %v7909_v39 = vadd.f32 %v7901_v51, %v7885_v5  ;;  %v7896_v30 = vrot.slane %v7888_v3, 6  ;;  %v7873_v0 = vrot.slane %v7865_v63, 7  ;;  %v7860_v16 = vmul.f32 %v17437_v36, %v7851_v57 }
0x12ab   :  { %v7918_v55 = vrot.slane %v7910_v34, 4  ;;  %v7895_v14 = vrot.slane %v7887_v45, 6  ;;  %v7882_v56 = vsel %vm442_vm8, %v7874_v28, 0.0  ;;  %v7859_v20 = vmul.f32 %v7847_v37, %v7660_v2 }
0x12ac   :  { %v7917_v58 = vrot.slane %v7909_v39, 4  ;;  %v7904_v8 = vsel %vm467_vm9, %v7896_v30, 0.0  ;;  %v7890_v25 = vadd.f32 %v7882_v56, %v7866_v9  ;;  %v7881_v50 = vsel %vm442_vm8, %v7873_v0, 0.0 }
0x12ad   :  { %v7926_v24 = vsel %vm492_vm10, %v7918_v55, 0.0  ;;  %v7912_v47 = vadd.f32 %v7904_v8, %v7888_v3  ;;  %v7903_v33 = vsel %vm467_vm9, %v7895_v14, 0.0  ;;  %v7889_v27 = vadd.f32 %v7881_v50, %v7865_v63 }
0x12ae   :  { %v7934_v62 = vadd.f32 %v7926_v24, %v7910_v34  ;;  %v7925_v59 = vsel %vm492_vm10, %v7917_v58, 0.0  ;;  %v7911_v52 = vadd.f32 %v7903_v33, %v7887_v45  ;;  %v7898_v43 = vrot.slane %v7890_v25, 6 }
0x12af   :  { %v7933_v23 = vadd.f32 %v7925_v59, %v7909_v39  ;;  %v7920_v61 = vrot.slane %v7912_v47, 4  ;;  %v7897_v38 = vrot.slane %v7889_v27, 6  ;;  %v7868_v1 = vadd.f32 %v7860_v16, %v7820_v60 }
0x12b0   :  { %v20218_v53 = vadd.f32 %v16399_v12, %v7934_v62  ;;  %v7919_v40 = vrot.slane %v7911_v52, 4  ;;  %v7906_v17 = vsel %vm467_vm9, %v7898_v43, 0.0  ;;  %v7867_v54 = vadd.f32 %v7859_v20, %v20182_v48 }
0x12b1   :  { %v20223_v15 = vadd.f32 %v16399_v12, %v7933_v23  ;;  %v7928_v29 = vsel %vm492_vm10, %v7920_v61, 0.0  ;;  %v7914_v10 = vadd.f32 %v7906_v17, %v7890_v25  ;;  %v7905_v7 = vsel %vm467_vm9, %v7897_v38, 0.0 }
0x12b2   :  { %v7936_v5 = vadd.f32 %v7928_v29, %v7912_v47  ;;  %v7927_v60 = vsel %vm492_vm10, %v7919_v40, 0.0  ;;  %v7913_v4 = vadd.f32 %v7905_v7, %v7889_v27  ;;  %v7876_v19 = vrot.slane %v7868_v1, 7  ;;  %8048 = vrot.lane.b32.xlu1 %v20218_v53, %s18618_s30 }
0x12b3   :  { %v7935_v22 = vadd.f32 %v7927_v60, %v7911_v52  ;;  %v7922_v48 = vrot.slane %v7914_v10, 4  ;;  %v7875_v41 = vrot.slane %v7867_v54, 7  ;;  %7970 = vrot.lane.b32.xlu0 %v20223_v15, %s18618_s30  ;;  %v20277_v24 = vmul.f32 0.4472136, %v20223_v15 }
0x12b4   :  { %v20235_v42 = vadd.f32 %v16399_v12, %v7936_v5  ;;  %v7921_v44 = vrot.slane %v7913_v4, 4  ;;  %v7884_v6 = vsel %vm442_vm8, %v7876_v19, 0.0  ;;  %v20286_v47 = vmul.f32 0.4472136, %v20218_v53 }
0x12b5   :  { %v20239_v31 = vadd.f32 %v16399_v12, %v7935_v22  ;;  %v7930_v9 = vsel %vm492_vm10, %v7922_v48, 0.0  ;;  %v7892_v46 = vadd.f32 %v7884_v6, %v7868_v1  ;;  %v7883_v3 = vsel %vm442_vm8, %v7875_v41, 0.0 }
0x12b6   :  { %v7938_v32 = vadd.f32 %v7930_v9, %v7914_v10  ;;  %v7929_v63 = vsel %vm492_vm10, %v7921_v44, 0.0  ;;  %v7891_v36 = vadd.f32 %v7883_v3, %v7867_v54  ;;  %8204 = vrot.lane.b32.xlu1 %v20235_v42, %s18618_s30  ;;  %v20313_v43 = vmul.f32 0.4472136, %v20235_v42 }
0x12b7   :  { %v7937_v57 = vadd.f32 %v7929_v63, %v7913_v4  ;;  %v7900_v34 = vrot.slane %v7892_v46, 6  ;;  %8126 = vrot.lane.b32.xlu0 %v20239_v31, %s18618_s30  ;;  %v20296_v62 = vmul.f32 0.4472136, %v20239_v31 }
0x12b8   :  { %v20251_v51 = vadd.f32 %v16399_v12, %v7938_v32  ;;  %v7899_v45 = vrot.slane %v7891_v36, 6 }
0x12b9   :  { %v20253_v28 = vadd.f32 %v16399_v12, %v7937_v57  ;;  %v7908_v2 = vsel %vm467_vm9, %v7900_v34, 0.0 }
0x12ba   :  { %v7916_v37 = vadd.f32 %v7908_v2, %v7892_v46  ;;  %v7907_v39 = vsel %vm467_vm9, %v7899_v45, 0.0  ;;  %8360 = vrot.lane.b32.xlu1 %v20251_v51, %s18618_s30  ;;  %v20323_v61 = vmul.f32 0.4472136, %v20251_v51 }
0x12bb   :  { %v7915_v30 = vadd.f32 %v7907_v39, %v7891_v36  ;;  %8282 = vrot.lane.b32.xlu0 %v20253_v28, %s18618_s30  ;;  %v20300_v59 = vmul.f32 0.4472136, %v20253_v28 }
0x12bc   :  { %v7924_v0 = vrot.slane %v7916_v37, 4 }
0x12bd   :  { %v7923_v16 = vrot.slane %v7915_v30, 4 }
0x12be   :  { %v7932_v55 = vsel %vm492_vm10, %v7924_v0, 0.0 }
0x12bf   :  { %v7940_v14 = vadd.f32 %v7932_v55, %v7916_v37  ;;  %v7931_v56 = vsel %vm492_vm10, %v7923_v16, 0.0 }
0x12c0   :  { %v7939_v20 = vadd.f32 %v7931_v56, %v7915_v30 }
0x12c1   :  { %v20267_v58 = vadd.f32 %v16399_v12, %v7940_v14 }
0x12c2   :  { %v20269_v8 = vadd.f32 %v16399_v12, %v7939_v20 }
0x12c3   :  { %8516 = vrot.lane.b32.xlu1 %v20267_v58, %s18618_s30  ;;  %v20338_v40 = vmul.f32 0.4472136, %v20267_v58 }
0x12c4   :  { %8438 = vrot.lane.b32.xlu0 %v20269_v8, %s18618_s30  ;;  %v20327_v38 = vmul.f32 0.4472136, %v20269_v8 }
0x1324   :  { %v8049_v50 = vpop.permute.xlu1 %8048 }
0x1325   :  { %v7971_v25 = vpop.permute.xlu0 %7970 }
0x1326   :  { %17439 = vmatpush3.xpose.msk.msra.mxu1 %vm1202_vm12, %v7971_v25 }
0x1327   :  { %17443 = vmatprep.subr.mxu1 %v21687_v26 }
0x1328   :  { %v8205_v33 = vpop.permute.xlu1 %8204 }
0x1329   :  { %17441 = vmatmul.mubr.msk.f32.vlgmr.msra.gmra.mrb[124].mxu1 %vm1202_vm12, %v20277_v24  ;;  %v8127_v12 = vpop.permute.xlu0 %8126 }
0x132a   :  { %17444 = vmatpush3.xpose.msk.msra.mxu1 %vm1202_vm12, %v8049_v50  ;;  %17445 = vmatprep.mubr.msk.f32.mxu1 %vm18617_vm11, %v21687_v26 }
0x132b   :  { %17448 = vmatprep.subr.mxu1 %v21687_v26 }
0x132c   :  { %v8361_v52 = vpop.permute.xlu1 %8360 }
0x132d   :  { %17446 = vmatmul.mubr.msk.f32.vlgmr.msra.gmra.mrb[126].mxu1 %vm1202_vm12, %v20286_v47  ;;  %v8283_v27 = vpop.permute.xlu0 %8282 }
0x132e   :  { %17449 = vmatpush3.xpose.msk.msra.mxu1 %vm1202_vm12, %v8127_v12  ;;  %17459 = vmatpush3.xpose.msk.msra.mxu0 %vm1202_vm12, %v8283_v27 }
0x132f   :  { %17450 = vmatprep.mubr.msk.f32.mxu1 %vm18617_vm11, %v21687_v26  ;;  %17453 = vmatprep.subr.mxu1 %v21687_v26 }
0x1330   :  { %17468 = vmatprep.subr.mxu0 %v21687_v26 }
0x1331   :  { %17451 = vmatmul.mubr.msk.f32.vlgmr.msra.gmra.mrb[128].mxu1 %vm1202_vm12, %v20296_v62  ;;  %17461 = vmatmul.mubr.msk.f32.vlgmr.msra.gmra.mrb[108].mxu0 %vm1202_vm12, %v20300_v59 }
0x1332   :  { %17454 = vmatpush3.xpose.msk.msra.mxu1 %vm1202_vm12, %v8205_v33  ;;  %17455 = vmatprep.mubr.msk.f32.mxu1 %vm18617_vm11, %v21687_v26 }
0x1333   :  { %17470 = vmatprep.mubr.msk.f32.mxu0 %vm18617_vm11, %v21687_v26  ;;  %17463 = vmatprep.subr.mxu1 %v21687_v26 }
0x1335   :  { %17456 = vmatmul.mubr.msk.f32.vlgmr.msra.gmra.mrb[130].mxu1 %vm1202_vm12, %v20313_v43  ;;  %v8517_v1 = vpop.permute.xlu1 %8516 }
0x1336   :  { %v8439_v23 = vpop.permute.xlu0 %8438  ;;  %17464 = vmatpush3.xpose.msk.msra.mxu1 %vm1202_vm12, %v8361_v52  ;;  %17465 = vmatprep.mubr.msk.f32.mxu1 %vm18617_vm11, %v21687_v26 }
0x1337   :  { %17469 = vmatpush3.xpose.msk.msra.mxu0 %vm1202_vm12, %v8439_v23  ;;  %17473 = vmatprep.subr.mxu1 %v21687_v26 }
0x1338   :  { %17478 = vmatprep.subr.mxu0 %v21687_v26 }
0x1339   :  { %17466 = vmatmul.mubr.msk.f32.vlgmr.msra.gmra.mrb[132].mxu1 %vm1202_vm12, %v20323_v61 }
0x133a   :  { %17471 = vmatmul.mubr.msk.f32.vlgmr.msra.gmra.mrb[110].mxu0 %vm1202_vm12, %v20327_v38  ;;  %17474 = vmatpush3.xpose.msk.msra.mxu1 %vm1202_vm12, %v8517_v1 }
0x133b   :  { %17475 = vmatprep.mubr.msk.f32.mxu1 %vm18617_vm11, %v21687_v26  ;;  %17483 = vmatprep.subr.mxu1 %v21687_v26 }
0x133c   :  { %17480 = vmatprep.mubr.msk.f32.mxu0 %vm18617_vm11, %v21687_v26 }
0x133d   :  { %17476 = vmatmul.mubr.msk.f32.vlgmr.msra.gmra.mrb[134].mxu1 %vm1202_vm12, %v20338_v40 }
0x133e   :  { %17485 = vmatprep.mubr.msk.f32.mxu1 %vm18617_vm11, %v21687_v26 }
0x13fc   :  { %v8043_v17 = vpop.f32.mrb[124].mxu1 }
0x13fd   :  { %v8044_v54 = vadd.f32 %v8043_v17, %v18733_v18  ;;  %v17442_v29 = vpop.f32.mrb[125].mxu1 }
0x13ff   :  { %v8593_v10 = vsel %vm1202_vm12, %v8044_v54, -inf }
0x1400   :  { %8594 = vmax.xlane.f32.xlu0 %v8593_v10  ;;  %v8121_v7 = vpop.f32.mrb[126].mxu1 }
0x1401   :  { %v8122_v5 = vadd.f32 %v8121_v7, %v18733_v18  ;;  %v17447_v60 = vpop.f32.mrb[127].mxu1 }
0x1403   :  { %v8596_v4 = vsel %vm1202_vm12, %v8122_v5, -inf }
0x1404   :  { %8597 = vmax.xlane.f32.xlu1 %v8596_v4  ;;  %v8199_v19 = vpop.f32.mrb[128].mxu1  ;;  %v8355_v22 = vpop.f32.mrb[108].mxu0 }
0x1405   :  { %v8200_v48 = vadd.f32 %v8199_v19, %v18733_v18  ;;  %v8356_v41 = vadd.f32 %v8355_v22, %v18733_v18  ;;  %v17452_v44 = vpop.f32.mrb[129].mxu1  ;;  %v17462_v6 = vpop.f32.mrb[109].mxu0 }
0x1407   :  { %v8599_v9 = vsel %vm1202_vm12, %v8200_v48, -inf  ;;  %v8605_v46 = vsel %vm1202_vm12, %v8356_v41, -inf }
0x1408   :  { %8600 = vmax.xlane.f32.xlu0 %v8599_v9  ;;  %v8277_v3 = vpop.f32.mrb[130].mxu1  ;;  %8606 = vmax.xlane.f32.xlu1 %v8605_v46 }
0x1409   :  { %v8278_v32 = vadd.f32 %v8277_v3, %v18733_v18  ;;  %v17457_v63 = vpop.f32.mrb[131].mxu1 }
0x140b   :  { %v8602_v36 = vsel %vm1202_vm12, %v8278_v32, -inf }
0x140c   :  { %8603 = vmax.xlane.f32.xlu0 %v8602_v36  ;;  %v8433_v57 = vpop.f32.mrb[132].mxu1 }
0x140d   :  { %v8511_v34 = vpop.f32.mrb[110].mxu0  ;;  %v8434_v45 = vadd.f32 %v8433_v57, %v18733_v18  ;;  %v17467_v2 = vpop.f32.mrb[133].mxu1 }
0x140e   :  { %v8512_v37 = vadd.f32 %v8511_v34, %v18733_v18  ;;  %v17472_v39 = vpop.f32.mrb[111].mxu0 }
0x140f   :  { %v8608_v30 = vsel %vm1202_vm12, %v8434_v45, -inf }
0x1410   :  { %v8611_v0 = vsel %vm1202_vm12, %v8512_v37, -inf  ;;  %8609 = vmax.xlane.f32.xlu0 %v8608_v30  ;;  %v8589_v16 = vpop.f32.mrb[134].mxu1 }
0x1411   :  { %8612 = vmax.xlane.f32.xlu1 %v8611_v0  ;;  %v8590_v55 = vadd.f32 %v8589_v16, %v18733_v18  ;;  %v17477_v14 = vpop.f32.mrb[135].mxu1 }
0x1413   :  { %v8614_v56 = vsel %vm1202_vm12, %v8590_v55, -inf }
0x1414   :  { %8615 = vmax.xlane.f32.xlu0 %v8614_v56 }
0x1422   :  { %8681 = vrot.lane.b32.xlu1 %v20223_v15, %s18619_s5 }
0x1426   :  { %8833 = vrot.lane.b32.xlu1 %v20239_v31, %s18619_s5 }
0x142a   :  { %8909 = vrot.lane.b32.xlu1 %v20235_v42, %s18619_s5  ;;  %8757 = vrot.lane.b32.xlu0 %v20218_v53, %s18619_s5 }
0x142e   :  { %9061 = vrot.lane.b32.xlu1 %v20251_v51, %s18619_s5  ;;  %8985 = vrot.lane.b32.xlu0 %v20253_v28, %s18619_s5 }
0x148d   :  { %v8595_v20 = vpop.xlane.xlu0 %8594 }
0x148e   :  { %v8617_v25 = vsub.f32 %v8044_v54, %v8595_v20 }
0x1490   :  { %v8625_v50 = vmul.f32 1.442695, %v8617_v25 }
0x1491   :  { %v8598_v12 = vpop.xlane.xlu1 %8597 }
0x1492   :  { %18316 = vpow2.f32 %v8625_v50  ;;  %v8618_v33 = vsub.f32 %v8122_v5, %v8598_v12 }
0x1494   :  { %v8627_v27 = vmul.f32 1.442695, %v8618_v33 }
0x1495   :  { %v8607_v52 = vpop.xlane.xlu1 %8606  ;;  %v8601_v23 = vpop.xlane.xlu0 %8600 }
0x1496   :  { %18318 = vpow2.f32 %v8627_v27  ;;  %v8621_v1 = vsub.f32 %v8356_v41, %v8607_v52  ;;  %v8619_v17 = vsub.f32 %v8200_v48, %v8601_v23 }
0x1498   :  { %v8629_v29 = vmul.f32 1.442695, %v8619_v17  ;;  %v8633_v10 = vmul.f32 1.442695, %v8621_v1 }
0x1499   :  { %v8604_v7 = vpop.xlane.xlu0 %8603 }
0x149a   :  { %v8620_v60 = vsub.f32 %v8278_v32, %v8604_v7  ;;  %18320 = vpow2.f32 %v8629_v29 }
0x149b   :  { %18322 = vpow2.f32 %v8633_v10 }
0x149c   :  { %v20375_v4 = vpop.eup %18316  ;;  %v8631_v19 = vmul.f32 1.442695, %v8620_v60 }
0x149d   :  { %v8610_v54 = vpop.xlane.xlu0 %8609  ;;  %v8641_v22 = vsel %vm1202_vm12, %v20375_v4, 0.0 }
0x149e   :  { %v8613_v5 = vpop.xlane.xlu1 %8612  ;;  %18324 = vpow2.f32 %v8631_v19  ;;  %v8622_v44 = vsub.f32 %v8434_v45, %v8610_v54  ;;  %8642 = vadd.xlane.f32.xlu1 %v8641_v22 }
0x149f   :  { %v8623_v6 = vsub.f32 %v8512_v37, %v8613_v5 }
0x14a0   :  { %v20379_v41 = vpop.eup %18318  ;;  %v8635_v48 = vmul.f32 1.442695, %v8622_v44 }
0x14a1   :  { %v8637_v9 = vmul.f32 1.442695, %v8623_v6  ;;  %v8616_v46 = vpop.xlane.xlu0 %8615  ;;  %v8644_v3 = vsel %vm1202_vm12, %v20379_v41, 0.0 }
0x14a2   :  { %v8682_v32 = vpop.permute.xlu1 %8681  ;;  %18326 = vpow2.f32 %v8635_v48  ;;  %v8624_v63 = vsub.f32 %v8590_v55, %v8616_v46  ;;  %8645 = vadd.xlane.f32.xlu0 %v8644_v3 }
0x14a3   :  { %18328 = vpow2.f32 %v8637_v9  ;;  %17479 = vmatpush3.msra.mxu0 %v8682_v32 }
0x14a4   :  { %v8639_v36 = vmul.f32 1.442695, %v8624_v63  ;;  %17488 = vmatprep.subr.mxu0 %v21687_v26  ;;  %v20384_v57 = vpop.eup %18320  ;;  %v7954_v63 = vld [vmem:[#allocation2 + $0x50] sm:$0xff] }
0x14a5   :  { %v8758_v34 = vpop.permute.xlu0 %8757  ;;  %v8647_v45 = vsel %vm1202_vm12, %v20384_v57, 0.0  ;;  %v20388_v2 = vpop.eup %18322 }
0x14a6   :  { %18330 = vpow2.f32 %v8639_v36  ;;  %17484 = vmatpush3.msra.mxu1 %v8758_v34  ;;  %8648 = vadd.xlane.f32.xlu1 %v8647_v45  ;;  %v8653_v30 = vsel %vm1202_vm12, %v20388_v2, 0.0  ;;  %v8834_v25 = vpop.permute.xlu1 %8833 }
0x14a7   :  { %17493 = vmatprep.subr.mxu1 %v21687_v26 }
0x14a8   :  { %v20391_v37 = vpop.eup %18324 }
0x14a9   :  { %v8650_v39 = vsel %vm1202_vm12, %v20391_v37, 0.0  ;;  %v8986_v33 = vpop.permute.xlu0 %8985 }
0x14aa   :  { %8651 = vadd.xlane.f32.xlu0 %v8650_v39  ;;  %8654 = vadd.xlane.f32.xlu1 %v8653_v30  ;;  %v8910_v50 = vpop.permute.xlu1 %8909 }
0x14ac   :  { %v20397_v0 = vpop.eup %18326 }
0x14ad   :  { %v20399_v16 = vpop.eup %18328  ;;  %v8656_v55 = vsel %vm1202_vm12, %v20397_v0, 0.0 }
0x14ae   :  { %v8659_v14 = vsel %vm1202_vm12, %v20399_v16, 0.0  ;;  %8657 = vadd.xlane.f32.xlu0 %v8656_v55  ;;  %v9062_v12 = vpop.permute.xlu1 %9061 }
0x14af   :  { %8660 = vadd.xlane.f32.xlu1 %v8659_v14 }
0x14b0   :  { %v20405_v56 = vpop.eup %18330 }
0x14b1   :  { %v8662_v20 = vsel %vm1202_vm12, %v20405_v56, 0.0 }
0x14b2   :  { %8663 = vadd.xlane.f32.xlu0 %v8662_v20 }
0x14c0   :  { %9213 = vrot.lane.b32.xlu1 %v20267_v58, %s18619_s5 }
0x14c4   :  { %9430 = vrot.lane.b32.xlu1 %v20277_v24, %s18608_s18 }
0x14c8   :  { %9508 = vrot.lane.b32.xlu1 %v20286_v47, %s18608_s18  ;;  %9137 = vrot.lane.b32.xlu0 %v20269_v8, %s18619_s5 }
0x14cc   :  { %9586 = vrot.lane.b32.xlu1 %v20296_v62, %s18608_s18  ;;  %9432 = vrot.lane.b32.xlu0 %v20223_v15, %s18620_s6 }
0x14d0   :  { %9664 = vrot.lane.b32.xlu1 %v20313_v43, %s18608_s18  ;;  %9510 = vrot.lane.b32.xlu0 %v20218_v53, %s18620_s6 }
0x14d4   :  { %9822 = vrot.lane.b32.xlu1 %v20251_v51, %s18620_s6  ;;  %9588 = vrot.lane.b32.xlu0 %v20239_v31, %s18620_s6 }
0x14d8   :  { %9820 = vrot.lane.b32.xlu1 %v20323_v61, %s18608_s18  ;;  %9666 = vrot.lane.b32.xlu0 %v20235_v42, %s18620_s6 }
0x14dc   :  { %9978 = vrot.lane.b32.xlu1 %v20267_v58, %s18620_s6  ;;  %9744 = vrot.lane.b32.xlu0 %v20253_v28, %s18620_s6 }
0x14e0   :  { %9976 = vrot.lane.b32.xlu1 %v20338_v40, %s18608_s18  ;;  %9742 = vrot.lane.b32.xlu0 %v20300_v59, %s18608_s18 }
0x14e4   :  { %9900 = vrot.lane.b32.xlu0 %v20269_v8, %s18620_s6 }
0x14e8   :  { %9898 = vrot.lane.b32.xlu0 %v20327_v38, %s18608_s18 }
0x152b   :  { %v8643_v27 = vpop.xlane.xlu1 %8642 }
0x152c   :  { %18332 = vrcp.f32 %v8643_v27 }
0x152f   :  { %v8646_v52 = vpop.xlane.xlu0 %8645 }
0x1530   :  { %18334 = vrcp.f32 %v8646_v52 }
0x1533   :  { %v8649_v23 = vpop.xlane.xlu1 %8648 }
0x1534   :  { %18336 = vrcp.f32 %v8649_v23 }
0x1536   :  { %v18333_v1 = vpop.eup %18332 }
0x1537   :  { %v8652_v17 = vpop.xlane.xlu0 %8651  ;;  %v8673_v29 = vmul.f32 %v18333_v1, %v20375_v4  ;;  %v8655_v10 = vpop.xlane.xlu1 %8654 }
0x1538   :  { %18338 = vrcp.f32 %v8652_v17 }
0x1539   :  { %18340 = vrcp.f32 %v8655_v10  ;;  %17481 = vmatmul.mubr.msk.f32.vlgmr.msra.gmra.mrb[112].mxu0 %vm1202_vm12, %v8673_v29 }
0x153a   :  { %v18335_v7 = vpop.eup %18334  ;;  %17489 = vmatpush3.msra.mxu0 %v8834_v25  ;;  %17490 = vmatprep.mubr.msk.f32.mxu0 %vm18617_vm11, %v21687_v26 }
0x153b   :  { %v8658_v60 = vpop.xlane.xlu0 %8657  ;;  %v8674_v19 = vmul.f32 %v18335_v7, %v20379_v41  ;;  %17498 = vmatprep.subr.mxu0 %v21687_v26 }
0x153c   :  { %v8661_v54 = vpop.xlane.xlu1 %8660  ;;  %18342 = vrcp.f32 %v8658_v60 }
0x153d   :  { %18344 = vrcp.f32 %v8661_v54  ;;  %17486 = vmatmul.mubr.msk.f32.vlgmr.msra.gmra.mrb[136].mxu1 %vm1202_vm12, %v8674_v19 }
0x153e   :  { %17494 = vmatpush3.msra.mxu1 %v8910_v50  ;;  %17495 = vmatprep.mubr.msk.f32.mxu1 %vm18617_vm11, %v21687_v26  ;;  %v18337_v4 = vpop.eup %18336 }
0x153f   :  { %v8664_v22 = vpop.xlane.xlu0 %8663  ;;  %17503 = vmatprep.subr.mxu1 %v21687_v26  ;;  %v8675_v44 = vmul.f32 %v18337_v4, %v20384_v57 }
0x1540   :  { %v9214_v5 = vpop.permute.xlu1 %9213  ;;  %18346 = vrcp.f32 %v8664_v22 }
0x1541   :  { %17491 = vmatmul.mubr.msk.f32.vlgmr.msra.gmra.mrb[114].mxu0 %vm1202_vm12, %v8675_v44 }
0x1542   :  { %v18339_v6 = vpop.eup %18338  ;;  %17499 = vmatpush3.msra.mxu0 %v8986_v33  ;;  %17500 = vmatprep.mubr.msk.f32.mxu0 %vm18617_vm11, %v21687_v26 }
0x1543   :  { %v18341_v41 = vpop.eup %18340  ;;  %v8676_v48 = vmul.f32 %v18339_v6, %v20391_v37  ;;  %v9138_v46 = vpop.permute.xlu0 %9137  ;;  %17508 = vmatprep.subr.mxu0 %v21687_v26 }
0x1544   :  { %v9431_v9 = vpop.permute.xlu1 %9430  ;;  %v8677_v3 = vmul.f32 %v18341_v41, %v20388_v2 }
0x1545   :  { %17496 = vmatmul.mubr.msk.f32.vlgmr.msra.gmra.mrb[138].mxu1 %vm1202_vm12, %v8676_v48 }
0x1546   :  { %v18343_v32 = vpop.eup %18342  ;;  %17501 = vmatmul.mubr.msk.f32.vlgmr.msra.gmra.mrb[116].mxu0 %vm1202_vm12, %v8677_v3  ;;  %17504 = vmatpush3.msra.mxu1 %v9062_v12 }
0x1547   :  { %v18345_v36 = vpop.eup %18344  ;;  %17509 = vmatpush3.msra.mxu0 %v9138_v46  ;;  %17505 = vmatprep.mubr.msk.f32.mxu1 %vm18617_vm11, %v21687_v26  ;;  %v8678_v57 = vmul.f32 %v18343_v32, %v20397_v0  ;;  %v9433_v37 = vpop.permute.xlu0 %9432 }
0x1548   :  { %v9509_v34 = vpop.permute.xlu1 %9508  ;;  %17510 = vmatprep.mubr.msk.f32.mxu0 %vm18617_vm11, %v21687_v26  ;;  %17513 = vmatprep.subr.mxu1 %v21687_v26  ;;  %v8679_v45 = vmul.f32 %v18345_v36, %v20399_v16 }
0x1549   :  { %17506 = vmatmul.mubr.msk.f32.vlgmr.msra.gmra.mrb[140].mxu1 %vm1202_vm12, %v8678_v57  ;;  %17518 = vmatprep.subr.mxu0 %v7954_v63 }
0x154a   :  { %v18347_v2 = vpop.eup %18346  ;;  %17511 = vmatmul.mubr.msk.f32.vlgmr.msra.gmra.mrb[118].mxu0 %vm1202_vm12, %v8679_v45  ;;  %17514 = vmatpush3.msra.mxu1 %v9214_v5 }
0x154b   :  { %17515 = vmatprep.mubr.msk.f32.mxu1 %vm18617_vm11, %v21687_v26  ;;  %v8680_v39 = vmul.f32 %v18347_v2, %v20405_v56  ;;  %17532 = vmatprep.subr.mxu1 %v21687_v26  ;;  %v9511_v0 = vpop.permute.xlu0 %9510 }
0x154c   :  { %v9587_v30 = vpop.permute.xlu1 %9586  ;;  %17519 = vmatpush3.msra.mxu0 %v7954_v63 }
0x154d   :  { %17516 = vmatmul.mubr.msk.f32.vlgmr.msra.gmra.mrb[142].mxu1 %vm1202_vm12, %v8680_v39  ;;  %17552 = vmatprep.subr.mxu0 %v21687_v26 }
0x154e   :  { %17534 = vmatprep.mubr.msk.f32.mxu1 %vm18617_vm11, %v21687_v26 }
0x154f   :  { %v9589_v14 = vpop.permute.xlu0 %9588 }
0x1550   :  { %v9665_v16 = vpop.permute.xlu1 %9664 }
0x1551   :  { %17533 = vmatpush3.xpose.msk.msra.mxu1 %vm1202_vm12, %v9433_v37 }
0x1552   :  { %17537 = vmatprep.subr.mxu1 %v21687_v26 }
0x1553   :  { %v9667_v20 = vpop.permute.xlu0 %9666 }
0x1554   :  { %17535 = vmatmul.mubr.msk.f32.vlgmr.msra.gmra.mrb[144].mxu1 %vm1202_vm12, %v9431_v9  ;;  %v9823_v55 = vpop.permute.xlu1 %9822 }
0x1555   :  { %17538 = vmatpush3.xpose.msk.msra.mxu1 %vm1202_vm12, %v9511_v0  ;;  %17539 = vmatprep.mubr.msk.f32.mxu1 %vm18617_vm11, %v21687_v26 }
0x1556   :  { %17542 = vmatprep.subr.mxu1 %v21687_v26 }
0x1557   :  { %v9745_v52 = vpop.permute.xlu0 %9744 }
0x1558   :  { %17540 = vmatmul.mubr.msk.f32.vlgmr.msra.gmra.mrb[146].mxu1 %vm1202_vm12, %v9509_v34  ;;  %v9821_v56 = vpop.permute.xlu1 %9820 }
0x1559   :  { %17543 = vmatpush3.xpose.msk.msra.mxu1 %vm1202_vm12, %v9589_v14  ;;  %17544 = vmatprep.mubr.msk.f32.mxu1 %vm18617_vm11, %v21687_v26 }
0x155a   :  { %17547 = vmatprep.subr.mxu1 %v21687_v26 }
0x155b   :  { %v9743_v19 = vpop.permute.xlu0 %9742 }
0x155c   :  { %17545 = vmatmul.mubr.msk.f32.vlgmr.msra.gmra.mrb[148].mxu1 %vm1202_vm12, %v9587_v30  ;;  %v9979_v25 = vpop.permute.xlu1 %9978 }
0x155d   :  { %17548 = vmatpush3.xpose.msk.msra.mxu1 %vm1202_vm12, %v9667_v20  ;;  %17549 = vmatprep.mubr.msk.f32.mxu1 %vm18617_vm11, %v21687_v26 }
0x155e   :  { %17557 = vmatprep.subr.mxu1 %v21687_v26 }
0x155f   :  { %v9901_v41 = vpop.permute.xlu0 %9900 }
0x1560   :  { %17550 = vmatmul.mubr.msk.f32.vlgmr.msra.gmra.mrb[150].mxu1 %vm1202_vm12, %v9665_v16  ;;  %v9977_v50 = vpop.permute.xlu1 %9976 }
0x1561   :  { %17558 = vmatpush3.xpose.msk.msra.mxu1 %vm1202_vm12, %v9823_v55  ;;  %17559 = vmatprep.mubr.msk.f32.mxu1 %vm18617_vm11, %v21687_v26 }
0x1562   :  { %17567 = vmatprep.subr.mxu1 %v21687_v26 }
0x1563   :  { %v9899_v9 = vpop.permute.xlu0 %9898 }
0x1564   :  { %17560 = vmatmul.mubr.msk.f32.vlgmr.msra.gmra.mrb[152].mxu1 %vm1202_vm12, %v9821_v56 }
0x1565   :  { %17568 = vmatpush3.xpose.msk.msra.mxu1 %vm1202_vm12, %v9979_v25  ;;  %17569 = vmatprep.mubr.msk.f32.mxu1 %vm18617_vm11, %v21687_v26 }
0x1566   :  { %17577 = vmatprep.subr.mxu1 %v21687_v26 }
0x1568   :  { %17570 = vmatmul.mubr.msk.f32.vlgmr.msra.gmra.mrb[154].mxu1 %vm1202_vm12, %v9977_v50 }
0x1569   :  { %17579 = vmatprep.mubr.msk.f32.mxu1 %vm18617_vm11, %v21687_v26 }
0x160c   :  { %v8753_v12 = vpop.f32.mrb[112].mxu0 }
0x160d   :  { %v17482_v33 = vpop.f32.mrb[113].mxu0  ;;  %17520 = vmatprep.mubr.msk.f32.mxu0 %vm1202_vm12, %v8753_v12 }
0x1610   :  { %v8829_v27 = vpop.f32.mrb[136].mxu1 }
0x1611   :  { %v17487_v23 = vpop.f32.mrb[137].mxu1  ;;  %17521 = vmatmul.mubr.msk.f32.vlgmr.msra.gmra.mrb[120].mxu0 %vm1202_vm12, %v8829_v27 }
0x1612   :  { %17553 = vmatpush3.xpose.msk.msra.mxu0 %vm1202_vm12, %v9745_v52 }
0x1613   :  { %17562 = vmatprep.subr.mxu0 %v21687_v26 }
0x1614   :  { %v8905_v1 = vpop.f32.mrb[114].mxu0 }
0x1615   :  { %v17492_v17 = vpop.f32.mrb[115].mxu0  ;;  %17523 = vmatprep.mubr.msk.f32.mxu0 %vm1202_vm12, %v8905_v1 }
0x1618   :  { %v8981_v29 = vpop.f32.mrb[138].mxu1 }
0x1619   :  { %v9057_v10 = vpop.f32.mrb[116].mxu0  ;;  %v17497_v7 = vpop.f32.mrb[139].mxu1  ;;  %17524 = vmatmul.mubr.msk.f32.gmra.mrb[122].mxu0 %vm1202_vm12, %v8981_v29 }
0x161a   :  { %v17502_v60 = vpop.f32.mrb[117].mxu0  ;;  %17526 = vmatprep.mubr.msk.f32.mxu0 %vm1202_vm12, %v9057_v10 }
0x161c   :  { %v9133_v54 = vpop.f32.mrb[140].mxu1 }
0x161d   :  { %v9209_v4 = vpop.f32.mrb[118].mxu0  ;;  %v17507_v22 = vpop.f32.mrb[141].mxu1  ;;  %17527 = vmatmul.mubr.msk.f32.gmra.mrb[124].mxu0 %vm1202_vm12, %v9133_v54 }
0x161e   :  { %v17512_v5 = vpop.f32.mrb[119].mxu0  ;;  %17529 = vmatprep.mubr.msk.f32.mxu0 %vm1202_vm12, %v9209_v4 }
0x1620   :  { %v9285_v44 = vpop.f32.mrb[142].mxu1 }
0x1621   :  { %v17517_v6 = vpop.f32.mrb[143].mxu1  ;;  %17530 = vmatmul.mubr.msk.f32.gmra.mrb[126].mxu0 %vm1202_vm12, %v9285_v44 }
0x1622   :  { %17554 = vmatprep.mubr.msk.f32.mxu0 %vm18617_vm11, %v21687_v26 }
0x1625   :  { %17555 = vmatmul.mubr.msk.f32.vlgmr.msra.gmra.mrb[128].mxu0 %vm1202_vm12, %v9743_v19 }
0x1626   :  { %17563 = vmatpush3.xpose.msk.msra.mxu0 %vm1202_vm12, %v9901_v41  ;;  %17564 = vmatprep.mubr.msk.f32.mxu0 %vm18617_vm11, %v21687_v26 }
0x1627   :  { %v9504_v48 = vpop.f32.mrb[144].mxu1  ;;  %17572 = vmatprep.subr.mxu0 %v21687_v26 }
0x1628   :  { %v9505_v46 = vadd.f32 %v9504_v48, %v18733_v18  ;;  %v17536_v3 = vpop.f32.mrb[145].mxu1 }
0x1629   :  { %17565 = vmatmul.mubr.msk.f32.vlgmr.msra.gmra.mrb[130].mxu0 %vm1202_vm12, %v9899_v9 }
0x162a   :  { %v10054_v32 = vsel %vm1202_vm12, %v9505_v46, -inf  ;;  %17574 = vmatprep.mubr.msk.f32.mxu0 %vm18617_vm11, %v21687_v26 }
0x162b   :  { %10055 = vmax.xlane.f32.xlu0 %v10054_v32  ;;  %v9582_v63 = vpop.f32.mrb[146].mxu1 }
0x162c   :  { %v9583_v36 = vadd.f32 %v9582_v63, %v18733_v18  ;;  %v17541_v57 = vpop.f32.mrb[147].mxu1 }
0x162e   :  { %v10057_v34 = vsel %vm1202_vm12, %v9583_v36, -inf }
0x162f   :  { %10058 = vmax.xlane.f32.xlu1 %v10057_v34  ;;  %v9660_v45 = vpop.f32.mrb[148].mxu1 }
0x1630   :  { %v9661_v2 = vadd.f32 %v9660_v45, %v18733_v18  ;;  %v17546_v37 = vpop.f32.mrb[149].mxu1 }
0x1632   :  { %v10060_v39 = vsel %vm1202_vm12, %v9661_v2, -inf }
0x1633   :  { %10061 = vmax.xlane.f32.xlu0 %v10060_v39  ;;  %v9738_v30 = vpop.f32.mrb[150].mxu1 }
0x1634   :  { %v9739_v0 = vadd.f32 %v9738_v30, %v18733_v18  ;;  %v17551_v16 = vpop.f32.mrb[151].mxu1 }
0x1636   :  { %v10063_v55 = vsel %vm1202_vm12, %v9739_v0, -inf }
0x1637   :  { %10064 = vmax.xlane.f32.xlu0 %v10063_v55  ;;  %v9894_v14 = vpop.f32.mrb[152].mxu1 }
0x1638   :  { %v9895_v56 = vadd.f32 %v9894_v14, %v18733_v18  ;;  %v17561_v20 = vpop.f32.mrb[153].mxu1 }
0x163a   :  { %v10069_v25 = vsel %vm1202_vm12, %v9895_v56, -inf }
0x163b   :  { %10070 = vmax.xlane.f32.xlu0 %v10069_v25  ;;  %v10050_v50 = vpop.f32.mrb[154].mxu1 }
0x163c   :  { %v10051_v12 = vadd.f32 %v10050_v50, %v18733_v18  ;;  %v17571_v33 = vpop.f32.mrb[155].mxu1 }
0x163e   :  { %v10075_v27 = vsel %vm1202_vm12, %v10051_v12, -inf }
0x163f   :  { %10076 = vmax.xlane.f32.xlu0 %v10075_v27 }
0x16b8   :  { %v10056_v52 = vpop.xlane.xlu0 %10055 }
0x16b9   :  { %v10078_v57 = vsub.f32 %v9505_v46, %v10056_v52 }
0x16bb   :  { %v10086_v34 = vmul.f32 1.442695, %v10078_v57 }
0x16bc   :  { %v10059_v23 = vpop.xlane.xlu1 %10058 }
0x16bd   :  { %v10079_v1 = vsub.f32 %v9583_v36, %v10059_v23 }
0x16bf   :  { %v10088_v17 = vmul.f32 1.442695, %v10079_v1 }
0x16c0   :  { %v10062_v29 = vpop.xlane.xlu0 %10061 }
0x16c1   :  { %18348 = vpow2.f32 %v10088_v17  ;;  %v10080_v45 = vsub.f32 %v9661_v2, %v10062_v29 }
0x16c3   :  { %v10090_v37 = vmul.f32 1.442695, %v10080_v45 }
0x16c4   :  { %v10065_v10 = vpop.xlane.xlu0 %10064 }
0x16c5   :  { %v10081_v7 = vsub.f32 %v9739_v0, %v10065_v10 }
0x16c7   :  { %v10092_v60 = vmul.f32 1.442695, %v10081_v7 }
0x16c8   :  { %v10071_v19 = vpop.xlane.xlu0 %10070 }
0x16c9   :  { %18350 = vpow2.f32 %v10092_v60  ;;  %v10083_v54 = vsub.f32 %v9895_v56, %v10071_v19 }
0x16cb   :  { %v18349_v4 = vpop.eup %18348  ;;  %v10096_v22 = vmul.f32 1.442695, %v10083_v54 }
0x16cc   :  { %v10077_v5 = vpop.xlane.xlu0 %10076  ;;  %v10105_v44 = vsel %vm1202_vm12, %v18349_v4, 0.0 }
0x16cd   :  { %18352 = vpow2.f32 %v10096_v22  ;;  %v10085_v6 = vsub.f32 %v10051_v12, %v10077_v5  ;;  %10106 = vadd.xlane.f32.xlu0 %v10105_v44 }
0x16cf   :  { %v10100_v41 = vmul.f32 1.442695, %v10085_v6 }
0x16d1   :  { %18354 = vpow2.f32 %v10100_v41 }
0x16d2   :  { %18356 = vpow2.f32 %v10086_v34 }
0x16d3   :  { %v20544_v48 = vpop.eup %18350  ;;  %18358 = vpow2.f32 %v10090_v37 }
0x16d4   :  { %v10111_v9 = vsel %vm1202_vm12, %v20544_v48, 0.0 }
0x16d5   :  { %10112 = vadd.xlane.f32.xlu0 %v10111_v9 }
0x16d7   :  { %v20548_v3 = vpop.eup %18352 }
0x16d8   :  { %v10117_v32 = vsel %vm1202_vm12, %v20548_v3, 0.0 }
0x16d9   :  { %10118 = vadd.xlane.f32.xlu0 %v10117_v32 }
0x16db   :  { %v20552_v63 = vpop.eup %18354 }
0x16dc   :  { %v10123_v36 = vsel %vm1202_vm12, %v20552_v63, 0.0  ;;  %v18357_v56 = vpop.eup %18356 }
0x16dd   :  { %10124 = vadd.xlane.f32.xlu0 %v10123_v36  ;;  %v10102_v20 = vsel %vm1202_vm12, %v18357_v56, 0.0  ;;  %v18359_v25 = vpop.eup %18358 }
0x16de   :  { %v10108_v50 = vsel %vm1202_vm12, %v18359_v25, 0.0 }
0x16f3   :  { %10218 = vrot.lane.b32.xlu0 %v20218_v53, %s18621_s7 }
0x16f7   :  { %10446 = vrot.lane.b32.xlu0 %v20253_v28, %s18621_s7 }
0x16f8   :  { %v9816_v39 = vpop.f32.mrb[128].mxu0 }
0x16f9   :  { %v9817_v30 = vadd.f32 %v9816_v39, %v18733_v18  ;;  %v17556_v0 = vpop.f32.mrb[129].mxu0 }
0x16fb   :  { %10598 = vrot.lane.b32.xlu0 %v20269_v8, %s18621_s7  ;;  %v10066_v46 = vsel %vm1202_vm12, %v9817_v30, -inf }
0x16fc   :  { %10067 = vmax.xlane.f32.xlu1 %v10066_v46  ;;  %v9972_v2 = vpop.f32.mrb[130].mxu0 }
0x16fd   :  { %v9973_v16 = vadd.f32 %v9972_v2, %v18733_v18  ;;  %v17566_v55 = vpop.f32.mrb[131].mxu0 }
0x16ff   :  { %10889 = vrot.lane.b32.xlu0 %v20223_v15, %s18622_s8  ;;  %v10072_v14 = vsel %vm1202_vm12, %v9973_v16, -inf }
0x1700   :  { %10073 = vmax.xlane.f32.xlu1 %v10072_v14 }
0x1703   :  { %10967 = vrot.lane.b32.xlu0 %v20218_v53, %s18622_s8 }
0x1704   :  { %10103 = vadd.xlane.f32.xlu1 %v10102_v20 }
0x1707   :  { %11045 = vrot.lane.b32.xlu0 %v20239_v31, %s18622_s8 }
0x1708   :  { %10109 = vadd.xlane.f32.xlu1 %v10108_v50 }
0x170b   :  { %11123 = vrot.lane.b32.xlu0 %v20235_v42, %s18622_s8 }
0x170f   :  { %11201 = vrot.lane.b32.xlu0 %v20253_v28, %s18622_s8 }
0x1713   :  { %11199 = vrot.lane.b32.xlu0 %v20300_v59, %s18623_s3 }
0x1717   :  { %11357 = vrot.lane.b32.xlu0 %v20269_v8, %s18622_s8 }
0x1719   :  { %10142 = vrot.lane.b32.xlu1 %v20223_v15, %s18621_s7 }
0x171b   :  { %11355 = vrot.lane.b32.xlu0 %v20327_v38, %s18623_s3 }
0x171d   :  { %10294 = vrot.lane.b32.xlu1 %v20239_v31, %s18621_s7 }
0x1721   :  { %10370 = vrot.lane.b32.xlu1 %v20235_v42, %s18621_s7 }
0x1725   :  { %10522 = vrot.lane.b32.xlu1 %v20251_v51, %s18621_s7 }
0x175a   :  { %v10107_v12 = vpop.xlane.xlu0 %10106 }
0x175b   :  { %18360 = vrcp.f32 %v10107_v12 }
0x1762   :  { %v10113_v33 = vpop.xlane.xlu0 %10112 }
0x1765   :  { %v18361_v23 = vpop.eup %18360 }
0x1766   :  { %v10119_v27 = vpop.xlane.xlu0 %10118  ;;  %v10135_v17 = vmul.f32 %v18361_v23, %v18349_v4 }
0x176a   :  { %v20592_v52 = vpop.xlane.xlu0 %10124 }
0x176e   :  { %v10219_v1 = vpop.permute.xlu0 %10218 }
0x176f   :  { %17578 = vmatpush3.msra.mxu1 %v10219_v1 }
0x1770   :  { %17580 = vmatmul.mubr.msk.f32.vlgmr.msra.gmra.mrb[156].mxu1 %vm1202_vm12, %v10135_v17  ;;  %17587 = vmatprep.subr.mxu1 %v21687_v26 }
0x1771   :  { %17589 = vmatprep.mubr.msk.f32.mxu1 %vm18617_vm11, %v21687_v26 }
0x1772   :  { %v10447_v46 = vpop.permute.xlu0 %10446 }
0x1789   :  { %v10068_v29 = vpop.xlane.xlu1 %10067 }
0x178a   :  { %v10082_v10 = vsub.f32 %v9817_v30, %v10068_v29 }
0x178c   :  { %v10094_v7 = vmul.f32 1.442695, %v10082_v10 }
0x178d   :  { %v10074_v60 = vpop.xlane.xlu1 %10073 }
0x178e   :  { %18362 = vpow2.f32 %v10094_v7  ;;  %v10084_v19 = vsub.f32 %v9973_v16, %v10074_v60 }
0x1790   :  { %v10098_v54 = vmul.f32 1.442695, %v10084_v19 }
0x1791   :  { %v10104_v22 = vpop.xlane.xlu1 %10103 }
0x1792   :  { %18364 = vpow2.f32 %v10098_v54 }
0x1793   :  { %18366 = vrcp.f32 %v10104_v22 }
0x1794   :  { %18368 = vrcp.f32 %v10113_v33 }
0x1795   :  { %v10110_v4 = vpop.xlane.xlu1 %10109 }
0x1796   :  { %18370 = vrcp.f32 %v10110_v4 }
0x1797   :  { %18372 = vrcp.f32 %v10119_v27  ;;  %v7955_v27 = vld [vmem:[#allocation2 + $0x58] sm:$0xff] }
0x1798   :  { %v20598_v5 = vpop.eup %18362  ;;  %18374 = vrcp.f32 %v20592_v52 }
0x1799   :  { %v10143_v44 = vpop.permute.xlu1 %10142  ;;  %v10114_v6 = vsel %vm1202_vm12, %v20598_v5, 0.0 }
0x179a   :  { %10115 = vadd.xlane.f32.xlu1 %v10114_v6  ;;  %17573 = vmatpush3.msra.mxu0 %v10143_v44 }
0x179b   :  { %17582 = vmatprep.subr.mxu0 %v21687_v26 }
0x179c   :  { %v20603_v41 = vpop.eup %18364 }
0x179d   :  { %v18367_v9 = vpop.eup %18366  ;;  %v10295_v32 = vpop.permute.xlu1 %10294  ;;  %v10120_v36 = vsel %vm1202_vm12, %v20603_v41, 0.0 }
0x179e   :  { %v18369_v57 = vpop.eup %18368  ;;  %10121 = vadd.xlane.f32.xlu1 %v10120_v36  ;;  %v10134_v34 = vmul.f32 %v18367_v9, %v18357_v56 }
0x179f   :  { %v10137_v30 = vmul.f32 %v18369_v57, %v20544_v48 }
0x17a0   :  { %v18371_v45 = vpop.eup %18370  ;;  %17575 = vmatmul.mubr.msk.f32.vlgmr.msra.gmra.mrb[132].mxu0 %vm1202_vm12, %v10134_v34 }
0x17a1   :  { %17583 = vmatpush3.msra.mxu0 %v10295_v32  ;;  %v10371_v37 = vpop.permute.xlu1 %10370  ;;  %17584 = vmatprep.mubr.msk.f32.mxu0 %vm18617_vm11, %v21687_v26  ;;  %v10136_v39 = vmul.f32 %v18371_v45, %v18359_v25  ;;  %v18373_v0 = vpop.eup %18372 }
0x17a2   :  { %17588 = vmatpush3.msra.mxu1 %v10371_v37  ;;  %17592 = vmatprep.subr.mxu0 %v21687_v26  ;;  %v10139_v16 = vmul.f32 %v18373_v0, %v20548_v3  ;;  %v10599_v3 = vpop.permute.xlu0 %10598  ;;  %v18375_v14 = vpop.eup %18374 }
0x17a3   :  { %17590 = vmatmul.mubr.msk.f32.vlgmr.msra.gmra.mrb[158].mxu1 %vm1202_vm12, %v10137_v30  ;;  %17597 = vmatprep.subr.mxu1 %v21687_v26  ;;  %v10141_v20 = vmul.f32 %v18375_v14, %v20552_v63 }
0x17a4   :  { %17585 = vmatmul.mubr.msk.f32.vlgmr.msra.gmra.mrb[134].mxu0 %vm1202_vm12, %v10136_v39  ;;  %17599 = vmatprep.mubr.msk.f32.mxu1 %vm18617_vm11, %v21687_v26 }
0x17a5   :  { %17593 = vmatpush3.msra.mxu0 %v10447_v46  ;;  %v10523_v2 = vpop.permute.xlu1 %10522  ;;  %17594 = vmatprep.mubr.msk.f32.mxu0 %vm18617_vm11, %v21687_v26 }
0x17a6   :  { %17598 = vmatpush3.msra.mxu1 %v10523_v2  ;;  %17602 = vmatprep.subr.mxu0 %v21687_v26  ;;  %v10890_v25 = vpop.permute.xlu0 %10889 }
0x17a7   :  { %17600 = vmatmul.mubr.msk.f32.vlgmr.msra.gmra.mrb[160].mxu1 %vm1202_vm12, %v10139_v16  ;;  %17607 = vmatprep.subr.mxu1 %v21687_v26 }
0x17a8   :  { %17609 = vmatprep.mubr.msk.f32.mxu1 %vm18617_vm11, %v21687_v26 }
0x17aa   :  { %v10968_v23 = vpop.permute.xlu0 %10967 }
0x17ae   :  { %v11046_v29 = vpop.permute.xlu0 %11045 }
0x17af   :  { %10674 = vrot.lane.b32.xlu1 %v20267_v58, %s18621_s7 }
0x17b2   :  { %v11124_v7 = vpop.permute.xlu0 %11123 }
0x17b3   :  { %10887 = vrot.lane.b32.xlu1 %v20277_v24, %s18623_s3 }
0x17b7   :  { %10965 = vrot.lane.b32.xlu1 %v20286_v47, %s18623_s3 }
0x17bb   :  { %11043 = vrot.lane.b32.xlu1 %v20296_v62, %s18623_s3 }
0x17bf   :  { %11121 = vrot.lane.b32.xlu1 %v20313_v43, %s18623_s3 }
0x17c3   :  { %11279 = vrot.lane.b32.xlu1 %v20251_v51, %s18622_s8 }
0x17c7   :  { %11277 = vrot.lane.b32.xlu1 %v20323_v61, %s18623_s3 }
0x17cb   :  { %11435 = vrot.lane.b32.xlu1 %v20267_v58, %s18622_s8 }
0x17cf   :  { %11433 = vrot.lane.b32.xlu1 %v20338_v40, %s18623_s3 }
0x1827   :  { %v10116_v48 = vpop.xlane.xlu1 %10115 }
0x1828   :  { %18376 = vrcp.f32 %v10116_v48 }
0x182b   :  { %v10122_v55 = vpop.xlane.xlu1 %10121 }
0x182c   :  { %18378 = vrcp.f32 %v10122_v55 }
0x182f   :  { %v10675_v56 = vpop.permute.xlu1 %10674 }
0x1830   :  { %17608 = vmatpush3.msra.mxu1 %v10675_v56 }
0x1831   :  { %17610 = vmatmul.mubr.msk.f32.vlgmr.msra.gmra.mrb[162].mxu1 %vm1202_vm12, %v10141_v20  ;;  %17626 = vmatprep.subr.mxu1 %v21687_v26 }
0x1832   :  { %v18377_v50 = vpop.eup %18376  ;;  %17628 = vmatprep.mubr.msk.f32.mxu1 %vm18617_vm11, %v21687_v26 }
0x1833   :  { %v10888_v12 = vpop.permute.xlu1 %10887  ;;  %v10138_v33 = vmul.f32 %v18377_v50, %v20598_v5 }
0x1835   :  { %17595 = vmatmul.mubr.msk.f32.vlgmr.msra.gmra.mrb[136].mxu0 %vm1202_vm12, %v10138_v33 }
0x1836   :  { %v18379_v52 = vpop.eup %18378  ;;  %17603 = vmatpush3.msra.mxu0 %v10599_v3  ;;  %17604 = vmatprep.mubr.msk.f32.mxu0 %vm18617_vm11, %v21687_v26 }
0x1837   :  { %v10966_v63 = vpop.permute.xlu1 %10965  ;;  %17627 = vmatpush3.xpose.msk.msra.mxu1 %vm1202_vm12, %v10890_v25  ;;  %v10140_v1 = vmul.f32 %v18379_v52, %v20603_v41  ;;  %17612 = vmatprep.subr.mxu0 %v7955_v27  ;;  %v11202_v41 = vpop.permute.xlu0 %11201 }
0x1838   :  { %17631 = vmatprep.subr.mxu1 %v21687_v26 }
0x1839   :  { %17605 = vmatmul.mubr.msk.f32.vlgmr.msra.gmra.mrb[138].mxu0 %vm1202_vm12, %v10140_v1 }
0x183a   :  { %17629 = vmatmul.mubr.msk.f32.vlgmr.msra.gmra.mrb[164].mxu1 %vm1202_vm12, %v10888_v12  ;;  %17613 = vmatpush3.msra.mxu0 %v7955_v27 }
0x183b   :  { %v11044_v17 = vpop.permute.xlu1 %11043  ;;  %17632 = vmatpush3.xpose.msk.msra.mxu1 %vm1202_vm12, %v10968_v23  ;;  %17633 = vmatprep.mubr.msk.f32.mxu1 %vm18617_vm11, %v21687_v26  ;;  %v11200_v0 = vpop.permute.xlu0 %11199 }
0x183c   :  { %17636 = vmatprep.subr.mxu1 %v21687_v26  ;;  %17646 = vmatprep.subr.mxu0 %v21687_v26 }
0x183e   :  { %17634 = vmatmul.mubr.msk.f32.vlgmr.msra.gmra.mrb[166].mxu1 %vm1202_vm12, %v10966_v63 }
0x183f   :  { %v11122_v10 = vpop.permute.xlu1 %11121  ;;  %17637 = vmatpush3.xpose.msk.msra.mxu1 %vm1202_vm12, %v11046_v29  ;;  %17638 = vmatprep.mubr.msk.f32.mxu1 %vm18617_vm11, %v21687_v26  ;;  %v11358_v14 = vpop.permute.xlu0 %11357 }
0x1840   :  { %17641 = vmatprep.subr.mxu1 %v21687_v26 }
0x1842   :  { %17639 = vmatmul.mubr.msk.f32.vlgmr.msra.gmra.mrb[168].mxu1 %vm1202_vm12, %v11044_v17 }
0x1843   :  { %v10290_v60 = vpop.f32.mrb[156].mxu1  ;;  %v11280_v19 = vpop.permute.xlu1 %11279  ;;  %17642 = vmatpush3.xpose.msk.msra.mxu1 %vm1202_vm12, %v11124_v7  ;;  %17643 = vmatprep.mubr.msk.f32.mxu1 %vm18617_vm11, %v21687_v26 }
0x1844   :  { %v17581_v54 = vpop.f32.mrb[157].mxu1  ;;  %17651 = vmatprep.subr.mxu1 %v21687_v26  ;;  %v11356_v33 = vpop.permute.xlu0 %11355 }
0x1846   :  { %17644 = vmatmul.mubr.msk.f32.vlgmr.msra.gmra.mrb[170].mxu1 %vm1202_vm12, %v11122_v10 }
0x1847   :  { %v11278_v22 = vpop.permute.xlu1 %11277  ;;  %17652 = vmatpush3.xpose.msk.msra.mxu1 %vm1202_vm12, %v11280_v19  ;;  %17653 = vmatprep.mubr.msk.f32.mxu1 %vm18617_vm11, %v21687_v26 }
0x1848   :  { %17661 = vmatprep.subr.mxu1 %v21687_v26 }
0x184a   :  { %17654 = vmatmul.mubr.msk.f32.vlgmr.msra.gmra.mrb[172].mxu1 %vm1202_vm12, %v11278_v22 }
0x184b   :  { %v11436_v4 = vpop.permute.xlu1 %11435  ;;  %17663 = vmatprep.mubr.msk.f32.mxu1 %vm18617_vm11, %v21687_v26 }
0x184c   :  { %17662 = vmatpush3.xpose.msk.msra.mxu1 %vm1202_vm12, %v11436_v4 }
0x184d   :  { %17671 = vmatprep.subr.mxu1 %v21687_v26 }
0x184f   :  { %v11434_v5 = vpop.permute.xlu1 %11433 }
0x1850   :  { %17664 = vmatmul.mubr.msk.f32.vlgmr.msra.gmra.mrb[174].mxu1 %vm1202_vm12, %v11434_v5 }
0x1851   :  { %17673 = vmatprep.mubr.msk.f32.mxu1 %vm18617_vm11, %v21687_v26 }
0x1873   :  { %v10214_v44 = vpop.f32.mrb[132].mxu0 }
0x1874   :  { %v17576_v6 = vpop.f32.mrb[133].mxu0  ;;  %17614 = vmatprep.mubr.msk.f32.mxu0 %vm1202_vm12, %v10214_v44 }
0x1875   :  { %17615 = vmatmul.mubr.msk.f32.vlgmr.msra.gmra.mrb[120].mxu0 %vm1202_vm12, %v10290_v60 }
0x1876   :  { %17647 = vmatpush3.xpose.msk.msra.mxu0 %vm1202_vm12, %v11202_v41  ;;  %v10442_v9 = vpop.f32.mrb[158].mxu1 }
0x1877   :  { %v10366_v32 = vpop.f32.mrb[134].mxu0  ;;  %v17591_v36 = vpop.f32.mrb[159].mxu1  ;;  %17656 = vmatprep.subr.mxu0 %v21687_v26 }
0x1878   :  { %v17586_v57 = vpop.f32.mrb[135].mxu0  ;;  %17617 = vmatprep.mubr.msk.f32.mxu0 %vm1202_vm12, %v10366_v32 }
0x1879   :  { %17618 = vmatmul.mubr.msk.f32.gmra.mrb[122].mxu0 %vm1202_vm12, %v10442_v9 }
0x187a   :  { %v10594_v34 = vpop.f32.mrb[160].mxu1 }
0x187b   :  { %v17601_v45 = vpop.f32.mrb[161].mxu1 }
0x1904   :  { %v10746_v37 = vpop.f32.mrb[162].mxu1 }
0x1905   :  { %v17611_v39 = vpop.f32.mrb[163].mxu1 }
0x1908   :  { %v10518_v30 = vpop.f32.mrb[136].mxu0 }
0x1909   :  { %v17596_v46 = vpop.f32.mrb[137].mxu0  ;;  %17620 = vmatprep.mubr.msk.f32.mxu0 %vm1202_vm12, %v10518_v30 }
0x190a   :  { %17621 = vmatmul.mubr.msk.f32.gmra.mrb[124].mxu0 %vm1202_vm12, %v10594_v34 }
0x190c   :  { %v10670_v2 = vpop.f32.mrb[138].mxu0 }
0x190d   :  { %v17606_v16 = vpop.f32.mrb[139].mxu0  ;;  %17623 = vmatprep.mubr.msk.f32.mxu0 %vm1202_vm12, %v10670_v2  ;;  %v10961_v48 = vpop.f32.mrb[164].mxu1 }
0x190e   :  { %v20696_v3 = vadd.f32 %v10961_v48, %v18733_v18  ;;  %17624 = vmatmul.mubr.msk.f32.gmra.mrb[126].mxu0 %vm1202_vm12, %v10746_v37  ;;  %v17630_v55 = vpop.f32.mrb[165].mxu1 }
0x190f   :  { %17648 = vmatprep.mubr.msk.f32.mxu0 %vm18617_vm11, %v21687_v26 }
0x1910   :  { %v11511_v56 = vsel %vm1202_vm12, %v20696_v3, -inf }
0x1911   :  { %11512 = vmax.xlane.f32.xlu0 %v11511_v56  ;;  %v11039_v20 = vpop.f32.mrb[166].mxu1 }
0x1912   :  { %v11040_v25 = vadd.f32 %v11039_v20, %v18733_v18  ;;  %v17635_v50 = vpop.f32.mrb[167].mxu1  ;;  %17649 = vmatmul.mubr.msk.f32.vlgmr.msra.gmra.mrb[140].mxu0 %vm1202_vm12, %v11200_v0 }
0x1913   :  { %17657 = vmatpush3.xpose.msk.msra.mxu0 %vm1202_vm12, %v11358_v14  ;;  %17658 = vmatprep.mubr.msk.f32.mxu0 %vm18617_vm11, %v21687_v26 }
0x1914   :  { %v11514_v12 = vsel %vm1202_vm12, %v11040_v25, -inf  ;;  %17666 = vmatprep.subr.mxu0 %v21687_v26 }
0x1915   :  { %11515 = vmax.xlane.f32.xlu1 %v11514_v12  ;;  %v11117_v27 = vpop.f32.mrb[168].mxu1 }
0x1916   :  { %v11118_v52 = vadd.f32 %v11117_v27, %v18733_v18  ;;  %v17640_v23 = vpop.f32.mrb[169].mxu1  ;;  %17659 = vmatmul.mubr.msk.f32.vlgmr.msra.gmra.mrb[142].mxu0 %vm1202_vm12, %v11356_v33 }
0x1917   :  { %17668 = vmatprep.mubr.msk.f32.mxu0 %vm18617_vm11, %v21687_v26 }
0x1918   :  { %v11517_v63 = vsel %vm1202_vm12, %v11118_v52, -inf }
0x1919   :  { %11518 = vmax.xlane.f32.xlu0 %v11517_v63  ;;  %v11195_v1 = vpop.f32.mrb[170].mxu1 }
0x191a   :  { %v11196_v17 = vadd.f32 %v11195_v1, %v18733_v18  ;;  %v17645_v29 = vpop.f32.mrb[171].mxu1 }
0x191c   :  { %v11520_v10 = vsel %vm1202_vm12, %v11196_v17, -inf }
0x191d   :  { %11521 = vmax.xlane.f32.xlu0 %v11520_v10  ;;  %v11351_v7 = vpop.f32.mrb[172].mxu1 }
0x191e   :  { %v11352_v60 = vadd.f32 %v11351_v7, %v18733_v18  ;;  %v17655_v19 = vpop.f32.mrb[173].mxu1 }
0x1920   :  { %v11526_v54 = vsel %vm1202_vm12, %v11352_v60, -inf }
0x1921   :  { %11527 = vmax.xlane.f32.xlu0 %v11526_v54 }
0x1923   :  { %v11507_v22 = vpop.f32.mrb[174].mxu1 }
0x1924   :  { %v11508_v4 = vadd.f32 %v11507_v22, %v18733_v18  ;;  %v17665_v5 = vpop.f32.mrb[175].mxu1 }
0x1926   :  { %v11532_v44 = vsel %vm1202_vm12, %v11508_v4, -inf }
0x1927   :  { %11533 = vmax.xlane.f32.xlu0 %v11532_v44 }
0x199e   :  { %v11513_v6 = vpop.xlane.xlu0 %11512 }
0x199f   :  { %v11535_v12 = vsub.f32 %v20696_v3, %v11513_v6 }
0x19a1   :  { %v11543_v33 = vmul.f32 1.442695, %v11535_v12 }
0x19a2   :  { %v11516_v41 = vpop.xlane.xlu1 %11515 }
0x19a3   :  { %v11536_v9 = vsub.f32 %v11040_v25, %v11516_v41 }
0x19a5   :  { %v11545_v32 = vmul.f32 1.442695, %v11536_v9 }
0x19a6   :  { %v11519_v36 = vpop.xlane.xlu0 %11518 }
0x19a7   :  { %18380 = vpow2.f32 %v11545_v32  ;;  %v11537_v27 = vsub.f32 %v11118_v52, %v11519_v36 }
0x19a9   :  { %v11547_v23 = vmul.f32 1.442695, %v11537_v27 }
0x19aa   :  { %v11522_v57 = vpop.xlane.xlu0 %11521 }
0x19ab   :  { %v11538_v34 = vsub.f32 %v11196_v17, %v11522_v57 }
0x19ad   :  { %v11549_v45 = vmul.f32 1.442695, %v11538_v34 }
0x19ae   :  { %v11528_v37 = vpop.xlane.xlu0 %11527 }
0x19af   :  { %18382 = vpow2.f32 %v11549_v45  ;;  %v11540_v39 = vsub.f32 %v11352_v60, %v11528_v37 }
0x19b1   :  { %v18381_v30 = vpop.eup %18380  ;;  %v11553_v0 = vmul.f32 1.442695, %v11540_v39 }
0x19b2   :  { %v11562_v46 = vsel %vm1202_vm12, %v18381_v30, 0.0 }
0x19b3   :  { %18384 = vpow2.f32 %v11553_v0  ;;  %11563 = vadd.xlane.f32.xlu0 %v11562_v46 }
0x19b4   :  { %v11534_v2 = vpop.xlane.xlu0 %11533 }
0x19b5   :  { %v11542_v16 = vsub.f32 %v11508_v4, %v11534_v2 }
0x19b7   :  { %v11557_v48 = vmul.f32 1.442695, %v11542_v16 }
0x19b9   :  { %v20722_v55 = vpop.eup %18382  ;;  %18386 = vpow2.f32 %v11557_v48 }
0x19ba   :  { %v11568_v14 = vsel %vm1202_vm12, %v20722_v55, 0.0  ;;  %18388 = vpow2.f32 %v11543_v33 }
0x19bb   :  { %11569 = vadd.xlane.f32.xlu0 %v11568_v14  ;;  %18390 = vpow2.f32 %v11547_v23 }
0x19bd   :  { %v20726_v56 = vpop.eup %18384 }
0x19be   :  { %v11574_v20 = vsel %vm1202_vm12, %v20726_v56, 0.0 }
0x19bf   :  { %11575 = vadd.xlane.f32.xlu0 %v11574_v20 }
0x19c3   :  { %v20730_v25 = vpop.eup %18386 }
0x19c4   :  { %v11580_v50 = vsel %vm1202_vm12, %v20730_v25, 0.0  ;;  %v18389_v60 = vpop.eup %18388 }
0x19c5   :  { %11581 = vadd.xlane.f32.xlu0 %v11580_v50  ;;  %v11559_v19 = vsel %vm1202_vm12, %v18389_v60, 0.0  ;;  %v18391_v54 = vpop.eup %18390 }
0x19c6   :  { %v11565_v22 = vsel %vm1202_vm12, %v18391_v54, 0.0 }
0x19db   :  { %11675 = vrot.lane.b32.xlu0 %v20218_v53, %s18624_s9 }
0x19df   :  { %11903 = vrot.lane.b32.xlu0 %v20253_v28, %s18624_s9 }
0x19e3   :  { %12055 = vrot.lane.b32.xlu0 %v20269_v8, %s18624_s9 }
0x19e5   :  { %v11273_v63 = vpop.f32.mrb[140].mxu0 }
0x19e6   :  { %v11274_v1 = vadd.f32 %v11273_v63, %v18733_v18  ;;  %v17650_v17 = vpop.f32.mrb[141].mxu0 }
0x19e7   :  { %12346 = vrot.lane.b32.xlu0 %v20223_v15, %s18625_s10 }
0x19e8   :  { %v11523_v3 = vsel %vm1202_vm12, %v11274_v1, -inf }
0x19e9   :  { %11524 = vmax.xlane.f32.xlu1 %v11523_v3  ;;  %v11429_v52 = vpop.f32.mrb[142].mxu0 }
0x19ea   :  { %v11430_v29 = vadd.f32 %v11429_v52, %v18733_v18  ;;  %v17660_v10 = vpop.f32.mrb[143].mxu0 }
0x19eb   :  { %12424 = vrot.lane.b32.xlu0 %v20218_v53, %s18625_s10  ;;  %v7956_v10 = vld [vmem:[#allocation2 + $0x60] sm:$0xff] }
0x19ec   :  { %v11529_v7 = vsel %vm1202_vm12, %v11430_v29, -inf }
0x19ed   :  { %11530 = vmax.xlane.f32.xlu1 %v11529_v7 }
0x19ef   :  { %12502 = vrot.lane.b32.xlu0 %v20239_v31, %s18625_s10 }
0x19f1   :  { %11560 = vadd.xlane.f32.xlu1 %v11559_v19 }
0x19f3   :  { %12580 = vrot.lane.b32.xlu0 %v20235_v42, %s18625_s10 }
0x19f5   :  { %11566 = vadd.xlane.f32.xlu1 %v11565_v22 }
0x19f7   :  { %12658 = vrot.lane.b32.xlu0 %v20253_v28, %s18625_s10 }
0x19fb   :  { %12656 = vrot.lane.b32.xlu0 %v20300_v59, %s18626_s11 }
0x19ff   :  { %12814 = vrot.lane.b32.xlu0 %v20269_v8, %s18625_s10 }
0x1a03   :  { %12812 = vrot.lane.b32.xlu0 %v20327_v38, %s18626_s11 }
0x1a06   :  { %11599 = vrot.lane.b32.xlu1 %v20223_v15, %s18624_s9 }
0x1a0a   :  { %11751 = vrot.lane.b32.xlu1 %v20239_v31, %s18624_s9 }
0x1a0e   :  { %11827 = vrot.lane.b32.xlu1 %v20235_v42, %s18624_s9 }
0x1a12   :  { %11979 = vrot.lane.b32.xlu1 %v20251_v51, %s18624_s9 }
0x1a40   :  { %v11564_v4 = vpop.xlane.xlu0 %11563 }
0x1a41   :  { %18392 = vrcp.f32 %v11564_v4 }
0x1a48   :  { %v11570_v59 = vpop.xlane.xlu0 %11569 }
0x1a4b   :  { %v18393_v6 = vpop.eup %18392 }
0x1a4c   :  { %v11576_v5 = vpop.xlane.xlu0 %11575  ;;  %v11592_v41 = vmul.f32 %v18393_v6, %v18381_v30 }
0x1a52   :  { %v20771_v44 = vpop.xlane.xlu0 %11581 }
0x1a56   :  { %v11676_v38 = vpop.permute.xlu0 %11675 }
0x1a57   :  { %17672 = vmatpush3.msra.mxu1 %v11676_v38 }
0x1a58   :  { %17674 = vmatmul.mubr.msk.f32.vlgmr.msra.gmra.mrb[176].mxu1 %vm1202_vm12, %v11592_v41  ;;  %17681 = vmatprep.subr.mxu1 %v21687_v26 }
0x1a59   :  { %17683 = vmatprep.mubr.msk.f32.mxu1 %vm18617_vm11, %v21687_v26 }
0x1a76   :  { %v11525_v9 = vpop.xlane.xlu1 %11524 }
0x1a77   :  { %v11539_v32 = vsub.f32 %v11274_v1, %v11525_v9  ;;  %v11904_v1 = vpop.permute.xlu0 %11903 }
0x1a79   :  { %v11551_v36 = vmul.f32 1.442695, %v11539_v32 }
0x1a7a   :  { %v11531_v57 = vpop.xlane.xlu1 %11530 }
0x1a7b   :  { %18394 = vpow2.f32 %v11551_v36  ;;  %v11541_v34 = vsub.f32 %v11430_v29, %v11531_v57 }
0x1a7d   :  { %v11555_v45 = vmul.f32 1.442695, %v11541_v34 }
0x1a7e   :  { %v11561_v37 = vpop.xlane.xlu1 %11560 }
0x1a7f   :  { %18396 = vpow2.f32 %v11555_v45 }
0x1a80   :  { %18398 = vrcp.f32 %v11561_v37 }
0x1a81   :  { %18400 = vrcp.f32 %v11570_v59 }
0x1a82   :  { %v11567_v39 = vpop.xlane.xlu1 %11566 }
0x1a83   :  { %18402 = vrcp.f32 %v11567_v39 }
0x1a84   :  { %18404 = vrcp.f32 %v11576_v5 }
0x1a85   :  { %v20777_v30 = vpop.eup %18394  ;;  %18406 = vrcp.f32 %v20771_v44 }
0x1a86   :  { %v11600_v0 = vpop.permute.xlu1 %11599  ;;  %v11571_v46 = vsel %vm1202_vm12, %v20777_v30, 0.0 }
0x1a87   :  { %11572 = vadd.xlane.f32.xlu1 %v11571_v46  ;;  %17667 = vmatpush3.msra.mxu0 %v11600_v0 }
0x1a88   :  { %17676 = vmatprep.subr.mxu0 %v21687_v26 }
0x1a89   :  { %v20782_v2 = vpop.eup %18396 }
0x1a8a   :  { %v18399_v16 = vpop.eup %18398  ;;  %v11752_v48 = vpop.permute.xlu1 %11751  ;;  %v11577_v14 = vsel %vm1202_vm12, %v20782_v2, 0.0 }
0x1a8b   :  { %v18401_v20 = vpop.eup %18400  ;;  %11578 = vadd.xlane.f32.xlu1 %v11577_v14  ;;  %v11591_v50 = vmul.f32 %v18399_v16, %v18389_v60 }
0x1a8c   :  { %v11594_v23 = vmul.f32 %v18401_v20, %v20722_v55 }
0x1a8d   :  { %v18403_v12 = vpop.eup %18402  ;;  %17669 = vmatmul.mubr.msk.f32.vlgmr.msra.gmra.mrb[144].mxu0 %vm1202_vm12, %v11591_v50 }
0x1a8e   :  { %17677 = vmatpush3.msra.mxu0 %v11752_v48  ;;  %v11828_v33 = vpop.permute.xlu1 %11827  ;;  %17678 = vmatprep.mubr.msk.f32.mxu0 %vm18617_vm11, %v21687_v26  ;;  %v11593_v27 = vmul.f32 %v18403_v12, %v18391_v54  ;;  %v18405_v63 = vpop.eup %18404 }
0x1a8f   :  { %17682 = vmatpush3.msra.mxu1 %v11828_v33  ;;  %17686 = vmatprep.subr.mxu0 %v21687_v26  ;;  %v11596_v3 = vmul.f32 %v18405_v63, %v20726_v56  ;;  %v18407_v55 = vpop.eup %18406 }
0x1a90   :  { %17684 = vmatmul.mubr.msk.f32.vlgmr.msra.gmra.mrb[178].mxu1 %vm1202_vm12, %v11594_v23  ;;  %17691 = vmatprep.subr.mxu1 %v21687_v26  ;;  %v11598_v56 = vmul.f32 %v18407_v55, %v20730_v25 }
0x1a91   :  { %17679 = vmatmul.mubr.msk.f32.vlgmr.msra.gmra.mrb[146].mxu0 %vm1202_vm12, %v11593_v27  ;;  %17693 = vmatprep.mubr.msk.f32.mxu1 %vm18617_vm11, %v21687_v26 }
0x1a92   :  { %17687 = vmatpush3.msra.mxu0 %v11904_v1  ;;  %v11980_v17 = vpop.permute.xlu1 %11979  ;;  %17688 = vmatprep.mubr.msk.f32.mxu0 %vm18617_vm11, %v21687_v26 }
0x1a93   :  { %17692 = vmatpush3.msra.mxu1 %v11980_v17  ;;  %17696 = vmatprep.subr.mxu0 %v21687_v26 }
0x1a94   :  { %17694 = vmatmul.mubr.msk.f32.vlgmr.msra.gmra.mrb[180].mxu1 %vm1202_vm12, %v11596_v3  ;;  %17701 = vmatprep.subr.mxu1 %v21687_v26 }
0x1a95   :  { %17703 = vmatprep.mubr.msk.f32.mxu1 %vm18617_vm11, %v21687_v26 }
0x1a9c   :  { %12131 = vrot.lane.b32.xlu1 %v20267_v58, %s18624_s9 }
0x1aa0   :  { %12344 = vrot.lane.b32.xlu1 %v20277_v24, %s18626_s11 }
0x1aa4   :  { %12422 = vrot.lane.b32.xlu1 %v20286_v47, %s18626_s11  ;;  %v12056_v47 = vpop.permute.xlu0 %12055 }
0x1aa8   :  { %12500 = vrot.lane.b32.xlu1 %v20296_v62, %s18626_s11  ;;  %v12347_v52 = vpop.permute.xlu0 %12346 }
0x1aac   :  { %12578 = vrot.lane.b32.xlu1 %v20313_v43, %s18626_s11  ;;  %v12425_v60 = vpop.permute.xlu0 %12424 }
0x1ab0   :  { %12736 = vrot.lane.b32.xlu1 %v20251_v51, %s18625_s10  ;;  %v12503_v22 = vpop.permute.xlu0 %12502 }
0x1ab4   :  { %12734 = vrot.lane.b32.xlu1 %v20323_v61, %s18626_s11  ;;  %v12581_v44 = vpop.permute.xlu0 %12580 }
0x1ab8   :  { %12892 = vrot.lane.b32.xlu1 %v20267_v58, %s18625_s10  ;;  %v12659_v57 = vpop.permute.xlu0 %12658  ;;  %s18631_s10 = smov 32  }
0x1abc   :  { %12890 = vrot.lane.b32.xlu1 %v20338_v40, %s18626_s11  ;;  %v12657_v48 = vpop.permute.xlu0 %12656 }
0x1ac0   :  { %v12815_v23 = vpop.permute.xlu0 %12814 }
0x1b14   :  { %v11573_v24 = vpop.xlane.xlu1 %11572 }
0x1b15   :  { %18408 = vrcp.f32 %v11573_v24 }
0x1b18   :  { %v11579_v62 = vpop.xlane.xlu1 %11578 }
0x1b19   :  { %18410 = vrcp.f32 %v11579_v62 }
0x1b1c   :  { %v12132_v43 = vpop.permute.xlu1 %12131 }
0x1b1d   :  { %17702 = vmatpush3.msra.mxu1 %v12132_v43 }
0x1b1e   :  { %17704 = vmatmul.mubr.msk.f32.vlgmr.msra.gmra.mrb[182].mxu1 %vm1202_vm12, %v11598_v56  ;;  %17720 = vmatprep.subr.mxu1 %v21687_v26 }
0x1b1f   :  { %v18409_v61 = vpop.eup %18408  ;;  %17722 = vmatprep.mubr.msk.f32.mxu1 %vm18617_vm11, %v21687_v26 }
0x1b20   :  { %v12345_v40 = vpop.permute.xlu1 %12344  ;;  %v11595_v29 = vmul.f32 %v18409_v61, %v20777_v30 }
0x1b22   :  { %17689 = vmatmul.mubr.msk.f32.vlgmr.msra.gmra.mrb[148].mxu0 %vm1202_vm12, %v11595_v29 }
0x1b23   :  { %v18411_v7 = vpop.eup %18410  ;;  %17697 = vmatpush3.msra.mxu0 %v12056_v47  ;;  %17698 = vmatprep.mubr.msk.f32.mxu0 %vm18617_vm11, %v21687_v26  ;;  %v12813_v47 = vpop.permute.xlu0 %12812 }
0x1b24   :  { %v12423_v25 = vpop.permute.xlu1 %12422  ;;  %17721 = vmatpush3.xpose.msk.msra.mxu1 %vm1202_vm12, %v12347_v52  ;;  %v11597_v19 = vmul.f32 %v18411_v7, %v20782_v2  ;;  %17706 = vmatprep.subr.mxu0 %v7956_v10 }
0x1b25   :  { %17725 = vmatprep.subr.mxu1 %v21687_v26 }
0x1b26   :  { %17699 = vmatmul.mubr.msk.f32.vlgmr.msra.gmra.mrb[150].mxu0 %vm1202_vm12, %v11597_v19 }
0x1b27   :  { %17723 = vmatmul.mubr.msk.f32.vlgmr.msra.gmra.mrb[184].mxu1 %vm1202_vm12, %v12345_v40  ;;  %17707 = vmatpush3.msra.mxu0 %v7956_v10 }
0x1b28   :  { %v12501_v54 = vpop.permute.xlu1 %12500  ;;  %17726 = vmatpush3.xpose.msk.msra.mxu1 %vm1202_vm12, %v12425_v60  ;;  %17727 = vmatprep.mubr.msk.f32.mxu1 %vm18617_vm11, %v21687_v26 }
0x1b29   :  { %17730 = vmatprep.subr.mxu1 %v21687_v26  ;;  %17740 = vmatprep.subr.mxu0 %v21687_v26 }
0x1b2b   :  { %v11747_v4 = vpop.f32.mrb[176].mxu1  ;;  %17728 = vmatmul.mubr.msk.f32.vlgmr.msra.gmra.mrb[186].mxu1 %vm1202_vm12, %v12423_v25 }
0x1b2c   :  { %v12579_v59 = vpop.permute.xlu1 %12578  ;;  %v17675_v5 = vpop.f32.mrb[177].mxu1  ;;  %17731 = vmatpush3.xpose.msk.msra.mxu1 %vm1202_vm12, %v12503_v22  ;;  %17732 = vmatprep.mubr.msk.f32.mxu1 %vm18617_vm11, %v21687_v26 }
0x1b2d   :  { %17735 = vmatprep.subr.mxu1 %v21687_v26 }
0x1b2f   :  { %17733 = vmatmul.mubr.msk.f32.vlgmr.msra.gmra.mrb[188].mxu1 %vm1202_vm12, %v12501_v54 }
0x1b30   :  { %v12737_v6 = vpop.permute.xlu1 %12736  ;;  %17736 = vmatpush3.xpose.msk.msra.mxu1 %vm1202_vm12, %v12581_v44  ;;  %17737 = vmatprep.mubr.msk.f32.mxu1 %vm18617_vm11, %v21687_v26 }
0x1b31   :  { %17745 = vmatprep.subr.mxu1 %v21687_v26 }
0x1b33   :  { %17738 = vmatmul.mubr.msk.f32.vlgmr.msra.gmra.mrb[190].mxu1 %vm1202_vm12, %v12579_v59 }
0x1b34   :  { %v12735_v38 = vpop.permute.xlu1 %12734  ;;  %17746 = vmatpush3.xpose.msk.msra.mxu1 %vm1202_vm12, %v12737_v6  ;;  %17747 = vmatprep.mubr.msk.f32.mxu1 %vm18617_vm11, %v21687_v26 }
0x1b35   :  { %17755 = vmatprep.subr.mxu1 %v21687_v26 }
0x1b37   :  { %17748 = vmatmul.mubr.msk.f32.vlgmr.msra.gmra.mrb[192].mxu1 %vm1202_vm12, %v12735_v38 }
0x1b38   :  { %v12893_v41 = vpop.permute.xlu1 %12892  ;;  %17757 = vmatprep.mubr.msk.f32.mxu1 %vm18617_vm11, %v21687_v26 }
0x1b39   :  { %17756 = vmatpush3.xpose.msk.msra.mxu1 %vm1202_vm12, %v12893_v41 }
0x1b3a   :  { %17765 = vmatprep.subr.mxu1 %v21687_v26 }
0x1b3c   :  { %v12891_v9 = vpop.permute.xlu1 %12890 }
0x1b3d   :  { %17758 = vmatmul.mubr.msk.f32.vlgmr.msra.gmra.mrb[194].mxu1 %vm1202_vm12, %v12891_v9 }
0x1b3e   :  { %17767 = vmatprep.mubr.msk.f32.mxu1 %vm18617_vm11, %v21687_v26 }
0x1b60   :  { %v11671_v32 = vpop.f32.mrb[144].mxu0 }
0x1b61   :  { %v17670_v36 = vpop.f32.mrb[145].mxu0  ;;  %17708 = vmatprep.mubr.msk.f32.mxu0 %vm1202_vm12, %v11671_v32 }
0x1b62   :  { %17709 = vmatmul.mubr.msk.f32.vlgmr.msra.gmra.mrb[120].mxu0 %vm1202_vm12, %v11747_v4 }
0x1b63   :  { %17741 = vmatpush3.xpose.msk.msra.mxu0 %vm1202_vm12, %v12659_v57  ;;  %v11899_v34 = vpop.f32.mrb[178].mxu1 }
0x1b64   :  { %v11823_v45 = vpop.f32.mrb[146].mxu0  ;;  %v17685_v37 = vpop.f32.mrb[179].mxu1  ;;  %17750 = vmatprep.subr.mxu0 %v21687_v26 }
0x1b65   :  { %v17680_v39 = vpop.f32.mrb[147].mxu0  ;;  %17711 = vmatprep.mubr.msk.f32.mxu0 %vm1202_vm12, %v11823_v45 }
0x1b66   :  { %17712 = vmatmul.mubr.msk.f32.gmra.mrb[122].mxu0 %vm1202_vm12, %v11899_v34 }
0x1b67   :  { %v12051_v30 = vpop.f32.mrb[180].mxu1 }
0x1b68   :  { %v17695_v0 = vpop.f32.mrb[181].mxu1 }
0x1bf1   :  { %v12203_v46 = vpop.f32.mrb[182].mxu1 }
0x1bf2   :  { %v17705_v2 = vpop.f32.mrb[183].mxu1 }
0x1bf5   :  { %v11975_v16 = vpop.f32.mrb[148].mxu0 }
0x1bf6   :  { %v17690_v14 = vpop.f32.mrb[149].mxu0  ;;  %17714 = vmatprep.mubr.msk.f32.mxu0 %vm1202_vm12, %v11975_v16 }
0x1bf7   :  { %17715 = vmatmul.mubr.msk.f32.gmra.mrb[124].mxu0 %vm1202_vm12, %v12051_v30 }
0x1bf9   :  { %v12127_v20 = vpop.f32.mrb[150].mxu0 }
0x1bfa   :  { %v17700_v50 = vpop.f32.mrb[151].mxu0  ;;  %17717 = vmatprep.mubr.msk.f32.mxu0 %vm1202_vm12, %v12127_v20  ;;  %v12418_v12 = vpop.f32.mrb[184].mxu1 }
0x1bfb   :  { %v20875_v33 = vadd.f32 %v12418_v12, %v18733_v18  ;;  %17718 = vmatmul.mubr.msk.f32.gmra.mrb[126].mxu0 %vm1202_vm12, %v12203_v46  ;;  %v17724_v27 = vpop.f32.mrb[185].mxu1 }
0x1bfc   :  { %17742 = vmatprep.mubr.msk.f32.mxu0 %vm18617_vm11, %v21687_v26 }
0x1bfd   :  { %v12968_v63 = vsel %vm1202_vm12, %v20875_v33, -inf }
0x1bfe   :  { %12969 = vmax.xlane.f32.xlu0 %v12968_v63  ;;  %v12496_v1 = vpop.f32.mrb[186].mxu1 }
0x1bff   :  { %v12497_v17 = vadd.f32 %v12496_v1, %v18733_v18  ;;  %v17729_v3 = vpop.f32.mrb[187].mxu1  ;;  %17743 = vmatmul.mubr.msk.f32.vlgmr.msra.gmra.mrb[152].mxu0 %vm1202_vm12, %v12657_v48 }
0x1c00   :  { %17751 = vmatpush3.xpose.msk.msra.mxu0 %vm1202_vm12, %v12815_v23  ;;  %17752 = vmatprep.mubr.msk.f32.mxu0 %vm18617_vm11, %v21687_v26 }
0x1c01   :  { %v12971_v24 = vsel %vm1202_vm12, %v12497_v17, -inf  ;;  %17760 = vmatprep.subr.mxu0 %v21687_v26 }
0x1c02   :  { %12972 = vmax.xlane.f32.xlu1 %v12971_v24  ;;  %v12574_v62 = vpop.f32.mrb[188].mxu1 }
0x1c03   :  { %v12575_v55 = vadd.f32 %v12574_v62, %v18733_v18  ;;  %v17734_v43 = vpop.f32.mrb[189].mxu1  ;;  %17753 = vmatmul.mubr.msk.f32.vlgmr.msra.gmra.mrb[154].mxu0 %vm1202_vm12, %v12813_v47 }
0x1c04   :  { %17762 = vmatprep.mubr.msk.f32.mxu0 %vm18617_vm11, %v21687_v26 }
0x1c05   :  { %v12974_v56 = vsel %vm1202_vm12, %v12575_v55, -inf }
0x1c06   :  { %12975 = vmax.xlane.f32.xlu0 %v12974_v56  ;;  %v12652_v52 = vpop.f32.mrb[190].mxu1 }
0x1c07   :  { %v12653_v61 = vadd.f32 %v12652_v52, %v18733_v18  ;;  %v17739_v40 = vpop.f32.mrb[191].mxu1 }
0x1c09   :  { %v12977_v29 = vsel %vm1202_vm12, %v12653_v61, -inf }
0x1c0a   :  { %12978 = vmax.xlane.f32.xlu0 %v12977_v29  ;;  %v12808_v10 = vpop.f32.mrb[192].mxu1 }
0x1c0b   :  { %v12809_v7 = vadd.f32 %v12808_v10, %v18733_v18  ;;  %v17749_v60 = vpop.f32.mrb[193].mxu1 }
0x1c0d   :  { %v12983_v25 = vsel %vm1202_vm12, %v12809_v7, -inf }
0x1c0e   :  { %12984 = vmax.xlane.f32.xlu0 %v12983_v25 }
0x1c10   :  { %v12964_v19 = vpop.f32.mrb[194].mxu1 }
0x1c11   :  { %v12965_v54 = vadd.f32 %v12964_v19, %v18733_v18  ;;  %v17759_v22 = vpop.f32.mrb[195].mxu1 }
0x1c13   :  { %v12989_v4 = vsel %vm1202_vm12, %v12965_v54, -inf }
0x1c14   :  { %12990 = vmax.xlane.f32.xlu0 %v12989_v4 }
0x1c8b   :  { %v12970_v59 = vpop.xlane.xlu0 %12969 }
0x1c8c   :  { %v12992_v50 = vsub.f32 %v20875_v33, %v12970_v59 }
0x1c8e   :  { %v13000_v12 = vmul.f32 1.442695, %v12992_v50 }
0x1c8f   :  { %v12973_v5 = vpop.xlane.xlu1 %12972 }
0x1c90   :  { %v12993_v44 = vsub.f32 %v12497_v17, %v12973_v5 }
0x1c92   :  { %v13002_v6 = vmul.f32 1.442695, %v12993_v44 }
0x1c93   :  { %v12976_v38 = vpop.xlane.xlu0 %12975 }
0x1c94   :  { %18412 = vpow2.f32 %v13002_v6  ;;  %v12994_v27 = vsub.f32 %v12575_v55, %v12976_v38 }
0x1c96   :  { %v13004_v23 = vmul.f32 1.442695, %v12994_v27 }
0x1c97   :  { %v12979_v41 = vpop.xlane.xlu0 %12978 }
0x1c98   :  { %v12995_v9 = vsub.f32 %v12653_v61, %v12979_v41 }
0x1c9a   :  { %v13006_v32 = vmul.f32 1.442695, %v12995_v9 }
0x1c9b   :  { %v12985_v36 = vpop.xlane.xlu0 %12984 }
0x1c9c   :  { %18414 = vpow2.f32 %v13006_v32  ;;  %v12997_v57 = vsub.f32 %v12809_v7, %v12985_v36 }
0x1c9e   :  { %v18413_v34 = vpop.eup %18412  ;;  %v13010_v45 = vmul.f32 1.442695, %v12997_v57 }
0x1c9f   :  { %v13019_v37 = vsel %vm1202_vm12, %v18413_v34, 0.0 }
0x1ca0   :  { %18416 = vpow2.f32 %v13010_v45  ;;  %13020 = vadd.xlane.f32.xlu0 %v13019_v37 }
0x1ca1   :  { %v12991_v39 = vpop.xlane.xlu0 %12990 }
0x1ca2   :  { %v12999_v30 = vsub.f32 %v12965_v54, %v12991_v39 }
0x1ca4   :  { %v13014_v0 = vmul.f32 1.442695, %v12999_v30 }
0x1ca6   :  { %v20901_v46 = vpop.eup %18414  ;;  %18418 = vpow2.f32 %v13014_v0 }
0x1ca7   :  { %v13025_v2 = vsel %vm1202_vm12, %v20901_v46, 0.0  ;;  %18420 = vpow2.f32 %v13000_v12 }
0x1ca8   :  { %13026 = vadd.xlane.f32.xlu0 %v13025_v2  ;;  %18422 = vpow2.f32 %v13004_v23 }
0x1caa   :  { %v20905_v16 = vpop.eup %18416 }
0x1cab   :  { %v13031_v48 = vsel %vm1202_vm12, %v20905_v16, 0.0 }
0x1cac   :  { %13032 = vadd.xlane.f32.xlu0 %v13031_v48 }
0x1cb0   :  { %v20909_v14 = vpop.eup %18418 }
0x1cb1   :  { %v13037_v20 = vsel %vm1202_vm12, %v20909_v14, 0.0 }
0x1cb2   :  { %13038 = vadd.xlane.f32.xlu0 %v13037_v20  ;;  %v7957_v20 = vld [vmem:[#allocation2 + $0x68] sm:$0xff] }
0x1cc8   :  { %13132 = vrot.lane.b32.xlu0 %v20218_v53, %s18627_s12 }
0x1ccc   :  { %13360 = vrot.lane.b32.xlu0 %v20253_v28, %s18627_s12  ;;  %v18421_v28 = vpop.eup %18420 }
0x1ccd   :  { %v13016_v62 = vsel %vm1202_vm12, %v18421_v28, 0.0  ;;  %v18423_v55 = vpop.eup %18422 }
0x1cd0   :  { %13512 = vrot.lane.b32.xlu0 %v20269_v8, %s18627_s12  ;;  %v13022_v8 = vsel %vm1202_vm12, %v18423_v55, 0.0 }
0x1cd2   :  { %v12730_v63 = vpop.f32.mrb[152].mxu0 }
0x1cd3   :  { %v12731_v1 = vadd.f32 %v12730_v63, %v18733_v18  ;;  %v17744_v17 = vpop.f32.mrb[153].mxu0 }
0x1cd5   :  { %v12980_v33 = vsel %vm1202_vm12, %v12731_v1, -inf }
0x1cd6   :  { %12981 = vmax.xlane.f32.xlu1 %v12980_v33  ;;  %v12886_v3 = vpop.f32.mrb[154].mxu0 }
0x1cd7   :  { %v12887_v53 = vadd.f32 %v12886_v3, %v18733_v18  ;;  %v17754_v24 = vpop.f32.mrb[155].mxu0 }
0x1cd9   :  { %v12986_v47 = vsel %vm1202_vm12, %v12887_v53, -inf }
0x1cda   :  { %12987 = vmax.xlane.f32.xlu1 %v12986_v47  ;;  %v13801_v47 = vld [vmem:[#allocation2 + $0x78] sm:$0xff] }
0x1cde   :  { %13017 = vadd.xlane.f32.xlu1 %v13016_v62 }
0x1ce2   :  { %13023 = vadd.xlane.f32.xlu1 %v13022_v8 }
0x1cf3   :  { %13056 = vrot.lane.b32.xlu1 %v20223_v15, %s18627_s12 }
0x1cf7   :  { %13208 = vrot.lane.b32.xlu1 %v20239_v31, %s18627_s12 }
0x1cfb   :  { %13284 = vrot.lane.b32.xlu1 %v20235_v42, %s18627_s12 }
0x1cff   :  { %13436 = vrot.lane.b32.xlu1 %v20251_v51, %s18627_s12 }
0x1d2d   :  { %v13021_v18 = vpop.xlane.xlu0 %13020 }
0x1d2e   :  { %18424 = vrcp.f32 %v13021_v18 }
0x1d35   :  { %v13027_v43 = vpop.xlane.xlu0 %13026 }
0x1d38   :  { %v18425_v61 = vpop.eup %18424 }
0x1d39   :  { %v13033_v56 = vpop.xlane.xlu0 %13032  ;;  %v13049_v29 = vmul.f32 %v18425_v61, %v18413_v34 }
0x1d3f   :  { %v13039_v52 = vpop.xlane.xlu0 %13038 }
0x1d43   :  { %v13133_v40 = vpop.permute.xlu0 %13132 }
0x1d44   :  { %17766 = vmatpush3.msra.mxu1 %v13133_v40  ;;  %v16432_v40 = vld [vmem:[#allocation2 + $0x70] ss:$0 sm:$0xff] }
0x1d45   :  { %17768 = vmatmul.mubr.msk.f32.vlgmr.msra.gmra.mrb[196].mxu1 %vm1202_vm12, %v13049_v29  ;;  %17775 = vmatprep.subr.mxu1 %v21687_v26 }
0x1d46   :  { %17777 = vmatprep.mubr.msk.f32.mxu1 %vm18617_vm11, %v21687_v26 }
0x1d47   :  { %v13361_v34 = vpop.permute.xlu0 %13360 }
0x1d4b   :  { %v13513_v50 = vpop.permute.xlu0 %13512 }
0x1d63   :  { %v12982_v15 = vpop.xlane.xlu1 %12981 }
0x1d64   :  { %v12996_v42 = vsub.f32 %v12731_v1, %v12982_v15 }
0x1d66   :  { %v13008_v31 = vmul.f32 1.442695, %v12996_v42 }
0x1d67   :  { %v12988_v51 = vpop.xlane.xlu1 %12987 }
0x1d68   :  { %18426 = vpow2.f32 %v13008_v31  ;;  %v12998_v10 = vsub.f32 %v12887_v53, %v12988_v51 }
0x1d6a   :  { %v13012_v7 = vmul.f32 1.442695, %v12998_v10 }
0x1d6b   :  { %v13018_v60 = vpop.xlane.xlu1 %13017 }
0x1d6c   :  { %18428 = vpow2.f32 %v13012_v7 }
0x1d6d   :  { %18430 = vrcp.f32 %v13018_v60 }
0x1d6e   :  { %18432 = vrcp.f32 %v13027_v43 }
0x1d6f   :  { %v13024_v25 = vpop.xlane.xlu1 %13023 }
0x1d70   :  { %18434 = vrcp.f32 %v13024_v25  ;;  %v13950_v25 = vld [vmem:[%s21680_s2 + $0x58] sm:$0xf] }
0x1d71   :  { %18436 = vrcp.f32 %v13033_v56 }
0x1d72   :  { %v18427_v19 = vpop.eup %18426  ;;  %18438 = vrcp.f32 %v13039_v52 }
0x1d73   :  { %v13057_v54 = vpop.permute.xlu1 %13056  ;;  %v13028_v22 = vsel %vm1202_vm12, %v18427_v19, 0.0 }
0x1d74   :  { %13029 = vadd.xlane.f32.xlu1 %v13028_v22  ;;  %17761 = vmatpush3.msra.mxu0 %v13057_v54  ;;  %v13949_v54 = vld [vmem:[%s21680_s2 + $0x50] sm:$0xf]  ;;  %v13951_v22 = vld [vmem:[%s21680_s2 + $0x60] sm:$0xf] }
0x1d75   :  { %17770 = vmatprep.subr.mxu0 %v21687_v26 }
0x1d76   :  { %v18429_v4 = vpop.eup %18428 }
0x1d77   :  { %v18431_v59 = vpop.eup %18430  ;;  %v13209_v5 = vpop.permute.xlu1 %13208  ;;  %v13034_v44 = vsel %vm1202_vm12, %v18429_v4, 0.0 }
0x1d78   :  { %v18433_v6 = vpop.eup %18432  ;;  %13035 = vadd.xlane.f32.xlu1 %v13034_v44  ;;  %v13048_v38 = vmul.f32 %v18431_v59, %v18421_v28  ;;  %v13802_v28 = vld [vmem:[#allocation2 + $0x80] sm:$0xff]  ;;  %v21000_v59 = vld [vmem:[#allocation2 + $0x98] sm:$0xff] }
0x1d79   :  { %v13051_v36 = vmul.f32 %v18433_v6, %v20901_v46  ;;  %v17931_v62 = vpack.c.bf16 %v13802_v28, %v13801_v47 }
0x1d7a   :  { %v18435_v41 = vpop.eup %18434  ;;  %17763 = vmatmul.mubr.msk.f32.vlgmr.msra.gmra.mrb[156].mxu0 %vm1202_vm12, %v13048_v38 }
0x1d7b   :  { %17771 = vmatpush3.msra.mxu0 %v13209_v5  ;;  %v13285_v9 = vpop.permute.xlu1 %13284  ;;  %17772 = vmatprep.mubr.msk.f32.mxu0 %vm18617_vm11, %v21687_v26  ;;  %v13050_v32 = vmul.f32 %v18435_v41, %v18423_v55  ;;  %v18437_v57 = vpop.eup %18436  ;;  %v13803_v55 = vld [vmem:[#allocation2 + $0x88] sm:$0xf] }
0x1d7c   :  { %17776 = vmatpush3.msra.mxu1 %v13285_v9  ;;  %17780 = vmatprep.subr.mxu0 %v21687_v26  ;;  %v13053_v37 = vmul.f32 %v18437_v57, %v20905_v16  ;;  %v18439_v0 = vpop.eup %18438 }
0x1d7d   :  { %17778 = vmatmul.mubr.msk.f32.vlgmr.msra.gmra.mrb[198].mxu1 %vm1202_vm12, %v13051_v36  ;;  %17785 = vmatprep.subr.mxu1 %v21687_v26  ;;  %v13055_v2 = vmul.f32 %v18439_v0, %v20909_v14 }
0x1d7e   :  { %17773 = vmatmul.mubr.msk.f32.vlgmr.msra.gmra.mrb[158].mxu0 %vm1202_vm12, %v13050_v32  ;;  %17787 = vmatprep.mubr.msk.f32.mxu1 %vm18617_vm11, %v21687_v26 }
0x1d7f   :  { %17781 = vmatpush3.msra.mxu0 %v13361_v34  ;;  %v13437_v45 = vpop.permute.xlu1 %13436  ;;  %17782 = vmatprep.mubr.msk.f32.mxu0 %vm18617_vm11, %v21687_v26  ;;  %v21010_v34 = vld [vmem:[#allocation2 + $0x8c] ss:$0 sm:$0xff] }
0x1d80   :  { %17786 = vmatpush3.msra.mxu1 %v13437_v45  ;;  %17790 = vmatprep.subr.mxu0 %v21687_v26 }
0x1d81   :  { %17788 = vmatmul.mubr.msk.f32.vlgmr.msra.gmra.mrb[200].mxu1 %vm1202_vm12, %v13053_v37  ;;  %17795 = vmatprep.subr.mxu1 %v21687_v26 }
0x1d82   :  { %17797 = vmatprep.mubr.msk.f32.mxu1 %vm18617_vm11, %v21687_v26 }
0x1d89   :  { %13588 = vrot.lane.b32.xlu1 %v20267_v58, %s18627_s12 }
0x1e01   :  { %v13030_v39 = vpop.xlane.xlu1 %13029 }
0x1e02   :  { %18440 = vrcp.f32 %v13030_v39 }
0x1e05   :  { %v13036_v30 = vpop.xlane.xlu1 %13035 }
0x1e06   :  { %18442 = vrcp.f32 %v13036_v30 }
0x1e09   :  { %v13589_v46 = vpop.permute.xlu1 %13588 }
0x1e0a   :  { %17796 = vmatpush3.msra.mxu1 %v13589_v46 }
0x1e0b   :  { %17798 = vmatmul.mubr.msk.f32.vlgmr.msra.gmra.mrb[202].mxu1 %vm1202_vm12, %v13055_v2  ;;  %17932 = vmatprep.subr.bf16.mxu1 %v17931_v62 }
0x1e0c   :  { %v18441_v16 = vpop.eup %18440  ;;  %17934 = vmatpush3.bf16.msra.mxu1 %v17931_v62 }
0x1e0d   :  { %v13052_v48 = vmul.f32 %v18441_v16, %v18427_v19  ;;  %17818 = vmatprep.subr.msk.mxu1 %vm550_vm5, %v13803_v55  ;;  %v13952_v19 = vld [vmem:[%s21680_s2 + $0x68] sm:$0xf] }
0x1e0f   :  { %17783 = vmatmul.mubr.msk.f32.vlgmr.msra.gmra.mrb[160].mxu0 %vm1202_vm12, %v13052_v48 }
0x1e10   :  { %v18443_v12 = vpop.eup %18442  ;;  %17791 = vmatpush3.msra.mxu0 %v13513_v50  ;;  %17792 = vmatprep.mubr.msk.f32.mxu0 %vm18617_vm11, %v21687_v26 }
0x1e11   :  { %v13054_v58 = vmul.f32 %v18443_v12, %v18429_v4  ;;  %17800 = vmatprep.subr.mxu0 %v7957_v20  ;;  %17819 = vmatpush3.msk.msra.mxu1 %vm550_vm5, %v13803_v55  ;;  %v20998_v4 = vld [vmem:[#allocation2 + $0x90] sm:$0xff] }
0x1e12   :  { %16549 = vmatprep.subr.msk.mxu1 %vm550_vm5, %v13952_v19  ;;  %v18129_v5 = vpack.i.bf16 %v21000_v59, %v20998_v4 }
0x1e13   :  { %17793 = vmatmul.mubr.msk.f32.vlgmr.msra.gmra.mrb[162].mxu0 %vm1202_vm12, %v13054_v58 }
0x1e14   :  { %17801 = vmatpush3.msra.mxu0 %v7957_v20  ;;  %18130 = vrot.lane.b32.xlu0 %v18129_v5, %s18619_s5 }
0x1e15   :  { %16539 = vmatprep.subr.msk.mxu0 %vm550_vm5, %v13950_v25 }
0x1e18   :  { %v13204_v14 = vpop.f32.mrb[196].mxu1 }
0x1e19   :  { %v17769_v27 = vpop.f32.mrb[197].mxu1 }
0x1e4d   :  { %v13128_v23 = vpop.f32.mrb[156].mxu0 }
0x1e4e   :  { %v17764_v63 = vpop.f32.mrb[157].mxu0  ;;  %17802 = vmatprep.mubr.msk.f32.mxu0 %vm1202_vm12, %v13128_v23 }
0x1e4f   :  { %17803 = vmatmul.mubr.msk.f32.vlgmr.msra.gmra.mrb[120].mxu0 %vm1202_vm12, %v13204_v14 }
0x1e50   :  { %v13356_v1 = vpop.f32.mrb[198].mxu1  ;;  %16540 = vmatpush1.msk.msra.mxu0 %vm550_vm5, %v13949_v54 }
0x1e51   :  { %v13280_v17 = vpop.f32.mrb[158].mxu0  ;;  %v17779_v33 = vpop.f32.mrb[199].mxu1 }
0x1e52   :  { %v17774_v3 = vpop.f32.mrb[159].mxu0  ;;  %17805 = vmatprep.mubr.msk.f32.mxu0 %vm1202_vm12, %v13280_v17 }
0x1e53   :  { %17806 = vmatmul.mubr.msk.f32.gmra.mrb[122].mxu0 %vm1202_vm12, %v13356_v1 }
0x1e54   :  { %v13508_v53 = vpop.f32.mrb[200].mxu1 }
0x1e55   :  { %v17789_v24 = vpop.f32.mrb[201].mxu1 }
0x1ede   :  { %v13660_v8 = vpop.f32.mrb[202].mxu1 }
0x1edf   :  { %v17799_v18 = vpop.f32.mrb[203].mxu1 }
0x1ee2   :  { %v13432_v43 = vpop.f32.mrb[160].mxu0 }
0x1ee3   :  { %v17784_v56 = vpop.f32.mrb[161].mxu0  ;;  %17808 = vmatprep.mubr.msk.f32.mxu0 %vm1202_vm12, %v13432_v43 }
0x1ee4   :  { %17809 = vmatmul.mubr.msk.f32.gmra.mrb[124].mxu0 %vm1202_vm12, %v13508_v53 }
0x1ee6   :  { %v13584_v52 = vpop.f32.mrb[162].mxu0 }
0x1ee7   :  { %v17794_v61 = vpop.f32.mrb[163].mxu0  ;;  %17811 = vmatprep.mubr.msk.f32.mxu0 %vm1202_vm12, %v13584_v52 }
0x1ee8   :  { %17812 = vmatmul.mubr.msk.f32.gmra.mrb[126].mxu0 %vm1202_vm12, %v13660_v8 }
0x1ee9   :  { %14170 = vmatprep.mubr.f32.mxu0 %v21687_v26 }
0x1f22   :  { %v17804_v29 = vpop.f32.mrb[120].mxu0 }
0x1f23   :  { %v13754_v15 = vpop.f32.mrb[121].mxu0  ;;  %v17980_v31 = vadd.f32 %v17804_v29, %v16432_v40 }
0x1f24   :  { %v17981_v42 = vadd.f32 %v16432_v40, %v13754_v15  ;;  %v21685_v15 = vmov 0.0|0.0  }
0x1f26   :  { %v17807_v51 = vpop.f32.mrb[122].mxu0  ;;  %17820 = vmatprep.mubr.msk.f32.mxu1 %vm7040_vm14, %v17981_v42  ;;  %v21077_v42 = vpack.c.bf16 %v21000_v59, %v20998_v4 }
0x1f27   :  { %v13764_v10 = vpop.f32.mrb[123].mxu0  ;;  %17821 = vmatmul.mubr.msk.f32.vlgmr.msra.gmra.mrb[204].mxu1 %vm7040_vm14, %v17980_v31  ;;  %v17982_v60 = vadd.f32 %v17807_v51, %v16432_v40  ;;  %v13953_v31 = vld [vmem:[%s21680_s2 + $0x70] sm:$0xf]  ;;  %s18629_s2 = smov 16  }
0x1f28   :  { %v17983_v7 = vadd.f32 %v16432_v40, %v13764_v10  ;;  %16550 = vmatpush1.msk.msra.mxu1 %vm550_vm5, %v13951_v22  ;;  %17832 = vmatprep.subr.msk.mxu0 %vm550_vm5, %v13953_v31 }
0x1f29   :  { %17935 = vmatprep.subr.bf16.mxu1 %v21685_v15 }
0x1f2a   :  { %17823 = vmatprep.mubr.msk.f32.mxu1 %vm7040_vm14, %v17983_v7 }
0x1f2b   :  { %17824 = vmatmul.mubr.msk.f32.gmra.mrb[206].mxu1 %vm7040_vm14, %v17982_v60 }
0x1fb7   :  { %v17810_v44 = vpop.f32.mrb[124].mxu0 }
0x1fb8   :  { %v13774_v6 = vpop.f32.mrb[125].mxu0  ;;  %v17984_v41 = vadd.f32 %v17810_v44, %v16432_v40 }
0x1fb9   :  { %v17985_v38 = vadd.f32 %v16432_v40, %v13774_v6 }
0x1fbb   :  { %v17813_v9 = vpop.f32.mrb[126].mxu0  ;;  %17826 = vmatprep.mubr.msk.f32.mxu1 %vm7040_vm14, %v17985_v38 }
0x1fbc   :  { %v13784_v32 = vpop.f32.mrb[127].mxu0  ;;  %17827 = vmatmul.mubr.msk.f32.gmra.mrb[208].mxu1 %vm7040_vm14, %v17984_v41  ;;  %v17986_v57 = vadd.f32 %v17813_v9, %v16432_v40 }
0x1fbd   :  { %v17987_v36 = vadd.f32 %v16432_v40, %v13784_v32 }
0x1fbf   :  { %17829 = vmatprep.mubr.msk.f32.mxu1 %vm7040_vm14, %v17987_v36 }
0x1fc0   :  { %17830 = vmatmul.mubr.msk.f32.gmra.mrb[210].mxu1 %vm7040_vm14, %v17986_v57 }
0x1fc1   :  { %14283 = vmatprep.mubr.f32.mxu1 %v21687_v26 }
0x1ffa   :  { %v17822_v45 = vpop.f32.mrb[204].mxu1 }
0x1ffb   :  { %v13908_v37 = vadd.f32 %v17822_v45, %v21010_v34  ;;  %v13902_v39 = vpop.f32.mrb[205].mxu1 }
0x1ffc   :  { %v13903_v30 = vadd.f32 %v21010_v34, %v13902_v39 }
0x1ffd   :  { %18444 = vtanh.f32 %v13908_v37 }
0x1ffe   :  { %18446 = vtanh.f32 %v13903_v30  ;;  %v17825_v0 = vpop.f32.mrb[206].mxu1 }
0x1fff   :  { %v13918_v46 = vadd.f32 %v17825_v0, %v21010_v34  ;;  %v13912_v2 = vpop.f32.mrb[207].mxu1 }
0x2000   :  { %v13913_v16 = vadd.f32 %v21010_v34, %v13912_v2 }
0x2001   :  { %18448 = vtanh.f32 %v13918_v46 }
0x2002   :  { %18450 = vtanh.f32 %v13913_v16  ;;  %v18131_v16 = vpop.permute.xlu0 %18130 }
0x2007   :  { %v18445_v48 = vpop.eup %18444 }
0x2008   :  { %v18447_v20 = vpop.eup %18446  ;;  %v13956_v50 = vrot.slane %v18445_v48, 1 }
0x2009   :  { %v13955_v12 = vrot.slane %v18447_v20, 1 }
0x200a   :  { %v13964_v17 = vsub.f32 %v13956_v50, %v18445_v48  ;;  %v18132_v50 = vunpack.i.l.bf16 %v18131_v16 }
0x200b   :  { %v18449_v58 = vpop.eup %18448  ;;  %v13963_v14 = vsub.f32 %v13955_v12, %v18447_v20  ;;  %v18133_v20 = vunpack.i.h.bf16 %v18131_v16 }
0x200c   :  { %v18451_v27 = vpop.eup %18450  ;;  %v13958_v23 = vrot.slane %v18449_v58, 1  ;;  %v21033_v53 = vsel %vm13954_vm0, %v13964_v17, 0.0 }
0x200d   :  { %v13957_v63 = vrot.slane %v18451_v27, 1  ;;  %v21019_v1 = vsel %vm13954_vm0, %v13963_v14, 0.0  ;;  %v21129_v14 = vpack.c.bf16 %v18133_v20, %v18132_v50 }
0x200e   :  { %16541 = vmatmul.mubr.msk.f32.vlgmr.msra.gmra.mrb[164].mxu0 %vm525_vm7, %v21019_v1  ;;  %16551 = vmatmul.mubr.msk.f32.vlgmr.msra.gmra.mrb[212].mxu1 %vm525_vm7, %v21019_v1  ;;  %v13966_v33 = vsub.f32 %v13958_v23, %v18449_v58 }
0x200f   :  { %14176 = vmatprep.mubr.f32.mxu0 %v21687_v26  ;;  %14289 = vmatprep.mubr.f32.mxu1 %v21687_v26  ;;  %v13965_v24 = vsub.f32 %v13957_v63, %v18451_v27 }
0x2010   :  { %v21029_v3 = vsel %vm13954_vm0, %v13966_v33, 0.0  ;;  %17937 = vmatpush3.bf16.msra.mxu1 %v21077_v42  ;;  %17833 = vmatpush3.msk.msra.mxu0 %vm550_vm5, %v13953_v31  ;;  %vm17961_vm5 = vmpackc.low %vm15937_vm3, %vm18635_vm4 }
0x2011   :  { %v13982_v47 = vrot.slane %v21029_v3, 7  ;;  %v21047_v55 = vsel %vm13954_vm0, %v13965_v24, 0.0  ;;  %v14054_v40 = vmul.f32 0.5, %v21029_v3  ;;  %17938 = vmatprep.subr.bf16.mxu1 %v21685_v15  ;;  %17944 = vmatprep.subr.bf16.mxu0 %v21685_v15 }
0x2012   :  { %16542 = vmatmul.mubr.msk.f32.gmra.mrb[166].mxu0 %vm525_vm7, %v21033_v53  ;;  %16552 = vmatmul.mubr.msk.f32.gmra.mrb[214].mxu1 %vm525_vm7, %v21033_v53 }
0x2013   :  { %14182 = vmatprep.mubr.f32.mxu0 %v21687_v26  ;;  %14295 = vmatprep.mubr.f32.mxu1 %v21687_v26  ;;  %v13990_v28 = vsel %vm442_vm8, %v13982_v47, 0.0 }
0x2014   :  { %v13998_v62 = vadd.f32 %v13990_v28, %v21029_v3 }
0x2016   :  { %16543 = vmatmul.mubr.msk.f32.gmra.mrb[168].mxu0 %vm525_vm7, %v21047_v55  ;;  %16553 = vmatmul.mubr.msk.f32.gmra.mrb[216].mxu1 %vm525_vm7, %v21047_v55  ;;  %v14006_v8 = vrot.slane %v13998_v62, 6 }
0x2017   :  { %14188 = vmatprep.mubr.f32.mxu0 %v21687_v26  ;;  %14301 = vmatprep.mubr.f32.mxu1 %v21687_v26 }
0x2018   :  { %v14014_v18 = vsel %vm467_vm9, %v14006_v8, 0.0 }
0x2019   :  { %v14022_v43 = vadd.f32 %v14014_v18, %v13998_v62 }
0x201a   :  { %16544 = vmatmul.mubr.msk.f32.gmra.mrb[170].mxu0 %vm525_vm7, %v21029_v3  ;;  %16554 = vmatmul.mubr.msk.f32.gmra.mrb[218].mxu1 %vm525_vm7, %v21029_v3 }
0x201b   :  { %v14030_v56 = vrot.slane %v14022_v43, 4  ;;  %14194 = vmatprep.mubr.f32.mxu0 %v21687_v26  ;;  %14307 = vmatprep.mubr.f32.mxu1 %v21687_v26 }
0x201d   :  { %v14038_v52 = vsel %vm492_vm10, %v14030_v56, 0.0 }
0x201e   :  { %v14046_v61 = vadd.f32 %v14038_v52, %v14022_v43 }
0x2020   :  { %v21066_v29 = vsub.f32 %v14046_v61, %v14054_v40 }
0x2022   :  { %14506 = vperm.xlu1 %18135, %v21066_v29   ;;  %14454 = vperm.xlu0 %18134, %v21066_v29  }
0x2026   :  { %18136 = vset.pattern.permute.xlu1 %v18615_v13  ;;  %18139 = vset.pattern.permute.xlu0 %v18615_v13 }
0x2027   :  { %14554 = vperm.xlu1 %18136, %v21066_v29  }
0x202b   :  { %18137 = vset.pattern.permute.xlu1 %v21683_v11 }
0x208f   :  { %v17828_v51 = vpop.f32.mrb[208].mxu1 }
0x2090   :  { %v13928_v10 = vadd.f32 %v17828_v51, %v21010_v34  ;;  %v13922_v7 = vpop.f32.mrb[209].mxu1 }
0x2091   :  { %v13923_v60 = vadd.f32 %v21010_v34, %v13922_v7 }
0x2092   :  { %18452 = vtanh.f32 %v13928_v10 }
0x2093   :  { %18454 = vtanh.f32 %v13923_v60  ;;  %v17831_v25 = vpop.f32.mrb[210].mxu1 }
0x2094   :  { %v13938_v19 = vadd.f32 %v17831_v25, %v21010_v34  ;;  %v13932_v54 = vpop.f32.mrb[211].mxu1 }
0x2095   :  { %v13933_v22 = vadd.f32 %v21010_v34, %v13932_v54 }
0x2096   :  { %18456 = vtanh.f32 %v13938_v19 }
0x2097   :  { %18458 = vtanh.f32 %v13933_v22 }
0x209c   :  { %v18453_v4 = vpop.eup %18452 }
0x209d   :  { %v18455_v59 = vpop.eup %18454  ;;  %v13960_v5 = vrot.slane %v18453_v4, 1 }
0x209e   :  { %v13959_v44 = vrot.slane %v18455_v59, 1 }
0x209f   :  { %v13968_v57 = vsub.f32 %v13960_v5, %v18453_v4 }
0x20a0   :  { %v18457_v6 = vpop.eup %18456  ;;  %v13967_v38 = vsub.f32 %v13959_v44, %v18455_v59 }
0x20a1   :  { %v18459_v41 = vpop.eup %18458  ;;  %v13962_v9 = vrot.slane %v18457_v6, 1  ;;  %v21105_v37 = vsel %vm13954_vm0, %v13968_v57, 0.0  ;;  %v14455_v31 = vpop.permute.xlu0 %14454 }
0x20a2   :  { %v13961_v32 = vrot.slane %v18459_v41, 1  ;;  %v21093_v36 = vsel %vm13954_vm0, %v13967_v38, 0.0 }
0x20a3   :  { %16545 = vmatmul.mubr.msk.f32.gmra.mrb[172].mxu0 %vm525_vm7, %v21093_v36  ;;  %16555 = vmatmul.mubr.msk.f32.gmra.mrb[220].mxu1 %vm525_vm7, %v21093_v36  ;;  %v13970_v34 = vsub.f32 %v13962_v9, %v18457_v6 }
0x20a4   :  { %14200 = vmatprep.mubr.f32.mxu0 %v21687_v26  ;;  %14313 = vmatprep.mubr.f32.mxu1 %v21687_v26  ;;  %v13969_v39 = vsub.f32 %v13961_v32, %v18459_v41 }
0x20a5   :  { %v13978_v45 = vsel %vm13954_vm0, %v13970_v34, 0.0 }
0x20a6   :  { %v13986_v30 = vrot.slane %v13978_v45, 7  ;;  %v21117_v2 = vsel %vm13954_vm0, %v13969_v39, 0.0  ;;  %v14058_v17 = vmul.f32 0.5, %v13978_v45 }
0x20a7   :  { %16546 = vmatmul.mubr.msk.f32.gmra.mrb[174].mxu0 %vm525_vm7, %v21105_v37  ;;  %16556 = vmatmul.mubr.msk.f32.gmra.mrb[222].mxu1 %vm525_vm7, %v21105_v37 }
0x20a8   :  { %14206 = vmatprep.mubr.f32.mxu0 %v21687_v26  ;;  %14319 = vmatprep.mubr.f32.mxu1 %v21687_v26  ;;  %v13994_v0 = vsel %vm442_vm8, %v13986_v30, 0.0 }
0x20a9   :  { %v14002_v46 = vadd.f32 %v13994_v0, %v13978_v45 }
0x20ab   :  { %16547 = vmatmul.mubr.msk.f32.gmra.mrb[176].mxu0 %vm525_vm7, %v21117_v2  ;;  %16557 = vmatmul.mubr.msk.f32.gmra.mrb[224].mxu1 %vm525_vm7, %v21117_v2  ;;  %v14010_v48 = vrot.slane %v14002_v46, 6 }
0x20ac   :  { %14212 = vmatprep.mubr.f32.mxu0 %v21687_v26  ;;  %14325 = vmatprep.mubr.f32.mxu1 %v21687_v26 }
0x20ad   :  { %v14018_v12 = vsel %vm467_vm9, %v14010_v48, 0.0 }
0x20ae   :  { %v14026_v58 = vadd.f32 %v14018_v12, %v14002_v46 }
0x20af   :  { %16548 = vmatmul.mubr.msk.f32.gmra.mrb[178].mxu0 %vm525_vm7, %v13978_v45  ;;  %16558 = vmatmul.mubr.msk.f32.gmra.mrb[226].mxu1 %vm525_vm7, %v13978_v45 }
0x20b0   :  { %17834 = vmatprep.mubr.msk.f32.mxu0 %vm525_vm7, %v21019_v1  ;;  %17850 = vmatprep.mubr.msk.f32.mxu1 %vm18617_vm11, %v21687_v26  ;;  %v14034_v27 = vrot.slane %v14026_v58, 4 }
0x20b2   :  { %v14042_v23 = vsel %vm492_vm10, %v14034_v27, 0.0 }
0x20b3   :  { %17835 = vmatmul.mubr.msk.f32.vlgmr.msra.gmra.mrb[180].mxu0 %vm525_vm7, %v21033_v53  ;;  %17851 = vmatmul.mubr.f32.vlgmr.msra.gmra.mrb[228].mxu1 %v21687_v26  ;;  %v14050_v63 = vadd.f32 %v14042_v23, %v14026_v58 }
0x20b4   :  { %17837 = vmatprep.mubr.msk.f32.mxu0 %vm525_vm7, %v21047_v55  ;;  %17940 = vmatpush3.bf16.msra.mxu1 %v21129_v14 }
0x20b5   :  { %17857 = vmatprep.mubr.msk.f32.mxu1 %vm18617_vm11, %v21687_v26  ;;  %v14066_v33 = vsub.f32 %v14050_v63, %v14058_v17  ;;  %17946 = vmatpush3.bf16.msra.mxu0 %v21129_v14 }
0x20b6   :  { %17950 = vmatprep.subr.bf16.mxu0 %v21685_v15  ;;  %17941 = vmatprep.subr.bf16.mxu1 %v21685_v15 }
0x20b7   :  { %14570 = vperm.xlu0 %18139, %v14066_v33   ;;  %14474 = vperm.xlu1 %18137, %v14066_v33  }
0x20b8   :  { %17838 = vmatmul.mubr.msk.f32.gmra.mrb[182].mxu0 %vm525_vm7, %v21029_v3  ;;  %17858 = vmatmul.mubr.f32.vlgmr.msra.gmra.mrb[230].mxu1 %v21687_v26 }
0x20b9   :  { %17840 = vmatprep.mubr.msk.f32.mxu0 %vm525_vm7, %v21093_v36  ;;  %17943 = vmatpush3.bf16.msra.mxu1 %v21077_v42 }
0x20ba   :  { %17864 = vmatprep.mubr.msk.f32.mxu1 %vm18617_vm11, %v21687_v26  ;;  %17947 = vmatprep.subr.bf16.mxu1 %v21685_v15 }
0x20bb   :  { %18141 = vset.pattern.permute.xlu0 %v18616_v21  ;;  %18138 = vset.pattern.permute.xlu1 %v18613_v49 }
0x20bc   :  { %17841 = vmatmul.mubr.msk.f32.gmra.mrb[184].mxu0 %vm525_vm7, %v21105_v37  ;;  %14602 = vperm.xlu0 %18141, %v21066_v29   ;;  %v14507_v29 = vpop.permute.xlu1 %14506 }
0x20bd   :  { %14522 = vperm.xlu1 %18138, %v14066_v33   ;;  %17843 = vmatprep.mubr.msk.f32.mxu0 %vm525_vm7, %v21117_v2 }
0x20c0   :  { %17844 = vmatmul.mubr.msk.f32.gmra.mrb[186].mxu0 %vm525_vm7, %v13978_v45  ;;  %18142 = vset.pattern.permute.xlu0 %v21683_v11  ;;  %v14555_v22 = vpop.permute.xlu1 %14554  ;;  %vm16100_vm7 = vcmask 261120  }
0x20c1   :  { %18140 = vset.pattern.permute.xlu1 %v18616_v21  ;;  %17871 = vmatprep.mubr.msk.f32.mxu0 %vm18617_vm11, %v21687_v26 }
0x20c2   :  { %14618 = vperm.xlu1 %18140, %v14066_v33  }
0x20c6   :  { %18143 = vset.pattern.permute.xlu1 %v21683_v11  ;;  %v21234_v11 = vld [vmem:[#allocation2 + $0xa0] ss:$0 sm:$0xff] }
0x20e1   :  { %v21170_v3 = vpop.f32.mrb[164].mxu0  ;;  %v21172_v24 = vpop.f32.mrb[212].mxu1 }
0x20e2   :  { %v21174_v47 = vpop.f32.mrb[165].mxu0  ;;  %v21176_v28 = vpop.f32.mrb[213].mxu1 }
0x20e5   :  { %v21178_v62 = vpop.f32.mrb[166].mxu0  ;;  %v21180_v8 = vpop.f32.mrb[214].mxu1 }
0x20e6   :  { %v21182_v18 = vpop.f32.mrb[167].mxu0  ;;  %v21184_v43 = vpop.f32.mrb[215].mxu1 }
0x20e9   :  { %v21186_v56 = vpop.f32.mrb[168].mxu0  ;;  %v21188_v52 = vpop.f32.mrb[216].mxu1 }
0x20ea   :  { %v21190_v61 = vpop.f32.mrb[169].mxu0  ;;  %v21192_v40 = vpop.f32.mrb[217].mxu1 }
0x20ed   :  { %v14190_v51 = vpop.f32.mrb[170].mxu0  ;;  %v14303_v10 = vpop.f32.mrb[218].mxu1 }
0x20ee   :  { %v14192_v7 = vpop.f32.mrb[171].mxu0  ;;  %v14305_v60 = vpop.f32.mrb[219].mxu1  ;;  %v14528_v19 = vmul.f32 %v14507_v29, %v14303_v10 }
0x20ef   :  { %v14480_v25 = vmul.f32 %v14455_v31, %v14192_v7  ;;  %v14576_v59 = vmul.f32 %v14555_v22, %v14305_v60 }
0x20f1   :  { %v14488_v54 = vadd.f32 %v14480_v25, %v14190_v51 }
0x20f3   :  { %v14536_v4 = vadd.f32 %v14528_v19, %v14488_v54 }
0x20f5   :  { %v14584_v5 = vadd.f32 %v14576_v59, %v14536_v4 }
0x2136   :  { %v14475_v45 = vpop.permute.xlu1 %14474  ;;  %v14571_v12 = vpop.permute.xlu0 %14570 }
0x213b   :  { %v14603_v7 = vpop.permute.xlu0 %14602 }
0x213c   :  { %v14523_v27 = vpop.permute.xlu1 %14522 }
0x2176   :  { %v21194_v44 = vpop.f32.mrb[172].mxu0  ;;  %v21196_v6 = vpop.f32.mrb[220].mxu1 }
0x2177   :  { %v21198_v38 = vpop.f32.mrb[173].mxu0  ;;  %v21200_v41 = vpop.f32.mrb[221].mxu1 }
0x217a   :  { %v21202_v9 = vpop.f32.mrb[174].mxu0  ;;  %v21204_v32 = vpop.f32.mrb[222].mxu1 }
0x217b   :  { %v21206_v57 = vpop.f32.mrb[175].mxu0  ;;  %v21208_v34 = vpop.f32.mrb[223].mxu1 }
0x217e   :  { %v21210_v39 = vpop.f32.mrb[176].mxu0  ;;  %v21212_v30 = vpop.f32.mrb[224].mxu1 }
0x217f   :  { %v21214_v0 = vpop.f32.mrb[177].mxu0  ;;  %v21216_v46 = vpop.f32.mrb[225].mxu1 }
0x2182   :  { %v14214_v16 = vpop.f32.mrb[178].mxu0  ;;  %v14327_v48 = vpop.f32.mrb[226].mxu1 }
0x2183   :  { %v14216_v20 = vpop.f32.mrb[179].mxu0  ;;  %v14329_v50 = vpop.f32.mrb[227].mxu1  ;;  %v14532_v23 = vmul.f32 %v14523_v27, %v14327_v48 }
0x2184   :  { %v14484_v58 = vmul.f32 %v14475_v45, %v14216_v20  ;;  %v14580_v10 = vmul.f32 %v14571_v12, %v14329_v50  ;;  %v14619_v20 = vpop.permute.xlu1 %14618 }
0x2186   :  { %v14492_v63 = vadd.f32 %v14484_v58, %v14214_v16  ;;  %v21218_v17 = vpop.f32.mrb[180].mxu0  ;;  %v21220_v33 = vpop.f32.mrb[228].mxu1 }
0x2187   :  { %v21222_v29 = vpop.f32.mrb[181].mxu0  ;;  %v17852_v31 = vpop.f32.mrb[229].mxu1 }
0x2188   :  { %v14540_v51 = vadd.f32 %v14532_v23, %v14492_v63 }
0x218a   :  { %v14588_v60 = vadd.f32 %v14580_v10, %v14540_v51 }
0x218b   :  { %v17839_v25 = vpop.f32.mrb[182].mxu0  ;;  %v14855_v19 = vpop.f32.mrb[230].mxu1 }
0x218c   :  { %v14624_v54 = vmul.f32 %v17839_v25, %v14603_v7  ;;  %v14860_v22 = vrot.slane %v14855_v19, 1  ;;  %v21224_v4 = vpop.f32.mrb[183].mxu0  ;;  %v17859_v59 = vpop.f32.mrb[231].mxu1 }
0x218e   :  { %v14632_v45 = vadd.f32 %v14624_v54, %v14584_v5  ;;  %14863 = vrot.lane.b32.xlu1 %v14860_v22, %s18619_s5 }
0x218f   :  { %v21227_v16 = vpop.f32.mrb[184].mxu0 }
0x2190   :  { %v21229_v48 = vpop.f32.mrb[185].mxu0  ;;  %v14655_v63 = vrot.slane %v14632_v45, 4 }
0x2192   :  { %14861 = vrot.lane.b32.xlu1 %v14855_v19, %s18619_s5  ;;  %v14656_v51 = vadd.f32 %v14655_v63, %v14632_v45 }
0x2193   :  { %v17845_v50 = vpop.f32.mrb[186].mxu0 }
0x2194   :  { %v14628_v12 = vmul.f32 %v17845_v50, %v14619_v20  ;;  %v21232_v58 = vpop.f32.mrb[187].mxu0  ;;  %v14657_v5 = vrot.slane %v14656_v51, 2 }
0x2196   :  { %v14636_v27 = vadd.f32 %v14628_v12, %v14588_v60  ;;  %v14658_v25 = vadd.f32 %v14657_v5, %v14656_v51 }
0x2198   :  { %v14679_v23 = vrot.slane %v14636_v27, 4  ;;  %v14659_v59 = vrot.slane %v14658_v25, 1 }
0x219a   :  { %v14680_v31 = vadd.f32 %v14679_v23, %v14636_v27  ;;  %v14660_v20 = vadd.f32 %v14659_v59, %v14658_v25 }
0x219c   :  { %v14681_v10 = vrot.slane %v14680_v31, 2  ;;  %v21241_v12 = vadd.f32 %v21234_v11, %v14660_v20 }
0x219e   :  { %v14682_v7 = vadd.f32 %v14681_v10, %v14680_v31  ;;  %v13983_v31 = vrot.slane %v21093_v36, 7  ;;  %v13979_v10 = vrot.slane %v21019_v1, 7 }
0x21a0   :  { %v14683_v54 = vrot.slane %v14682_v7, 1  ;;  %v13991_v51 = vsel %vm442_vm8, %v13983_v31, 0.0  ;;  %v13987_v25 = vsel %vm442_vm8, %v13979_v10, 0.0 }
0x21a1   :  { %v13995_v59 = vadd.f32 %v13987_v25, %v21019_v1 }
0x21a2   :  { %v14684_v22 = vadd.f32 %v14683_v54, %v14682_v7  ;;  %v13999_v7 = vadd.f32 %v13991_v51, %v21093_v36 }
0x21a4   :  { %v21237_v19 = vadd.f32 %v21234_v11, %v14684_v22  ;;  %v14007_v22 = vrot.slane %v13999_v7, 6 }
0x21a6   :  { %v14015_v20 = vsel %vm467_vm9, %v14007_v22, 0.0 }
0x2200   :  { %v14864_v50 = vpop.permute.xlu1 %14863 }
0x2201   :  { %v14868_v60 = vadd.f32 %v14864_v50, %v21237_v19  ;;  %v14003_v50 = vrot.slane %v13995_v59, 6 }
0x2203   :  { %18460 = vtanh.f32 %v14868_v60  ;;  %v14945_v5 = vmul.f32 0.5, %v14868_v60 }
0x2204   :  { %v14862_v45 = vpop.permute.xlu1 %14861 }
0x2205   :  { %v14867_v27 = vadd.f32 %v14862_v45, %v21241_v12  ;;  %v14023_v45 = vadd.f32 %v14015_v20, %v13999_v7  ;;  %v14055_v20 = vmul.f32 0.5, %v21093_v36 }
0x2207   :  { %18462 = vtanh.f32 %v14867_v27  ;;  %v14944_v54 = vmul.f32 0.5, %v14867_v27 }
0x2208   :  { %18464 = vtanh.f32 %v14945_v5 }
0x2209   :  { %18466 = vtanh.f32 %v14944_v54 }
0x220d   :  { %v18461_v23 = vpop.eup %18460 }
0x220e   :  { %14960 = vrot.lane.b32.xlu0 %v18461_v23, %s18618_s30  ;;  %v14011_v23 = vsel %vm467_vm9, %v14003_v50, 0.0 }
0x220f   :  { %v14019_v31 = vadd.f32 %v14011_v23, %v13995_v59 }
0x2211   :  { %v18463_v63 = vpop.eup %18462  ;;  %v14027_v10 = vrot.slane %v14019_v31, 4 }
0x2212   :  { %14958 = vrot.lane.b32.xlu1 %v18463_v63, %s18618_s30  ;;  %v18465_v60 = vpop.eup %18464  ;;  %v14031_v63 = vrot.slane %v14023_v45, 4 }
0x2213   :  { %v14949_v51 = vmul.f32 0.5, %v18465_v60  ;;  %v18467_v15 = vpop.eup %18466  ;;  %v14035_v7 = vsel %vm492_vm10, %v14027_v10, 0.0 }
0x2214   :  { %v14039_v27 = vsel %vm492_vm10, %v14031_v63, 0.0  ;;  %v14948_v25 = vmul.f32 0.5, %v18467_v15  ;;  %v14043_v63 = vadd.f32 %v14035_v7, %v14019_v31  ;;  %v14051_v15 = vmul.f32 0.5, %v21019_v1 }
0x2215   :  { %v21260_v5 = vadd.f32 0.5, %v14949_v51  ;;  %v14047_v26 = vadd.f32 %v14039_v27, %v14023_v45 }
0x2216   :  { %v21266_v59 = vadd.f32 0.5, %v14948_v25  ;;  %v14059_v45 = vsub.f32 %v14043_v63, %v14051_v15 }
0x2217   :  { %v14063_v60 = vsub.f32 %v14047_v26, %v14055_v20  ;;  %v18630_v26 = vmov 18   ;;  %v14955_v1 = vmul.f32 0.0, %v21260_v5 }
0x2218   :  { %v14954_v51 = vmul.f32 0.0, %v21266_v59 }
0x2280   :  { %v14961_v54 = vpop.permute.xlu0 %14960 }
0x2281   :  { %v14965_v22 = vmul.f32 %v14961_v54, %v21260_v5 }
0x2283   :  { %14970 = vrot.lane.b32.xlu0 %v14965_v22, %s18629_s2 }
0x2284   :  { %v14959_v50 = vpop.permute.xlu1 %14958 }
0x2285   :  { %v14964_v23 = vmul.f32 %v14959_v50, %v21266_v59 }
0x2287   :  { %14459 = vperm.xlu0 %18142, %v14063_v60   ;;  %14968 = vrot.lane.b32.xlu1 %v14964_v23, %s18629_s2 }
0x228b   :  { %18145 = vset.pattern.permute.xlu0 %v18613_v49  ;;  %14439 = vperm.xlu1 %18143, %v14059_v45  }
0x228c   :  { %14494 = vperm.xlu0 %18145, %v14059_v45  }
0x228f   :  { %18144 = vset.pattern.permute.xlu1 %v18613_v49 }
0x2290   :  { %18147 = vset.pattern.permute.xlu0 %v18616_v21  ;;  %14510 = vperm.xlu1 %18144, %v14063_v60  }
0x2291   :  { %14606 = vperm.xlu0 %18147, %v14063_v60  }
0x2294   :  { %18146 = vset.pattern.permute.xlu1 %v18615_v13 }
0x2295   :  { %14558 = vperm.xlu1 %18146, %v14063_v60   ;;  %18150 = vset.pattern.permute.xlu0 %v18630_v26 }
0x2299   :  { %14542 = vperm.xlu1 %18146, %v14059_v45  }
0x229d   :  { %18148 = vset.pattern.permute.xlu1 %v18616_v21 }
0x229e   :  { %14590 = vperm.xlu1 %18148, %v14059_v45  }
0x22a2   :  { %18149 = vset.pattern.permute.xlu1 %v18630_v26 }
0x22f5   :  { %v14971_v36 = vpop.permute.xlu0 %14970 }
0x22f6   :  { %v14975_v31 = vadd.f32 %v14971_v36, %v14955_v1 }
0x22f8   :  { %18468 = vtanh.f32 %v14975_v31  ;;  %v15008_v10 = vrot.slane %v14975_v31, 7 }
0x22f9   :  { %v14969_v27 = vpop.permute.xlu1 %14968 }
0x22fa   :  { %v14974_v25 = vadd.f32 %v14969_v27, %v14954_v51 }
0x22fc   :  { %18470 = vtanh.f32 %v14974_v25  ;;  %v21280_v54 = vsel %vm14921_vm1, %v15008_v10, %v14974_v25 }
0x2302   :  { %v18469_v22 = vpop.eup %18468 }
0x2303   :  { %14982 = vrot.lane.b32.xlu1 %v18469_v22, %s18631_s10 }
0x2306   :  { %v18471_v7 = vpop.eup %18470  ;;  %v14460_v20 = vpop.permute.xlu0 %14459 }
0x2307   :  { %v14481_v50 = vmul.f32 %v14460_v20, %v21198_v38  ;;  %14980 = vrot.lane.b32.xlu0 %v18471_v7, %s18631_s10 }
0x2309   :  { %v14489_v23 = vadd.f32 %v14481_v50, %v21194_v44 }
0x230a   :  { %v14440_v60 = vpop.permute.xlu1 %14439 }
0x230b   :  { %v14477_v63 = vmul.f32 %v14440_v60, %v21174_v47  ;;  %v14495_v15 = vpop.permute.xlu0 %14494 }
0x230c   :  { %v14525_v45 = vmul.f32 %v14495_v15, %v21172_v24 }
0x230d   :  { %v14485_v26 = vadd.f32 %v14477_v63, %v21170_v3 }
0x230f   :  { %v14533_v1 = vadd.f32 %v14525_v45, %v14485_v26  ;;  %v14511_v36 = vpop.permute.xlu1 %14510 }
0x2310   :  { %v14529_v31 = vmul.f32 %v14511_v36, %v21196_v6  ;;  %v14607_v27 = vpop.permute.xlu0 %14606 }
0x2311   :  { %v14625_v25 = vmul.f32 %v14607_v27, %v21229_v48  ;;  %v14776_v48 = vrot.slane %v21220_v33, 1 }
0x2312   :  { %v14537_v51 = vadd.f32 %v14529_v31, %v14489_v23 }
0x2314   :  { %v14559_v10 = vpop.permute.xlu1 %14558 }
0x2315   :  { %v14577_v38 = vmul.f32 %v14559_v10, %v21200_v41 }
0x2317   :  { %v14585_v44 = vadd.f32 %v14577_v38, %v14537_v51 }
0x2318   :  { %v14543_v22 = vpop.permute.xlu1 %14542 }
0x2319   :  { %v14633_v7 = vadd.f32 %v14625_v25, %v14585_v44  ;;  %v14573_v47 = vmul.f32 %v14543_v22, %v21176_v28  ;;  %v21308_v25 = vld [vmem:[%s21679_s1] sm:$0x3] }
0x231a   :  { %v21313_v22 = vsub.f32 1.0, %v21308_v25 }
0x231b   :  { %v14661_v20 = vrot.slane %v14633_v7, 4  ;;  %v14581_v24 = vadd.f32 %v14573_v47, %v14533_v1 }
0x231d   :  { %v14662_v50 = vadd.f32 %v14661_v20, %v14633_v7  ;;  %v14591_v3 = vpop.permute.xlu1 %14590 }
0x231e   :  { %v14621_v60 = vmul.f32 %v14591_v3, %v21222_v29 }
0x231f   :  { %v14663_v63 = vrot.slane %v14662_v50, 2 }
0x2320   :  { %v14629_v6 = vadd.f32 %v14621_v60, %v14581_v24 }
0x2321   :  { %v14664_v23 = vadd.f32 %v14663_v63, %v14662_v50 }
0x2322   :  { %v14637_v15 = vrot.slane %v14629_v6, 4 }
0x2323   :  { %v14665_v45 = vrot.slane %v14664_v23, 1 }
0x2324   :  { %v14638_v26 = vadd.f32 %v14637_v15, %v14629_v6 }
0x2325   :  { %v14666_v41 = vadd.f32 %v14665_v45, %v14664_v23 }
0x2326   :  { %v14639_v36 = vrot.slane %v14638_v26, 2 }
0x2327   :  { %v21296_v31 = vadd.f32 %v21234_v11, %v14666_v41 }
0x2328   :  { %v14640_v28 = vadd.f32 %v14639_v36, %v14638_v26 }
0x2329   :  { %v14780_v1 = vadd.f32 %v14776_v48, %v21296_v31  ;;  %v18632_v48 = vmov 15  }
0x232a   :  { %v14641_v51 = vrot.slane %v14640_v28, 1 }
0x232b   :  { %18472 = vtanh.f32 %v14780_v1  ;;  %v14870_v3 = vmul.f32 0.5, %v14780_v1 }
0x232c   :  { %v14642_v27 = vadd.f32 %v14641_v51, %v14640_v28 }
0x232e   :  { %v21300_v29 = vadd.f32 %v21234_v11, %v14642_v27 }
0x2330   :  { %v14779_v10 = vadd.f32 %v21220_v33, %v21300_v29 }
0x2332   :  { %18474 = vtanh.f32 %v14779_v10  ;;  %v14869_v60 = vmul.f32 0.5, %v14779_v10 }
0x2333   :  { %18476 = vtanh.f32 %v14870_v3 }
0x2334   :  { %18478 = vtanh.f32 %v14869_v60 }
0x2335   :  { %v18473_v38 = vpop.eup %18472 }
0x2336   :  { %14885 = vrot.lane.b32.xlu1 %v18473_v38, %s18618_s30 }
0x233a   :  { %14989 = vperm.xlu1 %18149, %v21308_v25  }
0x233c   :  { %v18475_v44 = vpop.eup %18474 }
0x233d   :  { %14883 = vrot.lane.b32.xlu0 %v18475_v44, %s18618_s30  ;;  %v18477_v63 = vpop.eup %18476  ;;  %v21689_v44 = vmov 0.0  }
0x233e   :  { %v14874_v6 = vmul.f32 0.5, %v18477_v63  ;;  %v18479_v23 = vpop.eup %18478  ;;  %18151 = vset.pattern.permute.xlu1 %v18632_v48 }
0x233f   :  { %v14873_v26 = vmul.f32 0.5, %v18479_v23 }
0x2340   :  { %v21320_v15 = vadd.f32 0.5, %v14874_v6 }
0x2341   :  { %15001 = vperm.xlu0 %18150, %v21313_v22  }
0x2345   :  { %18152 = vset.pattern.permute.xlu0 %v18632_v48 }
0x2375   :  { %v14983_v33 = vpop.permute.xlu1 %14982 }
0x2376   :  { %v14987_v7 = vmul.f32 %v14983_v33, %v21260_v5  ;;  %v21690_v33 = vmov 0.0|0.0  }
0x2378   :  { %v14994_v20 = vrot.slane %v14987_v7, 7  ;;  %v13981_v7 = vrot.slane %v21047_v55, 7 }
0x2379   :  { %v14981_v47 = vpop.permute.xlu0 %14980 }
0x237a   :  { %v14986_v24 = vmul.f32 %v14981_v47, %v21266_v59  ;;  %v21324_v59 = vadd.f32 0.5, %v14873_v26  ;;  %v14880_v47 = vmul.f32 0.0, %v21320_v15 }
0x237c   :  { %v14995_v50 = vsel %vm14921_vm1, %v14994_v20, %v14986_v24  ;;  %v13989_v20 = vsel %vm442_vm8, %v13981_v7, 0.0  ;;  %v14879_v6 = vmul.f32 0.0, %v21324_v59 }
0x237d   :  { %14996 = vrot.lane.b32.xlu1 %v14995_v50, %s18629_s2  ;;  %v13985_v50 = vrot.slane %v21117_v2, 7  ;;  %v13997_v60 = vadd.f32 %v13989_v20, %v21047_v55 }
0x237f   :  { %v13993_v63 = vsel %vm442_vm8, %v13985_v50, 0.0  ;;  %v14005_v23 = vrot.slane %v13997_v60, 6 }
0x23a8   :  { %v14886_v45 = vpop.permute.xlu1 %14885 }
0x23a9   :  { %v14890_v5 = vmul.f32 %v14886_v45, %v21320_v15 }
0x23ab   :  { %14895 = vrot.lane.b32.xlu1 %v14890_v5, %s18629_s2  ;;  %v14001_v5 = vadd.f32 %v13993_v63, %v21117_v2 }
0x23af   :  { %v14884_v41 = vpop.permute.xlu0 %14883 }
0x23b0   :  { %v14889_v36 = vmul.f32 %v14884_v41, %v21324_v59 }
0x23b2   :  { %14893 = vrot.lane.b32.xlu0 %v14889_v36, %s18629_s2  ;;  %v14013_v36 = vsel %vm467_vm9, %v14005_v23, 0.0 }
0x23b3   :  { %v14021_v7 = vadd.f32 %v14013_v36, %v13997_v60  ;;  %v14053_v60 = vmul.f32 0.5, %v21047_v55 }
0x23b5   :  { %v14029_v20 = vrot.slane %v14021_v7, 4 }
0x23b9   :  { %v21328_v28 = vpop.permute.xlu1 %14989 }
0x23c0   :  { %v21330_v1 = vpop.permute.xlu0 %15001 }
0x23c1   :  { %v21333_v51 = vmul.f32 0.0, %v21330_v1 }
0x23ef   :  { %v14997_v27 = vpop.permute.xlu1 %14996 }
0x23f0   :  { %v14999_v10 = vmul.f32 %v14997_v27, %v21328_v28  ;;  %v14009_v27 = vrot.slane %v14001_v5, 6 }
0x23f2   :  { %v21337_v38 = vadd.f32 %v21333_v51, %v14999_v10 }
0x23f4   :  { %17872 = vmatmul.mubr.msk.f32.vlgmr.msra.gmra.mrb[188].mxu0 %vm14701_vm2, %v21337_v38 }
0x23f5   :  { %17952 = vmatpush3.bf16.msra.mxu0 %v21129_v14  ;;  %17885 = vmatprep.mubr.msk.f32.mxu0 %vm18617_vm11, %v21689_v44 }
0x23f6   :  { %17956 = vmatprep.subr.bf16.mxu0 %v21690_v33 }
0x241d   :  { %v14896_v24 = vpop.permute.xlu1 %14895 }
0x241e   :  { %v14900_v3 = vadd.f32 %v14896_v24, %v14880_v47  ;;  %v14017_v47 = vsel %vm467_vm9, %v14009_v27, 0.0 }
0x241f   :  { %v14025_v24 = vadd.f32 %v14017_v47, %v14001_v5 }
0x2420   :  { %18480 = vtanh.f32 %v14900_v3  ;;  %v14937_v26 = vrot.slane %v14900_v3, 7  ;;  %v14037_v3 = vsel %vm492_vm10, %v14029_v20, 0.0 }
0x2421   :  { %v14033_v63 = vrot.slane %v14025_v24, 4  ;;  %v14045_v23 = vadd.f32 %v14037_v3, %v14021_v7 }
0x2423   :  { %v14061_v5 = vsub.f32 %v14045_v23, %v14053_v60 }
0x2424   :  { %v14894_v45 = vpop.permute.xlu0 %14893 }
0x2425   :  { %v14899_v41 = vadd.f32 %v14894_v45, %v14879_v6  ;;  %v21691_v6 = vmov 0   ;;  %v14041_v45 = vsel %vm492_vm10, %v14033_v63, 0.0 }
0x2427   :  { %18482 = vtanh.f32 %v14899_v41  ;;  %v21358_v48 = vsel %vm14921_vm1, %v14937_v26, %v14899_v41  ;;  %v14049_v26 = vadd.f32 %v14041_v45, %v14025_v24  ;;  %v14057_v41 = vmul.f32 0.5, %v21117_v2 }
0x2429   :  { %v14065_v36 = vsub.f32 %v14049_v26, %v14057_v41 }
0x242a   :  { %v18481_v10 = vpop.eup %18480 }
0x242b   :  { %14907 = vrot.lane.b32.xlu1 %v18481_v10, %s18631_s10 }
0x242f   :  { %14915 = vperm.xlu1 %18151, %v21308_v25  }
0x2431   :  { %v18483_v50 = vpop.eup %18482 }
0x2432   :  { %14905 = vrot.lane.b32.xlu0 %v18483_v50, %s18631_s10 }
0x2433   :  { %18153 = vset.pattern.permute.xlu1 %v21691_v6 }
0x2436   :  { %14930 = vperm.xlu0 %18152, %v21313_v22  }
0x243a   :  { %18154 = vset.pattern.permute.xlu0 %v21691_v6 }
0x243b   :  { %14449 = vperm.xlu0 %18154, %v14061_v5  }
0x243f   :  { %18156 = vset.pattern.permute.xlu0 %v18615_v13 }
0x2440   :  { %14566 = vperm.xlu0 %18156, %v14065_v36  }
0x2444   :  { %18159 = vset.pattern.permute.xlu0 %v18616_v21 }
0x2445   :  { %14598 = vperm.xlu0 %18159, %v14061_v5  }
0x2449   :  { %15010 = vrot.lane.b32.xlu0 %v21280_v54, %s18624_s9 }
0x244a   :  { %18161 = vset.pattern.permute.xlu0 %v21691_v6 }
0x249d   :  { %v14908_v55 = vpop.permute.xlu1 %14907 }
0x249e   :  { %v14912_v27 = vmul.f32 %v14908_v55, %v21320_v15 }
0x24a0   :  { %v14920_v7 = vrot.slane %v14912_v27, 7 }
0x24a4   :  { %v14906_v10 = vpop.permute.xlu0 %14905 }
0x24a5   :  { %v14911_v47 = vmul.f32 %v14906_v10, %v21324_v59 }
0x24a7   :  { %v14922_v2 = vsel %vm14921_vm1, %v14920_v7, %v14911_v47 }
0x24a8   :  { %14923 = vrot.lane.b32.xlu1 %v14922_v2, %s18622_s8 }
0x24ac   :  { %14469 = vperm.xlu1 %18153, %v14065_v36  }
0x24ae   :  { %v21393_v63 = vpop.permute.xlu1 %14915 }
0x24b0   :  { %18155 = vset.pattern.permute.xlu1 %v18613_v49 }
0x24b1   :  { %14518 = vperm.xlu1 %18155, %v14065_v36  }
0x24b5   :  { %14502 = vperm.xlu1 %18155, %v14061_v5   ;;  %v21384_v20 = vpop.permute.xlu0 %14930 }
0x24b6   :  { %v21396_v23 = vmul.f32 0.0, %v21384_v20 }
0x24b9   :  { %18157 = vset.pattern.permute.xlu1 %v18615_v13 }
0x24ba   :  { %14550 = vperm.xlu1 %18157, %v14061_v5   ;;  %v14450_v54 = vpop.permute.xlu0 %14449 }
0x24bb   :  { %v14479_v15 = vmul.f32 %v14450_v54, %v21190_v61 }
0x24bd   :  { %v14487_v24 = vadd.f32 %v14479_v15, %v21186_v56 }
0x24be   :  { %18158 = vset.pattern.permute.xlu1 %v18616_v21 }
0x24bf   :  { %14614 = vperm.xlu1 %18158, %v14065_v36   ;;  %v14567_v26 = vpop.permute.xlu0 %14566 }
0x24c0   :  { %v14579_v55 = vmul.f32 %v14567_v26, %v21216_v46  ;;  %v13984_v46 = vrot.slane %v21105_v37, 7 }
0x24c3   :  { %18160 = vset.pattern.permute.xlu1 %v21691_v6 }
0x24c4   :  { %v14599_v54 = vpop.permute.xlu0 %14598 }
0x24c7   :  { %v15163_v59 = vpop.f32.mrb[188].mxu0 }
0x24c8   :  { %v15168_v50 = vrot.slane %v15163_v59, 1  ;;  %v17873_v3 = vpop.f32.mrb[189].mxu0  ;;  %v15011_v35 = vpop.permute.xlu0 %15010 }
0x24ca   :  { %15171 = vrot.lane.b32.xlu1 %v15168_v50, %s18619_s5 }
0x24ce   :  { %15169 = vrot.lane.b32.xlu1 %v15163_v59, %s18619_s5 }
0x251a   :  { %v14924_v61 = vpop.permute.xlu1 %14923 }
0x251b   :  { %v14926_v56 = vmul.f32 %v14924_v61, %v21393_v63 }
0x251d   :  { %v21400_v60 = vadd.f32 %v21396_v23, %v14926_v56 }
0x251f   :  { %17865 = vmatmul.mubr.msk.f32.vlgmr.msra.gmra.mrb[232].mxu1 %vm14701_vm2, %v21400_v60 }
0x2520   :  { %17949 = vmatpush3.bf16.msra.mxu1 %v21077_v42  ;;  %17878 = vmatprep.mubr.msk.f32.mxu1 %vm18617_vm11, %v21689_v44 }
0x2521   :  { %17953 = vmatprep.subr.bf16.mxu1 %v21690_v33 }
0x252b   :  { %v14470_v6 = vpop.permute.xlu1 %14469 }
0x252c   :  { %v14483_v45 = vmul.f32 %v14470_v6, %v21214_v0  ;;  %v14623_v0 = vmul.f32 %v14599_v54, %v21224_v4  ;;  %v13992_v4 = vsel %vm442_vm8, %v13984_v46, 0.0 }
0x252e   :  { %v14491_v5 = vadd.f32 %v14483_v45, %v21210_v39  ;;  %v13980_v39 = vrot.slane %v21033_v53, 7 }
0x2530   :  { %v14519_v41 = vpop.permute.xlu1 %14518 }
0x2531   :  { %v14531_v36 = vmul.f32 %v14519_v41, %v21212_v30 }
0x2533   :  { %v14539_v27 = vadd.f32 %v14531_v36, %v14491_v5  ;;  %v14000_v36 = vadd.f32 %v13992_v4, %v21105_v37 }
0x2534   :  { %v14503_v10 = vpop.permute.xlu1 %14502 }
0x2535   :  { %v14527_v7 = vmul.f32 %v14503_v10, %v21188_v52  ;;  %v14587_v47 = vadd.f32 %v14579_v55, %v14539_v27  ;;  %v13988_v52 = vsel %vm442_vm8, %v13980_v39, 0.0  ;;  %v14008_v54 = vrot.slane %v14000_v36, 6 }
0x2536   :  { %vm16174_vm8 = vcmask 33792  }
0x2537   :  { %v14535_v2 = vadd.f32 %v14527_v7, %v14487_v24 }
0x2539   :  { %v14551_v15 = vpop.permute.xlu1 %14550 }
0x253a   :  { %v14575_v59 = vmul.f32 %v14551_v15, %v21192_v40  ;;  %v13996_v40 = vadd.f32 %v13988_v52, %v21033_v53 }
0x253c   :  { %v14583_v50 = vadd.f32 %v14575_v59, %v14535_v2  ;;  %v14004_v27 = vrot.slane %v13996_v40, 6 }
0x253e   :  { %v14631_v3 = vadd.f32 %v14623_v0, %v14583_v50  ;;  %v14615_v61 = vpop.permute.xlu1 %14614  ;;  %v14012_v15 = vsel %vm467_vm9, %v14004_v27, 0.0 }
0x253f   :  { %v14627_v30 = vmul.f32 %v14615_v61, %v21232_v58  ;;  %v14016_v61 = vsel %vm467_vm9, %v14008_v54, 0.0 }
0x2540   :  { %v14649_v56 = vrot.slane %v14631_v3, 4 }
0x2541   :  { %v14635_v24 = vadd.f32 %v14627_v30, %v14587_v47 }
0x2542   :  { %v14650_v6 = vadd.f32 %v14649_v56, %v14631_v3  ;;  %v15172_v55 = vpop.permute.xlu1 %15171  ;;  %v14020_v3 = vadd.f32 %v14012_v15, %v13996_v40  ;;  %v14024_v56 = vadd.f32 %v14016_v61, %v14000_v36  ;;  %v14056_v36 = vmul.f32 0.5, %v21105_v37 }
0x2543   :  { %v14673_v45 = vrot.slane %v14635_v24, 4 }
0x2544   :  { %v14651_v5 = vrot.slane %v14650_v6, 2  ;;  %v14028_v52 = vrot.slane %v14020_v3, 4 }
0x2545   :  { %v14674_v26 = vadd.f32 %v14673_v45, %v14635_v24  ;;  %v14032_v24 = vrot.slane %v14024_v56, 4 }
0x2546   :  { %v14652_v41 = vadd.f32 %v14651_v5, %v14650_v6  ;;  %v15170_v50 = vpop.permute.xlu1 %15169  ;;  %v14036_v6 = vsel %vm492_vm10, %v14028_v52, 0.0  ;;  %v14052_v5 = vmul.f32 0.5, %v21033_v53  ;;  %v15013_v53 = vmul.f32 %v15011_v35, %v21328_v28 }
0x2547   :  { %v14675_v58 = vrot.slane %v14674_v26, 2  ;;  %v14044_v45 = vadd.f32 %v14036_v6, %v14020_v3  ;;  %v14040_v40 = vsel %vm492_vm10, %v14032_v24, 0.0 }
0x2548   :  { %v14653_v10 = vrot.slane %v14652_v41, 1  ;;  %v21450_v37 = vadd.f32 %v15013_v53, %v21333_v51 }
0x2549   :  { %v14676_v7 = vadd.f32 %v14675_v58, %v14674_v26  ;;  %v14048_v26 = vadd.f32 %v14040_v40, %v14024_v56  ;;  %v14060_v58 = vsub.f32 %v14044_v45, %v14052_v5 }
0x254a   :  { %v14654_v2 = vadd.f32 %v14653_v10, %v14652_v41  ;;  %v15268_v27 = vrot.slane %v21450_v37, 1 }
0x254b   :  { %v14677_v47 = vrot.slane %v14676_v7, 1 }
0x254c   :  { %v21427_v59 = vadd.f32 %v21234_v11, %v14654_v2 }
0x254d   :  { %v14678_v0 = vadd.f32 %v14677_v47, %v14676_v7 }
0x254e   :  { %v15175_v39 = vadd.f32 %v15170_v50, %v21427_v59 }
0x254f   :  { %v21433_v30 = vadd.f32 %v21234_v11, %v14678_v0 }
0x2550   :  { %18484 = vtanh.f32 %v15175_v39 }
0x2551   :  { %v15176_v46 = vadd.f32 %v15172_v55, %v21433_v30  ;;  %v14064_v55 = vsub.f32 %v14048_v26, %v14056_v36 }
0x2553   :  { %18486 = vtanh.f32 %v15176_v46  ;;  %v15258_v10 = vmul.f32 0.5, %v15176_v46 }
0x255a   :  { %v18485_v4 = vpop.eup %18484 }
0x255b   :  { %15279 = vrot.lane.b32.xlu0 %v18485_v4, %s18618_s30 }
0x255d   :  { %v18487_v41 = vpop.eup %18486 }
0x255e   :  { %15281 = vrot.lane.b32.xlu1 %v18487_v41, %s18618_s30 }
0x255f   :  { %14444 = vperm.xlu0 %18161, %v14060_v58  }
0x2562   :  { %14464 = vperm.xlu1 %18160, %v14064_v55  }
0x2563   :  { %18163 = vset.pattern.permute.xlu0 %v18615_v13 }
0x2564   :  { %14562 = vperm.xlu0 %18163, %v14064_v55  }
0x2566   :  { %18162 = vset.pattern.permute.xlu1 %v18613_v49  ;;  %v15257_v49 = vmul.f32 0.5, %v15175_v39 }
0x2567   :  { %14514 = vperm.xlu1 %18162, %v14064_v55  }
0x2568   :  { %18166 = vset.pattern.permute.xlu0 %v18616_v21  ;;  %18488 = vtanh.f32 %v15257_v49 }
0x2569   :  { %14594 = vperm.xlu0 %18166, %v14060_v58   ;;  %18490 = vtanh.f32 %v15258_v10 }
0x256b   :  { %14498 = vperm.xlu1 %18162, %v14060_v58  }
0x256f   :  { %18164 = vset.pattern.permute.xlu1 %v18615_v13 }
0x2570   :  { %14546 = vperm.xlu1 %18164, %v14060_v58  }
0x2572   :  { %v18489_v7 = vpop.eup %18488 }
0x2573   :  { %v18491_v13 = vpop.eup %18490  ;;  %v15261_v2 = vmul.f32 0.5, %v18489_v7 }
0x2574   :  { %18165 = vset.pattern.permute.xlu1 %v18616_v21  ;;  %v15262_v54 = vmul.f32 0.5, %v18491_v13 }
0x2575   :  { %14610 = vperm.xlu1 %18165, %v14064_v55   ;;  %v21457_v51 = vadd.f32 0.5, %v15261_v2 }
0x2576   :  { %v21460_v15 = vadd.f32 0.5, %v15262_v54 }
0x2579   :  { %15271 = vrot.lane.b32.xlu1 %v15268_v27, %s18622_s8 }
0x257d   :  { %15269 = vrot.lane.b32.xlu1 %v21450_v37, %s18622_s8 }
0x25cd   :  { %v15280_v47 = vpop.permute.xlu0 %15279 }
0x25ce   :  { %v15285_v21 = vmul.f32 %v15280_v47, %v21457_v51 }
0x25d0   :  { %v15282_v0 = vpop.permute.xlu1 %15281  ;;  %15289 = vrot.lane.b32.xlu1 %v15285_v21, %s18629_s2 }
0x25d1   :  { %v15286_v50 = vmul.f32 %v15282_v0, %v21460_v15 }
0x25d3   :  { %15291 = vrot.lane.b32.xlu0 %v15286_v50, %s18629_s2 }
0x25d7   :  { %14939 = vrot.lane.b32.xlu0 %v21358_v48, %s18623_s3 }
0x25de   :  { %v14445_v39 = vpop.permute.xlu0 %14444 }
0x25df   :  { %v14478_v3 = vmul.f32 %v14445_v39, %v21182_v18 }
0x25e1   :  { %v14486_v61 = vadd.f32 %v14478_v3, %v21178_v62  ;;  %v14465_v46 = vpop.permute.xlu1 %14464 }
0x25e2   :  { %v14482_v56 = vmul.f32 %v14465_v46, %v21206_v57 }
0x25e3   :  { %v14563_v24 = vpop.permute.xlu0 %14562 }
0x25e4   :  { %v14490_v52 = vadd.f32 %v14482_v56, %v21202_v9  ;;  %v14578_v40 = vmul.f32 %v14563_v24, %v21208_v34 }
0x25e6   :  { %v14515_v6 = vpop.permute.xlu1 %14514 }
0x25e7   :  { %v14530_v45 = vmul.f32 %v14515_v6, %v21204_v32 }
0x25e8   :  { %v14595_v18 = vpop.permute.xlu0 %14594 }
0x25e9   :  { %v14538_v4 = vadd.f32 %v14530_v45, %v14490_v52  ;;  %v14622_v57 = vmul.f32 %v21218_v17, %v14595_v18 }
0x25ea   :  { %v14499_v5 = vpop.permute.xlu1 %14498 }
0x25eb   :  { %v14526_v48 = vmul.f32 %v14499_v5, %v21180_v8  ;;  %v14586_v26 = vadd.f32 %v14578_v40, %v14538_v4 }
0x25ed   :  { %v14534_v41 = vadd.f32 %v14526_v48, %v14486_v61  ;;  %v18633_v61 = vmov 17  }
0x25ee   :  { %18168 = vset.pattern.permute.xlu0 %v18633_v61  ;;  %18167 = vset.pattern.permute.xlu1 %v18633_v61 }
0x25ef   :  { %v14547_v58 = vpop.permute.xlu1 %14546 }
0x25f0   :  { %v14574_v62 = vmul.f32 %v14547_v58, %v21184_v43 }
0x25f2   :  { %v14582_v36 = vadd.f32 %v14574_v62, %v14534_v41  ;;  %v15084_v9 = vpop.f32.mrb[232].mxu1 }
0x25f3   :  { %v17866_v55 = vpop.f32.mrb[233].mxu1  ;;  %v15089_v39 = vrot.slane %v15084_v9, 1 }
0x25f4   :  { %v14630_v35 = vadd.f32 %v14622_v57, %v14582_v36  ;;  %v14611_v53 = vpop.permute.xlu1 %14610 }
0x25f5   :  { %v14626_v32 = vmul.f32 %v21227_v16, %v14611_v53 }
0x25f6   :  { %v14643_v34 = vrot.slane %v14630_v35, 4 }
0x25f7   :  { %v14634_v27 = vadd.f32 %v14626_v32, %v14586_v26 }
0x25f8   :  { %v14644_v49 = vadd.f32 %v14643_v34, %v14630_v35  ;;  %v15272_v52 = vpop.permute.xlu1 %15271 }
0x25f9   :  { %v14667_v10 = vrot.slane %v14634_v27, 4  ;;  %v15276_v40 = vmul.f32 %v15272_v52, %v21460_v15 }
0x25fa   :  { %v14645_v8 = vrot.slane %v14644_v49, 2 }
0x25fb   :  { %v14668_v7 = vadd.f32 %v14667_v10, %v14634_v27 }
0x25fc   :  { %v14646_v13 = vadd.f32 %v14645_v8, %v14644_v49  ;;  %v15270_v24 = vpop.permute.xlu1 %15269 }
0x25fd   :  { %v14669_v2 = vrot.slane %v14668_v7, 2 }
0x25fe   :  { %v14647_v54 = vrot.slane %v14646_v13, 1 }
0x25ff   :  { %v14670_v47 = vadd.f32 %v14669_v2, %v14668_v7 }
0x2600   :  { %v14648_v43 = vadd.f32 %v14647_v54, %v14646_v13  ;;  %v18634_v13 = vmov 16  }
0x2601   :  { %v14671_v21 = vrot.slane %v14670_v47, 1 }
0x2602   :  { %v21478_v17 = vadd.f32 %v21234_v11, %v14648_v43 }
0x2603   :  { %v14672_v0 = vadd.f32 %v14671_v21, %v14670_v47 }
0x2604   :  { %v15092_v50 = vadd.f32 %v15084_v9, %v21478_v17 }
0x2605   :  { %v21482_v16 = vadd.f32 %v21234_v11, %v14672_v0  ;;  %v15275_v11 = vmul.f32 %v15270_v24, %v21457_v51 }
0x2606   :  { %18492 = vtanh.f32 %v15092_v50  ;;  %v15177_v9 = vmul.f32 0.5, %v15092_v50 }
0x2607   :  { %v15093_v3 = vadd.f32 %v15089_v39, %v21482_v16 }
0x2609   :  { %18494 = vtanh.f32 %v15093_v3  ;;  %v15178_v55 = vmul.f32 0.5, %v15093_v3 }
0x2610   :  { %v18493_v46 = vpop.eup %18492 }
0x2611   :  { %15199 = vrot.lane.b32.xlu0 %v18493_v46, %s18618_s30 }
0x2613   :  { %v18495_v56 = vpop.eup %18494 }
0x2614   :  { %15201 = vrot.lane.b32.xlu1 %v18495_v56, %s18618_s30 }
0x2642   :  { %v15290_v6 = vpop.permute.xlu1 %15289 }
0x2643   :  { %v15295_v45 = vadd.f32 %v15290_v6, %v15275_v11 }
0x2645   :  { %18496 = vtanh.f32 %v15295_v45  ;;  %v15292_v4 = vpop.permute.xlu0 %15291 }
0x2646   :  { %v15296_v5 = vadd.f32 %v15292_v4, %v15276_v40 }
0x2648   :  { %18498 = vtanh.f32 %v15296_v5  ;;  %v15329_v48 = vrot.slane %v15296_v5, 7 }
0x2649   :  { %v14940_v26 = vpop.permute.xlu0 %14939  ;;  %18500 = vtanh.f32 %v15177_v9 }
0x264a   :  { %v21492_v41 = vsel %vm14921_vm1, %v15329_v48, %v15295_v45  ;;  %v14942_v18 = vmul.f32 %v14940_v26, %v21393_v63  ;;  %18502 = vtanh.f32 %v15178_v55 }
0x264c   :  { %v21497_v62 = vadd.f32 %v14942_v18, %v21396_v23 }
0x264e   :  { %v15188_v36 = vrot.slane %v21497_v62, 1 }
0x264f   :  { %v18497_v58 = vpop.eup %18496 }
0x2650   :  { %15301 = vrot.lane.b32.xlu0 %v18497_v58, %s18631_s10 }
0x2652   :  { %v18499_v57 = vpop.eup %18498 }
0x2653   :  { %15303 = vrot.lane.b32.xlu1 %v18499_v57, %s18631_s10  ;;  %v18501_v35 = vpop.eup %18500 }
0x2654   :  { %15189 = vrot.lane.b32.xlu0 %v21497_v62, %s18629_s2  ;;  %v18503_v53 = vpop.eup %18502  ;;  %v15181_v32 = vmul.f32 0.5, %v18501_v35 }
0x2655   :  { %v15182_v34 = vmul.f32 0.5, %v18503_v53 }
0x2656   :  { %v15183_v23 = vadd.f32 0.5, %v15181_v32 }
0x2657   :  { %15191 = vrot.lane.b32.xlu1 %v15188_v36, %s18629_s2  ;;  %v15184_v10 = vadd.f32 0.5, %v15182_v34 }
0x2683   :  { %v15200_v27 = vpop.permute.xlu0 %15199 }
0x2684   :  { %v15205_v49 = vmul.f32 %v15200_v27, %v15183_v23 }
0x2686   :  { %15209 = vrot.lane.b32.xlu0 %v15205_v49, %s18629_s2  ;;  %v15202_v8 = vpop.permute.xlu1 %15201 }
0x2687   :  { %v15206_v7 = vmul.f32 %v15202_v8, %v15184_v10 }
0x2689   :  { %15211 = vrot.lane.b32.xlu1 %v15206_v7, %s18629_s2 }
0x268a   :  { %15322 = vperm.xlu0 %18168, %v21313_v22  }
0x268d   :  { %15310 = vperm.xlu1 %18167, %v21308_v25  }
0x268e   :  { %18170 = vset.pattern.permute.xlu0 %v18634_v13 }
0x2691   :  { %18169 = vset.pattern.permute.xlu1 %v18634_v13 }
0x26c2   :  { %v15302_v2 = vpop.permute.xlu0 %15301 }
0x26c3   :  { %v15307_v43 = vmul.f32 %v15302_v2, %v21457_v51 }
0x26c5   :  { %v15304_v54 = vpop.permute.xlu1 %15303 }
0x26c6   :  { %v15308_v47 = vmul.f32 %v15304_v54, %v21460_v15  ;;  %v15190_v50 = vpop.permute.xlu0 %15189 }
0x26c7   :  { %v15195_v39 = vmul.f32 %v15190_v50, %v15183_v23 }
0x26c8   :  { %v15315_v21 = vrot.slane %v15308_v47, 7 }
0x26c9   :  { %v15192_v3 = vpop.permute.xlu1 %15191 }
0x26ca   :  { %v15316_v0 = vsel %vm14921_vm1, %v15315_v21, %v15307_v43  ;;  %v15196_v52 = vmul.f32 %v15192_v3, %v15184_v10 }
0x26cb   :  { %15317 = vrot.lane.b32.xlu1 %v15316_v0, %s18629_s2 }
0x26f8   :  { %v15210_v46 = vpop.permute.xlu0 %15209 }
0x26f9   :  { %v15215_v56 = vadd.f32 %v15210_v46, %v15195_v39 }
0x26fb   :  { %18504 = vtanh.f32 %v15215_v56  ;;  %v15212_v24 = vpop.permute.xlu1 %15211 }
0x26fc   :  { %v15216_v11 = vadd.f32 %v15212_v24, %v15196_v52 }
0x26fe   :  { %18506 = vtanh.f32 %v15216_v11  ;;  %v15249_v6 = vrot.slane %v15216_v11, 7 }
0x2700   :  { %v15250_v15 = vsel %vm14921_vm1, %v15249_v6, %v15215_v56 }
0x2705   :  { %v18505_v45 = vpop.eup %18504 }
0x2706   :  { %15221 = vrot.lane.b32.xlu0 %v18505_v45, %s18631_s10 }
0x2708   :  { %v18507_v51 = vpop.eup %18506 }
0x2709   :  { %15223 = vrot.lane.b32.xlu1 %v18507_v51, %s18631_s10  ;;  %v21520_v4 = vpop.permute.xlu0 %15322 }
0x270a   :  { %15242 = vperm.xlu0 %18170, %v21313_v22   ;;  %v15325_v48 = vmul.f32 %v21520_v4, %v21337_v38  ;;  %v15335_v2 = vmul.f32 %v21520_v4, %v21450_v37 }
0x270c   :  { %v21518_v40 = vpop.permute.xlu1 %15310 }
0x270d   :  { %15230 = vperm.xlu1 %18169, %v21308_v25  }
0x270e   :  { %18171 = vset.pattern.permute.xlu0 %v18633_v61 }
0x273d   :  { %v15318_v5 = vpop.permute.xlu1 %15317 }
0x273e   :  { %v15320_v26 = vmul.f32 %v15318_v5, %v21518_v40 }
0x2740   :  { %v21525_v18 = vadd.f32 %v15325_v48, %v15320_v26 }
0x2742   :  { %17886 = vmatmul.mubr.msk.f32.vlgmr.msra.gmra.mrb[190].mxu0 %vm14701_vm2, %v21525_v18 }
0x2743   :  { %17958 = vmatpush3.bf16.msra.mxu0 %v21129_v14  ;;  %17899 = vmatprep.mubr.msk.f32.mxu0 %vm18617_vm11, %v21689_v44 }
0x2744   :  { %17963 = vmatprep.subr.bf16.mxu0 %v21690_v33 }
0x2778   :  { %v15222_v25 = vpop.permute.xlu0 %15221 }
0x2779   :  { %v15227_v58 = vmul.f32 %v15222_v25, %v15183_v23 }
0x277b   :  { %v15224_v22 = vpop.permute.xlu1 %15223 }
0x277c   :  { %v15228_v61 = vmul.f32 %v15224_v22, %v15184_v10 }
0x277e   :  { %v15235_v57 = vrot.slane %v15228_v61, 7 }
0x2780   :  { %v15236_v38 = vsel %vm14921_vm1, %v15235_v57, %v15227_v58 }
0x2781   :  { %15237 = vrot.lane.b32.xlu1 %v15236_v38, %s18622_s8 }
0x2789   :  { %v21537_v9 = vpop.permute.xlu0 %15242 }
0x278a   :  { %v15245_v14 = vmul.f32 %v21537_v9, %v21400_v60  ;;  %v15255_v51 = vmul.f32 %v21537_v9, %v21497_v62 }
0x278c   :  { %v21535_v36 = vpop.permute.xlu1 %15230 }
0x27f3   :  { %v15238_v55 = vpop.permute.xlu1 %15237 }
0x27f4   :  { %v15240_v35 = vmul.f32 %v15238_v55, %v21535_v36 }
0x27f6   :  { %v21542_v53 = vadd.f32 %v15245_v14, %v15240_v35 }
0x27f8   :  { %17879 = vmatmul.mubr.msk.f32.vlgmr.msra.gmra.mrb[234].mxu1 %vm14701_vm2, %v21542_v53 }
0x27f9   :  { %17955 = vmatpush3.bf16.msra.mxu1 %v21077_v42  ;;  %17892 = vmatprep.mubr.msk.f32.mxu1 %vm18617_vm11, %v21689_v44 }
0x27fa   :  { %17959 = vmatprep.subr.bf16.mxu1 %v21690_v33 }
0x2815   :  { %v15485_v32 = vpop.f32.mrb[190].mxu0 }
0x2816   :  { %v15490_v34 = vrot.slane %v15485_v32, 1  ;;  %15491 = vrot.lane.b32.xlu0 %v15485_v32, %s18619_s5  ;;  %v17887_v23 = vpop.f32.mrb[191].mxu0 }
0x2818   :  { %15493 = vrot.lane.b32.xlu1 %v15490_v34, %s18619_s5 }
0x281c   :  { %15331 = vrot.lane.b32.xlu1 %v21492_v41, %s18624_s9 }
0x2888   :  { %v15492_v60 = vpop.permute.xlu0 %15491 }
0x2889   :  { %v15497_v27 = vadd.f32 %v15492_v60, %v21478_v17 }
0x288a   :  { %v15494_v49 = vpop.permute.xlu1 %15493 }
0x288b   :  { %18508 = vtanh.f32 %v15497_v27  ;;  %v15498_v42 = vadd.f32 %v15494_v49, %v21482_v16  ;;  %v15571_v50 = vmul.f32 0.5, %v15497_v27 }
0x288d   :  { %18510 = vtanh.f32 %v15498_v42  ;;  %v15572_v39 = vmul.f32 0.5, %v15498_v42 }
0x288e   :  { %v15332_v10 = vpop.permute.xlu1 %15331 }
0x288f   :  { %v15334_v7 = vmul.f32 %v15332_v10, %v21518_v40 }
0x2891   :  { %v21561_v41 = vadd.f32 %v15335_v2, %v15334_v7 }
0x2893   :  { %v15582_v17 = vrot.slane %v21561_v41, 1 }
0x2895   :  { %v18509_v8 = vpop.eup %18508 }
0x2896   :  { %15593 = vrot.lane.b32.xlu1 %v18509_v8, %s18618_s30 }
0x2897   :  { %v18511_v13 = vpop.eup %18510 }
0x2898   :  { %15595 = vrot.lane.b32.xlu0 %v18511_v13, %s18618_s30 }
0x289c   :  { %15251 = vrot.lane.b32.xlu0 %v15250_v15, %s18623_s3 }
0x28a0   :  { %15585 = vrot.lane.b32.xlu0 %v15582_v17, %s18622_s8 }
0x28a4   :  { %15583 = vrot.lane.b32.xlu0 %v21561_v41, %s18622_s8 }
0x28cb   :  { %v15406_v16 = vpop.f32.mrb[234].mxu1 }
0x28cc   :  { %v15411_v54 = vrot.slane %v15406_v16, 1  ;;  %v17880_v47 = vpop.f32.mrb[235].mxu1  ;;  %v15414_v37 = vadd.f32 %v15406_v16, %v21427_v59 }
0x28ce   :  { %v15415_v43 = vadd.f32 %v15411_v54, %v21433_v30  ;;  %v15499_v22 = vmul.f32 0.5, %v15414_v37 }
0x28d0   :  { %18512 = vtanh.f32 %v15415_v43  ;;  %v15500_v25 = vmul.f32 0.5, %v15415_v43 }
0x28d1   :  { %18514 = vtanh.f32 %v15414_v37 }
0x28d2   :  { %18516 = vtanh.f32 %v15571_v50 }
0x28d3   :  { %18518 = vtanh.f32 %v15572_v39 }
0x28d4   :  { %18520 = vtanh.f32 %v15500_v25 }
0x28d5   :  { %18522 = vtanh.f32 %v15499_v22 }
0x28da   :  { %v18513_v21 = vpop.eup %18512 }
0x28db   :  { %15523 = vrot.lane.b32.xlu1 %v18513_v21, %s18618_s30  ;;  %v18515_v0 = vpop.eup %18514 }
0x28dc   :  { %v18517_v3 = vpop.eup %18516 }
0x28dd   :  { %v18519_v46 = vpop.eup %18518  ;;  %v15575_v56 = vmul.f32 0.5, %v18517_v3 }
0x28de   :  { %v15576_v52 = vmul.f32 0.5, %v18519_v46  ;;  %v18521_v61 = vpop.eup %18520 }
0x28df   :  { %15521 = vrot.lane.b32.xlu1 %v18515_v0, %s18618_s30  ;;  %v21572_v24 = vadd.f32 0.5, %v15575_v56  ;;  %v15504_v58 = vmul.f32 0.5, %v18521_v61  ;;  %v18523_v57 = vpop.eup %18522 }
0x28e0   :  { %v15578_v11 = vadd.f32 0.5, %v15576_v52  ;;  %v15503_v62 = vmul.f32 0.5, %v18523_v57 }
0x28e1   :  { %v15506_v38 = vadd.f32 0.5, %v15504_v58 }
0x28e2   :  { %v15505_v35 = vadd.f32 0.5, %v15503_v62 }
0x2908   :  { %v15594_v30 = vpop.permute.xlu1 %15593 }
0x2909   :  { %v15599_v59 = vmul.f32 %v15594_v30, %v21572_v24 }
0x290a   :  { %v15596_v6 = vpop.permute.xlu0 %15595 }
0x290b   :  { %15603 = vrot.lane.b32.xlu0 %v15599_v59, %s18629_s2  ;;  %v15600_v15 = vmul.f32 %v15596_v6, %v15578_v11 }
0x290d   :  { %15605 = vrot.lane.b32.xlu1 %v15600_v15, %s18629_s2 }
0x290e   :  { %v15252_v45 = vpop.permute.xlu0 %15251 }
0x290f   :  { %v15254_v5 = vmul.f32 %v15252_v45, %v21535_v36 }
0x2911   :  { %v21580_v48 = vadd.f32 %v15255_v51, %v15254_v5 }
0x2912   :  { %v15586_v23 = vpop.permute.xlu0 %15585 }
0x2913   :  { %v15510_v26 = vrot.slane %v21580_v48, 1  ;;  %15511 = vrot.lane.b32.xlu0 %v21580_v48, %s18629_s2  ;;  %v15590_v10 = vmul.f32 %v15586_v23, %v15578_v11 }
0x2915   :  { %15513 = vrot.lane.b32.xlu1 %v15510_v26, %s18629_s2 }
0x2916   :  { %v15584_v60 = vpop.permute.xlu0 %15583 }
0x2917   :  { %v15589_v27 = vmul.f32 %v15584_v60, %v21572_v24 }
0x294d   :  { %v15524_v55 = vpop.permute.xlu1 %15523 }
0x294e   :  { %v15528_v14 = vmul.f32 %v15524_v55, %v15506_v38  ;;  %v15559_v55 = vmul.f32 %v21520_v4, %v21542_v53 }
0x2950   :  { %15533 = vrot.lane.b32.xlu1 %v15528_v14, %s18629_s2 }
0x2951   :  { %v15522_v32 = vpop.permute.xlu1 %15521 }
0x2952   :  { %v15527_v34 = vmul.f32 %v15522_v32, %v15505_v35 }
0x2954   :  { %15531 = vrot.lane.b32.xlu0 %v15527_v34, %s18629_s2 }
0x297d   :  { %v15604_v49 = vpop.permute.xlu0 %15603 }
0x297e   :  { %v15609_v42 = vadd.f32 %v15604_v49, %v15589_v27 }
0x297f   :  { %v15606_v8 = vpop.permute.xlu1 %15605 }
0x2980   :  { %18524 = vtanh.f32 %v15609_v42  ;;  %v15610_v7 = vadd.f32 %v15606_v8, %v15590_v10 }
0x2982   :  { %18526 = vtanh.f32 %v15610_v7  ;;  %v15635_v13 = vrot.slane %v15610_v7, 7 }
0x2984   :  { %v15636_v2 = vsel %vm14921_vm1, %v15635_v13, %v15609_v42 }
0x2985   :  { %v15512_v43 = vpop.permute.xlu0 %15511 }
0x2986   :  { %v15517_v0 = vmul.f32 %v15512_v43, %v15505_v35 }
0x2987   :  { %v15514_v54 = vpop.permute.xlu1 %15513 }
0x2988   :  { %v15518_v47 = vmul.f32 %v15514_v54, %v15506_v38 }
0x298a   :  { %v18525_v17 = vpop.eup %18524 }
0x298b   :  { %15615 = vrot.lane.b32.xlu0 %v18525_v17, %s18631_s10 }
0x298c   :  { %v18527_v16 = vpop.eup %18526 }
0x298d   :  { %15617 = vrot.lane.b32.xlu1 %v18527_v16, %s18631_s10 }
0x29c2   :  { %v15534_v37 = vpop.permute.xlu1 %15533 }
0x29c3   :  { %v15538_v21 = vadd.f32 %v15534_v37, %v15518_v47 }
0x29c5   :  { %18528 = vtanh.f32 %v15538_v21  ;;  %v15563_v39 = vrot.slane %v15538_v21, 7 }
0x29c6   :  { %v15532_v50 = vpop.permute.xlu0 %15531 }
0x29c7   :  { %v15537_v3 = vadd.f32 %v15532_v50, %v15517_v0 }
0x29c9   :  { %18530 = vtanh.f32 %v15537_v3  ;;  %v15564_v46 = vsel %vm14921_vm1, %v15563_v39, %v15537_v3 }
0x29cf   :  { %v18529_v56 = vpop.eup %18528 }
0x29d0   :  { %15545 = vrot.lane.b32.xlu1 %v18529_v56, %s18631_s10 }
0x29d3   :  { %v18531_v52 = vpop.eup %18530 }
0x29d4   :  { %15543 = vrot.lane.b32.xlu0 %v18531_v52, %s18631_s10 }
0x29fd   :  { %v15616_v30 = vpop.permute.xlu0 %15615 }
0x29fe   :  { %v15621_v15 = vmul.f32 %v15616_v30, %v21572_v24 }
0x29ff   :  { %v15618_v59 = vpop.permute.xlu1 %15617 }
0x2a00   :  { %v15622_v6 = vmul.f32 %v15618_v59, %v15578_v11  ;;  %v15631_v11 = vmul.f32 %v21525_v18, %v21537_v9 }
0x2a02   :  { %v15625_v45 = vrot.slane %v15622_v6, 7 }
0x2a04   :  { %v15626_v51 = vsel %vm14921_vm1, %v15625_v45, %v15621_v15 }
0x2a05   :  { %15627 = vrot.lane.b32.xlu1 %v15626_v51, %s18629_s2 }
0x2a42   :  { %v15546_v5 = vpop.permute.xlu1 %15545 }
0x2a43   :  { %v15550_v26 = vmul.f32 %v15546_v5, %v15506_v38 }
0x2a45   :  { %v15553_v22 = vrot.slane %v15550_v26, 7 }
0x2a46   :  { %v15544_v25 = vpop.permute.xlu0 %15543 }
0x2a47   :  { %v15549_v61 = vmul.f32 %v15544_v25, %v15505_v35 }
0x2a49   :  { %v15554_v58 = vsel %vm14921_vm1, %v15553_v22, %v15549_v61 }
0x2a4a   :  { %15555 = vrot.lane.b32.xlu0 %v15554_v58, %s18622_s8 }
0x2a77   :  { %v15628_v57 = vpop.permute.xlu1 %15627 }
0x2a78   :  { %v15630_v24 = vmul.f32 %v15628_v57, %v21535_v36 }
0x2a7a   :  { %v21603_v62 = vadd.f32 %v15631_v11, %v15630_v24 }
0x2a7c   :  { %17900 = vmatmul.mubr.msk.f32.vlgmr.msra.gmra.mrb[192].mxu0 %vm14701_vm2, %v21603_v62 }
0x2a7d   :  { %17913 = vmatprep.mubr.msk.f32.mxu0 %vm18617_vm11, %v21689_v44 }
0x2abc   :  { %v15556_v38 = vpop.permute.xlu0 %15555 }
0x2abd   :  { %v15558_v14 = vmul.f32 %v15556_v38, %v21518_v40 }
0x2abf   :  { %v21612_v35 = vadd.f32 %v15559_v55, %v15558_v14 }
0x2ac1   :  { %17893 = vmatmul.mubr.msk.f32.vlgmr.msra.gmra.mrb[236].mxu1 %vm14701_vm2, %v21612_v35 }
0x2ac2   :  { %17906 = vmatprep.mubr.msk.f32.mxu1 %vm18617_vm11, %v21689_v44 }
0x2b4f   :  { %v15791_v18 = vpop.f32.mrb[192].mxu0 }
0x2b50   :  { %v15796_v32 = vrot.slane %v15791_v18, 1  ;;  %15797 = vrot.lane.b32.xlu0 %v15791_v18, %s18619_s5  ;;  %v17901_v34 = vpop.f32.mrb[193].mxu0 }
0x2b52   :  { %15799 = vrot.lane.b32.xlu1 %v15796_v32, %s18619_s5 }
0x2b54   :  { %15637 = vrot.lane.b32.xlu0 %v15636_v2, %s18624_s9 }
0x2b56   :  { %15565 = vrot.lane.b32.xlu1 %v15564_v46, %s18623_s3 }
0x2b94   :  { %v15712_v53 = vpop.f32.mrb[236].mxu1 }
0x2b95   :  { %v15717_v23 = vrot.slane %v15712_v53, 1  ;;  %v17894_v60 = vpop.f32.mrb[237].mxu1  ;;  %v15720_v49 = vadd.f32 %v15712_v53, %v21241_v12 }
0x2b97   :  { %v15721_v27 = vadd.f32 %v15717_v23, %v21237_v19  ;;  %v15569_v19 = vmul.f32 %v21520_v4, %v21580_v48  ;;  %v15805_v21 = vmul.f32 0.5, %v15720_v49 }
0x2b99   :  { %18532 = vtanh.f32 %v15721_v27  ;;  %v15806_v48 = vmul.f32 0.5, %v15721_v27 }
0x2b9a   :  { %18534 = vtanh.f32 %v15720_v49 }
0x2ba3   :  { %v18533_v42 = vpop.eup %18532 }
0x2ba4   :  { %15829 = vrot.lane.b32.xlu1 %v18533_v42, %s18618_s30  ;;  %v18535_v10 = vpop.eup %18534 }
0x2ba8   :  { %15827 = vrot.lane.b32.xlu1 %v18535_v10, %s18618_s30 }
0x2bc2   :  { %v15798_v7 = vpop.permute.xlu0 %15797 }
0x2bc3   :  { %v15803_v2 = vadd.f32 %v15798_v7, %v21300_v29 }
0x2bc4   :  { %v15800_v8 = vpop.permute.xlu1 %15799 }
0x2bc5   :  { %v15804_v13 = vadd.f32 %v15800_v8, %v21296_v31  ;;  %v15641_v31 = vmul.f32 %v21561_v41, %v21537_v9  ;;  %v15867_v59 = vmul.f32 0.5, %v15803_v2 }
0x2bc6   :  { %v15638_v47 = vpop.permute.xlu0 %15637 }
0x2bc7   :  { %18536 = vtanh.f32 %v15804_v13  ;;  %v15640_v43 = vmul.f32 %v15638_v47, %v21535_v36  ;;  %v15868_v30 = vmul.f32 0.5, %v15804_v13 }
0x2bc8   :  { %v15566_v17 = vpop.permute.xlu1 %15565  ;;  %18538 = vtanh.f32 %v15803_v2 }
0x2bc9   :  { %v15568_v12 = vmul.f32 %v15566_v17, %v21518_v40  ;;  %v15642_v29 = vadd.f32 %v15641_v31, %v15640_v43  ;;  %18540 = vtanh.f32 %v15806_v48  ;;  %v15932_v43 = vld [vmem:[#allocation2 + $0xc8] sm:$0xff] }
0x2bca   :  { %18542 = vtanh.f32 %v15805_v21 }
0x2bcb   :  { %v15570_v16 = vadd.f32 %v15569_v19, %v15568_v12  ;;  %v15878_v40 = vrot.slane %v15642_v29, 1  ;;  %18544 = vtanh.f32 %v15868_v30 }
0x2bcc   :  { %18546 = vtanh.f32 %v15867_v59 }
0x2bcd   :  { %v15816_v54 = vrot.slane %v15570_v16, 1 }
0x2bcf   :  { %15819 = vrot.lane.b32.xlu1 %v15816_v54, %s18629_s2 }
0x2bd1   :  { %v18537_v37 = vpop.eup %18536 }
0x2bd2   :  { %15891 = vrot.lane.b32.xlu0 %v18537_v37, %s18618_s30  ;;  %v18539_v4 = vpop.eup %18538  ;;  %v15933_v37 = vld [vmem:[#allocation2 + $0xd0] sm:$0x7f] }
0x2bd3   :  { %15817 = vrot.lane.b32.xlu1 %v15570_v16, %s18629_s2  ;;  %v18541_v36 = vpop.eup %18540  ;;  %v17960_v31 = vpack.c.bf16 %v15933_v37, %v15932_v43 }
0x2bd4   :  { %v15810_v0 = vmul.f32 0.5, %v18541_v36  ;;  %v18543_v9 = vpop.eup %18542  ;;  %v18556_v36 = vld [vmem:[%s21679_s1] sm:$0x3]  ;;  %s18636_s1 = smov [#allocation5]  }
0x2bd5   :  { %v15809_v50 = vmul.f32 0.5, %v18543_v9  ;;  %v18545_v6 = vpop.eup %18544  ;;  %17962 = vmatpush3.bf16.msk.msra.mxu1 %vm17961_vm5, %v17960_v31 }
0x2bd6   :  { %15889 = vrot.lane.b32.xlu0 %v18539_v4, %s18618_s30  ;;  %v15812_v41 = vadd.f32 0.5, %v15810_v0  ;;  %v15872_v15 = vmul.f32 0.5, %v18545_v6  ;;  %v18547_v45 = vpop.eup %18546  ;;  %v15931_v4 = vld [vmem:[#allocation2 + $0xc0] sm:$0xff]  ;;  %17966 = vmatprep.subr.bf16.mxu1 %v21690_v33 }
0x2bd7   :  { %15879 = vrot.lane.b32.xlu1 %v15642_v29, %s18622_s8  ;;  %v15811_v46 = vadd.f32 0.5, %v15809_v50  ;;  %v15871_v5 = vmul.f32 0.5, %v18547_v45  ;;  %v15930_v29 = vld [vmem:[#allocation2 + $0xb8] sm:$0xff]  ;;  %v16092_v45 = vld [vmem:[#allocation2 + $0xe8] sm:$0xff] }
0x2bd8   :  { %v15874_v51 = vadd.f32 0.5, %v15872_v15  ;;  %17907 = vmatmul.mubr.msk.f32.vlgmr.msra.gmra.mrb[238].mxu1 %vm15934_vm6, %v18556_v36  ;;  %v16091_v15 = vld [vmem:[#allocation2 + $0xe0] sm:$0xff] }
0x2bd9   :  { %v15873_v22 = vadd.f32 0.5, %v15871_v5  ;;  %17924 = vmatprep.mubr.msk.f32.mxu1 %vm18617_vm11, %v21689_v44 }
0x2bda   :  { %15881 = vrot.lane.b32.xlu0 %v15878_v40, %s18622_s8  ;;  %v17964_v40 = vpack.c.bf16 %v15931_v4, %v15930_v29 }
0x2bdc   :  { %17965 = vmatpush3.bf16.msra.mxu0 %v17964_v40 }
0x2c16   :  { %v15830_v39 = vpop.permute.xlu1 %15829 }
0x2c17   :  { %v15834_v3 = vmul.f32 %v15830_v39, %v15812_v41 }
0x2c19   :  { %15839 = vrot.lane.b32.xlu0 %v15834_v3, %s18629_s2 }
0x2c1a   :  { %v15828_v56 = vpop.permute.xlu1 %15827 }
0x2c1b   :  { %v15833_v52 = vmul.f32 %v15828_v56, %v15811_v46  ;;  %v15865_v56 = vmul.f32 %v21612_v35, %v21330_v1  ;;  %v16094_v1 = vld [vmem:[#allocation2 + $0xf8] sm:$0xff] }
0x2c1d   :  { %15837 = vrot.lane.b32.xlu1 %v15833_v52, %s18629_s2  ;;  %v15927_v52 = vmul.f32 %v21603_v62, %v21384_v20  ;;  %v16578_v62 = vld [vmem:[#allocation2 + $0xd8] ss:$0 sm:$0xff] }
0x2c41   :  { %v15820_v57 = vpop.permute.xlu1 %15819 }
0x2c42   :  { %v15824_v38 = vmul.f32 %v15820_v57, %v15812_v41 }
0x2c44   :  { %v15892_v26 = vpop.permute.xlu0 %15891 }
0x2c45   :  { %v15896_v25 = vmul.f32 %v15892_v26, %v15874_v51  ;;  %v15818_v11 = vpop.permute.xlu1 %15817  ;;  %v16093_v26 = vld [vmem:[#allocation2 + $0xf0] sm:$0xff] }
0x2c46   :  { %v15823_v32 = vmul.f32 %v15818_v11, %v15811_v46  ;;  %v17970_v35 = vpack.c.bf16 %v16094_v1, %v16093_v26 }
0x2c47   :  { %15901 = vrot.lane.b32.xlu0 %v15896_v25, %s18629_s2 }
0x2c48   :  { %v15890_v61 = vpop.permute.xlu0 %15889 }
0x2c49   :  { %v15895_v58 = vmul.f32 %v15890_v61, %v15873_v22  ;;  %v15880_v55 = vpop.permute.xlu1 %15879 }
0x2c4a   :  { %v15885_v10 = vmul.f32 %v15880_v55, %v15873_v22 }
0x2c4b   :  { %15899 = vrot.lane.b32.xlu0 %v15895_v58, %s18629_s2  ;;  %v16579_v58 = vld [vmem:[#allocation2 + $0x100] ss:$0 sm:$0xff] }
0x2c4c   :  { %v15882_v24 = vpop.permute.xlu0 %15881 }
0x2c4d   :  { %v15886_v27 = vmul.f32 %v15882_v24, %v15874_v51 }
0x2c8b   :  { %v15840_v14 = vpop.permute.xlu0 %15839 }
0x2c8c   :  { %v15844_v18 = vadd.f32 %v15840_v14, %v15824_v38 }
0x2c8e   :  { %18548 = vtanh.f32 %v15844_v18 }
0x2c8f   :  { %v15838_v34 = vpop.permute.xlu1 %15837 }
0x2c90   :  { %v15843_v53 = vadd.f32 %v15838_v34, %v15823_v32 }
0x2c92   :  { %18550 = vtanh.f32 %v15843_v53 }
0x2c98   :  { %v18549_v23 = vpop.eup %18548 }
0x2c99   :  { %15851 = vrot.lane.b32.xlu1 %v18549_v23, %s18631_s10 }
0x2c9c   :  { %v18551_v60 = vpop.eup %18550 }
0x2c9d   :  { %15849 = vrot.lane.b32.xlu1 %v18551_v60, %s18631_s10 }
0x2cab   :  { %v16007_v5 = vpop.f32.mrb[238].mxu1 }
0x2cb9   :  { %v15902_v49 = vpop.permute.xlu0 %15901 }
0x2cba   :  { %v15906_v42 = vadd.f32 %v15902_v49, %v15886_v27 }
0x2cbc   :  { %18552 = vtanh.f32 %v15906_v42 }
0x2cbd   :  { %v15900_v8 = vpop.permute.xlu0 %15899 }
0x2cbe   :  { %v15905_v7 = vadd.f32 %v15900_v8, %v15885_v10 }
0x2cc0   :  { %18554 = vtanh.f32 %v15905_v7 }
0x2cc6   :  { %v18553_v13 = vpop.eup %18552 }
0x2cc7   :  { %15913 = vrot.lane.b32.xlu0 %v18553_v13, %s18631_s10 }
0x2cca   :  { %v18555_v2 = vpop.eup %18554 }
0x2ccb   :  { %15911 = vrot.lane.b32.xlu0 %v18555_v2, %s18631_s10 }
0x2d0b   :  { %v15852_v17 = vpop.permute.xlu1 %15851 }
0x2d0c   :  { %v15856_v19 = vmul.f32 %v15852_v17, %v15812_v41 }
0x2d0e   :  { %v15859_v16 = vrot.slane %v15856_v19, 7 }
0x2d0f   :  { %v15850_v12 = vpop.permute.xlu1 %15849 }
0x2d10   :  { %v15855_v54 = vmul.f32 %v15850_v12, %v15811_v46 }
0x2d12   :  { %v15860_v47 = vsel %vm14921_vm1, %v15859_v16, %v15855_v54 }
0x2d13   :  { %15861 = vrot.lane.b32.xlu1 %v15860_v47, %s18622_s8  ;;  %s16182_s8 = sshll.u32 %s18636_s1, 4  ;;  %s16183_s8 = int_to_ptr.vmem [resolvable:$true] %s16182_s8 }
0x2d14   :  { %s18579_s3 = scalar_lea.vmem %s16183_s8, 32  ;;  %p18584_p9 = scmp.lt.s32.totalorder %s16183_s8, %s16183_s8 }
0x2d15   :  { %p18580_p8 = scmp.ne.s32.totalorder %s16183_s8, %s18579_s3  ;;  %p18585_p10 = scmp.lt.s32.totalorder %s18579_s3, %s18579_s3 }
0x2d17   :  { %p18586_p11 = por %p18585_p10, %p18584_p9 }
0x2d19   :  { %p18587_p12 = pnand %p18586_p11, %p18580_p8 }
0x2d39   :  { %v15914_v48 = vpop.permute.xlu0 %15913 }
0x2d3a   :  { %v15918_v21 = vmul.f32 %v15914_v48, %v15874_v51  ;;  %v17967_v51 = vpack.c.bf16 %v16092_v45, %v16091_v15 }
0x2d3c   :  { %v15921_v9 = vrot.slane %v15918_v21, 7  ;;  %17968 = vmatpush3.bf16.msra.mxu1 %v17967_v51 }
0x2d3d   :  { %v15912_v0 = vpop.permute.xlu0 %15911  ;;  %17969 = vmatprep.subr.bf16.mxu1 %v21690_v33 }
0x2d3e   :  { %v15917_v41 = vmul.f32 %v15912_v0, %v15873_v22 }
0x2d40   :  { %v15922_v50 = vsel %vm14921_vm1, %v15921_v9, %v15917_v41  ;;  %17971 = vmatpush3.bf16.msra.mxu1 %v17970_v35 }
0x2d41   :  { %15923 = vrot.lane.b32.xlu0 %v15922_v50, %s18629_s2 }
0x2d85   :  { %v15862_v39 = vpop.permute.xlu1 %15861 }
0x2d86   :  { %v15864_v3 = vmul.f32 %v15862_v39, %v21328_v28  ;;  %v17908_v28 = vpop.f32.mrb[239].mxu1 }
0x2d88   :  { %v15866_v44 = vadd.f32 %v15865_v56, %v15864_v3 }
0x2db3   :  { %v15924_v46 = vpop.permute.xlu0 %15923 }
0x2db4   :  { %v15926_v30 = vmul.f32 %v15924_v46, %v21393_v63 }
0x2db6   :  { %v15928_v59 = vadd.f32 %v15927_v52, %v15926_v30 }
0x2db8   :  { %v15929_v6 = vadd.f32 %v15928_v59, %v15866_v44 }
0x2dba   :  { %17914 = vmatmul.mubr.msk.f32.vlgmr.msra.gmra.mrb[194].mxu0 %vm14701_vm2, %v15929_v6 }
0x2e8d   :  { %v16080_v20 = vpop.f32.mrb[194].mxu0 }
0x2e8e   :  { %v16081_v63 = vadd.f32 %v16080_v20, %v16007_v5  ;;  %v17915_v25 = vpop.f32.mrb[195].mxu0 }
0x2e90   :  { %v16089_v22 = vadd.f32 %v16578_v62, %v16081_v63 }
0x2e92   :  { %v16090_v61 = vmax.f32 %v16089_v22, 0.0 }
0x2e94   :  { %17925 = vmatmul.mubr.msk.f32.vlgmr.msra.gmra.mrb[240].mxu1 %vm16100_vm7, %v16090_v61 }
0x2f67   :  { %v16170_v57 = vpop.f32.mrb[240].mxu1 }
0x2f68   :  { %v16171_v11 = vadd.f32 %v16579_v58, %v16170_v57  ;;  %v17926_v24 = vpop.f32.mrb[241].mxu1 }
0x2f6a   :  { %16175 = vst.msk [vmem:[#allocation5] sm:$0x3] %vm16174_vm8, %v16171_v11 }
0x2f6b   :  { %18590 = shalt.err (!%p18587_p12)
}
0x2f6c   :  { %s18591_s14 = scalar_lea.hbm %s21682_s4, 32 }
0x2f6d   :  { %p18592_p13 = scmp.ne.s32.totalorder %s21682_s4, %s18591_s14  ;;  %p18595_p0 = scmp.lt.u32.totalorder %s18591_s14, %s21682_s4 }
0x2f6f   :  { %p18597_p1 = pnand %p18595_p0, %p18592_p13 }
0x2f71   :  { %18600 = shalt.err (!%p18597_p1)
}
0x2f72   :  { %16185 = dma.vmem_to_hbm [thread:$0]  %s16183_s8, 32, %s21682_s4, [#allocation4]  }
0x2f73   :  { %18603 = dma.done.wait [#allocation4], 32  }
0x2f74   :  { %18604 = vsyncadd [#allocation4], 4294967264 }
0x2f75   :  { %16189 = vsyncpa [#allocation3], 1 }
0x2f76   :  { %16190 = vsyncpa [#allocation4], 1 }

</bundles_post_ra>
